<compile_context>
chip_gen: v5e
topology: v5e:2x2
jax: 0.10.0
libtpu: 0.0.40
codegen_flags: <defaults>
</compile_context>

<pallas_src>
import math
from functools import partial

import jax
import jax.numpy as jnp
from jax import lax
from jax.experimental import pallas as pl
from jax.experimental.pallas import tpu as pltpu


def _round_up(x, m):
    return ((x + m - 1) // m) * m


# ---------------------------------------------------------------------------
# Kernel A: attention + single-layer LSTM cell (small, grid-less).
# ---------------------------------------------------------------------------
def attn_lstm_kernel(emb_ref, h_ref, c_ref, enc_ref,
                     wih_e_ref, wih_c_ref, whh_ref, bg_ref,
                     hout_ref, cout_ref, attn_ref, fcin_ref,
                     *, hidden_dim, src_len):
    emb = emb_ref[...]                            # (Bp, Ep)     bf16
    h = h_ref[...]                                # (Bp, Hp)     f32
    c = c_ref[...]                                # (Bp, Hp)     f32
    enc = enc_ref[...].astype(jnp.float32)        # (Bp, Sp, Hp) f32 (shipped bf16)

    Bp, Hp = h.shape
    Sp = enc.shape[1]

    # ---- scaled dot-product attention on the VPU/XLU (no tiny batched MXU) --
    # TODO(synk): attention() is undefined in the spec; scaled dot-product is assumed.
    inv_sqrt_h = 1.0 / math.sqrt(hidden_dim)
    scores = jnp.sum(h[:, None, :] * enc, axis=-1) * inv_sqrt_h   # (Bp, Sp)
    smask = lax.broadcasted_iota(jnp.int32, (Bp, Sp), 1) < src_len
    scores = jnp.where(smask, scores, jnp.float32(-1e30))
    scores = scores - jnp.max(scores, axis=-1, keepdims=True)
    p = jnp.exp(scores)                           # padded lanes underflow to 0
    attn = p / jnp.sum(p, axis=-1, keepdims=True)
    attn_ref[...] = attn

    # context: (Bp, Hp) — sublane reduce over Sp
    context = jnp.sum(attn[:, :, None] * enc, axis=1)

    h_b = h.astype(jnp.bfloat16)
    ctx_b = context.astype(jnp.bfloat16)

    # ---- single-layer LSTM cell (PyTorch gate order i, f, g, o) -------------
    # Per-gate weight columns were pre-placed on Hp boundaries, so the gate
    # slices below are always lane-aligned.
    gates = (jnp.dot(emb,   wih_e_ref[...], preferred_element_type=jnp.float32)
             + jnp.dot(ctx_b, wih_c_ref[...], preferred_element_type=jnp.float32)
             + jnp.dot(h_b,   whh_ref[...],   preferred_element_type=jnp.float32)
             + bg_ref[...])                                       # (Bp, 4*Hp)

    i_g = jax.nn.sigmoid(gates[:, 0 * Hp:1 * Hp])
    f_g = jax.nn.sigmoid(gates[:, 1 * Hp:2 * Hp])
    g_g = jnp.tanh(gates[:, 2 * Hp:3 * Hp])
    o_g = jax.nn.sigmoid(gates[:, 3 * Hp:4 * Hp])

    c_new = f_g * c + i_g * g_g
    h_new = o_g * jnp.tanh(c_new)
    hout_ref[...] = h_new
    cout_ref[...] = c_new

    # ---- fc input slab [h_new | context | embedded] in bf16 (lane-aligned) --
    fcin_ref[:, 0:Hp] = h_new.astype(jnp.bfloat16)
    fcin_ref[:, Hp:2 * Hp] = ctx_b
    fcin_ref[:, 2 * Hp:] = emb


# ---------------------------------------------------------------------------
# Kernel B: vocab-tiled fc_out projection (streams the dominant weight).
# ---------------------------------------------------------------------------
def fc_out_kernel(x_ref, w_ref, b_ref, o_ref):
    o_ref[...] = (jnp.dot(x_ref[...], w_ref[...],
                          preferred_element_type=jnp.float32)
                  + b_ref[...])


# ---------------------------------------------------------------------------
# One-time weight preparation.
# ---------------------------------------------------------------------------
def prepare_params(params, *, tile_v=512):
    """Transpose / split / pad weights once: per-gate columns on Hp boundaries,
    vocab padded to a TILE_V multiple, everything bf16 for MXU streaming."""
    V, E = params['embedding'].shape
    H = params['w_hh'].shape[1]

    Hp = _round_up(H, 128)
    Ep = _round_up(E, 128)
    Vp128 = _round_up(V, 128)
    tile_v = min(tile_v, Vp128)          # multiple of 256 when Vp allows it
    Vp = _round_up(Vp128, tile_v)
    Kp = 2 * Hp + Ep

    def regate(w, rows_pad):
        # (R, 4H) -> (rows_pad, 4*Hp) with gate k columns at [k*Hp, k*Hp+H)
        R = w.shape[0]
        out = jnp.zeros((rows_pad, 4 * Hp), jnp.float32)
        for k in range(4):
            out = out.at[:R, k * Hp:k * Hp + H].set(w[:, k * H:(k + 1) * H])
        return out.astype(jnp.bfloat16)

    wihT = params['w_ih'].T              # (E+H, 4H): rows = [emb | context]
    whhT = params['w_hh'].T              # (H, 4H)

    b_raw = params['b_ih'] + params['b_hh']
    b_g = jnp.zeros((1, 4 * Hp), jnp.float32)
    for k in range(4):
        b_g = b_g.at[0, k * Hp:k * Hp + H].set(b_raw[k * H:(k + 1) * H])

    wfcT = params['w_fc'].T              # (2H+E, V): rows = [output | ctx | emb]
    w_fc = jnp.zeros((Kp, Vp), jnp.float32)
    w_fc = w_fc.at[0:H, :V].set(wfcT[0:H])
    w_fc = w_fc.at[Hp:Hp + H, :V].set(wfcT[H:2 * H])
    w_fc = w_fc.at[2 * Hp:2 * Hp + E, :V].set(wfcT[2 * H:])
    w_fc = w_fc.astype(jnp.bfloat16)

    b_fc = jnp.zeros((1, Vp), jnp.float32).at[0, :V].set(params['b_fc'])

    emb_tab = jnp.zeros((V, Ep), jnp.float32).at[:, :E].set(
        params['embedding']).astype(jnp.bfloat16)

    return {
        'embedding': emb_tab,                      # (V, Ep)  bf16
        'wih_emb': regate(wihT[:E], Ep),           # (Ep, 4Hp) bf16
        'wih_ctx': regate(wihT[E:], Hp),           # (Hp, 4Hp) bf16
        'whh': regate(whhT, Hp),                   # (Hp, 4Hp) bf16
        'b_gates': b_g,                            # (1, 4Hp)  f32
        'w_fc': w_fc,                              # (Kp, Vp)  bf16
        'b_fc': b_fc,                              # (1, Vp)   f32
        'dims': dict(H=H, E=E, V=V, Hp=Hp, Ep=Ep, Vp=Vp, Kp=Kp, tile_v=tile_v),
    }


# ---------------------------------------------------------------------------
# Forward (one decode step).
# ---------------------------------------------------------------------------
def decoder_forward(tokens, hidden, cell, encoder_outputs, params, output_dim):
    """
    tokens          : (B,) int32 target token indices
    hidden, cell    : (1, B, H) float32
    encoder_outputs : (B, S, H) float32
    returns (prediction (B,V), hidden (1,B,H), cell (1,B,H), attn (B,1,S))
    """
    B = tokens.shape[0]
    S = encoder_outputs.shape[1]
    H = hidden.shape[-1]
    V = output_dim
    d = params['dims']
    Hp, Ep, Vp, Kp, tile_v = d['Hp'], d['Ep'], d['Vp'], d['Kp'], d['tile_v']

    Bp = _round_up(B, 16)        # bf16 packs 16 rows per sublane group
    Sp = _round_up(S, 128)       # lane-dense attention output

    # glue: embedding gather + dropout (identity in eval mode)
    # TODO(synk): training-mode dropout would need pltpu.prng_seed/prng_random_bits.
    embedded = params['embedding'][tokens]                       # (B, Ep) bf16

    emb_p = jnp.pad(embedded, ((0, Bp - B), (0, 0)))
    h_p = jnp.pad(hidden[-1], ((0, Bp - B), (0, Hp - H)))
    c_p = jnp.pad(cell[-1], ((0, Bp - B), (0, Hp - H)))
    enc_p = jnp.pad(encoder_outputs,
                    ((0, Bp - B), (0, Sp - S), (0, Hp - H))).astype(jnp.bfloat16)

    vmem = pl.BlockSpec(memory_space=pltpu.MemorySpace.VMEM)

    flops_a = (2 * Bp * (Ep + 2 * Hp) * 4 * Hp     # gate matmuls
               + 4 * Bp * Sp * Hp)                 # attention score + context
    bytes_a = (2 * (Bp * Ep + Bp * Sp * Hp + (Ep + 2 * Hp) * 4 * Hp + Bp * Kp)
               + 4 * (2 * Bp * Hp + 4 * Hp + 2 * Bp * Hp + Bp * Sp))

    hout, cout, attn, fc_in = pl.pallas_call(
        partial(attn_lstm_kernel, hidden_dim=H, src_len=S),
        out_shape=(
            jax.ShapeDtypeStruct((Bp, Hp), jnp.float32),   # h_new
            jax.ShapeDtypeStruct((Bp, Hp), jnp.float32),   # c_new
            jax.ShapeDtypeStruct((Bp, Sp), jnp.float32),   # attention weights
            jax.ShapeDtypeStruct((Bp, Kp), jnp.bfloat16),  # fc input slab
        ),
        in_specs=[vmem] * 8,
        out_specs=(vmem, vmem, vmem, vmem),
        input_output_aliases={1: 0, 2: 1},   # hidden->h_new, cell->c_new
        cost_estimate=pl.CostEstimate(
            flops=flops_a,
            transcendentals=Bp * (Sp + 4 * Hp),
            bytes_accessed=bytes_a),
    )(emb_p, h_p, c_p, enc_p,
      params['wih_emb'], params['wih_ctx'], params['whh'], params['b_gates'])

    # Vocab-tiled projection: weight tiles double-buffer behind the MXU and the
    # axis is parallel (shards across v7x's two TensorCores; no-op on v5e/v6e).
    n_v = Vp // tile_v
    pred = pl.pallas_call(
        fc_out_kernel,
        out_shape=jax.ShapeDtypeStruct((Bp, Vp), jnp.float32),
        grid=(n_v,),
        in_specs=[
            pl.BlockSpec((Bp, Kp), lambda j: (0, 0)),
            pl.BlockSpec((Kp, tile_v), lambda j: (0, j)),
            pl.BlockSpec((1, tile_v), lambda j: (0, j)),
        ],
        out_specs=pl.BlockSpec((Bp, tile_v), lambda j: (0, j)),
        compiler_params=pltpu.CompilerParams(
            dimension_semantics=("parallel",)),
        cost_estimate=pl.CostEstimate(
            flops=2 * Bp * Kp * Vp,
            transcendentals=0,
            bytes_accessed=2 * (Kp * Vp + Bp * Kp) + 4 * (Vp + Bp * Vp)),
    )(fc_in, params['w_fc'], params['b_fc'])

    return (pred[:B, :V],
            hout[:B, :H][None],
            cout[:B, :H][None],
            attn[:B, None, :S])


def init_params(key, output_dim, embed_dim, hidden_dim):
    """Deterministic parameter init mirroring the PyTorch module's shapes."""
    ks = jax.random.split(key, 6)
    k = 1.0 / math.sqrt(hidden_dim)
    u = lambda kk, shape, bound: jax.random.uniform(
        kk, shape, jnp.float32, -bound, bound)
    return {
        'embedding': jax.random.normal(ks[0], (output_dim, embed_dim),
                                       jnp.float32),
        # LSTM(input = embed_dim + hidden_dim, hidden = hidden_dim)
        'w_ih': u(ks[1], (4 * hidden_dim, embed_dim + hidden_dim), k),
        'w_hh': u(ks[2], (4 * hidden_dim, hidden_dim), k),
        'b_ih': u(ks[3], (4 * hidden_dim,), k),
        'b_hh': u(ks[4], (4 * hidden_dim,), k),
        # fc_out: Linear(2*hidden_dim + embed_dim -> output_dim)
        'w_fc': u(ks[5], (output_dim, 2 * hidden_dim + embed_dim),
                  1.0 / math.sqrt(2 * hidden_dim + embed_dim)),
        'b_fc': jnp.zeros((output_dim,), jnp.float32),
    }


if __name__ == "__main__":
    B, S, E, H, V = 2, 8, 32, 32, 64   # batch, src_len, embed, hidden, vocab

    key = jax.random.PRNGKey(0)
    kp, kt, kh, kc, ke = jax.random.split(key, 5)

    raw_params = init_params(kp, output_dim=V, embed_dim=E, hidden_dim=H)
    params = prepare_params(raw_params)           # one-time weight prep

    tokens = jax.random.randint(kt, (B,), 0, V, dtype=jnp.int32)
    hidden = jax.random.normal(kh, (1, B, H), jnp.float32)
    cell = jax.random.normal(kc, (1, B, H), jnp.float32)
    encoder_outputs = jax.random.normal(ke, (B, S, H), jnp.float32)

    fwd = jax.jit(partial(decoder_forward, params=params, output_dim=V))
    prediction, hidden_new, cell_new, attn_weights = fwd(
        tokens, hidden, cell, encoder_outputs)
    jax.block_until_ready((prediction, hidden_new, cell_new, attn_weights))

    assert prediction.shape == (B, V)
    assert hidden_new.shape == (1, B, H)
    assert cell_new.shape == (1, B, H)
    assert attn_weights.shape == (B, 1, S)
    assert bool(jnp.all(jnp.isfinite(prediction)))
    assert bool(jnp.all(jnp.isfinite(hidden_new)))
    assert bool(jnp.all(jnp.isfinite(cell_new)))
    # attention is an (exact) softmax -> rows sum to 1
    assert bool(jnp.allclose(jnp.sum(attn_weights, axis=-1), 1.0, atol=1e-4))

    print("KERNEL_OK")
</pallas_src>

<mosaic_0001>
module attributes {stable_mosaic.version = 11 : i64} {
  func.func @attn_lstm_kernel(%arg0: memref<16x128xbf16, #tpu.memory_space<vmem>>, %arg1: memref<16x128xf32, #tpu.memory_space<vmem>>, %arg2: memref<16x128xf32, #tpu.memory_space<vmem>>, %arg3: memref<16x128x128xbf16, #tpu.memory_space<vmem>>, %arg4: memref<128x512xbf16, #tpu.memory_space<vmem>>, %arg5: memref<128x512xbf16, #tpu.memory_space<vmem>>, %arg6: memref<128x512xbf16, #tpu.memory_space<vmem>>, %arg7: memref<1x512xf32, #tpu.memory_space<vmem>>, %arg8: memref<16x128xf32, #tpu.memory_space<vmem>>, %arg9: memref<16x128xf32, #tpu.memory_space<vmem>>, %arg10: memref<16x128xf32, #tpu.memory_space<vmem>>, %arg11: memref<16x384xbf16, #tpu.memory_space<vmem>>) attributes {dimension_semantics = [], scalar_prefetch = 0 : i64, scratch_operands = 0 : i64, tpu.core_type = #tpu.core_type<tc>} {
    %c0 = arith.constant 0 : index
    %c0_0 = arith.constant 0 : index
    %0 = vector.load %arg0[%c0, %c0_0] : memref<16x128xbf16, #tpu.memory_space<vmem>>, vector<16x128xbf16>
    %c0_1 = arith.constant 0 : index
    %c0_2 = arith.constant 0 : index
    %1 = vector.load %arg1[%c0_1, %c0_2] : memref<16x128xf32, #tpu.memory_space<vmem>>, vector<16x128xf32>
    %c0_3 = arith.constant 0 : index
    %c0_4 = arith.constant 0 : index
    %2 = vector.load %arg2[%c0_3, %c0_4] : memref<16x128xf32, #tpu.memory_space<vmem>>, vector<16x128xf32>
    %c0_5 = arith.constant 0 : index
    %c0_6 = arith.constant 0 : index
    %c0_7 = arith.constant 0 : index
    %3 = vector.load %arg3[%c0_5, %c0_6, %c0_7] : memref<16x128x128xbf16, #tpu.memory_space<vmem>>, vector<16x128x128xbf16>
    %4 = arith.extf %3 : vector<16x128x128xbf16> to vector<16x128x128xf32>
    %5 = vector.shape_cast %1 : vector<16x128xf32> to vector<16x1x128xf32>
    %6 = vector.broadcast %5 : vector<16x1x128xf32> to vector<16x128x128xf32>
    %7 = arith.mulf %6, %4 : vector<16x128x128xf32>
    %cst = arith.constant dense<0.000000e+00> : vector<16x128xf32>
    %8 = vector.multi_reduction <add>, %7, %cst [2] : vector<16x128x128xf32> to vector<16x128xf32>
    %cst_8 = arith.constant 0.176776692 : f32
    %9 = vector.broadcast %cst_8 : f32 to vector<16x128xf32>
    %10 = arith.mulf %8, %9 : vector<16x128xf32>
    %11 = tpu.iota {dimensions = array<i32: 1>} : vector<16x128xi32>
    %c8_i32 = arith.constant 8 : i32
    %12 = vector.broadcast %c8_i32 : i32 to vector<16x128xi32>
    %13 = arith.cmpi slt, %11, %12 : vector<16x128xi32>
    %cst_9 = arith.constant -1.000000e+30 : f32
    %14 = vector.broadcast %cst_9 : f32 to vector<16x128xf32>
    %15 = arith.select %13, %10, %14 : vector<16x128xi1>, vector<16x128xf32>
    %cst_10 = arith.constant dense<0xFF800000> : vector<16xf32>
    %16 = vector.multi_reduction <maximumf>, %15, %cst_10 [1] : vector<16x128xf32> to vector<16xf32>
    %17 = vector.shape_cast %16 : vector<16xf32> to vector<16x1xf32>
    %18 = vector.broadcast %17 : vector<16x1xf32> to vector<16x128xf32>
    %19 = arith.subf %15, %18 : vector<16x128xf32>
    %20 = math.exp %19 : vector<16x128xf32>
    %cst_11 = arith.constant dense<0.000000e+00> : vector<16xf32>
    %21 = vector.multi_reduction <add>, %20, %cst_11 [1] : vector<16x128xf32> to vector<16xf32>
    %22 = vector.shape_cast %21 : vector<16xf32> to vector<16x1xf32>
    %23 = vector.broadcast %22 : vector<16x1xf32> to vector<16x128xf32>
    %24 = arith.divf %20, %23 : vector<16x128xf32>
    %c0_12 = arith.constant 0 : index
    %c0_13 = arith.constant 0 : index
    %25 = vector.load %arg10[%c0_12, %c0_13] : memref<16x128xf32, #tpu.memory_space<vmem>>, vector<16x128xf32>
    tpu.vector_store %arg10[%c0_12, %c0_13], %24 {strides = array<i32>} : memref<16x128xf32, #tpu.memory_space<vmem>>, vector<16x128xf32>,
    %26 = vector.shape_cast %24 : vector<16x128xf32> to vector<16x128x1xf32>
    %27 = vector.broadcast %26 : vector<16x128x1xf32> to vector<16x128x128xf32>
    %28 = arith.mulf %27, %4 : vector<16x128x128xf32>
    %cst_14 = arith.constant dense<0.000000e+00> : vector<16x128xf32>
    %29 = vector.multi_reduction <add>, %28, %cst_14 [1] : vector<16x128x128xf32> to vector<16x128xf32>
    %30 = arith.truncf %1 : vector<16x128xf32> to vector<16x128xbf16>
    %31 = arith.truncf %29 : vector<16x128xf32> to vector<16x128xbf16>
    %c0_15 = arith.constant 0 : index
    %c0_16 = arith.constant 0 : index
    %32 = vector.load %arg4[%c0_15, %c0_16] : memref<128x512xbf16, #tpu.memory_space<vmem>>, vector<128x512xbf16>
    %cst_17 = arith.constant dense<0.000000e+00> : vector<16x512xf32>
    %33 = tpu.matmul %0, %32, %cst_17 {dimension_numbers = #tpu.dot_dimension_numbers<[1], [0], [0], [1], [0, 0, 1, 1], [], []>} : vector<16x128xbf16>, vector<128x512xbf16>, vector<16x512xf32> -> vector<16x512xf32>
    %c0_18 = arith.constant 0 : index
    %c0_19 = arith.constant 0 : index
    %34 = vector.load %arg5[%c0_18, %c0_19] : memref<128x512xbf16, #tpu.memory_space<vmem>>, vector<128x512xbf16>
    %cst_20 = arith.constant dense<0.000000e+00> : vector<16x512xf32>
    %35 = tpu.matmul %31, %34, %cst_20 {dimension_numbers = #tpu.dot_dimension_numbers<[1], [0], [0], [1], [0, 0, 1, 1], [], []>} : vector<16x128xbf16>, vector<128x512xbf16>, vector<16x512xf32> -> vector<16x512xf32>
    %36 = arith.addf %33, %35 : vector<16x512xf32>
    %c0_21 = arith.constant 0 : index
    %c0_22 = arith.constant 0 : index
    %37 = vector.load %arg6[%c0_21, %c0_22] : memref<128x512xbf16, #tpu.memory_space<vmem>>, vector<128x512xbf16>
    %cst_23 = arith.constant dense<0.000000e+00> : vector<16x512xf32>
    %38 = tpu.matmul %30, %37, %cst_23 {dimension_numbers = #tpu.dot_dimension_numbers<[1], [0], [0], [1], [0, 0, 1, 1], [], []>} : vector<16x128xbf16>, vector<128x512xbf16>, vector<16x512xf32> -> vector<16x512xf32>
    %39 = arith.addf %36, %38 : vector<16x512xf32>
    %c0_24 = arith.constant 0 : index
    %c0_25 = arith.constant 0 : index
    %40 = vector.load %arg7[%c0_24, %c0_25] : memref<1x512xf32, #tpu.memory_space<vmem>>, vector<1x512xf32>
    %41 = vector.broadcast %40 : vector<1x512xf32> to vector<16x512xf32>
    %42 = arith.addf %39, %41 : vector<16x512xf32>
    %43 = vector.extract_strided_slice %42 {offsets = [0, 0], sizes = [16, 128], strides = [1, 1]} : vector<16x512xf32> to vector<16x128xf32>
    %44 = arith.negf %43 : vector<16x128xf32>
    %45 = math.exp %44 : vector<16x128xf32>
    %cst_26 = arith.constant 1.000000e+00 : f32
    %46 = vector.broadcast %cst_26 : f32 to vector<16x128xf32>
    %47 = arith.addf %46, %45 : vector<16x128xf32>
    %48 = arith.divf %46, %47 : vector<16x128xf32>
    %49 = vector.extract_strided_slice %42 {offsets = [0, 128], sizes = [16, 128], strides = [1, 1]} : vector<16x512xf32> to vector<16x128xf32>
    %50 = arith.negf %49 : vector<16x128xf32>
    %51 = math.exp %50 : vector<16x128xf32>
    %cst_27 = arith.constant 1.000000e+00 : f32
    %52 = vector.broadcast %cst_27 : f32 to vector<16x128xf32>
    %53 = arith.addf %52, %51 : vector<16x128xf32>
    %54 = arith.divf %52, %53 : vector<16x128xf32>
    %55 = vector.extract_strided_slice %42 {offsets = [0, 256], sizes = [16, 128], strides = [1, 1]} : vector<16x512xf32> to vector<16x128xf32>
    %56 = math.tanh %55 : vector<16x128xf32>
    %57 = vector.extract_strided_slice %42 {offsets = [0, 384], sizes = [16, 128], strides = [1, 1]} : vector<16x512xf32> to vector<16x128xf32>
    %58 = arith.negf %57 : vector<16x128xf32>
    %59 = math.exp %58 : vector<16x128xf32>
    %cst_28 = arith.constant 1.000000e+00 : f32
    %60 = vector.broadcast %cst_28 : f32 to vector<16x128xf32>
    %61 = arith.addf %60, %59 : vector<16x128xf32>
    %62 = arith.divf %60, %61 : vector<16x128xf32>
    %63 = arith.mulf %54, %2 : vector<16x128xf32>
    %64 = arith.mulf %48, %56 : vector<16x128xf32>
    %65 = arith.addf %63, %64 : vector<16x128xf32>
    %66 = math.tanh %65 : vector<16x128xf32>
    %67 = arith.mulf %62, %66 : vector<16x128xf32>
    %c0_29 = arith.constant 0 : index
    %c0_30 = arith.constant 0 : index
    %68 = vector.load %arg8[%c0_29, %c0_30] : memref<16x128xf32, #tpu.memory_space<vmem>>, vector<16x128xf32>
    tpu.vector_store %arg8[%c0_29, %c0_30], %67 {strides = array<i32>} : memref<16x128xf32, #tpu.memory_space<vmem>>, vector<16x128xf32>,
    %c0_31 = arith.constant 0 : index
    %c0_32 = arith.constant 0 : index
    %69 = vector.load %arg9[%c0_31, %c0_32] : memref<16x128xf32, #tpu.memory_space<vmem>>, vector<16x128xf32>
    tpu.vector_store %arg9[%c0_31, %c0_32], %65 {strides = array<i32>} : memref<16x128xf32, #tpu.memory_space<vmem>>, vector<16x128xf32>,
    %70 = arith.truncf %67 : vector<16x128xf32> to vector<16x128xbf16>
    %c0_33 = arith.constant 0 : index
    %c0_34 = arith.constant 0 : index
    %71 = vector.load %arg11[%c0_33, %c0_34] : memref<16x384xbf16, #tpu.memory_space<vmem>>, vector<16x128xbf16>
    tpu.vector_store %arg11[%c0_33, %c0_34], %70 {strides = array<i32>} : memref<16x384xbf16, #tpu.memory_space<vmem>>, vector<16x128xbf16>,
    %c0_35 = arith.constant 0 : index
    %c128 = arith.constant 128 : index
    %72 = vector.load %arg11[%c0_35, %c128] : memref<16x384xbf16, #tpu.memory_space<vmem>>, vector<16x128xbf16>
    tpu.vector_store %arg11[%c0_35, %c128], %31 {strides = array<i32>} : memref<16x384xbf16, #tpu.memory_space<vmem>>, vector<16x128xbf16>,
    %c0_36 = arith.constant 0 : index
    %c256 = arith.constant 256 : index
    %73 = vector.load %arg11[%c0_36, %c256] : memref<16x384xbf16, #tpu.memory_space<vmem>>, vector<16x128xbf16>
    tpu.vector_store %arg11[%c0_36, %c256], %0 {strides = array<i32>} : memref<16x384xbf16, #tpu.memory_space<vmem>>, vector<16x128xbf16>,
    return
  }
}

module attributes {stable_mosaic.version = 11 : i64} {
  func.func @fc_out_kernel(%arg0: i32, %arg1: memref<16x384xbf16, #tpu.memory_space<vmem>>, %arg2: memref<384x128xbf16, #tpu.memory_space<vmem>>, %arg3: memref<1x128xf32, #tpu.memory_space<vmem>>, %arg4: memref<16x128xf32, #tpu.memory_space<vmem>>) attributes {dimension_semantics = [#tpu.dimension_semantics<parallel>], iteration_bounds = array<i64: 1>, scalar_prefetch = 0 : i64, scratch_operands = 0 : i64, tpu.core_type = #tpu.core_type<tc>, window_params = [{pipeline_mode = #tpu.pipeline_mode<synchronous>, transform_indices = @transform_0, window_bounds = array<i64: 16, 384>}, {transform_indices = @transform_1, window_bounds = array<i64: 384, 128>}, {transform_indices = @transform_2, window_bounds = array<i64: 1, 128>}, {transform_indices = @transform_3, window_bounds = array<i64: 16, 128>}]} {
    %c0 = arith.constant 0 : index
    %c0_0 = arith.constant 0 : index
    %0 = vector.load %arg1[%c0, %c0_0] : memref<16x384xbf16, #tpu.memory_space<vmem>>, vector<16x384xbf16>
    %c0_1 = arith.constant 0 : index
    %c0_2 = arith.constant 0 : index
    %1 = vector.load %arg2[%c0_1, %c0_2] : memref<384x128xbf16, #tpu.memory_space<vmem>>, vector<384x128xbf16>
    %cst = arith.constant dense<0.000000e+00> : vector<16x128xf32>
    %2 = tpu.matmul %0, %1, %cst {dimension_numbers = #tpu.dot_dimension_numbers<[1], [0], [0], [1], [0, 0, 1, 1], [], []>} : vector<16x384xbf16>, vector<384x128xbf16>, vector<16x128xf32> -> vector<16x128xf32>
    %c0_3 = arith.constant 0 : index
    %c0_4 = arith.constant 0 : index
    %3 = vector.load %arg3[%c0_3, %c0_4] : memref<1x128xf32, #tpu.memory_space<vmem>>, vector<1x128xf32>
    %4 = vector.broadcast %3 : vector<1x128xf32> to vector<16x128xf32>
    %5 = arith.addf %2, %4 : vector<16x128xf32>
    %c0_5 = arith.constant 0 : index
    %c0_6 = arith.constant 0 : index
    %6 = vector.load %arg4[%c0_5, %c0_6] : memref<16x128xf32, #tpu.memory_space<vmem>>, vector<16x128xf32>
    tpu.vector_store %arg4[%c0_5, %c0_6], %5 {strides = array<i32>} : memref<16x128xf32, #tpu.memory_space<vmem>>, vector<16x128xf32>,
    return
  }
  func.func @transform_0(%arg0: i32) -> (i32, i32) {
    %c0_i32 = arith.constant 0 : i32
    %c0_i32_0 = arith.constant 0 : i32
    %c0_i32_1 = arith.constant 0 : i32
    return %c0_i32, %c0_i32_0 : i32, i32
  }
  func.func @transform_1(%arg0: i32) -> (i32, i32) {
    %c0_i32 = arith.constant 0 : i32
    %c0_i32_0 = arith.constant 0 : i32
    return %c0_i32, %arg0 : i32, i32
  }
  func.func @transform_2(%arg0: i32) -> (i32, i32) {
    %c0_i32 = arith.constant 0 : i32
    %c0_i32_0 = arith.constant 0 : i32
    return %c0_i32, %arg0 : i32, i32
  }
  func.func @transform_3(%arg0: i32) -> (i32, i32) {
    %c0_i32 = arith.constant 0 : i32
    %c0_i32_0 = arith.constant 0 : i32
    return %c0_i32, %arg0 : i32, i32
  }
}

</mosaic_0001>

<bundles_post_ra>
// kernel: decoder_forward.3
= control target key start
LH: loop header
LB: loop body
LE: loop exit
PB: predicated region body
PF: predicated region fallthrough
CT: control target
= control target key end

     0   :  { %s533_s1 = inlined_call_operand.vmem [shape: bf16[384,128], index: 1, kind: input, shape index: {}]   ;;  %s534_s2 = inlined_call_operand.vmem [shape: f32[1,128], index: 2, kind: input, shape index: {}]   ;;  %s535_s0 = inlined_call_operand.vmem [shape: bf16[16,384], index: 0, kind: input, shape index: {}]   ;;  %s536_s3 = inlined_call_operand.vmem [shape: f32[16,128], index: 3, kind: output, shape index: {}]  }
   0x1   :  { %v396_v0 = vld [vmem:[%s533_s1 + $0x38] sm:$0xff]  ;;  %v395_v3 = vld [vmem:[%s533_s1 + $0x30] sm:$0xff]  ;;  %v394_v6 = vld [vmem:[%s533_s1 + $0x28] sm:$0xff] }
   0x2   :  { %v404_v1 = vld [vmem:[%s533_s1 + $0x78] sm:$0xff]  ;;  %230 = vmatpush.bf16.msra.mxu0 %v396_v0  ;;  %v403_v4 = vld [vmem:[%s533_s1 + $0x70] sm:$0xff]  ;;  %v402_v7 = vld [vmem:[%s533_s1 + $0x68] sm:$0xff] }
   0x3   :  { %v412_v2 = vld [vmem:[%s533_s1 + $0xb8] sm:$0xff]  ;;  %244 = vmatpush.bf16.msra.mxu1 %v404_v1  ;;  %v411_v5 = vld [vmem:[%s533_s1 + $0xb0] sm:$0xff]  ;;  %v410_v8 = vld [vmem:[%s533_s1 + $0xa8] sm:$0xff] }
   0x4   :  { %258 = vmatpush.bf16.msra.mxu2 %v412_v2  ;;  %v393_v9 = vld [vmem:[%s533_s1 + $0x20] sm:$0xff]  ;;  %v392_v12 = vld [vmem:[%s533_s1 + $0x18] sm:$0xff]  ;;  %v391_v15 = vld [vmem:[%s533_s1 + $0x10] sm:$0xff] }
   0x5   :  { %v401_v10 = vld [vmem:[%s533_s1 + $0x60] sm:$0xff]  ;;  %v400_v13 = vld [vmem:[%s533_s1 + $0x58] sm:$0xff]  ;;  %v399_v16 = vld [vmem:[%s533_s1 + $0x50] sm:$0xff] }
   0x6   :  { %231 = vmatpush.bf16.msra.mxu0 %v395_v3  ;;  %v409_v11 = vld [vmem:[%s533_s1 + $0xa0] sm:$0xff]  ;;  %v408_v14 = vld [vmem:[%s533_s1 + $0x98] sm:$0xff]  ;;  %v407_v17 = vld [vmem:[%s533_s1 + $0x90] sm:$0xff] }
   0x7   :  { %245 = vmatpush.bf16.msra.mxu1 %v403_v4  ;;  %v390_v18 = vld [vmem:[%s533_s1 + $0x8] sm:$0xff]  ;;  %v389_v21 = vld [vmem:[%s533_s1] sm:$0xff]  ;;  %v282_v26 = vld [vmem:[%s535_s0 + $0xc] sm:$0xf0] }
   0x8   :  { %259 = vmatpush.bf16.msra.mxu2 %v411_v5  ;;  %v398_v19 = vld [vmem:[%s533_s1 + $0x48] sm:$0xff]  ;;  %v397_v22 = vld [vmem:[%s533_s1 + $0x40] sm:$0xff]  ;;  %v388_v29 = vld [vmem:[%s535_s0 + $0x10] sm:$0xf0] }
   0x9   :  { %v406_v20 = vld [vmem:[%s533_s1 + $0x88] sm:$0xff]  ;;  %v280_v23 = vld [vmem:[%s535_s0] sm:$0xf]  ;;  %v386_v25 = vld [vmem:[%s535_s0 + $0x4] sm:$0xf] }
   0xa   :  { %232 = vmatpush.bf16.msra.mxu0 %v394_v6  ;;  %v387_v24 = vld [vmem:[%s535_s0 + $0x8] sm:$0xf0]  ;;  %v405_v27 = vld [vmem:[%s533_s1 + $0x80] sm:$0xff]  ;;  %v288_v28 = vld [vmem:[%s535_s0 + $0x8] sm:$0xf]  ;;  %v285_v31 = vor.u32 %v386_v25, %v282_v26 }
   0xb   :  { %246 = vmatpush.bf16.msra.mxu1 %v402_v7  ;;  %v281_v30 = vor.u32 %v387_v24, %v280_v23  ;;  %v289_v32 = vor.u32 %v388_v29, %v288_v28  ;;  %v413_v33 = vld [vmem:[%s534_s2] ss:$0 sm:$0xff] }
   0xc   :  { %260 = vmatpush.bf16.msra.mxu2 %v410_v8 }
   0xe   :  { %233 = vmatpush.bf16.msra.mxu0 %v393_v9 }
   0xf   :  { %247 = vmatpush.bf16.msra.mxu1 %v401_v10 }
  0x10   :  { %261 = vmatpush.bf16.msra.mxu2 %v409_v11 }
  0x12   :  { %234 = vmatpush.bf16.msra.mxu0 %v392_v12 }
  0x13   :  { %248 = vmatpush.bf16.msra.mxu1 %v400_v13 }
  0x14   :  { %262 = vmatpush.bf16.msra.mxu2 %v408_v14 }
  0x16   :  { %235 = vmatpush.bf16.msra.mxu0 %v391_v15 }
  0x17   :  { %249 = vmatpush.bf16.msra.mxu1 %v399_v16 }
  0x18   :  { %263 = vmatpush.bf16.msra.mxu2 %v407_v17 }
  0x1a   :  { %236 = vmatpush.bf16.msra.mxu0 %v390_v18 }
  0x1b   :  { %250 = vmatpush.bf16.msra.mxu1 %v398_v19 }
  0x1c   :  { %264 = vmatpush.bf16.msra.mxu2 %v406_v20 }
  0x1e   :  { %237 = vmatpush.bf16.msra.mxu0 %v389_v21 }
  0x1f   :  { %251 = vmatpush.bf16.msra.mxu1 %v397_v22 }
  0x20   :  { %265 = vmatpush.bf16.msra.mxu2 %v405_v27 }
  0x21   :  { %238 = vmatmul.bf16.vlgmr.msra.gmra.mxu0 %v281_v30 }
  0x22   :  { %252 = vmatmul.bf16.vlgmr.msra.gmra.mxu1 %v285_v31 }
  0x23   :  { %266 = vmatmul.bf16.vlgmr.msra.gmra.mxu2 %v289_v32 }
  0x9e   :  { %v239_v34 = vpop.f32.mrf.mxu0 }
  0x9f   :  { %v240_v35 = vadd.f32 %v413_v33, %v239_v34  ;;  %v253_v36 = vpop.f32.mrf.mxu1 }
  0xa1   :  { %v254_v37 = vadd.f32 %v253_v36, %v240_v35 }
  0xa6   :  { %v267_v38 = vpop.f32.mrf.mxu2  ;;  %v241_v40 = vpop.f32.mrf.mxu0 }
  0xa7   :  { %v268_v39 = vadd.f32 %v267_v38, %v254_v37  ;;  %v242_v41 = vadd.f32 %v413_v33, %v241_v40  ;;  %v255_v42 = vpop.f32.mrf.mxu1 }
  0xa9   :  { %272 = vst [vmem:[%s536_s3] sm:$0xff] %v268_v39  ;;  %v256_v43 = vadd.f32 %v255_v42, %v242_v41 }
  0xae   :  { %v269_v44 = vpop.f32.mrf.mxu2 }
  0xaf   :  { %v270_v45 = vadd.f32 %v269_v44, %v256_v43 }
  0xb1   :  { %273 = vst [vmem:[%s536_s3 + $0x8] sm:$0xff] %v270_v45 }

// kernel: decoder_forward.2
= control target key start
LH: loop header
LB: loop body
LE: loop exit
PB: predicated region body
PF: predicated region fallthrough
CT: control target
= control target key end

     0   :  { %vm1885_vm0 = vcmask 130112   ;;  %vm1889_vm1 = vcmask 195712   ;;  %vm1893_vm2 = vcmask 261312   ;;  %vm1897_vm3 = vcmask 326912   ;;  %s12311_s1 = inlined_call_operand.vmem [shape: f32[16,128], index: 1, kind: input, shape index: {}, may-alias: {1,8}]   ;;  %s12312_s3 = inlined_call_operand.vmem [shape: bf16[16,128,128], index: 3, kind: input, shape index: {}]   ;;  %s12313_s10 = inlined_call_operand.vmem [shape: f32[16,128], index: 10, kind: output, shape index: {2}]   ;;  %s12314_s11 = inlined_call_operand.vmem [shape: bf16[16,384], index: 11, kind: output, shape index: {3}]   ;;  %s12315_s5 = inlined_call_operand.vmem [shape: bf16[128,512], index: 5, kind: input, shape index: {}]   ;;  %s12316_s4 = inlined_call_operand.vmem [shape: bf16[128,512], index: 4, kind: input, shape index: {}]   ;;  %s12317_s0 = inlined_call_operand.vmem [shape: bf16[16,128], index: 0, kind: input, shape index: {}]   ;;  %s12318_s6 = inlined_call_operand.vmem [shape: bf16[128,512], index: 6, kind: input, shape index: {}]   ;;  %s12319_s7 = inlined_call_operand.vmem [shape: f32[1,512], index: 7, kind: input, shape index: {}]   ;;  %s12320_s2 = inlined_call_operand.vmem [shape: f32[16,128], index: 2, kind: input, shape index: {}, may-alias: {2,9}]   ;;  %s12321_s9 = inlined_call_operand.vmem [shape: f32[16,128], index: 9, kind: output, shape index: {1}, may-alias: {2,9}]   ;;  %s12322_s8 = inlined_call_operand.vmem [shape: f32[16,128], index: 8, kind: output, shape index: {0}, may-alias: {1,8}]  }
   0x1   :  { %v7115_v0 = vld [vmem:[%s12311_s1] sm:$0xff]  ;;  %v7120_v1 = vld [vmem:[%s12312_s3 + $0x10] sm:$0xff]   ;;  %v7125_v2 = vld [vmem:[%s12312_s3 + $0x8] sm:$0xff]   ;;  %vm1901_vm4 = vcmask 392512   ;;  %vm1905_vm5 = vcmask 458112   ;;  %vm1909_vm6 = vcmask 523712  }
   0x2   :  { %12850 = vst [vmem:[#allocation2_spill] sm:$0xff] %v7120_v1  ;;  %v12346_v3 = vunpack.c.l.bf16 %v7120_v1  ;;  %v567_v4 = vperm.slane %v7115_v0, 0  ;;  %v12348_v5 = vunpack.c.l.bf16 %v7125_v2  ;;  %v7133_v6 = vld [vmem:[%s12312_s3] sm:$0xff]   ;;  %v12344_v11 = vunpack.c.h.bf16 %v7120_v1  ;;  %v7159_v18 = vld [vmem:[%s12312_s3 + $0x18] sm:$0xff]   ;;  %v7173_v25 = vld [vmem:[%s12312_s3 + $0x28] sm:$0xff]  }
   0x3   :  { %12851 = vst [vmem:[#allocation3_spill] sm:$0xff] %v7125_v2  ;;  %v12349_v7 = vunpack.c.l.bf16 %v7133_v6  ;;  %v12347_v12 = vunpack.c.h.bf16 %v7125_v2  ;;  %v12351_v13 = vunpack.c.h.bf16 %v7133_v6  ;;  %v7154_v17 = vld [vmem:[%s12312_s3 + $0x20] sm:$0xff]   ;;  %v12340_v20 = vunpack.c.h.bf16 %v7159_v18  ;;  %v7187_v32 = vld [vmem:[%s12312_s3 + $0x38] sm:$0xff]   ;;  %v7192_v33 = vld [vmem:[%s12312_s3 + $0x30] sm:$0xff]  }
   0x4   :  { %12852 = vst [vmem:[#allocation4_spill] sm:$0xff] %v7133_v6  ;;  %v603_v8 = vmul.f32 %v12346_v3, %v567_v4  ;;  %v601_v9 = vmul.f32 %v12348_v5, %v567_v4  ;;  %v604_v14 = vmul.f32 %v12344_v11, %v567_v4  ;;  %v12339_v19 = vunpack.c.l.bf16 %v7154_v17  ;;  %v7207_v41 = vld [vmem:[%s12312_s3 + $0x40] sm:$0xff]   ;;  %v7221_v49 = vld [vmem:[%s12312_s3 + $0x48] sm:$0xff]   ;;  %v7226_v50 = vld [vmem:[%s12312_s3 + $0x50] sm:$0xff]  }
   0x5   :  { %v599_v10 = vmul.f32 %v12349_v7, %v567_v4  ;;  %v602_v15 = vmul.f32 %v12347_v12, %v567_v4  ;;  %v600_v16 = vmul.f32 %v12351_v13, %v567_v4  ;;  %12853 = vst [vmem:[#allocation5_spill] sm:$0xff] %v7154_v17  ;;  %v12341_v21 = vunpack.c.l.bf16 %v7159_v18  ;;  %v7240_v57 = vld [vmem:[%s12312_s3 + $0x58] sm:$0xff]  }
   0x6   :  { %863 = vadd.xlane.f32.xlu2 %v603_v8  ;;  %859 = vadd.xlane.f32.xlu1 %v601_v9  ;;  %12854 = vst [vmem:[#allocation6_spill] sm:$0xff] %v7159_v18  ;;  %v607_v22 = vmul.f32 %v12339_v19, %v567_v4  ;;  %v606_v23 = vmul.f32 %v12340_v20, %v567_v4  ;;  %v12336_v26 = vunpack.c.h.bf16 %v7173_v25  ;;  %v12337_v27 = vunpack.c.l.bf16 %v7173_v25  ;;  %v7259_v8 = vld [vmem:[%s12312_s3 + $0x68] sm:$0xff]  }
   0x7   :  { %855 = vadd.xlane.f32.xlu0 %v599_v10  ;;  %v605_v24 = vmul.f32 %v12341_v21, %v567_v4  ;;  %12855 = vst [vmem:[#allocation7_spill] sm:$0xff] %v7173_v25  ;;  %v12338_v28 = vunpack.c.h.bf16 %v7154_v17  ;;  %v12332_v34 = vunpack.c.l.bf16 %v7187_v32  ;;  %v12333_v35 = vunpack.c.h.bf16 %v7192_v33  ;;  %v7399_v21 = vld [vmem:[%s12312_s3 + $0xc8] sm:$0xff]  }
   0x8   :  { %v610_v29 = vmul.f32 %v12336_v26, %v567_v4  ;;  %v609_v30 = vmul.f32 %v12337_v27, %v567_v4  ;;  %12856 = vst [vmem:[#allocation8_spill] sm:$0xff] %v7187_v32  ;;  %v12334_v36 = vunpack.c.l.bf16 %v7192_v33  ;;  %v553_v39 = vrot.slane %v7115_v0, 1 }
   0x9   :  { %v608_v31 = vmul.f32 %v12338_v28, %v567_v4  ;;  %12857 = vst [vmem:[#allocation9_spill] sm:$0xff] %v7192_v33  ;;  %v613_v37 = vmul.f32 %v12332_v34, %v567_v4  ;;  %v612_v38 = vmul.f32 %v12333_v35, %v567_v4  ;;  %v12384_v42 = vunpack.c.h.bf16 %v7207_v41 }
   0xa   :  { %v611_v40 = vmul.f32 %v12334_v36, %v567_v4  ;;  %12858 = vst [vmem:[#allocation10_spill] sm:$0xff] %v7207_v41  ;;  %v568_v43 = vperm.slane %v553_v39, 0  ;;  %v12383_v44 = vunpack.c.l.bf16 %v7207_v41  ;;  %v12330_v45 = vunpack.c.h.bf16 %v7187_v32  ;;  %v7816_v41 = vld [vmem:[%s12312_s3 + $0x188] sm:$0xff]  }
   0xb   :  { %12859 = vst [vmem:[#allocation11_spill] sm:$0xff] %v7221_v49  ;;  %v12378_v51 = vunpack.c.l.bf16 %v7226_v50  ;;  %v12379_v52 = vunpack.c.h.bf16 %v7221_v49  ;;  %v12381_v53 = vunpack.c.l.bf16 %v7221_v49  ;;  %v12375_v58 = vunpack.c.h.bf16 %v7240_v57  ;;  %v7811_v49 = vld [vmem:[%s12312_s3 + $0x180] sm:$0xff]  }
   0xc   :  { %v616_v46 = vmul.f32 %v12384_v42, %v568_v43  ;;  %v615_v47 = vmul.f32 %v12383_v44, %v568_v43  ;;  %v614_v48 = vmul.f32 %v12330_v45, %v567_v4  ;;  %12860 = vst [vmem:[#allocation12_spill] sm:$0xff] %v7226_v50  ;;  %v12376_v59 = vunpack.c.l.bf16 %v7240_v57  ;;  %v7254_v4 = vld [vmem:[%s12312_s3 + $0x60] sm:$0xff]  }
   0xd   :  { %v619_v54 = vmul.f32 %v12378_v51, %v568_v43  ;;  %v618_v55 = vmul.f32 %v12379_v52, %v568_v43  ;;  %v617_v56 = vmul.f32 %v12381_v53, %v568_v43  ;;  %12861 = vst [vmem:[#allocation13_spill] sm:$0xff] %v7240_v57  ;;  %v12377_v60 = vunpack.c.h.bf16 %v7226_v50  ;;  %v7527_v51 = vld [vmem:[%s12312_s3 + $0x100] sm:$0xff]  }
   0xe   :  { %865 = vadd.xlane.f32.xlu2 %v604_v14  ;;  %861 = vadd.xlane.f32.xlu1 %v602_v15  ;;  %v622_v61 = vmul.f32 %v12375_v58, %v568_v43  ;;  %v621_v62 = vmul.f32 %v12376_v59, %v568_v43  ;;  %12862 = vst [vmem:[#allocation14_spill] sm:$0xff] %v7254_v4  ;;  %v12328_v9 = vunpack.c.l.bf16 %v7259_v8  ;;  %v12329_v10 = vunpack.c.h.bf16 %v7254_v4 }
   0xf   :  { %857 = vadd.xlane.f32.xlu0 %v600_v16  ;;  %v620_v63 = vmul.f32 %v12377_v60, %v568_v43  ;;  %12863 = vst [vmem:[#allocation15_spill] sm:$0xff] %v7259_v8  ;;  %v12331_v14 = vunpack.c.l.bf16 %v7254_v4  ;;  %v12388_v52 = vunpack.c.h.bf16 %v7527_v51  ;;  %v12389_v53 = vunpack.c.l.bf16 %v7527_v51 }
  0x10   :  { %v625_v15 = vmul.f32 %v12328_v9, %v568_v43  ;;  %v624_v16 = vmul.f32 %v12329_v10, %v568_v43  ;;  %12875 = vst [vmem:[#allocation27_spill] sm:$0xff] %v7399_v21  ;;  %vm12809_vm7 = vcmask 589312   ;;  %vm12810_vm8 = vcmask 654912  }
  0x11   :  { %12882 = vst [vmem:[#allocation34_spill] sm:$0xff] %v7527_v51  ;;  %vm1921_vm9 = vcmask 720512   ;;  %vm12819_vm10 = vcmask 786112   ;;  %vm12818_vm11 = vcmask 851712   ;;  %vm1933_vm12 = vcmask 917312  }
  0x12   :  { %12907 = vst [vmem:[#allocation59_spill] sm:$0xff] %v7811_v49  ;;  %vm1937_vm13 = vcmask 982912   ;;  %vm1941_vm14 = vcmask 1048512   ;;  %vm12820_vm15 = vcmask 1041409  }
  0x13   :  { %12908 = vst [vmem:[#allocation60_spill] sm:$0xff] %v7816_v41 }
  0x16   :  { %871 = vadd.xlane.f32.xlu2 %v607_v22  ;;  %869 = vadd.xlane.f32.xlu1 %v606_v23  ;;  %v623_v22 = vmul.f32 %v12331_v14, %v568_v43  ;;  %v7273_v23 = vld [vmem:[%s12312_s3 + $0x70] sm:$0xff]  }
  0x17   :  { %867 = vadd.xlane.f32.xlu0 %v605_v24  ;;  %12864 = vst [vmem:[#allocation16_spill] sm:$0xff] %v7273_v23  ;;  %v12325_v24 = vunpack.c.h.bf16 %v7273_v23 }
  0x1e   :  { %877 = vadd.xlane.f32.xlu2 %v610_v29  ;;  %875 = vadd.xlane.f32.xlu1 %v609_v30  ;;  %v12326_v29 = vunpack.c.l.bf16 %v7273_v23  ;;  %v12327_v30 = vunpack.c.h.bf16 %v7259_v8 }
  0x1f   :  { %873 = vadd.xlane.f32.xlu0 %v608_v31  ;;  %v628_v31 = vmul.f32 %v12325_v24, %v568_v43 }
  0x20   :  { %v626_v39 = vmul.f32 %v12327_v30, %v568_v43 }
  0x26   :  { %883 = vadd.xlane.f32.xlu2 %v613_v37  ;;  %881 = vadd.xlane.f32.xlu1 %v612_v38  ;;  %v627_v37 = vmul.f32 %v12326_v29, %v568_v43  ;;  %v554_v38 = vrot.slane %v7115_v0, 2 }
  0x27   :  { %879 = vadd.xlane.f32.xlu0 %v611_v40  ;;  %v7288_v40 = vld [vmem:[%s12312_s3 + $0x78] sm:$0xff]  }
  0x28   :  { %12865 = vst [vmem:[#allocation17_spill] sm:$0xff] %v7288_v40 }
  0x2e   :  { %889 = vadd.xlane.f32.xlu2 %v616_v46  ;;  %887 = vadd.xlane.f32.xlu1 %v615_v47  ;;  %v7293_v46 = vld [vmem:[%s12312_s3 + $0x80] sm:$0xff]  }
  0x2f   :  { %885 = vadd.xlane.f32.xlu0 %v614_v48  ;;  %12866 = vst [vmem:[#allocation18_spill] sm:$0xff] %v7293_v46  ;;  %v12373_v47 = vunpack.c.l.bf16 %v7293_v46  ;;  %v569_v48 = vperm.slane %v554_v38, 0  ;;  %v7321_v38 = vld [vmem:[%s12312_s3 + $0x90] sm:$0xff]  }
  0x30   :  { %12868 = vst [vmem:[#allocation20_spill] sm:$0xff] %v7321_v38 }
  0x36   :  { %895 = vadd.xlane.f32.xlu2 %v619_v54  ;;  %893 = vadd.xlane.f32.xlu1 %v618_v55  ;;  %v12323_v54 = vunpack.c.h.bf16 %v7288_v40  ;;  %v12324_v55 = vunpack.c.l.bf16 %v7288_v40  ;;  %v7557_v40 = vld [vmem:[%s12312_s3 + $0x110] sm:$0xff]  }
  0x37   :  { %891 = vadd.xlane.f32.xlu0 %v617_v56  ;;  %v631_v56 = vmul.f32 %v12373_v47, %v569_v48  ;;  %12884 = vst [vmem:[#allocation36_spill] sm:$0xff] %v7557_v40 }
  0x3e   :  { %901 = vadd.xlane.f32.xlu2 %v622_v61  ;;  %899 = vadd.xlane.f32.xlu1 %v621_v62  ;;  %v630_v61 = vmul.f32 %v12323_v54, %v568_v43  ;;  %v629_v62 = vmul.f32 %v12324_v55, %v568_v43 }
  0x3f   :  { %897 = vadd.xlane.f32.xlu0 %v620_v63  ;;  %v7307_v63 = vld [vmem:[%s12312_s3 + $0x88] sm:$0xff]  }
  0x40   :  { %12867 = vst [vmem:[#allocation19_spill] sm:$0xff] %v7307_v63 }
  0x46   :  { %907 = vadd.xlane.f32.xlu2 %v625_v15  ;;  %905 = vadd.xlane.f32.xlu1 %v624_v16  ;;  %v12366_v15 = vunpack.c.h.bf16 %v7307_v63  ;;  %v12368_v16 = vunpack.c.l.bf16 %v7307_v63 }
  0x47   :  { %903 = vadd.xlane.f32.xlu0 %v623_v22  ;;  %v12370_v22 = vunpack.c.h.bf16 %v7293_v46 }
  0x48   :  { %v633_v43 = vmul.f32 %v12368_v16, %v569_v48 }
  0x4e   :  { %913 = vadd.xlane.f32.xlu2 %v628_v31  ;;  %911 = vadd.xlane.f32.xlu1 %v627_v37  ;;  %v634_v31 = vmul.f32 %v12366_v15, %v569_v48  ;;  %v632_v37 = vmul.f32 %v12370_v22, %v569_v48  ;;  %v7503_v22 = vld [vmem:[%s12312_s3 + $0xf8] sm:$0xff]  }
  0x4f   :  { %909 = vadd.xlane.f32.xlu0 %v626_v39  ;;  %v7326_v39 = vld [vmem:[%s12312_s3 + $0x98] sm:$0xff]   ;;  %12881 = vst [vmem:[#allocation33_spill] sm:$0xff] %v7503_v22 }
  0x50   :  { %12869 = vst [vmem:[#allocation21_spill] sm:$0xff] %v7326_v39  ;;  %v12361_v29 = vunpack.c.h.bf16 %v7326_v39 }
  0x52   :  { %v638_v10 = vmul.f32 %v12361_v29, %v569_v48 }
  0x56   :  { %919 = vadd.xlane.f32.xlu2 %v631_v56  ;;  %917 = vadd.xlane.f32.xlu1 %v630_v61  ;;  %v12362_v56 = vunpack.c.l.bf16 %v7326_v39  ;;  %v12363_v61 = vunpack.c.h.bf16 %v7321_v38  ;;  %v7764_v39 = vld [vmem:[%s12312_s3 + $0x170] sm:$0xff]  }
  0x57   :  { %915 = vadd.xlane.f32.xlu0 %v629_v62  ;;  %v12364_v62 = vunpack.c.l.bf16 %v7321_v38  ;;  %12901 = vst [vmem:[#allocation53_spill] sm:$0xff] %v7764_v39 }
  0x58   :  { %v637_v54 = vmul.f32 %v12362_v56, %v569_v48  ;;  %v636_v55 = vmul.f32 %v12363_v61, %v569_v48 }
  0x59   :  { %v635_v24 = vmul.f32 %v12364_v62, %v569_v48 }
  0x5e   :  { %925 = vadd.xlane.f32.xlu2 %v634_v31  ;;  %923 = vadd.xlane.f32.xlu1 %v633_v43  ;;  %v7340_v31 = vld [vmem:[%s12312_s3 + $0xa0] sm:$0xff]  }
  0x5f   :  { %921 = vadd.xlane.f32.xlu0 %v632_v37  ;;  %12870 = vst [vmem:[#allocation22_spill] sm:$0xff] %v7340_v31  ;;  %v12358_v43 = vunpack.c.h.bf16 %v7340_v31  ;;  %v12360_v37 = vunpack.c.l.bf16 %v7340_v31 }
  0x61   :  { %v640_v30 = vmul.f32 %v12358_v43, %v569_v48  ;;  %v639_v9 = vmul.f32 %v12360_v37, %v569_v48 }
  0x66   :  { %931 = vadd.xlane.f32.xlu2 %v637_v54  ;;  %929 = vadd.xlane.f32.xlu1 %v636_v55  ;;  %v7354_v54 = vld [vmem:[%s12312_s3 + $0xa8] sm:$0xff]  }
  0x67   :  { %927 = vadd.xlane.f32.xlu0 %v635_v24  ;;  %12871 = vst [vmem:[#allocation23_spill] sm:$0xff] %v7354_v54  ;;  %v7359_v24 = vld [vmem:[%s12312_s3 + $0xb0] sm:$0xff]   ;;  %v12353_v45 = vunpack.c.h.bf16 %v7354_v54  ;;  %v12355_v14 = vunpack.c.l.bf16 %v7354_v54 }
  0x68   :  { %12872 = vst [vmem:[#allocation24_spill] sm:$0xff] %v7359_v24  ;;  %v12335_v55 = vunpack.c.l.bf16 %v7359_v24 }
  0x69   :  { %v642_v35 = vmul.f32 %v12353_v45, %v569_v48  ;;  %v641_v36 = vmul.f32 %v12355_v14, %v569_v48  ;;  %v7452_v14 = vld [vmem:[%s12312_s3 + $0xe0] sm:$0xff]  }
  0x6a   :  { %v643_v34 = vmul.f32 %v12335_v55, %v569_v48  ;;  %v12345_v55 = vunpack.c.h.bf16 %v7359_v24  ;;  %12878 = vst [vmem:[#allocation30_spill] sm:$0xff] %v7452_v14 }
  0x6c   :  { %v644_v20 = vmul.f32 %v12345_v55, %v569_v48 }
  0x6e   :  { %937 = vadd.xlane.f32.xlu2 %v640_v30  ;;  %935 = vadd.xlane.f32.xlu1 %v639_v9  ;;  %v7373_v9 = vld [vmem:[%s12312_s3 + $0xb8] sm:$0xff]  }
  0x6f   :  { %933 = vadd.xlane.f32.xlu0 %v638_v10  ;;  %12873 = vst [vmem:[#allocation25_spill] sm:$0xff] %v7373_v9  ;;  %v12342_v10 = vunpack.c.h.bf16 %v7373_v9  ;;  %v12343_v30 = vunpack.c.l.bf16 %v7373_v9 }
  0x71   :  { %v646_v19 = vmul.f32 %v12342_v10, %v569_v48 }
  0x76   :  { %943 = vadd.xlane.f32.xlu2 %v643_v34  ;;  %941 = vadd.xlane.f32.xlu1 %v642_v35  ;;  %v645_v34 = vmul.f32 %v12343_v30, %v569_v48  ;;  %v555_v35 = vrot.slane %v7115_v0, 3  ;;  %v12350_v30 = vunpack.c.l.bf16 %v7399_v21 }
  0x77   :  { %939 = vadd.xlane.f32.xlu0 %v641_v36  ;;  %v7394_v36 = vld [vmem:[%s12312_s3 + $0xc0] sm:$0xff]  }
  0x78   :  { %12874 = vst [vmem:[#allocation26_spill] sm:$0xff] %v7394_v36  ;;  %v7401_v10 = vperm.slane %v555_v35, 0  ;;  %v12352_v11 = vunpack.c.h.bf16 %v7394_v36  ;;  %v12354_v48 = vunpack.c.l.bf16 %v7394_v36  ;;  %v7424_v35 = vld [vmem:[%s12312_s3 + $0xd0] sm:$0xff]  }
  0x79   :  { %v7378_v26 = vpop.xlane.xlu2 %863  ;;  %v7380_v27 = vpop.xlane.xlu1 %859  ;;  %12876 = vst [vmem:[#allocation28_spill] sm:$0xff] %v7424_v35  ;;  %v12356_v5 = vunpack.c.h.bf16 %v7424_v35  ;;  %v12357_v7 = vunpack.c.l.bf16 %v7424_v35 }
  0x7a   :  { %v7382_v28 = vpop.xlane.xlu0 %855 }
  0x7e   :  { %949 = vadd.xlane.f32.xlu2 %v646_v19  ;;  %947 = vadd.xlane.f32.xlu1 %v645_v34  ;;  %v649_v19 = vmul.f32 %v12350_v30, %v7401_v10  ;;  %v648_v34 = vmul.f32 %v12352_v11, %v7401_v10  ;;  %v12359_v30 = vunpack.c.h.bf16 %v7399_v21 }
  0x7f   :  { %945 = vadd.xlane.f32.xlu0 %v644_v20  ;;  %v647_v20 = vmul.f32 %v12354_v48, %v7401_v10  ;;  %v652_v48 = vmul.f32 %v12356_v5, %v7401_v10  ;;  %v12365_v5 = vunpack.c.l.bf16 %v7452_v14 }
  0x81   :  { %v7406_v55 = vpop.xlane.xlu2 %865  ;;  %v7408_v3 = vpop.xlane.xlu1 %861  ;;  %v655_v56 = vmul.f32 %v12365_v5, %v7401_v10  ;;  %v12374_v5 = vunpack.c.h.bf16 %v7452_v14 }
  0x82   :  { %v7410_v12 = vpop.xlane.xlu0 %857 }
  0x86   :  { %955 = vadd.xlane.f32.xlu2 %v649_v19  ;;  %953 = vadd.xlane.f32.xlu1 %v648_v34  ;;  %v651_v19 = vmul.f32 %v12357_v7, %v7401_v10  ;;  %v650_v34 = vmul.f32 %v12359_v30, %v7401_v10 }
  0x87   :  { %951 = vadd.xlane.f32.xlu0 %v647_v20  ;;  %v7447_v20 = vld [vmem:[%s12312_s3 + $0xd8] sm:$0xff]  }
  0x88   :  { %12877 = vst [vmem:[#allocation29_spill] sm:$0xff] %v7447_v20  ;;  %v12367_v7 = vunpack.c.h.bf16 %v7447_v20  ;;  %v12369_v43 = vunpack.c.l.bf16 %v7447_v20 }
  0x89   :  { %v7429_v13 = vpop.xlane.xlu2 %871  ;;  %v7431_v11 = vpop.xlane.xlu1 %869 }
  0x8a   :  { %v7433_v45 = vpop.xlane.xlu0 %867 }
  0x8e   :  { %961 = vadd.xlane.f32.xlu2 %v652_v48  ;;  %959 = vadd.xlane.f32.xlu1 %v651_v19  ;;  %v654_v48 = vmul.f32 %v12367_v7, %v7401_v10  ;;  %v653_v19 = vmul.f32 %v12369_v43, %v7401_v10 }
  0x8f   :  { %957 = vadd.xlane.f32.xlu0 %v650_v34  ;;  %v7475_v34 = vld [vmem:[%s12312_s3 + $0xe8] sm:$0xff]  }
  0x90   :  { %12879 = vst [vmem:[#allocation31_spill] sm:$0xff] %v7475_v34  ;;  %v12371_v61 = vunpack.c.h.bf16 %v7475_v34  ;;  %v12372_v62 = vunpack.c.l.bf16 %v7475_v34 }
  0x91   :  { %v7457_v30 = vpop.xlane.xlu2 %877  ;;  %v7459_v37 = vpop.xlane.xlu1 %875 }
  0x92   :  { %v7461_v29 = vpop.xlane.xlu0 %873  ;;  %v658_v43 = vmul.f32 %v12371_v61, %v7401_v10  ;;  %v12380_v61 = vunpack.c.l.bf16 %v7503_v22 }
  0x94   :  { %v661_v60 = vmul.f32 %v12380_v61, %v7401_v10 }
  0x96   :  { %967 = vadd.xlane.f32.xlu2 %v655_v56  ;;  %965 = vadd.xlane.f32.xlu1 %v654_v48  ;;  %v657_v56 = vmul.f32 %v12372_v62, %v7401_v10  ;;  %v656_v48 = vmul.f32 %v12374_v5, %v7401_v10 }
  0x97   :  { %963 = vadd.xlane.f32.xlu0 %v653_v19  ;;  %v7498_v19 = vld [vmem:[%s12312_s3 + $0xf0] sm:$0xff]  }
  0x98   :  { %12880 = vst [vmem:[#allocation32_spill] sm:$0xff] %v7498_v19  ;;  %v12382_v62 = vunpack.c.h.bf16 %v7498_v19  ;;  %v12385_v47 = vunpack.c.l.bf16 %v7498_v19  ;;  %v7608_v19 = vld [vmem:[%s12312_s3 + $0x128] sm:$0xff]  }
  0x99   :  { %v7480_v15 = vpop.xlane.xlu2 %883  ;;  %v7482_v7 = vpop.xlane.xlu1 %881  ;;  %12887 = vst [vmem:[#allocation39_spill] sm:$0xff] %v7608_v19 }
  0x9a   :  { %v7484_v16 = vpop.xlane.xlu0 %879 }
  0x9e   :  { %973 = vadd.xlane.f32.xlu2 %v658_v43  ;;  %971 = vadd.xlane.f32.xlu1 %v657_v56  ;;  %v660_v43 = vmul.f32 %v12382_v62, %v7401_v10  ;;  %v556_v56 = vrot.slane %v7115_v0, 4  ;;  %v12392_v62 = vunpack.c.h.bf16 %v7503_v22 }
  0x9f   :  { %969 = vadd.xlane.f32.xlu0 %v656_v48  ;;  %v659_v48 = vmul.f32 %v12385_v47, %v7401_v10 }
  0xa0   :  { %v7530_v61 = vperm.slane %v556_v56, 0  ;;  %v662_v56 = vmul.f32 %v12392_v62, %v7401_v10 }
  0xa1   :  { %v7508_v5 = vpop.xlane.xlu2 %889  ;;  %v7510_v58 = vpop.xlane.xlu1 %887 }
  0xa2   :  { %v7512_v59 = vpop.xlane.xlu0 %885 }
  0xa6   :  { %979 = vadd.xlane.f32.xlu2 %v661_v60  ;;  %977 = vadd.xlane.f32.xlu1 %v660_v43  ;;  %v664_v60 = vmul.f32 %v12388_v52, %v7530_v61  ;;  %v663_v43 = vmul.f32 %v12389_v53, %v7530_v61  ;;  %v12401_v52 = vunpack.c.l.bf16 %v7557_v40 }
  0xa7   :  { %975 = vadd.xlane.f32.xlu0 %v659_v48  ;;  %v7552_v48 = vld [vmem:[%s12312_s3 + $0x108] sm:$0xff]  }
  0xa8   :  { %12883 = vst [vmem:[#allocation35_spill] sm:$0xff] %v7552_v48  ;;  %v12404_v53 = vunpack.c.h.bf16 %v7552_v48  ;;  %v12407_v23 = vunpack.c.l.bf16 %v7552_v48  ;;  %v667_v4 = vmul.f32 %v12401_v52, %v7530_v61  ;;  %v12414_v52 = vunpack.c.h.bf16 %v7557_v40  ;;  %v7655_v40 = vld [vmem:[%s12312_s3 + $0x138] sm:$0xff]   ;;  %v7660_v48 = vld [vmem:[%s12312_s3 + $0x140] sm:$0xff]  }
  0xa9   :  { %v7534_v44 = vpop.xlane.xlu2 %895  ;;  %v7536_v42 = vpop.xlane.xlu1 %893  ;;  %12892 = vst [vmem:[#allocation44_spill] sm:$0xff] %v7655_v40 }
  0xaa   :  { %v7538_v47 = vpop.xlane.xlu0 %891  ;;  %12893 = vst [vmem:[#allocation45_spill] sm:$0xff] %v7660_v48 }
  0xae   :  { %985 = vadd.xlane.f32.xlu2 %v664_v60  ;;  %983 = vadd.xlane.f32.xlu1 %v663_v43  ;;  %v666_v60 = vmul.f32 %v12404_v53, %v7530_v61  ;;  %v665_v43 = vmul.f32 %v12407_v23, %v7530_v61 }
  0xaf   :  { %981 = vadd.xlane.f32.xlu0 %v662_v56  ;;  %v7580_v56 = vld [vmem:[%s12312_s3 + $0x118] sm:$0xff]  }
  0xb0   :  { %12885 = vst [vmem:[#allocation37_spill] sm:$0xff] %v7580_v56  ;;  %v12410_v9 = vunpack.c.h.bf16 %v7580_v56  ;;  %v12411_v32 = vunpack.c.l.bf16 %v7580_v56 }
  0xb1   :  { %v7562_v10 = vpop.xlane.xlu2 %901  ;;  %v7564_v62 = vpop.xlane.xlu1 %899 }
  0xb2   :  { %v7566_v8 = vpop.xlane.xlu0 %897  ;;  %v670_v23 = vmul.f32 %v12410_v9, %v7530_v61  ;;  %v12425_v9 = vunpack.c.l.bf16 %v7608_v19 }
  0xb4   :  { %v673_v35 = vmul.f32 %v12425_v9, %v7530_v61  ;;  %v12440_v9 = vunpack.c.h.bf16 %v7608_v19 }
  0xb6   :  { %991 = vadd.xlane.f32.xlu2 %v667_v4  ;;  %989 = vadd.xlane.f32.xlu1 %v666_v60  ;;  %v669_v4 = vmul.f32 %v12411_v32, %v7530_v61  ;;  %v668_v60 = vmul.f32 %v12414_v52, %v7530_v61 }
  0xb7   :  { %987 = vadd.xlane.f32.xlu0 %v665_v43  ;;  %v7603_v43 = vld [vmem:[%s12312_s3 + $0x120] sm:$0xff]  }
  0xb8   :  { %12886 = vst [vmem:[#allocation38_spill] sm:$0xff] %v7603_v43  ;;  %v12428_v32 = vunpack.c.h.bf16 %v7603_v43  ;;  %v12431_v34 = vunpack.c.l.bf16 %v7603_v43 }
  0xb9   :  { %v7585_v24 = vpop.xlane.xlu2 %907  ;;  %v7587_v53 = vpop.xlane.xlu1 %905 }
  0xba   :  { %v7589_v22 = vpop.xlane.xlu0 %903 }
  0xbe   :  { %997 = vadd.xlane.f32.xlu2 %v670_v23  ;;  %995 = vadd.xlane.f32.xlu1 %v669_v4  ;;  %v672_v23 = vmul.f32 %v12428_v32, %v7530_v61  ;;  %v671_v4 = vmul.f32 %v12431_v34, %v7530_v61 }
  0xbf   :  { %993 = vadd.xlane.f32.xlu0 %v668_v60  ;;  %v7631_v60 = vld [vmem:[%s12312_s3 + $0x130] sm:$0xff]  }
  0xc0   :  { %12889 = vst [vmem:[#allocation41_spill] sm:$0xff] %v7631_v60  ;;  %v12436_v21 = vunpack.c.h.bf16 %v7631_v60  ;;  %v12437_v36 = vunpack.c.l.bf16 %v7631_v60  ;;  %v12454_v60 = vunpack.c.h.bf16 %v7655_v40 }
  0xc1   :  { %v7613_v52 = vpop.xlane.xlu2 %913  ;;  %v7615_v14 = vpop.xlane.xlu1 %911 }
  0xc2   :  { %12888 = vst [vmem:[#allocation40_spill] sm:$0xff] %v7615_v14  ;;  %v7617_v20 = vpop.xlane.xlu0 %909  ;;  %v676_v34 = vmul.f32 %v12436_v21, %v7530_v61  ;;  %v12451_v21 = vunpack.c.l.bf16 %v7660_v48 }
  0xc6   :  { %1003 = vadd.xlane.f32.xlu2 %v673_v35  ;;  %1001 = vadd.xlane.f32.xlu1 %v672_v23  ;;  %v675_v35 = vmul.f32 %v12437_v36, %v7530_v61  ;;  %v557_v23 = vrot.slane %v7115_v0, 5 }
  0xc7   :  { %999 = vadd.xlane.f32.xlu0 %v671_v4  ;;  %v674_v4 = vmul.f32 %v12440_v9, %v7530_v61  ;;  %v12457_v9 = vunpack.c.l.bf16 %v7655_v40 }
  0xc8   :  { %v7663_v36 = vperm.slane %v557_v23, 0 }
  0xc9   :  { %v7636_v56 = vpop.xlane.xlu2 %919  ;;  %v7638_v32 = vpop.xlane.xlu1 %917  ;;  %v677_v23 = vmul.f32 %v12457_v9, %v7530_v61  ;;  %v7713_v9 = vld [vmem:[%s12312_s3 + $0x158] sm:$0xff]  }
  0xca   :  { %12890 = vst [vmem:[#allocation42_spill] sm:$0xff] %v7638_v32  ;;  %v7640_v43 = vpop.xlane.xlu0 %915 }
  0xcb   :  { %12891 = vst [vmem:[#allocation43_spill] sm:$0xff] %v7640_v43 }
  0xcc   :  { %12896 = vst [vmem:[#allocation48_spill] sm:$0xff] %v7713_v9 }
  0xce   :  { %1009 = vadd.xlane.f32.xlu2 %v676_v34  ;;  %1007 = vadd.xlane.f32.xlu1 %v675_v35  ;;  %v679_v34 = vmul.f32 %v12451_v21, %v7663_v36  ;;  %v678_v35 = vmul.f32 %v12454_v60, %v7530_v61  ;;  %v12462_v21 = vunpack.c.h.bf16 %v7660_v48 }
  0xcf   :  { %1005 = vadd.xlane.f32.xlu0 %v674_v4  ;;  %v7685_v4 = vld [vmem:[%s12312_s3 + $0x148] sm:$0xff]  }
  0xd0   :  { %12894 = vst [vmem:[#allocation46_spill] sm:$0xff] %v7685_v4  ;;  %v12458_v25 = vunpack.c.h.bf16 %v7685_v4  ;;  %v12459_v17 = vunpack.c.l.bf16 %v7685_v4 }
  0xd1   :  { %v7667_v19 = vpop.xlane.xlu2 %925  ;;  %v7669_v51 = vpop.xlane.xlu1 %923 }
  0xd2   :  { %v7671_v33 = vpop.xlane.xlu0 %921  ;;  %v682_v61 = vmul.f32 %v12458_v25, %v7663_v36  ;;  %v12473_v25 = vunpack.c.l.bf16 %v7713_v9 }
  0xd4   :  { %v685_v2 = vmul.f32 %v12473_v25, %v7663_v36  ;;  %v12486_v25 = vunpack.c.h.bf16 %v7713_v9 }
  0xd6   :  { %1015 = vadd.xlane.f32.xlu2 %v679_v34  ;;  %1013 = vadd.xlane.f32.xlu1 %v678_v35  ;;  %v681_v34 = vmul.f32 %v12459_v17, %v7663_v36  ;;  %v680_v35 = vmul.f32 %v12462_v21, %v7663_v36 }
  0xd7   :  { %1011 = vadd.xlane.f32.xlu0 %v677_v23  ;;  %v7708_v23 = vld [vmem:[%s12312_s3 + $0x150] sm:$0xff]  }
  0xd8   :  { %12895 = vst [vmem:[#allocation47_spill] sm:$0xff] %v7708_v23  ;;  %v12476_v17 = vunpack.c.h.bf16 %v7708_v23  ;;  %v12479_v4 = vunpack.c.l.bf16 %v7708_v23 }
  0xd9   :  { %v7690_v18 = vpop.xlane.xlu2 %931  ;;  %v7692_v60 = vpop.xlane.xlu1 %929 }
  0xda   :  { %v7694_v40 = vpop.xlane.xlu0 %927 }
  0xde   :  { %1021 = vadd.xlane.f32.xlu2 %v682_v61  ;;  %1019 = vadd.xlane.f32.xlu1 %v681_v34  ;;  %v684_v61 = vmul.f32 %v12476_v17, %v7663_v36  ;;  %v683_v34 = vmul.f32 %v12479_v4, %v7663_v36 }
  0xdf   :  { %1017 = vadd.xlane.f32.xlu0 %v680_v35  ;;  %v7736_v35 = vld [vmem:[%s12312_s3 + $0x160] sm:$0xff]  }
  0xe0   :  { %12897 = vst [vmem:[#allocation49_spill] sm:$0xff] %v7736_v35  ;;  %v12482_v6 = vunpack.c.h.bf16 %v7736_v35  ;;  %v12483_v54 = vunpack.c.l.bf16 %v7736_v35 }
  0xe1   :  { %v7718_v21 = vpop.xlane.xlu2 %937  ;;  %v7720_v48 = vpop.xlane.xlu1 %935 }
  0xe2   :  { %v7722_v1 = vpop.xlane.xlu0 %933  ;;  %v688_v4 = vmul.f32 %v12482_v6, %v7663_v36  ;;  %v12497_v6 = vunpack.c.l.bf16 %v7764_v39 }
  0xe4   :  { %v691_v63 = vmul.f32 %v12497_v6, %v7663_v36  ;;  %v12512_v6 = vunpack.c.h.bf16 %v7764_v39 }
  0xe6   :  { %1027 = vadd.xlane.f32.xlu2 %v685_v2  ;;  %1025 = vadd.xlane.f32.xlu1 %v684_v61  ;;  %v687_v2 = vmul.f32 %v12483_v54, %v7663_v36  ;;  %v686_v61 = vmul.f32 %v12486_v25, %v7663_v36 }
  0xe7   :  { %1023 = vadd.xlane.f32.xlu0 %v683_v34  ;;  %v7759_v34 = vld [vmem:[%s12312_s3 + $0x168] sm:$0xff]  }
  0xe8   :  { %12900 = vst [vmem:[#allocation52_spill] sm:$0xff] %v7759_v34  ;;  %v12500_v54 = vunpack.c.h.bf16 %v7759_v34  ;;  %v12503_v35 = vunpack.c.l.bf16 %v7759_v34 }
  0xe9   :  { %v7741_v31 = vpop.xlane.xlu2 %943  ;;  %v7743_v17 = vpop.xlane.xlu1 %941 }
  0xea   :  { %12898 = vst [vmem:[#allocation50_spill] sm:$0xff] %v7741_v31  ;;  %v7745_v23 = vpop.xlane.xlu0 %939 }
  0xeb   :  { %12899 = vst [vmem:[#allocation51_spill] sm:$0xff] %v7743_v17 }
  0xee   :  { %1033 = vadd.xlane.f32.xlu2 %v688_v4  ;;  %1031 = vadd.xlane.f32.xlu1 %v687_v2  ;;  %v690_v4 = vmul.f32 %v12500_v54, %v7663_v36  ;;  %v689_v2 = vmul.f32 %v12503_v35, %v7663_v36 }
  0xef   :  { %1029 = vadd.xlane.f32.xlu0 %v686_v61  ;;  %v7787_v61 = vld [vmem:[%s12312_s3 + $0x178] sm:$0xff]  }
  0xf0   :  { %12905 = vst [vmem:[#allocation57_spill] sm:$0xff] %v7787_v61  ;;  %v12508_v46 = vunpack.c.h.bf16 %v7787_v61  ;;  %v12509_v57 = vunpack.c.l.bf16 %v7787_v61  ;;  %v12516_v61 = vunpack.c.h.bf16 %v7811_v49 }
  0xf1   :  { %v7769_v25 = vpop.xlane.xlu2 %949  ;;  %v7771_v9 = vpop.xlane.xlu1 %947 }
  0xf2   :  { %12902 = vst [vmem:[#allocation54_spill] sm:$0xff] %v7769_v25  ;;  %v7773_v38 = vpop.xlane.xlu0 %945  ;;  %v694_v35 = vmul.f32 %v12508_v46, %v7663_v36 }
  0xf3   :  { %12903 = vst [vmem:[#allocation55_spill] sm:$0xff] %v7771_v9 }
  0xf4   :  { %12904 = vst [vmem:[#allocation56_spill] sm:$0xff] %v7773_v38 }
  0xf6   :  { %1039 = vadd.xlane.f32.xlu2 %v691_v63  ;;  %1037 = vadd.xlane.f32.xlu1 %v690_v4  ;;  %v693_v63 = vmul.f32 %v12509_v57, %v7663_v36  ;;  %v558_v4 = vrot.slane %v7115_v0, 6  ;;  %v12515_v57 = vunpack.c.l.bf16 %v7816_v41 }
  0xf7   :  { %1035 = vadd.xlane.f32.xlu0 %v689_v2  ;;  %v692_v2 = vmul.f32 %v12512_v6, %v7663_v36  ;;  %v12519_v36 = vunpack.c.l.bf16 %v7811_v49 }
  0xf8   :  { %v7818_v46 = vperm.slane %v558_v4, 0 }
  0xf9   :  { %v7792_v50 = vpop.xlane.xlu2 %955  ;;  %v7794_v54 = vpop.xlane.xlu1 %953 }
  0xfa   :  { %12906 = vst [vmem:[#allocation58_spill] sm:$0xff] %v7792_v50  ;;  %v7796_v34 = vpop.xlane.xlu0 %951  ;;  %v695_v4 = vmul.f32 %v12519_v36, %v7818_v46 }
  0xfe   :  { %1045 = vadd.xlane.f32.xlu2 %v694_v35  ;;  %1043 = vadd.xlane.f32.xlu1 %v693_v63  ;;  %v697_v35 = vmul.f32 %v12515_v57, %v7818_v46  ;;  %v696_v63 = vmul.f32 %v12516_v61, %v7818_v46  ;;  %v12524_v57 = vunpack.c.h.bf16 %v7816_v41 }
  0xff   :  { %1041 = vadd.xlane.f32.xlu0 %v692_v2  ;;  %v7841_v2 = vld [vmem:[%s12312_s3 + $0x190] sm:$0xff]  }
 0x100   :  { %12912 = vst [vmem:[#allocation64_spill] sm:$0xff] %v7841_v2  ;;  %v12520_v38 = vunpack.c.h.bf16 %v7841_v2  ;;  %v12521_v25 = vunpack.c.l.bf16 %v7841_v2 }
 0x101   :  { %v7823_v6 = vpop.xlane.xlu2 %961  ;;  %v7825_v39 = vpop.xlane.xlu1 %959 }
 0x102   :  { %12909 = vst [vmem:[#allocation61_spill] sm:$0xff] %v7823_v6  ;;  %v7827_v9 = vpop.xlane.xlu0 %957  ;;  %v700_v36 = vmul.f32 %v12520_v38, %v7818_v46 }
 0x103   :  { %12910 = vst [vmem:[#allocation62_spill] sm:$0xff] %v7825_v39 }
 0x104   :  { %12911 = vst [vmem:[#allocation63_spill] sm:$0xff] %v7827_v9 }
 0x106   :  { %1051 = vadd.xlane.f32.xlu2 %v697_v35  ;;  %1049 = vadd.xlane.f32.xlu1 %v696_v63  ;;  %v699_v35 = vmul.f32 %v12521_v25, %v7818_v46  ;;  %v698_v63 = vmul.f32 %v12524_v57, %v7818_v46 }
 0x107   :  { %1047 = vadd.xlane.f32.xlu0 %v695_v4  ;;  %v7864_v4 = vld [vmem:[%s12312_s3 + $0x198] sm:$0xff]  }
 0x108   :  { %12916 = vst [vmem:[#allocation68_spill] sm:$0xff] %v7864_v4  ;;  %v12528_v25 = vunpack.c.h.bf16 %v7864_v4  ;;  %v12531_v2 = vunpack.c.l.bf16 %v7864_v4 }
 0x109   :  { %v7846_v32 = vpop.xlane.xlu2 %967  ;;  %v7848_v61 = vpop.xlane.xlu1 %965 }
 0x10a   :  { %12913 = vst [vmem:[#allocation65_spill] sm:$0xff] %v7846_v32  ;;  %v7850_v49 = vpop.xlane.xlu0 %963  ;;  %v7869_v32 = vld [vmem:[%s12312_s3 + $0x1a0] sm:$0xff]  }
 0x10b   :  { %12914 = vst [vmem:[#allocation66_spill] sm:$0xff] %v7848_v61  ;;  %v12527_v38 = vunpack.c.l.bf16 %v7869_v32 }
 0x10c   :  { %12915 = vst [vmem:[#allocation67_spill] sm:$0xff] %v7850_v49 }
 0x10d   :  { %12917 = vst [vmem:[#allocation69_spill] sm:$0xff] %v7869_v32  ;;  %v703_v49 = vmul.f32 %v12527_v38, %v7818_v46  ;;  %v12536_v38 = vunpack.c.h.bf16 %v7869_v32 }
 0x10e   :  { %1057 = vadd.xlane.f32.xlu2 %v700_v36  ;;  %1055 = vadd.xlane.f32.xlu1 %v699_v35  ;;  %v702_v36 = vmul.f32 %v12528_v25, %v7818_v46  ;;  %v701_v35 = vmul.f32 %v12531_v2, %v7818_v46 }
 0x10f   :  { %1053 = vadd.xlane.f32.xlu0 %v698_v63  ;;  %v7892_v63 = vld [vmem:[%s12312_s3 + $0x1a8] sm:$0xff]  }
 0x110   :  { %12921 = vst [vmem:[#allocation73_spill] sm:$0xff] %v7892_v63 }
 0x111   :  { %v7874_v57 = vpop.xlane.xlu2 %973  ;;  %v7876_v41 = vpop.xlane.xlu1 %971 }
 0x112   :  { %12918 = vst [vmem:[#allocation70_spill] sm:$0xff] %v7874_v57  ;;  %v7878_v61 = vpop.xlane.xlu0 %969  ;;  %v12532_v57 = vunpack.c.h.bf16 %v7892_v63 }
 0x113   :  { %12919 = vst [vmem:[#allocation71_spill] sm:$0xff] %v7876_v41  ;;  %v12533_v41 = vunpack.c.l.bf16 %v7892_v63 }
 0x114   :  { %12920 = vst [vmem:[#allocation72_spill] sm:$0xff] %v7878_v61  ;;  %v706_v2 = vmul.f32 %v12532_v57, %v7818_v46 }
 0x116   :  { %1063 = vadd.xlane.f32.xlu2 %v703_v49  ;;  %1061 = vadd.xlane.f32.xlu1 %v702_v36  ;;  %v705_v49 = vmul.f32 %v12533_v41, %v7818_v46  ;;  %v704_v36 = vmul.f32 %v12536_v38, %v7818_v46 }
 0x117   :  { %1059 = vadd.xlane.f32.xlu0 %v701_v35  ;;  %v7915_v35 = vld [vmem:[%s12312_s3 + $0x1b0] sm:$0xff]  }
 0x118   :  { %12925 = vst [vmem:[#allocation77_spill] sm:$0xff] %v7915_v35  ;;  %v12540_v41 = vunpack.c.h.bf16 %v7915_v35  ;;  %v12543_v63 = vunpack.c.l.bf16 %v7915_v35 }
 0x119   :  { %v7897_v61 = vpop.xlane.xlu2 %979  ;;  %v7899_v25 = vpop.xlane.xlu1 %977 }
 0x11a   :  { %12922 = vst [vmem:[#allocation74_spill] sm:$0xff] %v7897_v61  ;;  %v7901_v4 = vpop.xlane.xlu0 %975  ;;  %v7920_v61 = vld [vmem:[%s12312_s3 + $0x1b8] sm:$0xff]  }
 0x11b   :  { %12923 = vst [vmem:[#allocation75_spill] sm:$0xff] %v7899_v25  ;;  %v12539_v57 = vunpack.c.l.bf16 %v7920_v61 }
 0x11c   :  { %12924 = vst [vmem:[#allocation76_spill] sm:$0xff] %v7901_v4 }
 0x11d   :  { %12926 = vst [vmem:[#allocation78_spill] sm:$0xff] %v7920_v61  ;;  %v709_v4 = vmul.f32 %v12539_v57, %v7818_v46 }
 0x11e   :  { %1069 = vadd.xlane.f32.xlu2 %v706_v2  ;;  %1067 = vadd.xlane.f32.xlu1 %v705_v49  ;;  %v708_v2 = vmul.f32 %v12540_v41, %v7818_v46  ;;  %v559_v49 = vrot.slane %v7115_v0, 7  ;;  %v12548_v0 = vunpack.c.h.bf16 %v7920_v61 }
 0x11f   :  { %1065 = vadd.xlane.f32.xlu0 %v704_v36  ;;  %v707_v36 = vmul.f32 %v12543_v63, %v7818_v46 }
 0x120   :  { %v7947_v57 = vperm.slane %v559_v49, 0  ;;  %v710_v49 = vmul.f32 %v12548_v0, %v7818_v46 }
 0x121   :  { %v7925_v38 = vpop.xlane.xlu2 %985  ;;  %v7927_v32 = vpop.xlane.xlu1 %983 }
 0x122   :  { %12927 = vst [vmem:[#allocation79_spill] sm:$0xff] %v7925_v38  ;;  %v7929_v25 = vpop.xlane.xlu0 %981 }
 0x123   :  { %12928 = vst [vmem:[#allocation80_spill] sm:$0xff] %v7927_v32  ;;  %v7944_v32 = vld [vmem:[%s12312_s3 + $0x1c0] sm:$0xff]  }
 0x124   :  { %12929 = vst [vmem:[#allocation81_spill] sm:$0xff] %v7929_v25  ;;  %v12544_v25 = vunpack.c.h.bf16 %v7944_v32  ;;  %v12545_v38 = vunpack.c.l.bf16 %v7944_v32 }
 0x125   :  { %12930 = vst [vmem:[#allocation82_spill] sm:$0xff] %v7944_v32 }
 0x126   :  { %1075 = vadd.xlane.f32.xlu2 %v709_v4  ;;  %1073 = vadd.xlane.f32.xlu1 %v708_v2  ;;  %v712_v4 = vmul.f32 %v12544_v25, %v7947_v57  ;;  %v711_v2 = vmul.f32 %v12545_v38, %v7947_v57 }
 0x127   :  { %1071 = vadd.xlane.f32.xlu0 %v707_v36  ;;  %v7969_v36 = vld [vmem:[%s12312_s3 + $0x1c8] sm:$0xff]  }
 0x128   :  { %12934 = vst [vmem:[#allocation86_spill] sm:$0xff] %v7969_v36  ;;  %v12552_v38 = vunpack.c.h.bf16 %v7969_v36  ;;  %v12555_v32 = vunpack.c.l.bf16 %v7969_v36 }
 0x129   :  { %v7951_v41 = vpop.xlane.xlu2 %991  ;;  %v7953_v35 = vpop.xlane.xlu1 %989 }
 0x12a   :  { %12931 = vst [vmem:[#allocation83_spill] sm:$0xff] %v7951_v41  ;;  %v7955_v63 = vpop.xlane.xlu0 %987  ;;  %v7974_v41 = vld [vmem:[%s12312_s3 + $0x1d0] sm:$0xff]  }
 0x12b   :  { %12932 = vst [vmem:[#allocation84_spill] sm:$0xff] %v7953_v35  ;;  %v12551_v25 = vunpack.c.l.bf16 %v7974_v41 }
 0x12c   :  { %12933 = vst [vmem:[#allocation85_spill] sm:$0xff] %v7955_v63 }
 0x12d   :  { %12935 = vst [vmem:[#allocation87_spill] sm:$0xff] %v7974_v41  ;;  %v715_v35 = vmul.f32 %v12551_v25, %v7947_v57  ;;  %v12560_v25 = vunpack.c.h.bf16 %v7974_v41 }
 0x12e   :  { %1081 = vadd.xlane.f32.xlu2 %v712_v4  ;;  %1079 = vadd.xlane.f32.xlu1 %v711_v2  ;;  %v714_v4 = vmul.f32 %v12552_v38, %v7947_v57  ;;  %v713_v2 = vmul.f32 %v12555_v32, %v7947_v57 }
 0x12f   :  { %1077 = vadd.xlane.f32.xlu0 %v710_v49  ;;  %v7997_v49 = vld [vmem:[%s12312_s3 + $0x1d8] sm:$0xff]  }
 0x130   :  { %12939 = vst [vmem:[#allocation91_spill] sm:$0xff] %v7997_v49 }
 0x131   :  { %v7979_v46 = vpop.xlane.xlu2 %997  ;;  %v7981_v0 = vpop.xlane.xlu1 %995 }
 0x132   :  { %12936 = vst [vmem:[#allocation88_spill] sm:$0xff] %v7979_v46  ;;  %v7983_v61 = vpop.xlane.xlu0 %993  ;;  %v12556_v46 = vunpack.c.h.bf16 %v7997_v49 }
 0x133   :  { %12937 = vst [vmem:[#allocation89_spill] sm:$0xff] %v7981_v0  ;;  %v12557_v0 = vunpack.c.l.bf16 %v7997_v49 }
 0x134   :  { %12938 = vst [vmem:[#allocation90_spill] sm:$0xff] %v7983_v61  ;;  %v718_v32 = vmul.f32 %v12556_v46, %v7947_v57 }
 0x136   :  { %1087 = vadd.xlane.f32.xlu2 %v715_v35  ;;  %1085 = vadd.xlane.f32.xlu1 %v714_v4  ;;  %v717_v35 = vmul.f32 %v12557_v0, %v7947_v57  ;;  %v716_v4 = vmul.f32 %v12560_v25, %v7947_v57 }
 0x137   :  { %1083 = vadd.xlane.f32.xlu0 %v713_v2  ;;  %v8020_v2 = vld [vmem:[%s12312_s3 + $0x1e0] sm:$0xff]  }
 0x138   :  { %12943 = vst [vmem:[#allocation95_spill] sm:$0xff] %v8020_v2  ;;  %v12564_v0 = vunpack.c.h.bf16 %v8020_v2  ;;  %v12567_v49 = vunpack.c.l.bf16 %v8020_v2 }
 0x139   :  { %v8002_v61 = vpop.xlane.xlu2 %1003  ;;  %v8004_v38 = vpop.xlane.xlu1 %1001 }
 0x13a   :  { %12940 = vst [vmem:[#allocation92_spill] sm:$0xff] %v8002_v61  ;;  %v8006_v36 = vpop.xlane.xlu0 %999  ;;  %v8025_v61 = vld [vmem:[%s12312_s3 + $0x1e8] sm:$0xff]  }
 0x13b   :  { %12941 = vst [vmem:[#allocation93_spill] sm:$0xff] %v8004_v38  ;;  %v12563_v46 = vunpack.c.l.bf16 %v8025_v61 }
 0x13c   :  { %12942 = vst [vmem:[#allocation94_spill] sm:$0xff] %v8006_v36 }
 0x13d   :  { %12944 = vst [vmem:[#allocation96_spill] sm:$0xff] %v8025_v61  ;;  %v721_v36 = vmul.f32 %v12563_v46, %v7947_v57  ;;  %v12570_v46 = vunpack.c.h.bf16 %v8025_v61 }
 0x13e   :  { %1093 = vadd.xlane.f32.xlu2 %v718_v32  ;;  %1091 = vadd.xlane.f32.xlu1 %v717_v35  ;;  %v720_v32 = vmul.f32 %v12564_v0, %v7947_v57  ;;  %v719_v35 = vmul.f32 %v12567_v49, %v7947_v57 }
 0x13f   :  { %1089 = vadd.xlane.f32.xlu0 %v716_v4  ;;  %v8048_v4 = vld [vmem:[%s12312_s3 + $0x1f0] sm:$0xff]  }
 0x140   :  { %12948 = vst [vmem:[#allocation100_spill] sm:$0xff] %v8048_v4 }
 0x141   :  { %v8030_v25 = vpop.xlane.xlu2 %1009  ;;  %v8032_v41 = vpop.xlane.xlu1 %1007 }
 0x142   :  { %12945 = vst [vmem:[#allocation97_spill] sm:$0xff] %v8030_v25  ;;  %v8034_v38 = vpop.xlane.xlu0 %1005 }
 0x143   :  { %12946 = vst [vmem:[#allocation98_spill] sm:$0xff] %v8032_v41  ;;  %v12569_v41 = vunpack.c.l.bf16 %v8048_v4 }
 0x144   :  { %12947 = vst [vmem:[#allocation99_spill] sm:$0xff] %v8034_v38  ;;  %v12568_v38 = vunpack.c.h.bf16 %v8048_v4 }
 0x146   :  { %1099 = vadd.xlane.f32.xlu2 %v721_v36  ;;  %1097 = vadd.xlane.f32.xlu1 %v720_v32  ;;  %v724_v49 = vmul.f32 %v12568_v38, %v7947_v57  ;;  %v723_v36 = vmul.f32 %v12569_v41, %v7947_v57  ;;  %v722_v32 = vmul.f32 %v12570_v46, %v7947_v57  ;;  %v8081_v38 = vld [vmem:[%s12312_s3 + $0x200] sm:$0xff]  }
 0x147   :  { %1095 = vadd.xlane.f32.xlu0 %v719_v35  ;;  %v8071_v35 = vld [vmem:[%s12312_s3 + $0x1f8] sm:$0xff]   ;;  %12953 = vst [vmem:[#allocation105_spill] sm:$0xff] %v8081_v38  ;;  %v12575_v41 = vunpack.c.l.bf16 %v8081_v38 }
 0x148   :  { %12952 = vst [vmem:[#allocation104_spill] sm:$0xff] %v8071_v35  ;;  %v12576_v4 = vunpack.c.h.bf16 %v8071_v35  ;;  %v12579_v61 = vunpack.c.l.bf16 %v8071_v35 }
 0x149   :  { %v8053_v25 = vpop.xlane.xlu2 %1015  ;;  %v8055_v0 = vpop.xlane.xlu1 %1013 }
 0x14a   :  { %12949 = vst [vmem:[#allocation101_spill] sm:$0xff] %v8053_v25  ;;  %v8057_v2 = vpop.xlane.xlu0 %1011 }
 0x14b   :  { %12950 = vst [vmem:[#allocation102_spill] sm:$0xff] %v8055_v0 }
 0x14c   :  { %12951 = vst [vmem:[#allocation103_spill] sm:$0xff] %v8057_v2  ;;  %v8076_v2 = vld [vmem:[%s12311_s1 + $0x8] sm:$0xff] }
 0x14d   :  { %v8085_v46 = vperm.slane %v8076_v2, 0 }
 0x14e   :  { %1105 = vadd.xlane.f32.xlu2 %v724_v49  ;;  %1103 = vadd.xlane.f32.xlu1 %v723_v36  ;;  %v726_v36 = vmul.f32 %v12576_v4, %v7947_v57 }
 0x14f   :  { %1101 = vadd.xlane.f32.xlu0 %v722_v32  ;;  %v727_v49 = vmul.f32 %v12575_v41, %v8085_v46  ;;  %v725_v32 = vmul.f32 %v12579_v61, %v7947_v57  ;;  %v12584_v41 = vunpack.c.h.bf16 %v8081_v38  ;;  %v8135_v61 = vld [vmem:[%s12312_s3 + $0x218] sm:$0xff]  }
 0x150   :  { %12962 = vst [vmem:[#allocation114_spill] sm:$0xff] %v8135_v61 }
 0x151   :  { %v8089_v0 = vpop.xlane.xlu2 %1021  ;;  %v8091_v25 = vpop.xlane.xlu1 %1019 }
 0x152   :  { %12954 = vst [vmem:[#allocation106_spill] sm:$0xff] %v8089_v0  ;;  %v8093_v63 = vpop.xlane.xlu0 %1017  ;;  %v8107_v0 = vld [vmem:[%s12312_s3 + $0x208] sm:$0xff]  }
 0x153   :  { %12955 = vst [vmem:[#allocation107_spill] sm:$0xff] %v8091_v25  ;;  %v12580_v25 = vunpack.c.h.bf16 %v8107_v0 }
 0x154   :  { %12956 = vst [vmem:[#allocation108_spill] sm:$0xff] %v8093_v63  ;;  %v12581_v63 = vunpack.c.l.bf16 %v8107_v0 }
 0x155   :  { %12957 = vst [vmem:[#allocation109_spill] sm:$0xff] %v8107_v0  ;;  %v730_v57 = vmul.f32 %v12580_v25, %v8085_v46  ;;  %v12587_v25 = vunpack.c.l.bf16 %v8135_v61 }
 0x156   :  { %1111 = vadd.xlane.f32.xlu2 %v727_v49  ;;  %1109 = vadd.xlane.f32.xlu1 %v726_v36  ;;  %v729_v49 = vmul.f32 %v12581_v63, %v8085_v46  ;;  %v728_v36 = vmul.f32 %v12584_v41, %v8085_v46 }
 0x157   :  { %1107 = vadd.xlane.f32.xlu0 %v725_v32  ;;  %v8130_v32 = vld [vmem:[%s12312_s3 + $0x210] sm:$0xff]  }
 0x158   :  { %12961 = vst [vmem:[#allocation113_spill] sm:$0xff] %v8130_v32  ;;  %v12588_v63 = vunpack.c.h.bf16 %v8130_v32  ;;  %v12591_v0 = vunpack.c.l.bf16 %v8130_v32 }
 0x159   :  { %v8112_v6 = vpop.xlane.xlu2 %1027  ;;  %v8114_v4 = vpop.xlane.xlu1 %1025 }
 0x15a   :  { %12958 = vst [vmem:[#allocation110_spill] sm:$0xff] %v8112_v6  ;;  %v8116_v35 = vpop.xlane.xlu0 %1023 }
 0x15b   :  { %12959 = vst [vmem:[#allocation111_spill] sm:$0xff] %v8114_v4  ;;  %v733_v4 = vmul.f32 %v12587_v25, %v8085_v46  ;;  %v12596_v25 = vunpack.c.h.bf16 %v8135_v61 }
 0x15c   :  { %12960 = vst [vmem:[#allocation112_spill] sm:$0xff] %v8116_v35 }
 0x15e   :  { %1117 = vadd.xlane.f32.xlu2 %v730_v57  ;;  %1115 = vadd.xlane.f32.xlu1 %v729_v49  ;;  %v732_v57 = vmul.f32 %v12588_v63, %v8085_v46  ;;  %v731_v49 = vmul.f32 %v12591_v0, %v8085_v46 }
 0x15f   :  { %1113 = vadd.xlane.f32.xlu0 %v728_v36  ;;  %v8158_v36 = vld [vmem:[%s12312_s3 + $0x220] sm:$0xff]  }
 0x160   :  { %12966 = vst [vmem:[#allocation118_spill] sm:$0xff] %v8158_v36 }
 0x161   :  { %v8140_v41 = vpop.xlane.xlu2 %1033  ;;  %v8142_v38 = vpop.xlane.xlu1 %1031 }
 0x162   :  { %12963 = vst [vmem:[#allocation115_spill] sm:$0xff] %v8140_v41  ;;  %v8144_v6 = vpop.xlane.xlu0 %1029  ;;  %v12592_v41 = vunpack.c.h.bf16 %v8158_v36 }
 0x163   :  { %12964 = vst [vmem:[#allocation116_spill] sm:$0xff] %v8142_v38  ;;  %v12593_v38 = vunpack.c.l.bf16 %v8158_v36 }
 0x164   :  { %12965 = vst [vmem:[#allocation117_spill] sm:$0xff] %v8144_v6  ;;  %v736_v0 = vmul.f32 %v12592_v41, %v8085_v46 }
 0x166   :  { %1123 = vadd.xlane.f32.xlu2 %v733_v4  ;;  %1121 = vadd.xlane.f32.xlu1 %v732_v57  ;;  %v735_v4 = vmul.f32 %v12593_v38, %v8085_v46  ;;  %v734_v57 = vmul.f32 %v12596_v25, %v8085_v46 }
 0x167   :  { %1119 = vadd.xlane.f32.xlu0 %v731_v49  ;;  %v8181_v49 = vld [vmem:[%s12312_s3 + $0x228] sm:$0xff]  }
 0x168   :  { %12970 = vst [vmem:[#allocation122_spill] sm:$0xff] %v8181_v49  ;;  %v12600_v38 = vunpack.c.h.bf16 %v8181_v49  ;;  %v12603_v36 = vunpack.c.l.bf16 %v8181_v49 }
 0x169   :  { %v8163_v6 = vpop.xlane.xlu2 %1039  ;;  %v8165_v63 = vpop.xlane.xlu1 %1037 }
 0x16a   :  { %12967 = vst [vmem:[#allocation119_spill] sm:$0xff] %v8163_v6  ;;  %v8167_v32 = vpop.xlane.xlu0 %1035  ;;  %v8186_v6 = vld [vmem:[%s12312_s3 + $0x230] sm:$0xff]  }
 0x16b   :  { %12968 = vst [vmem:[#allocation120_spill] sm:$0xff] %v8165_v63  ;;  %v12599_v41 = vunpack.c.l.bf16 %v8186_v6 }
 0x16c   :  { %12969 = vst [vmem:[#allocation121_spill] sm:$0xff] %v8167_v32 }
 0x16d   :  { %12971 = vst [vmem:[#allocation123_spill] sm:$0xff] %v8186_v6  ;;  %v739_v32 = vmul.f32 %v12599_v41, %v8085_v46  ;;  %v12608_v41 = vunpack.c.h.bf16 %v8186_v6 }
 0x16e   :  { %1129 = vadd.xlane.f32.xlu2 %v736_v0  ;;  %1127 = vadd.xlane.f32.xlu1 %v735_v4  ;;  %v738_v0 = vmul.f32 %v12600_v38, %v8085_v46  ;;  %v737_v4 = vmul.f32 %v12603_v36, %v8085_v46 }
 0x16f   :  { %1125 = vadd.xlane.f32.xlu0 %v734_v57  ;;  %v8209_v57 = vld [vmem:[%s12312_s3 + $0x238] sm:$0xff]  }
 0x170   :  { %12975 = vst [vmem:[#allocation127_spill] sm:$0xff] %v8209_v57 }
 0x171   :  { %v8191_v25 = vpop.xlane.xlu2 %1045  ;;  %v8193_v61 = vpop.xlane.xlu1 %1043 }
 0x172   :  { %12972 = vst [vmem:[#allocation124_spill] sm:$0xff] %v8191_v25  ;;  %v8195_v63 = vpop.xlane.xlu0 %1041  ;;  %v12604_v25 = vunpack.c.h.bf16 %v8209_v57 }
 0x173   :  { %12973 = vst [vmem:[#allocation125_spill] sm:$0xff] %v8193_v61  ;;  %v12605_v61 = vunpack.c.l.bf16 %v8209_v57 }
 0x174   :  { %12974 = vst [vmem:[#allocation126_spill] sm:$0xff] %v8195_v63  ;;  %v742_v36 = vmul.f32 %v12604_v25, %v8085_v46 }
 0x176   :  { %1135 = vadd.xlane.f32.xlu2 %v739_v32  ;;  %1133 = vadd.xlane.f32.xlu1 %v738_v0  ;;  %v741_v32 = vmul.f32 %v12605_v61, %v8085_v46  ;;  %v560_v0 = vrot.slane %v8076_v2, 1 }
 0x177   :  { %1131 = vadd.xlane.f32.xlu0 %v737_v4  ;;  %v740_v4 = vmul.f32 %v12608_v41, %v8085_v46 }
 0x178   :  { %v8240_v25 = vperm.slane %v560_v0, 0 }
 0x179   :  { %v8214_v63 = vpop.xlane.xlu2 %1051  ;;  %v8216_v38 = vpop.xlane.xlu1 %1049 }
 0x17a   :  { %12976 = vst [vmem:[#allocation128_spill] sm:$0xff] %v8214_v63  ;;  %v8218_v49 = vpop.xlane.xlu0 %1047  ;;  %v8233_v63 = vld [vmem:[%s12312_s3 + $0x240] sm:$0xff]  }
 0x17b   :  { %12977 = vst [vmem:[#allocation129_spill] sm:$0xff] %v8216_v38  ;;  %v8238_v38 = vld [vmem:[%s12312_s3 + $0x248] sm:$0xff]   ;;  %v12612_v57 = vunpack.c.h.bf16 %v8233_v63  ;;  %v12615_v46 = vunpack.c.l.bf16 %v8233_v63 }
 0x17c   :  { %12978 = vst [vmem:[#allocation130_spill] sm:$0xff] %v8218_v49  ;;  %v12611_v61 = vunpack.c.l.bf16 %v8238_v38 }
 0x17d   :  { %12979 = vst [vmem:[#allocation131_spill] sm:$0xff] %v8233_v63  ;;  %v743_v0 = vmul.f32 %v12615_v46, %v8240_v25 }
 0x17e   :  { %12980 = vst [vmem:[#allocation132_spill] sm:$0xff] %v8238_v38  ;;  %1141 = vadd.xlane.f32.xlu2 %v742_v36  ;;  %1139 = vadd.xlane.f32.xlu1 %v741_v32  ;;  %v745_v36 = vmul.f32 %v12611_v61, %v8240_v25  ;;  %v744_v32 = vmul.f32 %v12612_v57, %v8240_v25  ;;  %v12620_v61 = vunpack.c.h.bf16 %v8238_v38 }
 0x17f   :  { %1137 = vadd.xlane.f32.xlu0 %v740_v4  ;;  %v8263_v4 = vld [vmem:[%s12312_s3 + $0x250] sm:$0xff]  }
 0x180   :  { %12984 = vst [vmem:[#allocation136_spill] sm:$0xff] %v8263_v4 }
 0x181   :  { %v8245_v41 = vpop.xlane.xlu2 %1057  ;;  %v8247_v6 = vpop.xlane.xlu1 %1055 }
 0x182   :  { %12981 = vst [vmem:[#allocation133_spill] sm:$0xff] %v8245_v41  ;;  %v8249_v49 = vpop.xlane.xlu0 %1053  ;;  %v12616_v41 = vunpack.c.h.bf16 %v8263_v4 }
 0x183   :  { %12982 = vst [vmem:[#allocation134_spill] sm:$0xff] %v8247_v6  ;;  %v12617_v6 = vunpack.c.l.bf16 %v8263_v4 }
 0x184   :  { %12983 = vst [vmem:[#allocation135_spill] sm:$0xff] %v8249_v49  ;;  %v748_v46 = vmul.f32 %v12616_v41, %v8240_v25 }
 0x186   :  { %1147 = vadd.xlane.f32.xlu2 %v745_v36  ;;  %1145 = vadd.xlane.f32.xlu1 %v744_v32  ;;  %v747_v36 = vmul.f32 %v12617_v6, %v8240_v25  ;;  %v746_v32 = vmul.f32 %v12620_v61, %v8240_v25 }
 0x187   :  { %1143 = vadd.xlane.f32.xlu0 %v743_v0  ;;  %v8286_v0 = vld [vmem:[%s12312_s3 + $0x258] sm:$0xff]  }
 0x188   :  { %12988 = vst [vmem:[#allocation140_spill] sm:$0xff] %v8286_v0  ;;  %v12624_v6 = vunpack.c.h.bf16 %v8286_v0  ;;  %v12627_v4 = vunpack.c.l.bf16 %v8286_v0 }
 0x189   :  { %v8268_v49 = vpop.xlane.xlu2 %1063  ;;  %v8270_v57 = vpop.xlane.xlu1 %1061 }
 0x18a   :  { %12985 = vst [vmem:[#allocation137_spill] sm:$0xff] %v8268_v49  ;;  %v8272_v63 = vpop.xlane.xlu0 %1059  ;;  %v8291_v49 = vld [vmem:[%s12312_s3 + $0x260] sm:$0xff]  }
 0x18b   :  { %12986 = vst [vmem:[#allocation138_spill] sm:$0xff] %v8270_v57  ;;  %v12623_v41 = vunpack.c.l.bf16 %v8291_v49 }
 0x18c   :  { %12987 = vst [vmem:[#allocation139_spill] sm:$0xff] %v8272_v63 }
 0x18d   :  { %12989 = vst [vmem:[#allocation141_spill] sm:$0xff] %v8291_v49  ;;  %v751_v63 = vmul.f32 %v12623_v41, %v8240_v25  ;;  %v12632_v41 = vunpack.c.h.bf16 %v8291_v49 }
 0x18e   :  { %1153 = vadd.xlane.f32.xlu2 %v748_v46  ;;  %1151 = vadd.xlane.f32.xlu1 %v747_v36  ;;  %v750_v46 = vmul.f32 %v12624_v6, %v8240_v25  ;;  %v749_v36 = vmul.f32 %v12627_v4, %v8240_v25 }
 0x18f   :  { %1149 = vadd.xlane.f32.xlu0 %v746_v32  ;;  %v8314_v32 = vld [vmem:[%s12312_s3 + $0x268] sm:$0xff]  }
 0x190   :  { %12993 = vst [vmem:[#allocation145_spill] sm:$0xff] %v8314_v32 }
 0x191   :  { %v8296_v61 = vpop.xlane.xlu2 %1069  ;;  %v8298_v38 = vpop.xlane.xlu1 %1067 }
 0x192   :  { %12990 = vst [vmem:[#allocation142_spill] sm:$0xff] %v8296_v61  ;;  %v8300_v57 = vpop.xlane.xlu0 %1065  ;;  %v12628_v61 = vunpack.c.h.bf16 %v8314_v32 }
 0x193   :  { %12991 = vst [vmem:[#allocation143_spill] sm:$0xff] %v8298_v38  ;;  %v12629_v38 = vunpack.c.l.bf16 %v8314_v32 }
 0x194   :  { %12992 = vst [vmem:[#allocation144_spill] sm:$0xff] %v8300_v57  ;;  %v754_v4 = vmul.f32 %v12628_v61, %v8240_v25 }
 0x196   :  { %1159 = vadd.xlane.f32.xlu2 %v751_v63  ;;  %1157 = vadd.xlane.f32.xlu1 %v750_v46  ;;  %v753_v63 = vmul.f32 %v12629_v38, %v8240_v25  ;;  %v752_v46 = vmul.f32 %v12632_v41, %v8240_v25 }
 0x197   :  { %1155 = vadd.xlane.f32.xlu0 %v749_v36  ;;  %v8337_v36 = vld [vmem:[%s12312_s3 + $0x270] sm:$0xff]  }
 0x198   :  { %12997 = vst [vmem:[#allocation149_spill] sm:$0xff] %v8337_v36  ;;  %v12636_v38 = vunpack.c.h.bf16 %v8337_v36  ;;  %v12639_v32 = vunpack.c.l.bf16 %v8337_v36 }
 0x199   :  { %v8319_v57 = vpop.xlane.xlu2 %1075  ;;  %v8321_v6 = vpop.xlane.xlu1 %1073 }
 0x19a   :  { %12994 = vst [vmem:[#allocation146_spill] sm:$0xff] %v8319_v57  ;;  %v8323_v0 = vpop.xlane.xlu0 %1071  ;;  %v8342_v57 = vld [vmem:[%s12312_s3 + $0x278] sm:$0xff]  }
 0x19b   :  { %12995 = vst [vmem:[#allocation147_spill] sm:$0xff] %v8321_v6  ;;  %v12635_v61 = vunpack.c.l.bf16 %v8342_v57 }
 0x19c   :  { %12996 = vst [vmem:[#allocation148_spill] sm:$0xff] %v8323_v0 }
 0x19d   :  { %12998 = vst [vmem:[#allocation150_spill] sm:$0xff] %v8342_v57  ;;  %v757_v0 = vmul.f32 %v12635_v61, %v8240_v25 }
 0x19e   :  { %1165 = vadd.xlane.f32.xlu2 %v754_v4  ;;  %1163 = vadd.xlane.f32.xlu1 %v753_v63  ;;  %v756_v4 = vmul.f32 %v12636_v38, %v8240_v25  ;;  %v561_v63 = vrot.slane %v8076_v2, 2  ;;  %v12644_v38 = vunpack.c.h.bf16 %v8342_v57 }
 0x19f   :  { %1161 = vadd.xlane.f32.xlu0 %v752_v46  ;;  %v755_v46 = vmul.f32 %v12639_v32, %v8240_v25 }
 0x1a0   :  { %v8369_v61 = vperm.slane %v561_v63, 0  ;;  %v758_v63 = vmul.f32 %v12644_v38, %v8240_v25 }
 0x1a1   :  { %v8347_v41 = vpop.xlane.xlu2 %1081  ;;  %v8349_v49 = vpop.xlane.xlu1 %1079 }
 0x1a2   :  { %12999 = vst [vmem:[#allocation151_spill] sm:$0xff] %v8347_v41  ;;  %v8351_v6 = vpop.xlane.xlu0 %1077 }
 0x1a3   :  { %13000 = vst [vmem:[#allocation152_spill] sm:$0xff] %v8349_v49  ;;  %v8366_v49 = vld [vmem:[%s12312_s3 + $0x280] sm:$0xff]  }
 0x1a4   :  { %13001 = vst [vmem:[#allocation153_spill] sm:$0xff] %v8351_v6  ;;  %v12640_v6 = vunpack.c.h.bf16 %v8366_v49  ;;  %v12641_v41 = vunpack.c.l.bf16 %v8366_v49 }
 0x1a5   :  { %13002 = vst [vmem:[#allocation154_spill] sm:$0xff] %v8366_v49 }
 0x1a6   :  { %1171 = vadd.xlane.f32.xlu2 %v757_v0  ;;  %1169 = vadd.xlane.f32.xlu1 %v756_v4  ;;  %v760_v0 = vmul.f32 %v12640_v6, %v8369_v61  ;;  %v759_v4 = vmul.f32 %v12641_v41, %v8369_v61 }
 0x1a7   :  { %1167 = vadd.xlane.f32.xlu0 %v755_v46  ;;  %v8391_v46 = vld [vmem:[%s12312_s3 + $0x288] sm:$0xff]  }
 0x1a8   :  { %13006 = vst [vmem:[#allocation158_spill] sm:$0xff] %v8391_v46  ;;  %v12648_v41 = vunpack.c.h.bf16 %v8391_v46  ;;  %v12651_v49 = vunpack.c.l.bf16 %v8391_v46 }
 0x1a9   :  { %v8373_v35 = vpop.xlane.xlu2 %1087  ;;  %v8375_v36 = vpop.xlane.xlu1 %1085 }
 0x1aa   :  { %13003 = vst [vmem:[#allocation155_spill] sm:$0xff] %v8373_v35  ;;  %v8377_v32 = vpop.xlane.xlu0 %1083  ;;  %v8396_v35 = vld [vmem:[%s12312_s3 + $0x290] sm:$0xff]  }
 0x1ab   :  { %13004 = vst [vmem:[#allocation156_spill] sm:$0xff] %v8375_v36  ;;  %v12647_v6 = vunpack.c.l.bf16 %v8396_v35 }
 0x1ac   :  { %13005 = vst [vmem:[#allocation157_spill] sm:$0xff] %v8377_v32 }
 0x1ad   :  { %13007 = vst [vmem:[#allocation159_spill] sm:$0xff] %v8396_v35  ;;  %v763_v36 = vmul.f32 %v12647_v6, %v8369_v61  ;;  %v12656_v6 = vunpack.c.h.bf16 %v8396_v35 }
 0x1ae   :  { %1177 = vadd.xlane.f32.xlu2 %v760_v0  ;;  %1175 = vadd.xlane.f32.xlu1 %v759_v4  ;;  %v762_v0 = vmul.f32 %v12648_v41, %v8369_v61  ;;  %v761_v4 = vmul.f32 %v12651_v49, %v8369_v61 }
 0x1af   :  { %1173 = vadd.xlane.f32.xlu0 %v758_v63  ;;  %v8419_v63 = vld [vmem:[%s12312_s3 + $0x298] sm:$0xff]  }
 0x1b0   :  { %13011 = vst [vmem:[#allocation163_spill] sm:$0xff] %v8419_v63 }
 0x1b1   :  { %v8401_v25 = vpop.xlane.xlu2 %1093  ;;  %v8403_v38 = vpop.xlane.xlu1 %1091 }
 0x1b2   :  { %13008 = vst [vmem:[#allocation160_spill] sm:$0xff] %v8401_v25  ;;  %v8405_v57 = vpop.xlane.xlu0 %1089  ;;  %v12652_v25 = vunpack.c.h.bf16 %v8419_v63 }
 0x1b3   :  { %13009 = vst [vmem:[#allocation161_spill] sm:$0xff] %v8403_v38  ;;  %v12653_v38 = vunpack.c.l.bf16 %v8419_v63 }
 0x1b4   :  { %13010 = vst [vmem:[#allocation162_spill] sm:$0xff] %v8405_v57  ;;  %v766_v49 = vmul.f32 %v12652_v25, %v8369_v61 }
 0x1b6   :  { %1183 = vadd.xlane.f32.xlu2 %v763_v36  ;;  %1181 = vadd.xlane.f32.xlu1 %v762_v0  ;;  %v765_v36 = vmul.f32 %v12653_v38, %v8369_v61  ;;  %v764_v0 = vmul.f32 %v12656_v6, %v8369_v61 }
 0x1b7   :  { %1179 = vadd.xlane.f32.xlu0 %v761_v4  ;;  %v8442_v4 = vld [vmem:[%s12312_s3 + $0x2a0] sm:$0xff]  }
 0x1b8   :  { %13015 = vst [vmem:[#allocation167_spill] sm:$0xff] %v8442_v4  ;;  %v12660_v38 = vunpack.c.h.bf16 %v8442_v4  ;;  %v12663_v63 = vunpack.c.l.bf16 %v8442_v4 }
 0x1b9   :  { %v8424_v57 = vpop.xlane.xlu2 %1099  ;;  %v8426_v41 = vpop.xlane.xlu1 %1097 }
 0x1ba   :  { %13012 = vst [vmem:[#allocation164_spill] sm:$0xff] %v8424_v57  ;;  %v8428_v46 = vpop.xlane.xlu0 %1095  ;;  %v8447_v57 = vld [vmem:[%s12312_s3 + $0x2a8] sm:$0xff]  }
 0x1bb   :  { %13013 = vst [vmem:[#allocation165_spill] sm:$0xff] %v8426_v41  ;;  %v12659_v25 = vunpack.c.l.bf16 %v8447_v57 }
 0x1bc   :  { %13014 = vst [vmem:[#allocation166_spill] sm:$0xff] %v8428_v46 }
 0x1bd   :  { %13016 = vst [vmem:[#allocation168_spill] sm:$0xff] %v8447_v57  ;;  %v769_v46 = vmul.f32 %v12659_v25, %v8369_v61  ;;  %v12668_v25 = vunpack.c.h.bf16 %v8447_v57 }
 0x1be   :  { %1189 = vadd.xlane.f32.xlu2 %v766_v49  ;;  %1187 = vadd.xlane.f32.xlu1 %v765_v36  ;;  %v768_v49 = vmul.f32 %v12660_v38, %v8369_v61  ;;  %v767_v36 = vmul.f32 %v12663_v63, %v8369_v61 }
 0x1bf   :  { %1185 = vadd.xlane.f32.xlu0 %v764_v0  ;;  %v8470_v0 = vld [vmem:[%s12312_s3 + $0x2b0] sm:$0xff]  }
 0x1c0   :  { %13020 = vst [vmem:[#allocation172_spill] sm:$0xff] %v8470_v0 }
 0x1c1   :  { %v8452_v6 = vpop.xlane.xlu2 %1105  ;;  %v8454_v35 = vpop.xlane.xlu1 %1103 }
 0x1c2   :  { %13017 = vst [vmem:[#allocation169_spill] sm:$0xff] %v8452_v6  ;;  %v8456_v41 = vpop.xlane.xlu0 %1101  ;;  %v12664_v6 = vunpack.c.h.bf16 %v8470_v0 }
 0x1c3   :  { %13018 = vst [vmem:[#allocation170_spill] sm:$0xff] %v8454_v35  ;;  %v12665_v35 = vunpack.c.l.bf16 %v8470_v0 }
 0x1c4   :  { %13019 = vst [vmem:[#allocation171_spill] sm:$0xff] %v8456_v41  ;;  %v772_v63 = vmul.f32 %v12664_v6, %v8369_v61 }
 0x1c6   :  { %1195 = vadd.xlane.f32.xlu2 %v769_v46  ;;  %1193 = vadd.xlane.f32.xlu1 %v768_v49  ;;  %v771_v46 = vmul.f32 %v12665_v35, %v8369_v61  ;;  %v562_v49 = vrot.slane %v8076_v2, 3 }
 0x1c7   :  { %1191 = vadd.xlane.f32.xlu0 %v767_v36  ;;  %v770_v36 = vmul.f32 %v12668_v25, %v8369_v61 }
 0x1c8   :  { %v8502_v35 = vperm.slane %v562_v49, 0 }
 0x1c9   :  { %v8475_v41 = vpop.xlane.xlu2 %1111  ;;  %v8477_v38 = vpop.xlane.xlu1 %1109 }
 0x1ca   :  { %13021 = vst [vmem:[#allocation173_spill] sm:$0xff] %v8475_v41  ;;  %v8479_v4 = vpop.xlane.xlu0 %1107  ;;  %v8494_v41 = vld [vmem:[%s12312_s3 + $0x2b8] sm:$0xff]  }
 0x1cb   :  { %13022 = vst [vmem:[#allocation174_spill] sm:$0xff] %v8477_v38  ;;  %v8499_v38 = vld [vmem:[%s12312_s3 + $0x2c0] sm:$0xff]   ;;  %v12672_v0 = vunpack.c.h.bf16 %v8494_v41  ;;  %v12675_v25 = vunpack.c.l.bf16 %v8494_v41 }
 0x1cc   :  { %13023 = vst [vmem:[#allocation175_spill] sm:$0xff] %v8479_v4  ;;  %v12671_v6 = vunpack.c.l.bf16 %v8499_v38 }
 0x1cd   :  { %13024 = vst [vmem:[#allocation176_spill] sm:$0xff] %v8494_v41  ;;  %v773_v49 = vmul.f32 %v12675_v25, %v8369_v61  ;;  %v8552_v25 = vld [vmem:[%s12312_s3 + $0x2d8] sm:$0xff]  }
 0x1ce   :  { %13025 = vst [vmem:[#allocation177_spill] sm:$0xff] %v8499_v38  ;;  %1201 = vadd.xlane.f32.xlu2 %v772_v63  ;;  %1199 = vadd.xlane.f32.xlu1 %v771_v46  ;;  %v775_v63 = vmul.f32 %v12671_v6, %v8502_v35  ;;  %v774_v46 = vmul.f32 %v12672_v0, %v8369_v61  ;;  %v12680_v6 = vunpack.c.h.bf16 %v8499_v38 }
 0x1cf   :  { %1197 = vadd.xlane.f32.xlu0 %v770_v36  ;;  %v8524_v36 = vld [vmem:[%s12312_s3 + $0x2c8] sm:$0xff]   ;;  %13034 = vst [vmem:[#allocation186_spill] sm:$0xff] %v8552_v25 }
 0x1d0   :  { %13029 = vst [vmem:[#allocation181_spill] sm:$0xff] %v8524_v36 }
 0x1d1   :  { %v8506_v57 = vpop.xlane.xlu2 %1117  ;;  %v8508_v4 = vpop.xlane.xlu1 %1115 }
 0x1d2   :  { %13026 = vst [vmem:[#allocation178_spill] sm:$0xff] %v8506_v57  ;;  %v8510_v32 = vpop.xlane.xlu0 %1113  ;;  %v12676_v57 = vunpack.c.h.bf16 %v8524_v36 }
 0x1d3   :  { %13027 = vst [vmem:[#allocation179_spill] sm:$0xff] %v8508_v4  ;;  %v12677_v4 = vunpack.c.l.bf16 %v8524_v36 }
 0x1d4   :  { %13028 = vst [vmem:[#allocation180_spill] sm:$0xff] %v8510_v32  ;;  %v778_v61 = vmul.f32 %v12676_v57, %v8502_v35  ;;  %v12683_v57 = vunpack.c.l.bf16 %v8552_v25 }
 0x1d6   :  { %1207 = vadd.xlane.f32.xlu2 %v775_v63  ;;  %1205 = vadd.xlane.f32.xlu1 %v774_v46  ;;  %v777_v63 = vmul.f32 %v12677_v4, %v8502_v35  ;;  %v776_v46 = vmul.f32 %v12680_v6, %v8502_v35 }
 0x1d7   :  { %1203 = vadd.xlane.f32.xlu0 %v773_v49  ;;  %v8547_v49 = vld [vmem:[%s12312_s3 + $0x2d0] sm:$0xff]  }
 0x1d8   :  { %13033 = vst [vmem:[#allocation185_spill] sm:$0xff] %v8547_v49  ;;  %v12684_v4 = vunpack.c.h.bf16 %v8547_v49  ;;  %v12687_v36 = vunpack.c.l.bf16 %v8547_v49 }
 0x1d9   :  { %v8529_v32 = vpop.xlane.xlu2 %1123  ;;  %v8531_v0 = vpop.xlane.xlu1 %1121 }
 0x1da   :  { %13030 = vst [vmem:[#allocation182_spill] sm:$0xff] %v8529_v32  ;;  %v8533_v41 = vpop.xlane.xlu0 %1119 }
 0x1db   :  { %13031 = vst [vmem:[#allocation183_spill] sm:$0xff] %v8531_v0  ;;  %v781_v0 = vmul.f32 %v12683_v57, %v8502_v35  ;;  %v12692_v57 = vunpack.c.h.bf16 %v8552_v25 }
 0x1dc   :  { %13032 = vst [vmem:[#allocation184_spill] sm:$0xff] %v8533_v41 }
 0x1de   :  { %1213 = vadd.xlane.f32.xlu2 %v778_v61  ;;  %1211 = vadd.xlane.f32.xlu1 %v777_v63  ;;  %v780_v61 = vmul.f32 %v12684_v4, %v8502_v35  ;;  %v779_v63 = vmul.f32 %v12687_v36, %v8502_v35 }
 0x1df   :  { %1209 = vadd.xlane.f32.xlu0 %v776_v46  ;;  %v8575_v46 = vld [vmem:[%s12312_s3 + $0x2e0] sm:$0xff]  }
 0x1e0   :  { %13038 = vst [vmem:[#allocation190_spill] sm:$0xff] %v8575_v46 }
 0x1e1   :  { %v8557_v6 = vpop.xlane.xlu2 %1129  ;;  %v8559_v38 = vpop.xlane.xlu1 %1127 }
 0x1e2   :  { %13035 = vst [vmem:[#allocation187_spill] sm:$0xff] %v8557_v6  ;;  %v8561_v32 = vpop.xlane.xlu0 %1125  ;;  %v12688_v6 = vunpack.c.h.bf16 %v8575_v46 }
 0x1e3   :  { %13036 = vst [vmem:[#allocation188_spill] sm:$0xff] %v8559_v38  ;;  %v12689_v38 = vunpack.c.l.bf16 %v8575_v46 }
 0x1e4   :  { %13037 = vst [vmem:[#allocation189_spill] sm:$0xff] %v8561_v32  ;;  %v784_v36 = vmul.f32 %v12688_v6, %v8502_v35 }
 0x1e6   :  { %1219 = vadd.xlane.f32.xlu2 %v781_v0  ;;  %1217 = vadd.xlane.f32.xlu1 %v780_v61  ;;  %v783_v0 = vmul.f32 %v12689_v38, %v8502_v35  ;;  %v782_v61 = vmul.f32 %v12692_v57, %v8502_v35 }
 0x1e7   :  { %1215 = vadd.xlane.f32.xlu0 %v779_v63  ;;  %v8598_v63 = vld [vmem:[%s12312_s3 + $0x2e8] sm:$0xff]  }
 0x1e8   :  { %13042 = vst [vmem:[#allocation194_spill] sm:$0xff] %v8598_v63  ;;  %v12696_v38 = vunpack.c.h.bf16 %v8598_v63  ;;  %v12699_v46 = vunpack.c.l.bf16 %v8598_v63 }
 0x1e9   :  { %v8580_v32 = vpop.xlane.xlu2 %1135  ;;  %v8582_v4 = vpop.xlane.xlu1 %1133 }
 0x1ea   :  { %13039 = vst [vmem:[#allocation191_spill] sm:$0xff] %v8580_v32  ;;  %v8584_v49 = vpop.xlane.xlu0 %1131  ;;  %v8603_v32 = vld [vmem:[%s12312_s3 + $0x2f0] sm:$0xff]  }
 0x1eb   :  { %13040 = vst [vmem:[#allocation192_spill] sm:$0xff] %v8582_v4  ;;  %v12695_v6 = vunpack.c.l.bf16 %v8603_v32 }
 0x1ec   :  { %13041 = vst [vmem:[#allocation193_spill] sm:$0xff] %v8584_v49 }
 0x1ed   :  { %13043 = vst [vmem:[#allocation195_spill] sm:$0xff] %v8603_v32  ;;  %v787_v49 = vmul.f32 %v12695_v6, %v8502_v35  ;;  %v12704_v6 = vunpack.c.h.bf16 %v8603_v32 }
 0x1ee   :  { %1225 = vadd.xlane.f32.xlu2 %v784_v36  ;;  %1223 = vadd.xlane.f32.xlu1 %v783_v0  ;;  %v786_v36 = vmul.f32 %v12696_v38, %v8502_v35  ;;  %v785_v0 = vmul.f32 %v12699_v46, %v8502_v35 }
 0x1ef   :  { %1221 = vadd.xlane.f32.xlu0 %v782_v61  ;;  %v8626_v61 = vld [vmem:[%s12312_s3 + $0x2f8] sm:$0xff]  }
 0x1f0   :  { %13047 = vst [vmem:[#allocation199_spill] sm:$0xff] %v8626_v61 }
 0x1f1   :  { %v8608_v57 = vpop.xlane.xlu2 %1141  ;;  %v8610_v25 = vpop.xlane.xlu1 %1139 }
 0x1f2   :  { %13044 = vst [vmem:[#allocation196_spill] sm:$0xff] %v8608_v57  ;;  %v8612_v4 = vpop.xlane.xlu0 %1137  ;;  %v12701_v57 = vunpack.c.l.bf16 %v8626_v61 }
 0x1f3   :  { %13045 = vst [vmem:[#allocation197_spill] sm:$0xff] %v8610_v25  ;;  %v12700_v25 = vunpack.c.h.bf16 %v8626_v61 }
 0x1f4   :  { %13046 = vst [vmem:[#allocation198_spill] sm:$0xff] %v8612_v4 }
 0x1f5   :  { %v790_v46 = vmul.f32 %v12700_v25, %v8502_v35 }
 0x1f6   :  { %1231 = vadd.xlane.f32.xlu2 %v787_v49  ;;  %1229 = vadd.xlane.f32.xlu1 %v786_v36  ;;  %v789_v49 = vmul.f32 %v12701_v57, %v8502_v35  ;;  %v563_v36 = vrot.slane %v8076_v2, 4 }
 0x1f7   :  { %1227 = vadd.xlane.f32.xlu0 %v785_v0  ;;  %v788_v0 = vmul.f32 %v12704_v6, %v8502_v35 }
 0x1f8   :  { %v8657_v25 = vperm.slane %v563_v36, 0 }
 0x1f9   :  { %v8631_v4 = vpop.xlane.xlu2 %1147  ;;  %v8633_v38 = vpop.xlane.xlu1 %1145 }
 0x1fa   :  { %13048 = vst [vmem:[#allocation200_spill] sm:$0xff] %v8631_v4  ;;  %v8635_v63 = vpop.xlane.xlu0 %1143  ;;  %v8650_v4 = vld [vmem:[%s12312_s3 + $0x300] sm:$0xff]  }
 0x1fb   :  { %13049 = vst [vmem:[#allocation201_spill] sm:$0xff] %v8633_v38  ;;  %v8655_v38 = vld [vmem:[%s12312_s3 + $0x308] sm:$0xff]   ;;  %v12708_v61 = vunpack.c.h.bf16 %v8650_v4  ;;  %v12711_v35 = vunpack.c.l.bf16 %v8650_v4 }
 0x1fc   :  { %13050 = vst [vmem:[#allocation202_spill] sm:$0xff] %v8635_v63  ;;  %v12707_v57 = vunpack.c.l.bf16 %v8655_v38 }
 0x1fd   :  { %13051 = vst [vmem:[#allocation203_spill] sm:$0xff] %v8650_v4  ;;  %v791_v36 = vmul.f32 %v12711_v35, %v8657_v25 }
 0x1fe   :  { %13052 = vst [vmem:[#allocation204_spill] sm:$0xff] %v8655_v38  ;;  %1237 = vadd.xlane.f32.xlu2 %v790_v46  ;;  %1235 = vadd.xlane.f32.xlu1 %v789_v49  ;;  %v793_v46 = vmul.f32 %v12707_v57, %v8657_v25  ;;  %v792_v49 = vmul.f32 %v12708_v61, %v8657_v25  ;;  %v12716_v57 = vunpack.c.h.bf16 %v8655_v38 }
 0x1ff   :  { %1233 = vadd.xlane.f32.xlu0 %v788_v0  ;;  %v8680_v0 = vld [vmem:[%s12312_s3 + $0x310] sm:$0xff]  }
 0x200   :  { %13056 = vst [vmem:[#allocation208_spill] sm:$0xff] %v8680_v0 }
 0x201   :  { %v8662_v6 = vpop.xlane.xlu2 %1153  ;;  %v8664_v32 = vpop.xlane.xlu1 %1151 }
 0x202   :  { %13053 = vst [vmem:[#allocation205_spill] sm:$0xff] %v8662_v6  ;;  %v8666_v63 = vpop.xlane.xlu0 %1149  ;;  %v12712_v6 = vunpack.c.h.bf16 %v8680_v0 }
 0x203   :  { %13054 = vst [vmem:[#allocation206_spill] sm:$0xff] %v8664_v32  ;;  %v12713_v32 = vunpack.c.l.bf16 %v8680_v0 }
 0x204   :  { %13055 = vst [vmem:[#allocation207_spill] sm:$0xff] %v8666_v63  ;;  %v796_v35 = vmul.f32 %v12712_v6, %v8657_v25 }
 0x206   :  { %1243 = vadd.xlane.f32.xlu2 %v793_v46  ;;  %1241 = vadd.xlane.f32.xlu1 %v792_v49  ;;  %v795_v46 = vmul.f32 %v12713_v32, %v8657_v25  ;;  %v794_v49 = vmul.f32 %v12716_v57, %v8657_v25 }
 0x207   :  { %1239 = vadd.xlane.f32.xlu0 %v791_v36  ;;  %v8703_v36 = vld [vmem:[%s12312_s3 + $0x318] sm:$0xff]  }
 0x208   :  { %13060 = vst [vmem:[#allocation212_spill] sm:$0xff] %v8703_v36  ;;  %v12720_v32 = vunpack.c.h.bf16 %v8703_v36  ;;  %v12721_v0 = vunpack.c.l.bf16 %v8703_v36 }
 0x209   :  { %v8685_v63 = vpop.xlane.xlu2 %1159  ;;  %v8687_v61 = vpop.xlane.xlu1 %1157 }
 0x20a   :  { %13057 = vst [vmem:[#allocation209_spill] sm:$0xff] %v8685_v63  ;;  %v8689_v4 = vpop.xlane.xlu0 %1155  ;;  %v8708_v63 = vld [vmem:[%s12312_s3 + $0x320] sm:$0xff]  }
 0x20b   :  { %13058 = vst [vmem:[#allocation210_spill] sm:$0xff] %v8687_v61  ;;  %v12719_v6 = vunpack.c.l.bf16 %v8708_v63 }
 0x20c   :  { %13059 = vst [vmem:[#allocation211_spill] sm:$0xff] %v8689_v4 }
 0x20d   :  { %13061 = vst [vmem:[#allocation213_spill] sm:$0xff] %v8708_v63  ;;  %v799_v4 = vmul.f32 %v12719_v6, %v8657_v25  ;;  %v12728_v6 = vlaneseq }
 0x20e   :  { %1249 = vadd.xlane.f32.xlu2 %v796_v35  ;;  %1247 = vadd.xlane.f32.xlu1 %v795_v46  ;;  %v798_v35 = vmul.f32 %v12720_v32, %v8657_v25  ;;  %v797_v46 = vmul.f32 %v12721_v0, %v8657_v25 }
 0x20f   :  { %1245 = vadd.xlane.f32.xlu0 %v794_v49  ;;  %v8731_v49 = vld [vmem:[%s12312_s3 + $0x328] sm:$0xff]  }
 0x210   :  { %13065 = vst [vmem:[#allocation217_spill] sm:$0xff] %v8731_v49 }
 0x211   :  { %v8713_v57 = vpop.xlane.xlu2 %1165  ;;  %v8715_v38 = vpop.xlane.xlu1 %1163 }
 0x212   :  { %13062 = vst [vmem:[#allocation214_spill] sm:$0xff] %v8713_v57  ;;  %v8717_v61 = vpop.xlane.xlu0 %1161  ;;  %v12724_v57 = vunpack.c.h.bf16 %v8731_v49 }
 0x213   :  { %13063 = vst [vmem:[#allocation215_spill] sm:$0xff] %v8715_v38  ;;  %v12727_v38 = vunpack.c.l.bf16 %v8731_v49 }
 0x214   :  { %13064 = vst [vmem:[#allocation216_spill] sm:$0xff] %v8717_v61  ;;  %v12729_v61 = vunpack.c.h.bf16 %v8708_v63  ;;  %v802_v36 = vmul.f32 %v12724_v57, %v8657_v25  ;;  %v8762_v57 = vld [vmem:[%s12312_s3 + $0x338] sm:$0xff]   ;;  %v1367_v63 = vmul.f32 0.17677669, %v7382_v28 }
 0x215   :  { %13070 = vst [vmem:[#allocation222_spill] sm:$0xff] %v8762_v57 }
 0x216   :  { %1255 = vadd.xlane.f32.xlu2 %v799_v4  ;;  %1253 = vadd.xlane.f32.xlu1 %v798_v35  ;;  %v801_v4 = vmul.f32 %v12727_v38, %v8657_v25  ;;  %v8749_v35 = vand.u32 127, %v12728_v6  ;;  %v1368_v38 = vmul.f32 0.17677669, %v7410_v12  ;;  %v12732_v6 = vunpack.c.l.bf16 %v8762_v57 }
 0x217   :  { %1251 = vadd.xlane.f32.xlu0 %v797_v46  ;;  %v800_v46 = vmul.f32 %v12729_v61, %v8657_v25 }
 0x218   :  { %v8765_v49 = vadd.s32 4294967288, %v8749_v35  ;;  %v805_v28 = vmul.f32 %v12732_v6, %v8657_v25  ;;  %v8803_v6 = vadd.s32 4294967272, %v8749_v35 }
 0x219   :  { %v8736_v32 = vpop.xlane.xlu2 %1171  ;;  %v8738_v41 = vpop.xlane.xlu1 %1169 }
 0x21a   :  { %13066 = vst [vmem:[#allocation218_spill] sm:$0xff] %v8736_v32  ;;  %v8740_v0 = vpop.xlane.xlu0 %1167  ;;  %v1884_v31 = vperm.slane %v1368_v38, %v8765_v49  ;;  %v564_v32 = vrot.slane %v8076_v2, 5  ;;  %v1882_v38 = vperm.slane %v1367_v63, %v8749_v35  ;;  %v1370_v2 = vmul.f32 0.17677669, %v7408_v3 }
 0x21b   :  { %13067 = vst [vmem:[#allocation219_spill] sm:$0xff] %v8738_v41  ;;  %v8757_v41 = vld [vmem:[%s12312_s3 + $0x330] sm:$0xff]   ;;  %v8816_v3 = vadd.s32 4294967256, %v8749_v35 }
 0x21c   :  { %13068 = vst [vmem:[#allocation220_spill] sm:$0xff] %v8740_v0  ;;  %v12733_v61 = vunpack.c.h.bf16 %v8757_v41  ;;  %v8773_v0 = vadd.s32 4294967280, %v8749_v35  ;;  %v1886_v63 = vsel %vm1885_vm0, %v1884_v31, %v1882_v38  ;;  %v8810_v39 = vperm.slane %v564_v32, 0 }
 0x21d   :  { %13069 = vst [vmem:[#allocation221_spill] sm:$0xff] %v8757_v41  ;;  %v1372_v31 = vmul.f32 0.17677669, %v7406_v55  ;;  %v1373_v38 = vmul.f32 0.17677669, %v7433_v45  ;;  %v8844_v45 = vld [vmem:[%s12312_s3 + $0x348] sm:$0xff]  }
 0x21e   :  { %1261 = vadd.xlane.f32.xlu2 %v802_v36  ;;  %1259 = vadd.xlane.f32.xlu1 %v801_v4  ;;  %v1369_v36 = vmul.f32 0.17677669, %v7380_v27  ;;  %v8797_v27 = vld [vmem:[%s12312_s3 + $0x340] sm:$0xff]   ;;  %13080 = vst [vmem:[#allocation230_spill] sm:$0xff] %v8844_v45 }
 0x21f   :  { %1257 = vadd.xlane.f32.xlu0 %v800_v46  ;;  %v804_v46 = vmul.f32 %v12733_v61, %v8657_v25  ;;  %13075 = vst [vmem:[#allocation226_spill] sm:$0xff] %v8797_v27  ;;  %v1371_v61 = vmul.f32 0.17677669, %v7378_v26  ;;  %v12737_v17 = vunpack.c.l.bf16 %v8797_v27 }
 0x221   :  { %v8776_v43 = vpop.xlane.xlu2 %1177  ;;  %v8778_v12 = vpop.xlane.xlu1 %1175  ;;  %v807_v55 = vmul.f32 %v12737_v17, %v8810_v39  ;;  %v8853_v17 = vadd.s32 4294967240, %v8749_v35 }
 0x222   :  { %13071 = vst [vmem:[#allocation223_spill] sm:$0xff] %v8776_v43  ;;  %v8781_v4 = vpop.xlane.xlu0 %1173  ;;  %v13074_v43 = vunpack.c.l.bf16 %v8757_v41  ;;  %v12736_v41 = vunpack.c.h.bf16 %v8797_v27  ;;  %v8862_v27 = vadd.s32 4294967232, %v8749_v35 }
 0x223   :  { %13072 = vst [vmem:[#allocation224_spill] sm:$0xff] %v8778_v12 }
 0x224   :  { %13073 = vst [vmem:[#allocation225_spill] sm:$0xff] %v8781_v4  ;;  %v803_v12 = vmul.f32 %v13074_v43, %v8657_v25  ;;  %v8800_v4 = vadd.s32 4294967264, %v8749_v35  ;;  %v1888_v43 = vperm.slane %v1369_v36, %v8773_v0  ;;  %v1892_v36 = vperm.slane %v1370_v2, %v8803_v6 }
 0x226   :  { %1267 = vadd.xlane.f32.xlu2 %v805_v28  ;;  %1265 = vadd.xlane.f32.xlu1 %v804_v46  ;;  %v1890_v26 = vsel %vm1889_vm1, %v1888_v43, %v1886_v63  ;;  %v8821_v28 = vadd.s32 4294967248, %v8749_v35  ;;  %v808_v63 = vmul.f32 %v12736_v41, %v8810_v39  ;;  %v13079_v43 = vunpack.c.h.bf16 %v8762_v57 }
 0x227   :  { %1263 = vadd.xlane.f32.xlu0 %v803_v12  ;;  %v1896_v12 = vperm.slane %v1371_v61, %v8800_v4  ;;  %v1894_v2 = vsel %vm1893_vm2, %v1892_v36, %v1890_v26  ;;  %v8849_v61 = vld [vmem:[%s12312_s3 + $0x350] sm:$0xff]   ;;  %v1900_v41 = vperm.slane %v1372_v31, %v8816_v3  ;;  %v1374_v26 = vmul.f32 0.17677669, %v7431_v11 }
 0x228   :  { %13081 = vst [vmem:[#allocation231_spill] sm:$0xff] %v8849_v61  ;;  %v1904_v36 = vperm.slane %v1373_v38, %v8821_v28  ;;  %v12743_v57 = vunpack.c.l.bf16 %v8849_v61  ;;  %v1375_v11 = vmul.f32 0.17677669, %v7429_v13  ;;  %v8868_v38 = vadd.s32 4294967224, %v8749_v35 }
 0x229   :  { %v8823_v32 = vpop.xlane.xlu2 %1183  ;;  %v8825_v46 = vpop.xlane.xlu1 %1181 }
 0x22a   :  { %13076 = vst [vmem:[#allocation227_spill] sm:$0xff] %v8823_v32  ;;  %v8829_v14 = vpop.xlane.xlu0 %1179  ;;  %v806_v32 = vmul.f32 %v13079_v43, %v8657_v25  ;;  %v1898_v25 = vsel %vm1897_vm3, %v1896_v12, %v1894_v2  ;;  %v12742_v43 = vunpack.c.h.bf16 %v8844_v45 }
 0x22b   :  { %13077 = vst [vmem:[#allocation228_spill] sm:$0xff] %v8825_v46  ;;  %v1908_v46 = vperm.slane %v1374_v26, %v8853_v17  ;;  %v1902_v12 = vsel %vm1901_vm4, %v1900_v41, %v1898_v25  ;;  %v811_v41 = vmul.f32 %v12743_v57, %v8810_v39  ;;  %v8885_v26 = vadd.s32 4294967208, %v8749_v35 }
 0x22c   :  { %13078 = vst [vmem:[#allocation229_spill] sm:$0xff] %v8829_v14  ;;  %v810_v13 = vmul.f32 %v12742_v43, %v8810_v39  ;;  %v13085_v25 = vunpack.c.l.bf16 %v8844_v45  ;;  %v1912_v43 = vperm.slane %v1375_v11, %v8862_v27  ;;  %v1384_v57 = vmul.f32 0.17677669, %v7508_v5 }
 0x22d   :  { %v8906_v45 = vadd.s32 4294967184, %v8749_v35 }
 0x22e   :  { %1273 = vadd.xlane.f32.xlu2 %v808_v63  ;;  %1271 = vadd.xlane.f32.xlu1 %v807_v55  ;;  %v1376_v63 = vmul.f32 0.17677669, %v7461_v29  ;;  %v8888_v29 = vadd.s32 4294967216, %v8749_v35 }
 0x22f   :  { %1269 = vadd.xlane.f32.xlu0 %v806_v32  ;;  %v1906_v32 = vsel %vm1905_vm5, %v1904_v36, %v1902_v12  ;;  %v809_v36 = vmul.f32 %v13085_v25, %v8810_v39  ;;  %v8896_v12 = vld [vmem:[%s12312_s3 + $0x358] sm:$0xff]   ;;  %v1385_v25 = vmul.f32 0.17677669, %v7538_v47  ;;  %v12746_v47 = vunpack.c.h.bf16 %v8849_v61 }
 0x230   :  { %13086 = vst [vmem:[#allocation235_spill] sm:$0xff] %v8896_v12  ;;  %v1916_v14 = vperm.slane %v1376_v63, %v8868_v38  ;;  %v1944_v63 = vperm.slane %v1384_v57, %v8765_v49  ;;  %v1400_v57 = vmul.f32 0.17677669, %v7671_v33  ;;  %v8947_v33 = vld [vmem:[%s12312_s3 + $0x360] sm:$0xff]   ;;  %v1401_v61 = vmul.f32 0.17677669, %v7669_v51 }
 0x231   :  { %v8871_v55 = vpop.xlane.xlu2 %1189  ;;  %v8873_v2 = vpop.xlane.xlu1 %1187  ;;  %v1946_v9 = vperm.slane %v1385_v25, %v8773_v0  ;;  %v1387_v25 = vmul.f32 0.17677669, %v7534_v44  ;;  %13091 = vst [vmem:[#allocation238_spill] sm:$0xff] %v8947_v33  ;;  %v1388_v44 = vmul.f32 0.17677669, %v7566_v8 }
 0x232   :  { %13082 = vst [vmem:[#allocation232_spill] sm:$0xff] %v8871_v55  ;;  %v8876_v31 = vpop.xlane.xlu0 %1185  ;;  %v1383_v55 = vmul.f32 0.17677669, %v7510_v58  ;;  %v8911_v58 = vadd.s32 4294967192, %v8749_v35  ;;  %v1380_v8 = vmul.f32 0.17677669, %v7482_v7  ;;  %v1977_v7 = vperm.slane %v1401_v61, %v8773_v0 }
 0x233   :  { %13083 = vst [vmem:[#allocation233_spill] sm:$0xff] %v8873_v2  ;;  %v1910_v2 = vsel %vm1909_vm6, %v1908_v46, %v1906_v32 }
 0x234   :  { %13084 = vst [vmem:[#allocation234_spill] sm:$0xff] %v8876_v31  ;;  %v1377_v31 = vmul.f32 0.17677669, %v7459_v37  ;;  %v8914_v37 = vadd.s32 4294967200, %v8749_v35  ;;  %v1914_v46 = vsel %vm12809_vm7, %v1912_v43, %v1910_v2  ;;  %v1943_v32 = vperm.slane %v1383_v55, %v8749_v35 }
 0x235   :  { %v1918_v11 = vsel %vm12810_vm8, %v1916_v14, %v1914_v46  ;;  %v1399_v43 = vmul.f32 0.17677669, %v7636_v56  ;;  %v1379_v55 = vmul.f32 0.17677669, %v7484_v16  ;;  %v812_v56 = vmul.f32 %v12746_v47, %v8810_v39  ;;  %v8952_v46 = vld [vmem:[%s12312_s3 + $0x368] sm:$0xff]  }
 0x236   :  { %1277 = vadd.xlane.f32.xlu1 %v810_v13  ;;  %1279 = vadd.xlane.f32.xlu2 %v811_v41  ;;  %v1386_v13 = vmul.f32 0.17677669, %v7536_v42  ;;  %v1378_v41 = vmul.f32 0.17677669, %v7457_v30  ;;  %v1920_v5 = vperm.slane %v1377_v31, %v8888_v29  ;;  %v13089_v42 = vunpack.c.l.bf16 %v8896_v12  ;;  %13092 = vst [vmem:[#allocation239_spill] sm:$0xff] %v8952_v46 }
 0x237   :  { %1275 = vadd.xlane.f32.xlu0 %v809_v36  ;;  %v13090_v31 = vunpack.c.h.bf16 %v8896_v12 }
 0x238   :  { %v813_v30 = vmul.f32 %v13089_v42, %v8810_v39  ;;  %v1945_v42 = vsel %vm1885_vm0, %v1944_v63, %v1943_v32  ;;  %v1948_v16 = vperm.slane %v1386_v13, %v8803_v6  ;;  %v1922_v47 = vsel %vm1921_vm9, %v1920_v5, %v1918_v11 }
 0x239   :  { %v8925_v50 = vpop.xlane.xlu2 %1195  ;;  %v8927_v36 = vpop.xlane.xlu1 %1193  ;;  %v814_v14 = vmul.f32 %v13090_v31, %v8810_v39  ;;  %v1924_v31 = vperm.slane %v1378_v41, %v8885_v26  ;;  %v1947_v12 = vsel %vm1889_vm1, %v1946_v9, %v1945_v42  ;;  %v12757_v63 = vunpack.c.h.bf16 %v8947_v33 }
 0x23a   :  { %13087 = vst [vmem:[#allocation236_spill] sm:$0xff] %v8925_v50  ;;  %v8931_v2 = vpop.xlane.xlu0 %1191  ;;  %v1974_v50 = vperm.slane %v1399_v43, %v8749_v35  ;;  %v12754_v32 = vunpack.c.l.bf16 %v8952_v46  ;;  %v1928_v13 = vperm.slane %v1379_v55, %v8914_v37  ;;  %v1950_v11 = vperm.slane %v1387_v25, %v8800_v4 }
 0x23b   :  { %13088 = vst [vmem:[#allocation237_spill] sm:$0xff] %v8927_v36  ;;  %v1975_v36 = vperm.slane %v1400_v57, %v8765_v49  ;;  %v12758_v9 = vunpack.c.l.bf16 %v8947_v33  ;;  %v1949_v51 = vsel %vm1893_vm2, %v1948_v16, %v1947_v12  ;;  %v1952_v5 = vperm.slane %v1388_v44, %v8816_v3  ;;  %v13118_v33 = vld [vmem:[#allocation66_spill] sm:$0xff] }
 0x23c   :  { %v1389_v41 = vmul.f32 0.17677669, %v7564_v62  ;;  %v1402_v43 = vmul.f32 0.17677669, %v7667_v19  ;;  %v1926_v57 = vsel %vm12819_vm10, %v1924_v31, %v1922_v47  ;;  %v1381_v25 = vmul.f32 0.17677669, %v7480_v15 }
 0x23d   :  { %v1976_v12 = vsel %vm1885_vm0, %v1975_v36, %v1974_v50  ;;  %v816_v62 = vmul.f32 %v12757_v63, %v8810_v39  ;;  %v817_v19 = vmul.f32 %v12754_v32, %v8810_v39  ;;  %v1930_v61 = vsel %vm12818_vm11, %v1928_v13, %v1926_v57  ;;  %v8999_v15 = vld [vmem:[%s12312_s3 + $0x370] sm:$0xff]  }
 0x23e   :  { %1283 = vadd.xlane.f32.xlu1 %v813_v30  ;;  %1285 = vadd.xlane.f32.xlu2 %v814_v14  ;;  %v1403_v30 = vmul.f32 0.17677669, %v7694_v40  ;;  %v1932_v40 = vperm.slane %v1380_v8, %v8911_v58  ;;  %v1951_v47 = vsel %vm1897_vm3, %v1950_v11, %v1949_v51  ;;  %v815_v50 = vmul.f32 %v12758_v9, %v8810_v39  ;;  %v13106_v9 = vld [vmem:[#allocation62_spill] sm:$0xff] }
 0x23f   :  { %1281 = vadd.xlane.f32.xlu0 %v812_v56  ;;  %13096 = vst [vmem:[#allocation243_spill] sm:$0xff] %v8999_v15  ;;  %v1953_v36 = vsel %vm1901_vm4, %v1952_v5, %v1951_v47  ;;  %v1390_v42 = vmul.f32 0.17677669, %v7562_v10  ;;  %v1954_v16 = vperm.slane %v1389_v41, %v8821_v28  ;;  %v1979_v44 = vperm.slane %v1402_v43, %v8803_v6 }
 0x240   :  { %v1391_v31 = vmul.f32 0.17677669, %v7589_v22  ;;  %v1978_v8 = vsel %vm1889_vm1, %v1977_v7, %v1976_v12  ;;  %v1981_v13 = vperm.slane %v1403_v30, %v8800_v4  ;;  %v1404_v11 = vmul.f32 0.17677669, %v7692_v60 }
 0x241   :  { %v8976_v14 = vpop.xlane.xlu2 %1201  ;;  %v8978_v55 = vpop.xlane.xlu1 %1199  ;;  %v12752_v51 = vunpack.c.l.bf16 %v8999_v15  ;;  %v12751_v5 = vunpack.c.h.bf16 %v8999_v15  ;;  %v1936_v10 = vperm.slane %v1381_v25, %v8906_v45  ;;  %v1934_v41 = vsel %vm1933_vm12, %v1932_v40, %v1930_v61 }
 0x242   :  { %13093 = vst [vmem:[#allocation240_spill] sm:$0xff] %v8976_v14  ;;  %v8982_v56 = vpop.xlane.xlu0 %1197  ;;  %v12753_v22 = vunpack.c.h.bf16 %v8952_v46  ;;  %v1956_v43 = vperm.slane %v1390_v42, %v8853_v17  ;;  %v1955_v57 = vsel %vm1905_vm5, %v1954_v16, %v1953_v36  ;;  %v1392_v60 = vmul.f32 0.17677669, %v7587_v53 }
 0x243   :  { %13094 = vst [vmem:[#allocation241_spill] sm:$0xff] %v8978_v55  ;;  %v1980_v7 = vsel %vm1893_vm2, %v1979_v44, %v1978_v8  ;;  %v1958_v30 = vperm.slane %v1391_v31, %v8862_v27  ;;  %v1405_v25 = vmul.f32 0.17677669, %v7690_v18  ;;  %v1406_v61 = vmul.f32 0.17677669, %v7722_v1  ;;  %v9038_v18 = vld [vmem:[%s12311_s1 + $0x8] sm:$0xff] }
 0x244   :  { %13095 = vst [vmem:[#allocation242_spill] sm:$0xff] %v8982_v56  ;;  %v1982_v12 = vsel %vm1897_vm3, %v1981_v13, %v1980_v7  ;;  %v819_v53 = vmul.f32 %v12752_v51, %v8810_v39  ;;  %v565_v36 = vrot.slane %v9038_v18, 6  ;;  %v9042_v42 = vadd.s32 4294967176, %v8749_v35  ;;  %v9051_v44 = vld [vmem:[%s12312_s3 + $0x378] sm:$0xff]   ;;  %v9056_v31 = vld [vmem:[%s12312_s3 + $0x380] sm:$0xff]   ;;  %v13191_v56 = vld [vmem:[#allocation139_spill] sm:$0xff] }
 0x245   :  { %v1382_v1 = vmul.f32 0.17677669, %v7512_v59  ;;  %v818_v16 = vmul.f32 %v12753_v22, %v8810_v39  ;;  %13099 = vst [vmem:[#allocation246_spill] sm:$0xff] %v9051_v44  ;;  %v1938_v8 = vsel %vm1937_vm13, %v1936_v10, %v1934_v41  ;;  %v1957_v13 = vsel %vm1909_vm6, %v1956_v43, %v1955_v57 }
 0x246   :  { %1289 = vadd.xlane.f32.xlu1 %v816_v62  ;;  %1291 = vadd.xlane.f32.xlu2 %v817_v19  ;;  %v1983_v62 = vperm.slane %v1404_v11, %v8816_v3  ;;  %13100 = vst [vmem:[#allocation247_spill] sm:$0xff] %v9056_v31  ;;  %v1393_v59 = vmul.f32 0.17677669, %v7585_v24  ;;  %v1960_v11 = vperm.slane %v1392_v60, %v8868_v38  ;;  %v1407_v22 = vmul.f32 0.17677669, %v7720_v48 }
 0x247   :  { %1287 = vadd.xlane.f32.xlu0 %v815_v50  ;;  %v820_v50 = vmul.f32 %v12751_v5, %v8810_v39  ;;  %v1959_v7 = vsel %vm12809_vm7, %v1958_v30, %v1957_v13  ;;  %v1985_v5 = vperm.slane %v1405_v25, %v8821_v28  ;;  %v1987_v32 = vperm.slane %v1406_v61, %v8853_v17 }
 0x248   :  { %v1984_v51 = vsel %vm1901_vm4, %v1983_v62, %v1982_v12  ;;  %v12755_v10 = vunpack.c.h.bf16 %v9051_v44  ;;  %v12759_v41 = vunpack.c.l.bf16 %v9056_v31  ;;  %v9069_v43 = vperm.slane %v565_v36, 0 }
 0x249   :  { %v9022_v19 = vpop.xlane.xlu2 %1207  ;;  %v9024_v40 = vpop.xlane.xlu1 %1205  ;;  %v1940_v24 = vperm.slane %v1382_v1, %v9042_v42  ;;  %v1415_v57 = vmul.f32 0.17677669, %v7796_v34  ;;  %v1416_v60 = vmul.f32 0.17677669, %v7794_v54  ;;  %v12756_v30 = vunpack.c.l.bf16 %v9051_v44  ;;  %v13117_v44 = vld [vmem:[#allocation85_spill] sm:$0xff] }
 0x24a   :  { %13097 = vst [vmem:[#allocation244_spill] sm:$0xff] %v9024_v40  ;;  %v9027_v47 = vpop.xlane.xlu0 %1203  ;;  %v1962_v48 = vperm.slane %v1393_v59, %v8888_v29  ;;  %v1961_v12 = vsel %vm12810_vm8, %v1960_v11, %v1959_v7  ;;  %v1394_v25 = vmul.f32 0.17677669, %v7617_v20  ;;  %v1408_v62 = vmul.f32 0.17677669, %v7718_v21  ;;  %v9108_v59 = vld [vmem:[%s12312_s3 + $0x388] sm:$0xff]  }
 0x24b   :  { %13098 = vst [vmem:[#allocation245_spill] sm:$0xff] %v9027_v47  ;;  %v9080_v61 = vmul.f32 0.17677669, %v7613_v52  ;;  %v1989_v34 = vperm.slane %v1407_v22, %v8862_v27  ;;  %v1409_v54 = vmul.f32 0.17677669, %v7745_v23  ;;  %v822_v21 = vmul.f32 %v12755_v10, %v8810_v39  ;;  %v13105_v10 = vld [vmem:[#allocation51_spill] sm:$0xff] }
 0x24c   :  { %v823_v52 = vmul.f32 %v12759_v41, %v9069_v43  ;;  %v2005_v23 = vperm.slane %v1415_v57, %v8749_v35  ;;  %v9111_v11 = vsel %vm1941_vm14, %v1940_v24, %v1938_v8  ;;  %v1964_v7 = vperm.slane %v1394_v25, %v8885_v26  ;;  %v13131_v40 = vld [vmem:[#allocation71_spill] sm:$0xff] }
 0x24d   :  { %v1419_v41 = vmul.f32 0.17677669, %v13106_v9  ;;  %v12761_v8 = vunpack.c.l.bf16 %v9108_v59  ;;  %v12760_v24 = vunpack.c.h.bf16 %v9108_v59  ;;  %v1968_v25 = vperm.slane %v9080_v61, %v8911_v58 }
 0x24e   :  { %1295 = vadd.xlane.f32.xlu1 %v819_v53  ;;  %1297 = vadd.xlane.f32.xlu2 %v820_v50  ;;  %v1986_v53 = vsel %vm1905_vm5, %v1985_v5, %v1984_v51  ;;  %v2006_v51 = vperm.slane %v1416_v60, %v8765_v49  ;;  %v13102_v5 = vld [vmem:[#allocation63_spill] sm:$0xff]  ;;  %v1991_v60 = vperm.slane %v1408_v62, %v8868_v38  ;;  %v1433_v15 = vmul.f32 0.17677669, %v13117_v44 }
 0x24f   :  { %1293 = vadd.xlane.f32.xlu0 %v818_v16  ;;  %v1988_v1 = vsel %vm1909_vm6, %v1987_v32, %v1986_v53  ;;  %v13101_v16 = vld [vmem:[#allocation58_spill] sm:$0xff]  ;;  %v1418_v22 = vmul.f32 0.17677669, %v13102_v5  ;;  %v821_v32 = vmul.f32 %v12756_v30, %v8810_v39  ;;  %v13104_v53 = vld [vmem:[#allocation40_spill] sm:$0xff]  ;;  %v1993_v39 = vperm.slane %v1409_v54, %v8888_v29 }
 0x250   :  { %v1417_v13 = vmul.f32 0.17677669, %v13101_v16  ;;  %13103 = vst [vmem:[#allocation58_spill] sm:$0xff] %v9108_v59  ;;  %v1395_v57 = vmul.f32 0.17677669, %v13104_v53  ;;  %v1963_v16 = vsel %vm1921_vm9, %v1962_v48, %v1961_v12  ;;  %v1990_v5 = vsel %vm12809_vm7, %v1989_v34, %v1988_v1  ;;  %v13107_v34 = vld [vmem:[#allocation43_spill] sm:$0xff] }
 0x251   :  { %v9085_v50 = vpop.xlane.xlu2 %1213  ;;  %v9087_v36 = vpop.xlane.xlu1 %1211  ;;  %v1410_v30 = vmul.f32 0.17677669, %v13105_v10  ;;  %v2007_v48 = vsel %vm1885_vm0, %v2006_v51, %v2005_v23  ;;  %v2010_v12 = vperm.slane %v1418_v22, %v8803_v6  ;;  %v12762_v10 = vunpack.c.h.bf16 %v9056_v31  ;;  %v13109_v23 = vld [vmem:[#allocation61_spill] sm:$0xff] }
 0x252   :  { %v9091_v20 = vpop.xlane.xlu0 %1209  ;;  %v2008_v63 = vperm.slane %v1417_v13, %v8773_v0  ;;  %v1965_v62 = vsel %vm12819_vm10, %v1964_v7, %v1963_v16  ;;  %v1966_v9 = vperm.slane %v1395_v57, %v8914_v37  ;;  %v1397_v54 = vmul.f32 0.17677669, %v13107_v34  ;;  %v13111_v16 = vld [vmem:[#allocation42_spill] sm:$0xff]  ;;  %v13112_v34 = vld [vmem:[#allocation67_spill] sm:$0xff] }
 0x253   :  { %v1992_v1 = vsel %vm12810_vm8, %v1991_v60, %v1990_v5  ;;  %v1995_v61 = vperm.slane %v1410_v30, %v8885_v26  ;;  %v1420_v51 = vmul.f32 0.17677669, %v13109_v23  ;;  %v2012_v53 = vperm.slane %v1419_v41, %v8800_v4  ;;  %v9162_v41 = vld [vmem:[%s12312_s3 + $0x390] sm:$0xff]   ;;  %v13115_v23 = vld [vmem:[#allocation79_spill] sm:$0xff] }
 0x254   :  { %v1994_v13 = vsel %vm1921_vm9, %v1993_v39, %v1992_v1  ;;  %v2009_v7 = vsel %vm1889_vm1, %v2008_v63, %v2007_v48  ;;  %v825_v60 = vmul.f32 %v12761_v8, %v9069_v43  ;;  %v826_v30 = vmul.f32 %v12760_v24, %v9069_v43  ;;  %13113 = vst [vmem:[#allocation40_spill] sm:$0xff] %v9162_v41  ;;  %v9167_v48 = vld [vmem:[%s12312_s3 + $0x398] sm:$0xff]  }
 0x255   :  { %v9152_v5 = vmul.f32 0.17677669, %v13111_v16  ;;  %v2011_v39 = vsel %vm1893_vm2, %v2010_v12, %v2009_v7  ;;  %v1421_v1 = vmul.f32 0.17677669, %v13112_v34  ;;  %v824_v63 = vmul.f32 %v12762_v10, %v9069_v43  ;;  %13114 = vst [vmem:[#allocation51_spill] sm:$0xff] %v9167_v48  ;;  %v13116_v16 = vld [vmem:[#allocation80_spill] sm:$0xff] }
 0x256   :  { %1301 = vadd.xlane.f32.xlu1 %v822_v21  ;;  %1303 = vadd.xlane.f32.xlu2 %v823_v52  ;;  %v13108_v21 = vld [vmem:[#allocation50_spill] sm:$0xff]  ;;  %v1970_v12 = vperm.slane %v1397_v54, %v8906_v45  ;;  %v1432_v7 = vmul.f32 0.17677669, %v13115_v23  ;;  %v1431_v34 = vmul.f32 0.17677669, %v13116_v16  ;;  %v1996_v8 = vsel %vm12819_vm10, %v1995_v61, %v1994_v13  ;;  %v13123_v16 = vld [vmem:[#allocation72_spill] sm:$0xff] }
 0x257   :  { %1299 = vadd.xlane.f32.xlu0 %v821_v32  ;;  %v1411_v52 = vmul.f32 0.17677669, %v13108_v21  ;;  %v1967_v21 = vsel %vm12818_vm11, %v1966_v9, %v1965_v62  ;;  %v2014_v10 = vperm.slane %v1420_v51, %v8816_v3  ;;  %v2013_v46 = vsel %vm1897_vm3, %v2012_v53, %v2011_v39  ;;  %v13119_v53 = vld [vmem:[#allocation84_spill] sm:$0xff]  ;;  %v13120_v39 = vld [vmem:[#allocation65_spill] sm:$0xff] }
 0x258   :  { %v1422_v59 = vmul.f32 0.17677669, %v13118_v33  ;;  %v12773_v62 = vunpack.c.h.bf16 %v9162_v41  ;;  %v12774_v9 = vunpack.c.l.bf16 %v9167_v48  ;;  %v1969_v54 = vsel %vm1933_vm12, %v1968_v25, %v1967_v21 }
 0x259   :  { %v9137_v22 = vpop.xlane.xlu2 %1219  ;;  %v9139_v32 = vpop.xlane.xlu1 %1217  ;;  %v1997_v24 = vperm.slane %v1411_v52, %v8914_v37  ;;  %v2016_v13 = vperm.slane %v1421_v1, %v8821_v28  ;;  %v12779_v44 = vunpack.c.l.bf16 %v9162_v41  ;;  %v9187_v61 = vsel %vm1937_vm13, %v1970_v12, %v1969_v54  ;;  %v13129_v52 = vld [vmem:[#allocation90_spill] sm:$0xff] }
 0x25a   :  { %13110 = vst [vmem:[#allocation63_spill] sm:$0xff] %v9137_v22  ;;  %v9143_v57 = vpop.xlane.xlu0 %1215  ;;  %v2037_v33 = vperm.slane %v1432_v7, %v8765_v49  ;;  %v2036_v51 = vperm.slane %v1431_v34, %v8749_v35  ;;  %v2015_v25 = vsel %vm1901_vm4, %v2014_v10, %v2013_v46  ;;  %v1423_v21 = vmul.f32 0.17677669, %v13120_v39  ;;  %v13126_v34 = vld [vmem:[#allocation83_spill] sm:$0xff]  ;;  %v9221_v39 = vld [vmem:[%s12312_s3 + $0x3a0] sm:$0xff]  }
 0x25b   :  { %v2039_v1 = vperm.slane %v1433_v15, %v8773_v0  ;;  %v2018_v12 = vperm.slane %v1422_v59, %v8853_v17  ;;  %v1424_v7 = vmul.f32 0.17677669, %v13123_v16  ;;  %v829_v46 = vmul.f32 %v12774_v9, %v9069_v43  ;;  %13127 = vst [vmem:[#allocation61_spill] sm:$0xff] %v9221_v39  ;;  %v13128_v16 = vld [vmem:[#allocation56_spill] sm:$0xff] }
 0x25c   :  { %v2017_v10 = vsel %vm1905_vm5, %v2016_v13, %v2015_v25  ;;  %v827_v59 = vmul.f32 %v12779_v44, %v9069_v43  ;;  %v2038_v9 = vsel %vm1885_vm0, %v2037_v33, %v2036_v51  ;;  %v1436_v31 = vmul.f32 0.17677669, %v13129_v52  ;;  %v13130_v13 = vld [vmem:[#allocation55_spill] sm:$0xff] }
 0x25d   :  { %v1413_v25 = vmul.f32 0.17677669, %v13130_v13  ;;  %v1425_v41 = vmul.f32 0.17677669, %v13131_v40  ;;  %v2040_v44 = vsel %vm1889_vm1, %v2039_v1, %v2038_v9  ;;  %v2019_v47 = vsel %vm1909_vm6, %v2018_v12, %v2017_v10  ;;  %v13133_v1 = vld [vmem:[#allocation70_spill] sm:$0xff]  ;;  %v13137_v40 = vld [vmem:[#allocation88_spill] sm:$0xff] }
 0x25e   :  { %1307 = vadd.xlane.f32.xlu1 %v825_v60  ;;  %1309 = vadd.xlane.f32.xlu2 %v826_v30  ;;  %v1434_v60 = vmul.f32 0.17677669, %v13119_v53  ;;  %v1998_v30 = vsel %vm12818_vm11, %v1997_v24, %v1996_v8  ;;  %v828_v8 = vmul.f32 %v12773_v62, %v9069_v43  ;;  %v13125_v24 = vld [vmem:[#allocation54_spill] sm:$0xff]  ;;  %v1435_v53 = vmul.f32 0.17677669, %v13126_v34 }
 0x25f   :  { %1305 = vadd.xlane.f32.xlu0 %v824_v63  ;;  %v9211_v15 = vmul.f32 0.17677669, %v13125_v24  ;;  %v1412_v62 = vmul.f32 0.17677669, %v13128_v16  ;;  %v2020_v34 = vperm.slane %v1423_v21, %v8862_v27  ;;  %v2022_v14 = vperm.slane %v1424_v7, %v8868_v38  ;;  %v13132_v21 = vld [vmem:[#allocation89_spill] sm:$0xff] }
 0x260   :  { %v2041_v24 = vperm.slane %v1434_v60, %v8803_v6  ;;  %v12780_v33 = vunpack.c.l.bf16 %v9221_v39  ;;  %v2043_v60 = vperm.slane %v1435_v53, %v8800_v4  ;;  %v1437_v16 = vmul.f32 0.17677669, %v13132_v21  ;;  %v13134_v53 = vld [vmem:[#allocation76_spill] sm:$0xff] }
 0x261   :  { %v9196_v63 = vpop.xlane.xlu2 %1225  ;;  %v9198_v23 = vpop.xlane.xlu1 %1223  ;;  %v1999_v9 = vperm.slane %v1412_v62, %v8911_v58  ;;  %v1426_v12 = vmul.f32 0.17677669, %v13133_v1  ;;  %v2021_v10 = vsel %vm12809_vm7, %v2020_v34, %v2019_v47  ;;  %v2024_v13 = vperm.slane %v1425_v41, %v8888_v29 }
 0x262   :  { %13121 = vst [vmem:[#allocation62_spill] sm:$0xff] %v9196_v63  ;;  %v9202_v54 = vpop.xlane.xlu0 %1221  ;;  %v2042_v7 = vsel %vm1893_vm2, %v2041_v24, %v2040_v44  ;;  %v1427_v52 = vmul.f32 0.17677669, %v13134_v53  ;;  %v2023_v62 = vsel %vm12810_vm8, %v2022_v14, %v2021_v10  ;;  %v1438_v1 = vmul.f32 0.17677669, %v13137_v40  ;;  %v9271_v10 = vld [vmem:[%s12312_s3 + $0x3a8] sm:$0xff]  }
 0x263   :  { %13122 = vst [vmem:[#allocation43_spill] sm:$0xff] %v9198_v23  ;;  %v13139_v47 = vunpack.c.h.bf16 %v9221_v39  ;;  %v2044_v44 = vsel %vm1897_vm3, %v2043_v60, %v2042_v7  ;;  %v2047_v24 = vperm.slane %v1437_v16, %v8821_v28  ;;  %v13141_v14 = vunpack.c.h.bf16 %v9167_v48  ;;  %v9276_v53 = vld [vmem:[%s12312_s3 + $0x3b0] sm:$0xff]   ;;  %v13144_v7 = vld [vmem:[#allocation75_spill] sm:$0xff]  ;;  %v13145_v39 = vld [vmem:[#allocation101_spill] sm:$0xff] }
 0x264   :  { %13124 = vst [vmem:[#allocation50_spill] sm:$0xff] %v9202_v54  ;;  %v2000_v60 = vsel %vm1933_vm12, %v1999_v9, %v1998_v30  ;;  %v2026_v16 = vperm.slane %v1426_v12, %v8885_v26  ;;  %v1447_v48 = vmul.f32 0.17677669, %v13145_v39  ;;  %v13147_v63 = vld [vmem:[#allocation93_spill] sm:$0xff]  ;;  %v12786_v30 = vunpack.c.h.bf16 %v9271_v10  ;;  %v13148_v12 = vld [vmem:[#allocation74_spill] sm:$0xff] }
 0x265   :  { %v832_v41 = vmul.f32 %v13139_v47, %v9069_v43  ;;  %v830_v40 = vmul.f32 %v13141_v14, %v9069_v43  ;;  %13142 = vst [vmem:[#allocation80_spill] sm:$0xff] %v9271_v10  ;;  %v1428_v47 = vmul.f32 0.17677669, %v13144_v7  ;;  %v2025_v14 = vsel %vm1921_vm9, %v2024_v13, %v2023_v62 }
 0x266   :  { %1313 = vadd.xlane.f32.xlu1 %v828_v8  ;;  %1315 = vadd.xlane.f32.xlu2 %v829_v46  ;;  %v2045_v8 = vperm.slane %v1436_v31, %v8816_v3  ;;  %v2001_v46 = vperm.slane %v1413_v25, %v8906_v45  ;;  %v831_v31 = vmul.f32 %v12780_v33, %v9069_v43  ;;  %v13140_v25 = vld [vmem:[#allocation94_spill] sm:$0xff]  ;;  %v1440_v55 = vmul.f32 0.17677669, %v13147_v63 }
 0x267   :  { %1311 = vadd.xlane.f32.xlu0 %v827_v59  ;;  %v1439_v34 = vmul.f32 0.17677669, %v13140_v25  ;;  %13143 = vst [vmem:[#allocation85_spill] sm:$0xff] %v9276_v53  ;;  %v2028_v33 = vperm.slane %v1427_v52, %v8914_v37  ;;  %v12785_v9 = vunpack.c.l.bf16 %v9276_v53  ;;  %v12787_v39 = vunpack.c.l.bf16 %v9271_v10 }
 0x268   :  { %v2046_v25 = vsel %vm1901_vm4, %v2045_v8, %v2044_v44  ;;  %v1429_v8 = vmul.f32 0.17677669, %v13148_v12  ;;  %v2027_v62 = vsel %vm12819_vm10, %v2026_v16, %v2025_v14  ;;  %v2030_v63 = vperm.slane %v1428_v47, %v8911_v58  ;;  %v13150_v44 = vld [vmem:[#allocation92_spill] sm:$0xff] }
 0x269   :  { %v9248_v21 = vpop.xlane.xlu2 %1231  ;;  %v9250_v59 = vpop.xlane.xlu1 %1229  ;;  %v2048_v13 = vsel %vm1905_vm5, %v2047_v24, %v2046_v25  ;;  %v2051_v52 = vperm.slane %v1439_v34, %v8862_v27  ;;  %v1441_v7 = vmul.f32 0.17677669, %v13150_v44  ;;  %v2067_v12 = vperm.slane %v1447_v48, %v8749_v35  ;;  %v13154_v25 = vld [vmem:[#allocation106_spill] sm:$0xff]  ;;  %v13157_v44 = vld [vmem:[#allocation112_spill] sm:$0xff] }
 0x26a   :  { %13135 = vst [vmem:[#allocation42_spill] sm:$0xff] %v9248_v21  ;;  %v9254_v51 = vpop.xlane.xlu0 %1227  ;;  %v13146_v21 = vld [vmem:[#allocation108_spill] sm:$0xff]  ;;  %v835_v48 = vmul.f32 %v12785_v9, %v9069_v43  ;;  %v1450_v14 = vmul.f32 0.17677669, %v13154_v25  ;;  %v13159_v9 = vperm.slane %v9211_v15, %v9042_v42 }
 0x26b   :  { %13136 = vst [vmem:[#allocation67_spill] sm:$0xff] %v9250_v59  ;;  %v1448_v59 = vmul.f32 0.17677669, %v13146_v21  ;;  %v2002_v21 = vsel %vm1937_vm13, %v2001_v46, %v2000_v60  ;;  %v2053_v60 = vperm.slane %v1440_v55, %v8868_v38  ;;  %v833_v55 = vmul.f32 %v12787_v39, %v9069_v43 }
 0x26c   :  { %13138 = vst [vmem:[#allocation79_spill] sm:$0xff] %v9254_v51  ;;  %v2049_v51 = vperm.slane %v1438_v1, %v8853_v17  ;;  %v13149_v1 = vld [vmem:[#allocation107_spill] sm:$0xff] }
 0x26d   :  { %v2068_v24 = vperm.slane %v1448_v59, %v8765_v49  ;;  %v2032_v59 = vperm.slane %v1429_v8, %v8906_v45 }
 0x26e   :  { %1319 = vadd.xlane.f32.xlu1 %v831_v31  ;;  %1321 = vadd.xlane.f32.xlu2 %v832_v41  ;;  %v1449_v31 = vmul.f32 0.17677669, %v13149_v1  ;;  %v2029_v41 = vsel %vm12818_vm11, %v2028_v33, %v2027_v62  ;;  %v2050_v46 = vsel %vm1909_vm6, %v2049_v51, %v2048_v13  ;;  %v834_v33 = vmul.f32 %v12786_v30, %v9069_v43  ;;  %v9325_v51 = vld [vmem:[%s12312_s3 + $0x3b8] sm:$0xff]  }
 0x26f   :  { %1317 = vadd.xlane.f32.xlu0 %v830_v40  ;;  %v2052_v47 = vsel %vm12809_vm7, %v2051_v52, %v2050_v46  ;;  %13155 = vst [vmem:[#allocation72_spill] sm:$0xff] %v9325_v51  ;;  %v2031_v13 = vsel %vm1933_vm12, %v2030_v63, %v2029_v41  ;;  %v13156_v62 = vld [vmem:[#allocation81_spill] sm:$0xff]  ;;  %v1451_v52 = vmul.f32 0.17677669, %v13157_v44  ;;  %v13158_v46 = vperm.slane %v9152_v5, %v9042_v42 }
 0x270   :  { %v9329_v1 = vmul.f32 0.17677669, %v13156_v62  ;;  %v2070_v8 = vperm.slane %v1449_v31, %v8773_v0  ;;  %v9344_v30 = vsel %vm1941_vm14, %v13159_v9, %v2002_v21  ;;  %v2055_v63 = vperm.slane %v1441_v7, %v8888_v29  ;;  %v13160_v62 = vld [vmem:[#allocation97_spill] sm:$0xff]  ;;  %v13161_v9 = vld [vmem:[#allocation98_spill] sm:$0xff] }
 0x271   :  { %v9302_v34 = vpop.xlane.xlu2 %1237  ;;  %v9304_v40 = vpop.xlane.xlu1 %1235  ;;  %v9338_v25 = vsel %vm1941_vm14, %v13158_v46, %v9187_v61  ;;  %v2069_v41 = vsel %vm1885_vm0, %v2068_v24, %v2067_v12  ;;  %v2054_v31 = vsel %vm12810_vm8, %v2053_v60, %v2052_v47  ;;  %v9350_v44 = vmul.f32 0.17677669, %v13160_v62  ;;  %v13163_v46 = vld [vmem:[#allocation99_spill] sm:$0xff]  ;;  %v13164_v62 = vld [vmem:[#allocation130_spill] sm:$0xff] }
 0x272   :  { %13151 = vst [vmem:[#allocation66_spill] sm:$0xff] %v9302_v34  ;;  %v9308_v16 = vpop.xlane.xlu0 %1233  ;;  %v12788_v5 = vunpack.c.l.bf16 %v9325_v51  ;;  %v12789_v61 = vunpack.c.h.bf16 %v9325_v51  ;;  %v9355_v15 = vsel %vm1937_vm13, %v2032_v59, %v2031_v13  ;;  %v9358_v21 = vmul.f32 0.17677669, %v13161_v9 }
 0x273   :  { %13152 = vst [vmem:[#allocation84_spill] sm:$0xff] %v9304_v40  ;;  %v2072_v7 = vperm.slane %v1450_v14, %v8803_v6  ;;  %v2071_v60 = vsel %vm1889_vm1, %v2070_v8, %v2069_v41  ;;  %v9368_v59 = vmul.f32 0.17677669, %v13163_v46  ;;  %v9371_v13 = vsel %vm1921_vm9, %v2055_v63, %v2054_v31  ;;  %v13176_v40 = vld [vmem:[#allocation151_spill] sm:$0xff] }
 0x274   :  { %13153 = vst [vmem:[#allocation65_spill] sm:$0xff] %v9308_v16  ;;  %v1463_v14 = vmul.f32 0.17677669, %v13164_v62  ;;  %v837_v41 = vmul.f32 %v12788_v5, %v9069_v43  ;;  %v838_v63 = vmul.f32 %v12789_v61, %v9069_v43  ;;  %v566_v31 = vrot.slane %v9038_v18, 7  ;;  %v13169_v62 = vld [vmem:[#allocation110_spill] sm:$0xff]  ;;  %v9405_v18 = vld [vmem:[%s12312_s3 + $0x3c8] sm:$0xff]  }
 0x275   :  { %v2073_v46 = vsel %vm1893_vm2, %v2072_v7, %v2071_v60  ;;  %v13170_v24 = vunpack.c.h.bf16 %v9276_v53  ;;  %v9400_v5 = vld [vmem:[%s12312_s3 + $0x3c0] sm:$0xff]   ;;  %13172 = vst [vmem:[#allocation55_spill] sm:$0xff] %v9405_v18  ;;  %v13173_v60 = vld [vmem:[#allocation117_spill] sm:$0xff]  ;;  %v13175_v53 = vld [vmem:[#allocation135_spill] sm:$0xff]  ;;  %v1480_v34 = vmul.f32 0.17677669, %v13176_v40 }
 0x276   :  { %1325 = vadd.xlane.f32.xlu1 %v834_v33  ;;  %1327 = vadd.xlane.f32.xlu2 %v835_v48  ;;  %v2074_v33 = vperm.slane %v1451_v52, %v8800_v4  ;;  %v13162_v48 = vld [vmem:[#allocation111_spill] sm:$0xff]  ;;  %13171 = vst [vmem:[#allocation90_spill] sm:$0xff] %v9400_v5  ;;  %v1466_v10 = vmul.f32 0.17677669, %v13175_v53  ;;  %v13177_v16 = vld [vmem:[#allocation152_spill] sm:$0xff] }
 0x277   :  { %1323 = vadd.xlane.f32.xlu0 %v833_v55  ;;  %v1452_v47 = vmul.f32 0.17677669, %v13162_v48  ;;  %v13165_v55 = vld [vmem:[#allocation129_spill] sm:$0xff]  ;;  %v836_v8 = vmul.f32 %v13170_v24, %v9069_v43  ;;  %v13174_v48 = vld [vmem:[#allocation128_spill] sm:$0xff]  ;;  %v2098_v43 = vperm.slane %v1463_v14, %v8749_v35  ;;  %v1479_v23 = vmul.f32 0.17677669, %v13177_v16 }
 0x278   :  { %v1464_v9 = vmul.f32 0.17677669, %v13165_v55  ;;  %v1453_v55 = vmul.f32 0.17677669, %v13169_v62  ;;  %v2075_v61 = vsel %vm1897_vm3, %v2074_v33, %v2073_v46  ;;  %v1454_v62 = vmul.f32 0.17677669, %v13173_v60 }
 0x279   :  { %v9375_v39 = vpop.xlane.xlu2 %1243  ;;  %v9377_v12 = vpop.xlane.xlu1 %1241  ;;  %v2076_v7 = vperm.slane %v1452_v47, %v8816_v3  ;;  %v1465_v51 = vmul.f32 0.17677669, %v13174_v48  ;;  %v2057_v48 = vperm.slane %v9368_v59, %v8885_v26  ;;  %v2103_v47 = vperm.slane %v1466_v10, %v8803_v6  ;;  %v13180_v59 = vld [vmem:[#allocation134_spill] sm:$0xff] }
 0x27a   :  { %13166 = vst [vmem:[#allocation54_spill] sm:$0xff] %v9375_v39  ;;  %v9381_v52 = vpop.xlane.xlu0 %1239  ;;  %v2099_v24 = vperm.slane %v1464_v9, %v8765_v49  ;;  %v9416_v39 = vperm.slane %v566_v31, 0  ;;  %v2078_v14 = vperm.slane %v1453_v55, %v8821_v28  ;;  %v13178_v9 = vld [vmem:[#allocation157_spill] sm:$0xff]  ;;  %v2080_v16 = vperm.slane %v1454_v62, %v8853_v17 }
 0x27b   :  { %13167 = vst [vmem:[#allocation83_spill] sm:$0xff] %v9377_v12  ;;  %v1481_v46 = vmul.f32 0.17677669, %v13178_v9  ;;  %v2077_v40 = vsel %vm1901_vm4, %v2076_v7, %v2075_v61  ;;  %v2101_v31 = vperm.slane %v1465_v51, %v8773_v0  ;;  %v1467_v33 = vmul.f32 0.17677669, %v13180_v59  ;;  %v13183_v7 = vld [vmem:[#allocation156_spill] sm:$0xff] }
 0x27c   :  { %13168 = vst [vmem:[#allocation56_spill] sm:$0xff] %v9381_v52  ;;  %v2100_v60 = vsel %vm1885_vm0, %v2099_v24, %v2098_v43  ;;  %v2130_v55 = vperm.slane %v1480_v34, %v8765_v49  ;;  %v2129_v61 = vperm.slane %v1479_v23, %v8749_v35  ;;  %v1482_v62 = vmul.f32 0.17677669, %v13183_v7 }
 0x27d   :  { %v13185_v51 = vunpack.c.h.bf16 %v9400_v5  ;;  %v13186_v10 = vunpack.c.l.bf16 %v9405_v18  ;;  %v2079_v34 = vsel %vm1905_vm5, %v2078_v14, %v2077_v40  ;;  %v13188_v23 = vunpack.c.l.bf16 %v9400_v5  ;;  %v13190_v14 = vld [vmem:[#allocation133_spill] sm:$0xff] }
 0x27e   :  { %1331 = vadd.xlane.f32.xlu1 %v837_v41  ;;  %1333 = vadd.xlane.f32.xlu2 %v838_v63  ;;  %v13179_v41 = vld [vmem:[#allocation116_spill] sm:$0xff]  ;;  %v1468_v40 = vmul.f32 0.17677669, %v13190_v14  ;;  %v1469_v5 = vmul.f32 0.17677669, %v13191_v56  ;;  %v2131_v22 = vsel %vm1885_vm0, %v2130_v55, %v2129_v61  ;;  %v2134_v12 = vperm.slane %v1482_v62, %v8803_v6  ;;  %v13194_v62 = vld [vmem:[#allocation121_spill] sm:$0xff] }
 0x27f   :  { %1329 = vadd.xlane.f32.xlu0 %v836_v8  ;;  %v1455_v63 = vmul.f32 0.17677669, %v13179_v41  ;;  %v840_v43 = vmul.f32 %v13185_v51, %v9416_v39  ;;  %v841_v24 = vmul.f32 %v13186_v10, %v9416_v39  ;;  %v13187_v41 = vld [vmem:[#allocation115_spill] sm:$0xff]  ;;  %v839_v7 = vmul.f32 %v13188_v23, %v9416_v39 }
 0x280   :  { %v1456_v59 = vmul.f32 0.17677669, %v13187_v41  ;;  %v2081_v51 = vsel %vm1909_vm6, %v2080_v16, %v2079_v34  ;;  %v2102_v10 = vsel %vm1889_vm1, %v2101_v31, %v2100_v60  ;;  %v13192_v23 = vld [vmem:[#allocation155_spill] sm:$0xff]  ;;  %v13193_v60 = vld [vmem:[#allocation162_spill] sm:$0xff]  ;;  %v12800_v56 = vunpack.c.h.bf16 %v9405_v18 }
 0x281   :  { %v9433_v9 = vpop.xlane.xlu2 %1249  ;;  %v9435_v8 = vpop.xlane.xlu1 %1247  ;;  %v2104_v41 = vsel %vm1893_vm2, %v2103_v47, %v2102_v10  ;;  %v1483_v54 = vmul.f32 0.17677669, %v13192_v23  ;;  %v2058_v55 = vsel %vm12819_vm10, %v2057_v48, %v9371_v13  ;;  %v13195_v10 = vld [vmem:[#allocation138_spill] sm:$0xff]  ;;  %v13198_v48 = vld [vmem:[#allocation161_spill] sm:$0xff] }
 0x282   :  { %13181 = vst [vmem:[#allocation71_spill] sm:$0xff] %v9433_v9  ;;  %v9439_v53 = vpop.xlane.xlu0 %1245  ;;  %v2132_v9 = vperm.slane %v1481_v46, %v8773_v0  ;;  %v2105_v46 = vperm.slane %v1467_v33, %v8800_v4  ;;  %v2084_v31 = vperm.slane %v1456_v59, %v8868_v38  ;;  %v1484_v33 = vmul.f32 0.17677669, %v13193_v60 }
 0x283   :  { %13182 = vst [vmem:[#allocation89_spill] sm:$0xff] %v9435_v8  ;;  %v9456_v8 = vld [vmem:[%s12312_s3 + $0x3d0] sm:$0xff]   ;;  %v2109_v59 = vperm.slane %v1469_v5, %v8821_v28  ;;  %v842_v23 = vmul.f32 %v12800_v56, %v9416_v39 }
 0x284   :  { %13184 = vst [vmem:[#allocation70_spill] sm:$0xff] %v9439_v53  ;;  %v2082_v53 = vperm.slane %v1455_v63, %v8862_v27  ;;  %v12799_v16 = vunpack.c.l.bf16 %v9456_v8  ;;  %v12798_v63 = vunpack.c.h.bf16 %v9456_v8  ;;  %v2133_v47 = vsel %vm1889_vm1, %v2132_v9, %v2131_v22 }
 0x285   :  { %13189 = vst [vmem:[#allocation76_spill] sm:$0xff] %v9456_v8  ;;  %v2106_v34 = vsel %vm1897_vm3, %v2105_v46, %v2104_v41  ;;  %v1470_v22 = vmul.f32 0.17677669, %v13195_v10  ;;  %v2136_v9 = vperm.slane %v1483_v54, %v8800_v4  ;;  %v2135_v13 = vsel %vm1893_vm2, %v2134_v12, %v2133_v47  ;;  %v9511_v47 = vld [vmem:[%s12312_s3 + $0x3d8] sm:$0xff]   ;;  %v13206_v8 = vld [vmem:[#allocation166_spill] sm:$0xff] }
 0x286   :  { %1337 = vadd.xlane.f32.xlu1 %v840_v43  ;;  %1339 = vadd.xlane.f32.xlu2 %v841_v24  ;;  %v2083_v61 = vsel %vm12809_vm7, %v2082_v53, %v2081_v51  ;;  %v1457_v43 = vmul.f32 0.17677669, %v13194_v62  ;;  %v2107_v24 = vperm.slane %v1468_v40, %v8816_v3  ;;  %v1485_v53 = vmul.f32 0.17677669, %v13198_v48  ;;  %13201 = vst [vmem:[#allocation101_spill] sm:$0xff] %v9511_v47 }
 0x287   :  { %1335 = vadd.xlane.f32.xlu0 %v839_v7  ;;  %v843_v40 = vmul.f32 %v12799_v16, %v9416_v39  ;;  %v844_v5 = vmul.f32 %v12798_v63, %v9416_v39  ;;  %v13200_v54 = vperm.slane %v9358_v21, %v8914_v37  ;;  %v2085_v12 = vsel %vm12810_vm8, %v2084_v31, %v2083_v61  ;;  %v9516_v21 = vld [vmem:[%s12312_s3 + $0x3e0] sm:$0xff]   ;;  %v13204_v61 = vld [vmem:[#allocation137_spill] sm:$0xff]  ;;  %v13205_v63 = vld [vmem:[#allocation160_spill] sm:$0xff] }
 0x288   :  { %v2138_v46 = vperm.slane %v1484_v33, %v8816_v3  ;;  %13202 = vst [vmem:[#allocation108_spill] sm:$0xff] %v9516_v21  ;;  %v2086_v60 = vperm.slane %v1457_v43, %v8888_v29  ;;  %v2108_v33 = vsel %vm1901_vm4, %v2107_v24, %v2106_v34  ;;  %v1471_v62 = vmul.f32 0.17677669, %v13204_v61  ;;  %v13207_v34 = vld [vmem:[#allocation119_spill] sm:$0xff]  ;;  %v13208_v61 = vld [vmem:[#allocation144_spill] sm:$0xff]  ;;  %v13211_v24 = vld [vmem:[#allocation165_spill] sm:$0xff] }
 0x289   :  { %v9483_v7 = vpop.xlane.xlu2 %1255  ;;  %v9485_v14 = vpop.xlane.xlu1 %1253  ;;  %v9501_v41 = vsel %vm12818_vm11, %v13200_v54, %v2058_v55  ;;  %v13203_v55 = vld [vmem:[#allocation120_spill] sm:$0xff]  ;;  %v2110_v10 = vsel %vm1905_vm5, %v2109_v59, %v2108_v33  ;;  %v2111_v48 = vperm.slane %v1470_v22, %v8853_v17  ;;  %v2137_v54 = vsel %vm1897_vm3, %v2136_v9, %v2135_v13  ;;  %v13210_v33 = vld [vmem:[#allocation143_spill] sm:$0xff] }
 0x28a   :  { %13196 = vst [vmem:[#allocation88_spill] sm:$0xff] %v9483_v7  ;;  %v9489_v51 = vpop.xlane.xlu0 %1251  ;;  %v1458_v31 = vmul.f32 0.17677669, %v13203_v55  ;;  %v1486_v16 = vmul.f32 0.17677669, %v13205_v63  ;;  %v2140_v56 = vperm.slane %v1485_v53, %v8821_v28  ;;  %v12805_v43 = vunpack.c.h.bf16 %v9511_v47  ;;  %v13209_v63 = vld [vmem:[#allocation102_spill] sm:$0xff] }
 0x28b   :  { %13197 = vst [vmem:[#allocation94_spill] sm:$0xff] %v9485_v14  ;;  %v1487_v18 = vmul.f32 0.17677669, %v13206_v8  ;;  %v1459_v55 = vmul.f32 0.17677669, %v13207_v34  ;;  %v2139_v22 = vsel %vm1901_vm4, %v2138_v46, %v2137_v54  ;;  %v12808_v9 = vunpack.c.l.bf16 %v9511_v47 }
 0x28c   :  { %13199 = vst [vmem:[#allocation75_spill] sm:$0xff] %v9489_v51  ;;  %v1472_v59 = vmul.f32 0.17677669, %v13208_v61  ;;  %v9535_v13 = vmul.f32 0.17677669, %v13209_v63  ;;  %v2087_v8 = vsel %vm1921_vm9, %v2086_v60, %v2085_v12  ;;  %v2088_v53 = vperm.slane %v1458_v31, %v8885_v26 }
 0x28d   :  { %v1473_v34 = vmul.f32 0.17677669, %v13210_v33  ;;  %v2142_v61 = vperm.slane %v1486_v16, %v8853_v17  ;;  %v1488_v46 = vmul.f32 0.17677669, %v13211_v24  ;;  %v2141_v63 = vsel %vm1905_vm5, %v2140_v56, %v2139_v22  ;;  %v9569_v56 = vld [vmem:[%s12312_s3 + $0x3e8] sm:$0xff]  }
 0x28e   :  { %1343 = vadd.xlane.f32.xlu1 %v843_v40  ;;  %1345 = vadd.xlane.f32.xlu2 %v844_v5  ;;  %v2113_v40 = vperm.slane %v1471_v62, %v8862_v27  ;;  %v2112_v5 = vsel %vm1909_vm6, %v2111_v48, %v2110_v10  ;;  %v2144_v12 = vperm.slane %v1487_v18, %v8862_v27  ;;  %v13215_v62 = vunpack.c.l.bf16 %v9516_v21  ;;  %v13216_v10 = vld [vmem:[#allocation103_spill] sm:$0xff] }
 0x28f   :  { %1341 = vadd.xlane.f32.xlu0 %v842_v23  ;;  %v846_v31 = vmul.f32 %v12805_v43, %v9416_v39  ;;  %v9559_v48 = vmul.f32 0.17677669, %v13216_v10  ;;  %v2090_v24 = vperm.slane %v1459_v55, %v8914_v37  ;;  %v2115_v33 = vperm.slane %v1472_v59, %v8868_v38  ;;  %13217 = vst [vmem:[#allocation92_spill] sm:$0xff] %v9569_v56  ;;  %v13218_v43 = vld [vmem:[#allocation126_spill] sm:$0xff] }
 0x290   :  { %v847_v16 = vmul.f32 %v13215_v62, %v9416_v39  ;;  %v845_v18 = vmul.f32 %v12808_v9, %v9416_v39  ;;  %v2089_v22 = vsel %vm12819_vm10, %v2088_v53, %v2087_v8  ;;  %v1460_v62 = vmul.f32 0.17677669, %v13218_v43  ;;  %v13220_v55 = vld [vmem:[#allocation142_spill] sm:$0xff]  ;;  %v13221_v9 = vld [vmem:[#allocation171_spill] sm:$0xff] }
 0x291   :  { %v9544_v23 = vpop.xlane.xlu2 %1261  ;;  %v9546_v54 = vpop.xlane.xlu1 %1259  ;;  %v2114_v10 = vsel %vm12809_vm7, %v2113_v40, %v2112_v5  ;;  %v2143_v59 = vsel %vm1909_vm6, %v2142_v61, %v2141_v63  ;;  %v2146_v47 = vperm.slane %v1488_v46, %v8868_v38  ;;  %v1490_v7 = vmul.f32 0.17677669, %v13221_v9  ;;  %v13222_v5 = vld [vmem:[#allocation148_spill] sm:$0xff]  ;;  %v13223_v46 = vld [vmem:[#allocation125_spill] sm:$0xff] }
 0x292   :  { %13212 = vst [vmem:[#allocation93_spill] sm:$0xff] %v9544_v23  ;;  %v9550_v60 = vpop.xlane.xlu0 %1257  ;;  %v13219_v23 = vld [vmem:[#allocation164_spill] sm:$0xff]  ;;  %v2117_v14 = vperm.slane %v1473_v34, %v8888_v29  ;;  %v2145_v51 = vsel %vm12809_vm7, %v2144_v12, %v2143_v59  ;;  %v12812_v43 = vunpack.c.l.bf16 %v9569_v56  ;;  %v12811_v8 = vunpack.c.h.bf16 %v9569_v56  ;;  %v13224_v12 = vld [vmem:[#allocation170_spill] sm:$0xff] }
 0x293   :  { %13213 = vst [vmem:[#allocation74_spill] sm:$0xff] %v9546_v54  ;;  %v1489_v54 = vmul.f32 0.17677669, %v13219_v23  ;;  %v2063_v53 = vperm.slane %v9559_v48, %v8906_v45  ;;  %v2116_v40 = vsel %vm12810_vm8, %v2115_v33, %v2114_v10  ;;  %v1475_v61 = vmul.f32 0.17677669, %v13222_v5  ;;  %v13230_v5 = vld [vmem:[#allocation169_spill] sm:$0xff] }
 0x294   :  { %13214 = vst [vmem:[#allocation107_spill] sm:$0xff] %v9550_v60  ;;  %v1474_v60 = vmul.f32 0.17677669, %v13220_v55  ;;  %v12813_v9 = vunpack.c.h.bf16 %v9516_v21  ;;  %v2091_v34 = vsel %vm12818_vm11, %v2090_v24, %v2089_v22  ;;  %v1461_v23 = vmul.f32 0.17677669, %v13223_v46  ;;  %v13227_v22 = vld [vmem:[#allocation147_spill] sm:$0xff] }
 0x295   :  { %v2148_v63 = vperm.slane %v1489_v54, %v8888_v29  ;;  %v2147_v33 = vsel %vm12810_vm8, %v2146_v47, %v2145_v51  ;;  %v2150_v10 = vperm.slane %v1490_v7, %v8885_v26  ;;  %vm12821_vm7 = vcmask 1042434   ;;  %v13229_v7 = vld [vmem:[#allocation124_spill] sm:$0xff]  ;;  %v13234_v56 = vld [vmem:[#allocation146_spill] sm:$0xff] }
 0x296   :  { %1349 = vadd.xlane.f32.xlu1 %v846_v31  ;;  %1351 = vadd.xlane.f32.xlu2 %v847_v16  ;;  %v1491_v31 = vmul.f32 0.17677669, %v13224_v12  ;;  %v2092_v16 = vperm.slane %v1460_v62, %v8911_v58  ;;  %v2119_v48 = vperm.slane %v1474_v60, %v8885_v26  ;;  %v2118_v24 = vsel %vm1921_vm9, %v2117_v14, %v2116_v40  ;;  %v9619_v40 = vld [vmem:[%s12312_s3 + $0x3f0] sm:$0xff]   ;;  %v9624_v12 = vld [vmem:[%s12312_s3 + $0x3f8] sm:$0xff]  }
 0x297   :  { %1347 = vadd.xlane.f32.xlu0 %v845_v18  ;;  %v1476_v54 = vmul.f32 0.17677669, %v13227_v22  ;;  %v849_v62 = vmul.f32 %v12812_v43, %v9416_v39  ;;  %v850_v51 = vmul.f32 %v12811_v8, %v9416_v39  ;;  %vm12822_vm8 = vcmask 1043459   ;;  %13231 = vst [vmem:[#allocation97_spill] sm:$0xff] %v9619_v40 }
 0x298   :  { %v1462_v47 = vmul.f32 0.17677669, %v13229_v7  ;;  %v2121_v60 = vperm.slane %v1475_v61, %v8914_v37  ;;  %v1492_v46 = vmul.f32 0.17677669, %v13230_v5  ;;  %v848_v14 = vmul.f32 %v12813_v9, %v9416_v39  ;;  %13232 = vst [vmem:[#allocation98_spill] sm:$0xff] %v9624_v12  ;;  %v13233_v5 = vld [vmem:[#allocation175_spill] sm:$0xff] }
 0x299   :  { %v9596_v18 = vpop.xlane.xlu2 %1267  ;;  %v9598_v55 = vpop.xlane.xlu1 %1265  ;;  %v2094_v22 = vperm.slane %v1461_v23, %v8906_v45  ;;  %v2149_v61 = vsel %vm1921_vm9, %v2148_v63, %v2147_v33  ;;  %v2152_v7 = vperm.slane %v1491_v31, %v8914_v37  ;;  %v1493_v8 = vmul.f32 0.17677669, %v13233_v5 }
 0x29a   :  { %13225 = vst [vmem:[#allocation106_spill] sm:$0xff] %v9596_v18  ;;  %v9602_v59 = vpop.xlane.xlu0 %1263  ;;  %v2093_v43 = vsel %vm1933_vm12, %v2092_v16, %v2091_v34  ;;  %v2120_v9 = vsel %vm12819_vm10, %v2119_v48, %v2118_v24  ;;  %v1477_v21 = vmul.f32 0.17677669, %v13234_v56  ;;  %v13235_v18 = vld [vmem:[#allocation153_spill] sm:$0xff]  ;;  %v12825_v23 = vunpack.c.h.bf16 %v9619_v40  ;;  %v13236_v16 = vld [vmem:[#allocation174_spill] sm:$0xff] }
 0x29b   :  { %13226 = vst [vmem:[#allocation81_spill] sm:$0xff] %v9598_v55  ;;  %v2123_v55 = vperm.slane %v1476_v54, %v8911_v58  ;;  %v1478_v52 = vmul.f32 0.17677669, %v13235_v18  ;;  %v12824_v63 = vunpack.c.l.bf16 %v9624_v12  ;;  %v2122_v31 = vsel %vm12818_vm11, %v2121_v60, %v2120_v9 }
 0x29c   :  { %13228 = vst [vmem:[#allocation112_spill] sm:$0xff] %v9602_v59  ;;  %v2151_v59 = vsel %vm12819_vm10, %v2150_v10, %v2149_v61  ;;  %v2154_v34 = vperm.slane %v1492_v46, %v8911_v58  ;;  %v1494_v48 = vmul.f32 0.17677669, %v13236_v16  ;;  %v12826_v56 = vunpack.c.l.bf16 %v9619_v40 }
 0x29d   :  { %v13237_v33 = vperm.slane %v9350_v44, %v8911_v58  ;;  %v2065_v18 = vperm.slane %v9535_v13, %v9042_v42  ;;  %v2153_v24 = vsel %vm12818_vm11, %v2152_v7, %v2151_v59  ;;  %v2156_v9 = vperm.slane %v1493_v8, %v8906_v45 }
 0x29e   :  { %1355 = vadd.xlane.f32.xlu1 %v849_v62  ;;  %1357 = vadd.xlane.f32.xlu2 %v850_v51  ;;  %v2096_v62 = vperm.slane %v1462_v47, %v9042_v42  ;;  %v2095_v51 = vsel %vm1937_vm13, %v2094_v22, %v2093_v43  ;;  %v2125_v60 = vperm.slane %v1477_v21, %v8906_v45  ;;  %vm2414_vm11 = vcmask 1044484  }
 0x29f   :  { %1353 = vadd.xlane.f32.xlu0 %v848_v14  ;;  %v2062_v10 = vsel %vm1933_vm12, %v13237_v33, %v9501_v41  ;;  %v2124_v41 = vsel %vm1933_vm12, %v2123_v55, %v2122_v31  ;;  %v2127_v13 = vperm.slane %v1478_v52, %v9042_v42  ;;  %v852_v8 = vmul.f32 %v12825_v23, %v9416_v39  ;;  %v13264_v23 = vld [vmem:[#allocation205_spill] sm:$0xff] }
 0x2a0   :  { %v2064_v54 = vsel %vm1937_vm13, %v2063_v53, %v2062_v10  ;;  %v853_v43 = vmul.f32 %v12824_v63, %v9416_v39  ;;  %v13239_v21 = vperm.slane %v9329_v1, %v9042_v42  ;;  %v2158_v55 = vperm.slane %v1494_v48, %v9042_v42 }
 0x2a1   :  { %v9655_v46 = vpop.xlane.xlu2 %1273  ;;  %v9657_v44 = vpop.xlane.xlu1 %1271  ;;  %v851_v52 = vmul.f32 %v12826_v56, %v9416_v39  ;;  %v2155_v59 = vsel %vm1933_vm12, %v2154_v34, %v2153_v24  ;;  %v2409_v47 = vsel %vm12820_vm15, %v9338_v25, %v9111_v11  ;;  %v2066_v22 = vsel %vm1941_vm14, %v2065_v18, %v2064_v54 }
 0x2a2   :  { %v9661_v14 = vpop.xlane.xlu0 %1269  ;;  %v2035_v53 = vsel %vm1941_vm14, %v13239_v21, %v9355_v15  ;;  %v2157_v61 = vsel %vm1937_vm13, %v2156_v9, %v2155_v59  ;;  %v2411_v1 = vsel %vm12821_vm7, %v9344_v30, %v2409_v47  ;;  %v2097_v15 = vsel %vm1941_vm14, %v2096_v62, %v2095_v51  ;;  %v13245_v21 = vld [vmem:[#allocation179_spill] sm:$0xff]  ;;  %v13247_v47 = vld [vmem:[#allocation178_spill] sm:$0xff] }
 0x2a3   :  { %13238 = vst [vmem:[#allocation111_spill] sm:$0xff] %v9661_v14  ;;  %v2126_v7 = vsel %vm1937_vm13, %v2125_v60, %v2124_v41  ;;  %vm2416_vm10 = vcmask 1045509   ;;  %v2413_v5 = vsel %vm12822_vm8, %v2035_v53, %v2411_v1  ;;  %vm12834_vm15 = vcmask 1046534   ;;  %v13241_v60 = vld [vmem:[#allocation173_spill] sm:$0xff]  ;;  %v13248_v1 = vld [vmem:[#allocation184_spill] sm:$0xff] }
 0x2a4   :  { %v2128_v31 = vsel %vm1941_vm14, %v2127_v13, %v2126_v7  ;;  %v12823_v11 = vunpack.c.h.bf16 %v9624_v12  ;;  %v2159_v25 = vsel %vm1941_vm14, %v2158_v55, %v2157_v61  ;;  %v2415_v34 = vsel %vm2414_vm11, %v2066_v22, %v2413_v5  ;;  %v13242_v13 = vld [vmem:[#allocation180_spill] sm:$0xff]  ;;  %v13265_v12 = vld [vmem:[#allocation193_spill] sm:$0xff] }
 0x2a5   :  { %vm12833_vm7 = vcmask 1047559   ;;  %v2417_v30 = vsel %vm2416_vm10, %v2097_v15, %v2415_v34  ;;  %vm12832_vm8 = vcmp.lt.s32.totalorder %v8749_v35, 8  ;;  %v1495_v41 = vmul.f32 0.17677669, %v13241_v60  ;;  %v13253_v60 = vld [vmem:[#allocation202_spill] sm:$0xff] }
 0x2a6   :  { %1361 = vadd.xlane.f32.xlu1 %v852_v8  ;;  %1363 = vadd.xlane.f32.xlu2 %v853_v43  ;;  %v2419_v33 = vsel %vm12834_vm15, %v2128_v31, %v2417_v30  ;;  %v854_v24 = vmul.f32 %v12823_v11, %v9416_v39  ;;  %v1496_v8 = vmul.f32 0.17677669, %v13242_v13  ;;  %v1497_v53 = vmul.f32 0.17677669, %v13245_v21  ;;  %v13249_v31 = vld [vmem:[#allocation183_spill] sm:$0xff]  ;;  %v13254_v13 = vld [vmem:[#allocation201_spill] sm:$0xff] }
 0x2a7   :  { %1359 = vadd.xlane.f32.xlu0 %v851_v52  ;;  %v2421_v18 = vsel %vm12833_vm7, %v2159_v25, %v2419_v33  ;;  %v2160_v52 = vperm.slane %v1495_v41, %v8749_v35  ;;  %v1498_v22 = vmul.f32 0.17677669, %v13247_v47  ;;  %v1499_v15 = vmul.f32 0.17677669, %v13248_v1  ;;  %v13255_v21 = vld [vmem:[#allocation182_spill] sm:$0xff]  ;;  %v13256_v47 = vld [vmem:[#allocation189_spill] sm:$0xff] }
 0x2a8   :  { %v9708_v9 = vsel %vm12832_vm8, %v2421_v18, -1e+30  ;;  %v2161_v59 = vperm.slane %v1496_v8, %v8765_v49  ;;  %v2163_v61 = vperm.slane %v1497_v53, %v8773_v0  ;;  %v1500_v25 = vmul.f32 0.17677669, %v13249_v31  ;;  %v13257_v31 = vld [vmem:[#allocation200_spill] sm:$0xff]  ;;  %v13258_v11 = vld [vmem:[#allocation207_spill] sm:$0xff] }
 0x2a9   :  { %v9694_v16 = vpop.xlane.xlu1 %1277  ;;  %v9696_v48 = vpop.xlane.xlu2 %1279  ;;  %13240 = vst [vmem:[#allocation99_spill] sm:$0xff] %v9708_v9  ;;  %v2165_v5 = vperm.slane %v1498_v22, %v8803_v6  ;;  %v2167_v18 = vperm.slane %v1499_v15, %v8800_v4  ;;  %v1511_v41 = vmul.f32 0.17677669, %v13253_v60  ;;  %v1512_v8 = vmul.f32 0.17677669, %v13254_v13 }
 0x2aa   :  { %v9699_v10 = vpop.xlane.xlu0 %1275  ;;  %v2162_v7 = vsel %vm1885_vm0, %v2161_v59, %v2160_v52  ;;  %v1501_v53 = vmul.f32 0.17677669, %v13255_v21  ;;  %v2169_v59 = vperm.slane %v1500_v25, %v8816_v3  ;;  %v1502_v22 = vmul.f32 0.17677669, %v13256_v47 }
 0x2ab   :  { %v2164_v33 = vsel %vm1889_vm1, %v2163_v61, %v2162_v7  ;;  %v1513_v61 = vmul.f32 0.17677669, %v13257_v31  ;;  %v2191_v15 = vperm.slane %v1511_v41, %v8749_v35  ;;  %v2192_v7 = vperm.slane %v1512_v8, %v8765_v49 }
 0x2ac   :  { %v2166_v52 = vsel %vm1893_vm2, %v2165_v5, %v2164_v33  ;;  %v1514_v60 = vmul.f32 0.17677669, %v13258_v11  ;;  %v2171_v13 = vperm.slane %v1501_v53, %v8821_v28  ;;  %v2173_v5 = vperm.slane %v1502_v22, %v8853_v17  ;;  %v13259_v33 = vld [vmem:[#allocation188_spill] sm:$0xff] }
 0x2ad   :  { %v2168_v1 = vsel %vm1897_vm3, %v2167_v18, %v2166_v52  ;;  %v1503_v25 = vmul.f32 0.17677669, %v13259_v33  ;;  %v2194_v18 = vperm.slane %v1513_v61, %v8773_v0  ;;  %v13261_v52 = vld [vmem:[#allocation206_spill] sm:$0xff]  ;;  %v2193_v11 = vsel %vm1885_vm0, %v2192_v7, %v2191_v15 }
 0x2ae   :  { %2433 = vmax.xlane.f32.xlu1 %v9708_v9  ;;  %v2170_v21 = vsel %vm1901_vm4, %v2169_v59, %v2168_v1  ;;  %v1515_v41 = vmul.f32 0.17677669, %v13261_v52  ;;  %v2196_v8 = vperm.slane %v1514_v60, %v8803_v6  ;;  %v13263_v59 = vld [vmem:[#allocation187_spill] sm:$0xff]  ;;  %v1516_v56 = vmul.f32 0.17677669, %v13264_v23 }
 0x2af   :  { %1365 = vadd.xlane.f32.xlu0 %v854_v24  ;;  %v2172_v53 = vsel %vm1905_vm5, %v2171_v13, %v2170_v21  ;;  %v1504_v22 = vmul.f32 0.17677669, %v13263_v59  ;;  %v2175_v33 = vperm.slane %v1503_v25, %v8862_v27  ;;  %v1505_v61 = vmul.f32 0.17677669, %v13265_v12  ;;  %v13266_v9 = vld [vmem:[#allocation211_spill] sm:$0xff]  ;;  %v13268_v21 = vld [vmem:[#allocation224_spill] sm:$0xff] }
 0x2b0   :  { %v2174_v1 = vsel %vm1909_vm6, %v2173_v5, %v2172_v53  ;;  %v2195_v52 = vsel %vm1889_vm1, %v2194_v18, %v2193_v11  ;;  %v2198_v40 = vperm.slane %v1515_v41, %v8800_v4  ;;  %v1517_v15 = vmul.f32 0.17677669, %v13266_v9  ;;  %v13267_v60 = vld [vmem:[#allocation223_spill] sm:$0xff]  ;;  %v13269_v53 = vld [vmem:[#allocation229_spill] sm:$0xff]  ;;  %v13272_v11 = vld [vmem:[#allocation210_spill] sm:$0xff] }
 0x2b1   :  { %v9711_v54 = vpop.xlane.xlu1 %1283  ;;  %v9713_v62 = vpop.xlane.xlu2 %1285  ;;  %v2197_v7 = vsel %vm1893_vm2, %v2196_v8, %v2195_v52  ;;  %v1528_v13 = vmul.f32 0.17677669, %v13267_v60  ;;  %v1527_v59 = vmul.f32 0.17677669, %v13268_v21  ;;  %v2177_v5 = vperm.slane %v1504_v22, %v8868_v38  ;;  %v13273_v21 = vld [vmem:[#allocation209_spill] sm:$0xff] }
 0x2b2   :  { %v9715_v51 = vpop.xlane.xlu0 %1281  ;;  %v1529_v25 = vmul.f32 0.17677669, %v13269_v53  ;;  %vm13270_vm8 = vcmask 589312   ;;  %v2200_v18 = vperm.slane %v1516_v56, %v8816_v3  ;;  %v1518_v41 = vmul.f32 0.17677669, %v13272_v11 }
 0x2b3   :  { %v2176_v23 = vsel %vm13270_vm8, %v2175_v33, %v2174_v1  ;;  %v2179_v8 = vperm.slane %v1505_v61, %v8888_v29  ;;  %v2199_v52 = vsel %vm1897_vm3, %v2198_v40, %v2197_v7  ;;  %v2202_v22 = vperm.slane %v1517_v15, %v8821_v28  ;;  %v13274_v33 = vld [vmem:[#allocation228_spill] sm:$0xff] }
 0x2b4   :  { %v1519_v1 = vmul.f32 0.17677669, %v13273_v21  ;;  %v2222_v56 = vperm.slane %v1527_v59, %v8749_v35  ;;  %v1530_v53 = vmul.f32 0.17677669, %v13274_v33  ;;  %vm13275_vm8 = vcmask 654912  }
 0x2b5   :  { %v2178_v11 = vsel %vm13275_vm8, %v2177_v5, %v2176_v23  ;;  %v2225_v61 = vperm.slane %v1529_v25, %v8773_v0  ;;  %v2201_v15 = vsel %vm1901_vm4, %v2200_v18, %v2199_v52  ;;  %v2204_v7 = vperm.slane %v1518_v41, %v8853_v17  ;;  %v13279_v23 = vld [vmem:[#allocation234_spill] sm:$0xff] }
 0x2b6   :  { %v2203_v59 = vsel %vm1905_vm5, %v2202_v22, %v2201_v15  ;;  %v2206_v5 = vperm.slane %v1519_v1, %v8862_v27  ;;  %v2227_v25 = vperm.slane %v1530_v53, %v8803_v6  ;;  %vm13281_vm8 = vcmask 786112   ;;  %v13282_v53 = vld [vmem:[#allocation198_spill] sm:$0xff] }
 0x2b7   :  { %v2205_v22 = vsel %vm1909_vm6, %v2204_v7, %v2203_v59  ;;  %v1545_v59 = vmul.f32 0.17677669, %v9087_v36  ;;  %vm13288_vm7 = vcmask 851712   ;;  %vm13290_vm15 = vcmask 654912  }
 0x2b9   :  { %v9719_v43 = vpop.xlane.xlu1 %1289  ;;  %v9721_v39 = vpop.xlane.xlu2 %1291 }
 0x2ba   :  { %13243 = vst [vmem:[#allocation130_spill] sm:$0xff] %v9719_v43  ;;  %v9724_v55 = vpop.xlane.xlu0 %1287 }
 0x2bb   :  { %13244 = vst [vmem:[#allocation129_spill] sm:$0xff] %v9721_v39  ;;  %v13280_v39 = vld [vmem:[#allocation215_spill] sm:$0xff] }
 0x2bc   :  { %13246 = vst [vmem:[#allocation110_spill] sm:$0xff] %v9724_v55  ;;  %v1521_v18 = vmul.f32 0.17677669, %v13280_v39  ;;  %v1508_v39 = vmul.f32 0.17677669, %v13282_v53 }
 0x2c1   :  { %v9734_v34 = vpop.xlane.xlu1 %1295  ;;  %v9736_v30 = vpop.xlane.xlu2 %1297 }
 0x2c2   :  { %13250 = vst [vmem:[#allocation117_spill] sm:$0xff] %v9734_v34  ;;  %v9740_v24 = vpop.xlane.xlu0 %1293  ;;  %v13277_v34 = vld [vmem:[#allocation216_spill] sm:$0xff] }
 0x2c3   :  { %13251 = vst [vmem:[#allocation128_spill] sm:$0xff] %v9736_v30  ;;  %v1520_v21 = vmul.f32 0.17677669, %v13277_v34  ;;  %v1543_v34 = vmul.f32 0.17677669, %v9022_v19 }
 0x2c4   :  { %13252 = vst [vmem:[#allocation135_spill] sm:$0xff] %v9740_v24  ;;  %v13278_v24 = vld [vmem:[#allocation227_spill] sm:$0xff] }
 0x2c5   :  { %v1531_v33 = vmul.f32 0.17677669, %v13278_v24  ;;  %v2208_v1 = vperm.slane %v1520_v21, %v8868_v38  ;;  %v2253_v53 = vperm.slane %v1543_v34, %v8749_v35 }
 0x2c7   :  { %v2229_v19 = vperm.slane %v1531_v33, %v8800_v4 }
 0x2c9   :  { %v9757_v63 = vpop.xlane.xlu1 %1301  ;;  %v9759_v47 = vpop.xlane.xlu2 %1303 }
 0x2ca   :  { %13260 = vst [vmem:[#allocation151_spill] sm:$0xff] %v9757_v63  ;;  %v9763_v31 = vpop.xlane.xlu0 %1299  ;;  %v13271_v63 = vld [vmem:[#allocation192_spill] sm:$0xff] }
 0x2cb   :  { %13262 = vst [vmem:[#allocation152_spill] sm:$0xff] %v9763_v31  ;;  %v1506_v12 = vmul.f32 0.17677669, %v13271_v63  ;;  %v2223_v63 = vperm.slane %v1528_v13, %v8765_v49  ;;  %v13276_v31 = vld [vmem:[#allocation191_spill] sm:$0xff]  ;;  %v2180_v13 = vsel %vm1921_vm9, %v2179_v8, %v2178_v11  ;;  %v1544_v8 = vmul.f32 0.17677669, %v9091_v20 }
 0x2cc   :  { %v1507_v30 = vmul.f32 0.17677669, %v13276_v31  ;;  %v13283_v11 = vld [vmem:[#allocation196_spill] sm:$0xff]  ;;  %v13285_v20 = vld [vmem:[#allocation233_spill] sm:$0xff] }
 0x2cd   :  { %v2181_v40 = vperm.slane %v1506_v12, %v8885_v26  ;;  %v2224_v31 = vsel %vm1885_vm0, %v2223_v63, %v2222_v56  ;;  %v1532_v12 = vmul.f32 0.17677669, %v13279_v23  ;;  %v1533_v15 = vmul.f32 0.17677669, %v13285_v20  ;;  %v13289_v20 = vld [vmem:[#allocation197_spill] sm:$0xff] }
 0x2ce   :  { %v2226_v41 = vsel %vm1889_vm1, %v2225_v61, %v2224_v31  ;;  %v2183_v52 = vperm.slane %v1507_v30, %v8914_v37  ;;  %v9826_v61 = vmul.f32 0.17677669, %v13283_v11  ;;  %v2210_v23 = vperm.slane %v1521_v18, %v8888_v29 }
 0x2cf   :  { %v2182_v24 = vsel %vm13281_vm8, %v2181_v40, %v2180_v13  ;;  %v13286_v40 = vld [vmem:[#allocation214_spill] sm:$0xff]  ;;  %v2228_v7 = vsel %vm1893_vm2, %v2227_v25, %v2226_v41  ;;  %v2231_v21 = vperm.slane %v1532_v12, %v8816_v3  ;;  %vm13287_vm8 = vcmask 589312   ;;  %v13291_v25 = vld [vmem:[#allocation232_spill] sm:$0xff] }
 0x2d0   :  { %13284 = vst [vmem:[#allocation157_spill] sm:$0xff] %v9826_v61  ;;  %v1522_v13 = vmul.f32 0.17677669, %v13286_v40  ;;  %v2207_v31 = vsel %vm13287_vm8, %v2206_v5, %v2205_v22  ;;  %v2254_v33 = vperm.slane %v1544_v8, %v8765_v49  ;;  %v2184_v11 = vsel %vm13288_vm7, %v2183_v52, %v2182_v24 }
 0x2d1   :  { %v9785_v14 = vpop.xlane.xlu1 %1307  ;;  %v9787_v9 = vpop.xlane.xlu2 %1309  ;;  %v9842_v43 = vmul.f32 0.17677669, %v13289_v20  ;;  %v2209_v40 = vsel %vm13290_vm15, %v2208_v1, %v2207_v31  ;;  %v1534_v41 = vmul.f32 0.17677669, %v13291_v25  ;;  %v2185_v12 = vperm.slane %v1508_v39, %v8911_v58  ;;  %v13298_v25 = vld [vmem:[#allocation237_spill] sm:$0xff]  ;;  %vm13307_vm15 = vmmov %vm13287_vm8 }
 0x2d2   :  { %v9792_v60 = vpop.xlane.xlu0 %1305  ;;  %v2230_v36 = vsel %vm1897_vm3, %v2229_v19, %v2228_v7  ;;  %v2233_v5 = vperm.slane %v1533_v15, %v8821_v28  ;;  %v1546_v18 = vmul.f32 0.17677669, %v9085_v50  ;;  %v2212_v34 = vperm.slane %v1522_v13, %v8885_v26  ;;  %v13292_v15 = vld [vmem:[#allocation220_spill] sm:$0xff]  ;;  %v13293_v7 = vld [vmem:[#allocation218_spill] sm:$0xff] }
 0x2d3   :  { %v2232_v8 = vsel %vm1901_vm4, %v2231_v21, %v2230_v36  ;;  %v2256_v52 = vperm.slane %v1545_v59, %v8773_v0  ;;  %v1547_v24 = vmul.f32 0.17677669, %v9143_v57  ;;  %v2211_v1 = vsel %vm1921_vm9, %v2210_v23, %v2209_v40 }
 0x2d4   :  { %v1535_v39 = vmul.f32 0.17677669, %v8931_v2  ;;  %v2255_v19 = vsel %vm1885_vm0, %v2254_v33, %v2253_v53  ;;  %v1523_v13 = vmul.f32 0.17677669, %v13292_v15  ;;  %v9863_v21 = vmul.f32 0.17677669, %v13293_v7 }
 0x2d5   :  { %v2235_v59 = vperm.slane %v1534_v41, %v8853_v17  ;;  %v9871_v23 = vsel %vm1933_vm12, %v2185_v12, %v2184_v11  ;;  %v2234_v2 = vsel %vm1905_vm5, %v2233_v5, %v2232_v8  ;;  %v2258_v53 = vperm.slane %v1546_v18, %v8803_v6  ;;  %v13299_v7 = vld [vmem:[#allocation219_spill] sm:$0xff]  ;;  %v13300_v12 = vld [vmem:[#allocation56_spill] sm:$0xff] }
 0x2d6   :  { %v1548_v33 = vmul.f32 0.17677669, %v9139_v32  ;;  %vm13297_vm7 = vcmask 786112   ;;  %v1536_v36 = vmul.f32 0.17677669, %v13298_v25  ;;  %v2257_v41 = vsel %vm1889_vm1, %v2256_v52, %v2255_v19  ;;  %v13301_v8 = vld [vmem:[#allocation83_spill] sm:$0xff] }
 0x2d7   :  { %v2213_v40 = vsel %vm13297_vm7, %v2212_v34, %v2211_v1  ;;  %v2260_v15 = vperm.slane %v1547_v24, %v8800_v4  ;;  %v1524_v22 = vmul.f32 0.17677669, %v13299_v7  ;;  %v2237_v11 = vperm.slane %v1535_v39, %v8862_v27  ;;  %v13302_v1 = vld [vmem:[#allocation63_spill] sm:$0xff]  ;;  %v13303_v52 = vld [vmem:[#allocation236_spill] sm:$0xff]  ;;  %v13304_v39 = vld [vmem:[#allocation50_spill] sm:$0xff] }
 0x2d8   :  { %v1559_v5 = vmul.f32 0.17677669, %v13300_v12  ;;  %v1560_v18 = vmul.f32 0.17677669, %v13301_v8  ;;  %v2214_v32 = vperm.slane %v1523_v13, %v8914_v37  ;;  %v2236_v34 = vsel %vm1909_vm6, %v2235_v59, %v2234_v2  ;;  %v13305_v8 = vld [vmem:[#allocation242_spill] sm:$0xff] }
 0x2d9   :  { %v9820_v63 = vpop.xlane.xlu1 %1313  ;;  %v9822_v56 = vpop.xlane.xlu2 %1315  ;;  %v1549_v25 = vmul.f32 0.17677669, %v13302_v1  ;;  %v1537_v19 = vmul.f32 0.17677669, %v13303_v52  ;;  %v2259_v24 = vsel %vm1893_vm2, %v2258_v53, %v2257_v41  ;;  %v2262_v7 = vperm.slane %v1548_v33, %v8816_v3  ;;  %v13308_v52 = vld [vmem:[#allocation70_spill] sm:$0xff] }
 0x2da   :  { %v9830_v30 = vpop.xlane.xlu0 %1311  ;;  %v1550_v61 = vmul.f32 0.17677669, %v13304_v39  ;;  %v2239_v12 = vperm.slane %v1536_v36, %v8868_v38  ;;  %v2261_v13 = vsel %vm1897_vm3, %v2260_v15, %v2259_v24  ;;  %v2238_v59 = vsel %vm13307_vm15, %v2237_v11, %v2236_v34  ;;  %v13310_v39 = vld [vmem:[#allocation43_spill] sm:$0xff]  ;;  %v13313_v11 = vld [vmem:[#allocation241_spill] sm:$0xff] }
 0x2db   :  { %v2284_v2 = vperm.slane %v1559_v5, %v8749_v35  ;;  %v2285_v1 = vperm.slane %v1560_v18, %v8765_v49  ;;  %v1562_v53 = vmul.f32 0.17677669, %v13308_v52  ;;  %vm13309_vm8 = vcmask 851712  }
 0x2dc   :  { %v2215_v33 = vsel %vm13309_vm8, %v2214_v32, %v2213_v40  ;;  %v2216_v41 = vperm.slane %v1524_v22, %v8911_v58  ;;  %v2264_v36 = vperm.slane %v1549_v25, %v8821_v28  ;;  %v1539_v5 = vmul.f32 0.17677669, %v13313_v11  ;;  %v13316_v25 = vld [vmem:[#allocation89_spill] sm:$0xff] }
 0x2dd   :  { %v2263_v18 = vsel %vm1901_vm4, %v2262_v7, %v2261_v13  ;;  %v2266_v34 = vperm.slane %v1550_v61, %v8853_v17  ;;  %vm13315_vm7 = vcmask 654912   ;;  %v1563_v52 = vmul.f32 0.17677669, %v13316_v25  ;;  %v13319_v13 = vld [vmem:[#allocation240_spill] sm:$0xff] }
 0x2de   :  { %v2240_v22 = vsel %vm13315_vm7, %v2239_v12, %v2238_v59  ;;  %v2286_v11 = vsel %vm1885_vm0, %v2285_v1, %v2284_v2  ;;  %v2289_v7 = vperm.slane %v1562_v53, %v8803_v6  ;;  %v1540_v61 = vmul.f32 0.17677669, %v13319_v13  ;;  %v13320_v59 = vld [vmem:[#allocation79_spill] sm:$0xff] }
 0x2df   :  { %v2245_v25 = vperm.slane %v1539_v5, %v8914_v37  ;;  %vm13322_vm15 = vcmask 786112   ;;  %v2291_v53 = vperm.slane %v1563_v52, %v8800_v4  ;;  %v13323_v13 = vld [vmem:[#allocation75_spill] sm:$0xff]  ;;  %vm13325_vm8 = vcmask 589312  }
 0x2e0   :  { %vm13326_vm7 = vcmask 851712  }
 0x2e1   :  { %v9866_v57 = vpop.xlane.xlu1 %1319  ;;  %v9868_v31 = vpop.xlane.xlu2 %1321 }
 0x2e2   :  { %13294 = vst [vmem:[#allocation116_spill] sm:$0xff] %v9866_v57  ;;  %v9876_v20 = vpop.xlane.xlu0 %1317  ;;  %v13306_v57 = vld [vmem:[#allocation54_spill] sm:$0xff] }
 0x2e3   :  { %13295 = vst [vmem:[#allocation134_spill] sm:$0xff] %v9868_v31  ;;  %v1538_v31 = vmul.f32 0.17677669, %v13305_v8  ;;  %v1561_v50 = vmul.f32 0.17677669, %v13306_v57  ;;  %v2241_v57 = vperm.slane %v1537_v19, %v8888_v29 }
 0x2e4   :  { %13296 = vst [vmem:[#allocation156_spill] sm:$0xff] %v9876_v20  ;;  %v1551_v8 = vmul.f32 0.17677669, %v13310_v39  ;;  %v13317_v39 = vld [vmem:[#allocation225_spill] sm:$0xff]  ;;  %v13321_v20 = vld [vmem:[#allocation71_spill] sm:$0xff] }
 0x2e5   :  { %v2243_v40 = vperm.slane %v1538_v31, %v8885_v26  ;;  %v2287_v32 = vperm.slane %v1561_v50, %v8773_v0  ;;  %v1553_v31 = vmul.f32 0.17677669, %v13320_v59  ;;  %v2242_v50 = vsel %vm1921_vm9, %v2241_v57, %v2240_v22  ;;  %v13324_v59 = vld [vmem:[#allocation67_spill] sm:$0xff] }
 0x2e6   :  { %v2268_v12 = vperm.slane %v1551_v8, %v8862_v27  ;;  %v2217_v8 = vsel %vm1933_vm12, %v2216_v41, %v2215_v33  ;;  %v1554_v57 = vmul.f32 0.17677669, %v13324_v59  ;;  %v13327_v41 = vld [vmem:[#allocation245_spill] sm:$0xff] }
 0x2e7   :  { %v2244_v2 = vsel %vm13322_vm15, %v2243_v40, %v2242_v50  ;;  %v2288_v1 = vsel %vm1889_vm1, %v2287_v32, %v2286_v11  ;;  %v2272_v22 = vperm.slane %v1553_v31, %v8888_v29  ;;  %v1541_v52 = vmul.f32 0.17677669, %v13327_v41  ;;  %v13328_v11 = vld [vmem:[#allocation94_spill] sm:$0xff] }
 0x2e8   :  { %v2290_v5 = vsel %vm1893_vm2, %v2289_v7, %v2288_v1  ;;  %v2246_v33 = vsel %vm13326_vm7, %v2245_v25, %v2244_v2  ;;  %v1566_v7 = vmul.f32 0.17677669, %v13328_v11  ;;  %v13332_v1 = vld [vmem:[#allocation244_spill] sm:$0xff]  ;;  %vm13333_vm15 = vcmask 654912  }
 0x2e9   :  { %v9907_v55 = vpop.xlane.xlu1 %1325  ;;  %v9909_v15 = vpop.xlane.xlu2 %1327 }
 0x2ea   :  { %13311 = vst [vmem:[#allocation115_spill] sm:$0xff] %v9907_v55  ;;  %v9915_v24 = vpop.xlane.xlu0 %1323  ;;  %v13318_v55 = vld [vmem:[#allocation62_spill] sm:$0xff]  ;;  %v2297_v11 = vperm.slane %v1566_v7, %v8853_v17  ;;  %v13339_v7 = vld [vmem:[#allocation84_spill] sm:$0xff] }
 0x2eb   :  { %13312 = vst [vmem:[#allocation133_spill] sm:$0xff] %v9909_v15  ;;  %v1526_v15 = vmul.f32 0.17677669, %v13317_v39  ;;  %v1552_v19 = vmul.f32 0.17677669, %v13318_v55 }
 0x2ec   :  { %13314 = vst [vmem:[#allocation139_spill] sm:$0xff] %v9915_v24  ;;  %v2265_v24 = vsel %vm1905_vm5, %v2264_v36, %v2263_v18  ;;  %v1564_v55 = vmul.f32 0.17677669, %v13321_v20  ;;  %v1565_v36 = vmul.f32 0.17677669, %v13323_v13  ;;  %v2247_v20 = vperm.slane %v1540_v61, %v8911_v58 }
 0x2ed   :  { %v2267_v39 = vsel %vm1909_vm6, %v2266_v34, %v2265_v24  ;;  %v2270_v18 = vperm.slane %v1552_v19, %v8868_v38  ;;  %v2220_v34 = vperm.slane %v1526_v15, %v9042_v42  ;;  %v13329_v15 = vperm.slane %v9842_v43, %v8906_v45 }
 0x2ee   :  { %v2269_v24 = vsel %vm13325_vm8, %v2268_v12, %v2267_v39  ;;  %v2293_v19 = vperm.slane %v1564_v55, %v8816_v3  ;;  %v13330_v12 = vld [vmem:[#allocation42_spill] sm:$0xff]  ;;  %v2292_v39 = vsel %vm1897_vm3, %v2291_v53, %v2290_v5  ;;  %v2295_v25 = vperm.slane %v1565_v36, %v8821_v28  ;;  %v13334_v36 = vld [vmem:[#allocation88_spill] sm:$0xff] }
 0x2ef   :  { %v9960_v61 = vsel %vm1937_vm13, %v13329_v15, %v9871_v23  ;;  %v1555_v31 = vmul.f32 0.17677669, %v13330_v12  ;;  %v13331_v55 = vperm.slane %v9863_v21, %v8906_v45  ;;  %v9970_v13 = vmul.f32 0.17677669, %v13332_v1  ;;  %v13335_v15 = vld [vmem:[#allocation107_spill] sm:$0xff] }
 0x2f0   :  { %v2271_v59 = vsel %vm13333_vm15, %v2270_v18, %v2269_v24  ;;  %v2274_v43 = vperm.slane %v1554_v57, %v8885_v26  ;;  %v2248_v41 = vsel %vm1933_vm12, %v2247_v20, %v2246_v33  ;;  %v1567_v5 = vmul.f32 0.17677669, %v13334_v36  ;;  %v13336_v57 = vld [vmem:[#allocation65_spill] sm:$0xff] }
 0x2f1   :  { %v9945_v40 = vpop.xlane.xlu1 %1331  ;;  %v9947_v32 = vpop.xlane.xlu2 %1333  ;;  %v2219_v2 = vsel %vm1937_vm13, %v13331_v55, %v2217_v8  ;;  %v2273_v53 = vsel %vm1921_vm9, %v2272_v22, %v2271_v59  ;;  %v2249_v21 = vperm.slane %v1541_v52, %v8906_v45  ;;  %v2294_v8 = vsel %vm1901_vm4, %v2293_v19, %v2292_v39 }
 0x2f2   :  { %v9953_v50 = vpop.xlane.xlu0 %1329  ;;  %v9975_v23 = vsel %vm1941_vm14, %v2220_v34, %v2219_v2  ;;  %v1568_v12 = vmul.f32 0.17677669, %v13335_v15  ;;  %v2276_v18 = vperm.slane %v1555_v31, %v8914_v37  ;;  %v1556_v24 = vmul.f32 0.17677669, %v13336_v57  ;;  %v13337_v34 = vld [vmem:[#allocation66_spill] sm:$0xff] }
 0x2f3   :  { %v9987_v55 = vmul.f32 0.17677669, %v13337_v34  ;;  %v2296_v20 = vsel %vm1905_vm5, %v2295_v25, %v2294_v8  ;;  %v2251_v22 = vperm.slane %v9970_v13, %v9042_v42  ;;  %vm13338_vm8 = vcmask 786112   ;;  %v13340_v2 = vld [vmem:[#allocation74_spill] sm:$0xff]  ;;  %v13341_v34 = vld [vmem:[#allocation93_spill] sm:$0xff] }
 0x2f4   :  { %v2275_v33 = vsel %vm13338_vm8, %v2274_v43, %v2273_v53  ;;  %v1576_v52 = vmul.f32 0.17677669, %v9655_v46  ;;  %v1575_v19 = vmul.f32 0.17677669, %v9657_v44  ;;  %v1557_v39 = vmul.f32 0.17677669, %v13339_v7 }
 0x2f5   :  { %v2299_v31 = vperm.slane %v1567_v5, %v8862_v27  ;;  %v1569_v1 = vmul.f32 0.17677669, %v13340_v2  ;;  %v1577_v59 = vmul.f32 0.17677669, %v9699_v10  ;;  %v2298_v25 = vsel %vm1909_vm6, %v2297_v11, %v2296_v20 }
 0x2f6   :  { %v2301_v8 = vperm.slane %v1568_v12, %v8868_v38  ;;  %v1591_v43 = vmul.f32 0.17677669, %v9759_v47  ;;  %v1592_v46 = vmul.f32 0.17677669, %v9792_v60  ;;  %v10004_v44 = vsel %vm1937_vm13, %v2249_v21, %v2248_v41 }
 0x2f7   :  { %v2277_v5 = vsel %vm13326_vm7, %v2276_v18, %v2275_v33  ;;  %v2278_v57 = vperm.slane %v1556_v24, %v8911_v58  ;;  %v2282_v10 = vperm.slane %v9987_v55, %v9042_v42  ;;  %v1570_v7 = vmul.f32 0.17677669, %v13341_v34 }
 0x2f8   :  { %v2316_v11 = vperm.slane %v1576_v52, %v8765_v49  ;;  %v2315_v12 = vperm.slane %v1575_v19, %v8749_v35  ;;  %v1578_v47 = vmul.f32 0.17677669, %v9694_v16  ;;  %vm13342_vm15 = vcmask 589312  }
 0x2f9   :  { %v1338_v36 = vpop.xlane.xlu1 %1337  ;;  %v1340_v15 = vpop.xlane.xlu2 %1339  ;;  %v2300_v60 = vsel %vm13342_vm15, %v2299_v31, %v2298_v25  ;;  %v2303_v41 = vperm.slane %v1569_v1, %v8888_v29  ;;  %v2318_v21 = vperm.slane %v1577_v59, %v8773_v0  ;;  %v1593_v18 = vmul.f32 0.17677669, %v9785_v14 }
 0x2fa   :  { %v1336_v53 = vpop.xlane.xlu0 %1335  ;;  %v2280_v24 = vperm.slane %v1557_v39, %v8906_v45  ;;  %vm13343_vm8 = vcmask 654912   ;;  %v2346_v33 = vperm.slane %v1591_v43, %v8749_v35  ;;  %v2347_v52 = vperm.slane %v1592_v46, %v8765_v49 }
 0x2fb   :  { %v2302_v20 = vsel %vm13343_vm8, %v2301_v8, %v2300_v60  ;;  %v2279_v19 = vsel %vm1933_vm12, %v2278_v57, %v2277_v5  ;;  %v1579_v16 = vmul.f32 0.17677669, %v9696_v48  ;;  %v1607_v2 = vmul.f32 0.17677669, %v1336_v53 }
 0x2fc   :  { %v1608_v31 = vmul.f32 0.17677669, %v1338_v36  ;;  %v2305_v1 = vperm.slane %v1570_v7, %v8885_v26  ;;  %v2317_v59 = vsel %vm1885_vm0, %v2316_v11, %v2315_v12  ;;  %v2320_v14 = vperm.slane %v1578_v47, %v8803_v6 }
 0x2fd   :  { %v1594_v39 = vmul.f32 0.17677669, %v9787_v9  ;;  %v2304_v25 = vsel %vm1921_vm9, %v2303_v41, %v2302_v20  ;;  %v2319_v8 = vsel %vm1889_vm1, %v2318_v21, %v2317_v59  ;;  %v2349_v43 = vperm.slane %v1593_v18, %v8773_v0  ;;  %v13345_v21 = vld [vmem:[#allocation106_spill] sm:$0xff] }
 0x2fe   :  { %v1595_v46 = vmul.f32 0.17677669, %v9830_v30  ;;  %v10033_v36 = vsel %vm1937_vm13, %v2280_v24, %v2279_v19  ;;  %v1580_v53 = vmul.f32 0.17677669, %v9715_v51  ;;  %v2348_v57 = vsel %vm1885_vm0, %v2347_v52, %v2346_v33 }
 0x2ff   :  { %v1609_v34 = vmul.f32 0.17677669, %v1340_v15  ;;  %v2322_v9 = vperm.slane %v1579_v16, %v8800_v4  ;;  %v2377_v11 = vperm.slane %v1607_v2, %v8749_v35  ;;  %v2378_v12 = vperm.slane %v1608_v31, %v8765_v49  ;;  %v13346_v49 = vld [vmem:[#allocation81_spill] sm:$0xff] }
 0x300   :  { %vm13344_vm7 = vcmask 786112   ;;  %v2321_v60 = vsel %vm1893_vm2, %v2320_v14, %v2319_v8  ;;  %v2351_v41 = vperm.slane %v1594_v39, %v8803_v6  ;;  %v1596_v51 = vmul.f32 0.17677669, %v9820_v63  ;;  %v13347_v39 = vld [vmem:[#allocation156_spill] sm:$0xff] }
 0x301   :  { %v1344_v5 = vpop.xlane.xlu1 %1343  ;;  %v1346_v48 = vpop.xlane.xlu2 %1345  ;;  %v10041_v30 = vsel %vm13344_vm7, %v2305_v1, %v2304_v25  ;;  %v10047_v18 = vmul.f32 0.17677669, %v13345_v21  ;;  %v1581_v15 = vmul.f32 0.17677669, %v9711_v54  ;;  %v2350_v24 = vsel %vm1889_vm1, %v2349_v43, %v2348_v57  ;;  %v13349_v57 = vld [vmem:[#allocation112_spill] sm:$0xff] }
 0x302   :  { %v1342_v7 = vpop.xlane.xlu0 %1341  ;;  %v2353_v20 = vperm.slane %v1595_v46, %v8800_v4  ;;  %v10053_v33 = vmul.f32 0.17677669, %v13346_v49  ;;  %v2324_v52 = vperm.slane %v1580_v53, %v8816_v3  ;;  %v2380_v19 = vperm.slane %v1609_v34, %v8773_v0  ;;  %v13348_v0 = vld [vmem:[#allocation110_spill] sm:$0xff] }
 0x303   :  { %v1610_v47 = vmul.f32 0.17677669, %v1342_v7  ;;  %v1611_v16 = vmul.f32 0.17677669, %v1344_v5  ;;  %v2323_v2 = vsel %vm1897_vm3, %v2322_v9, %v2321_v60  ;;  %v1597_v63 = vmul.f32 0.17677669, %v9822_v56 }
 0x304   :  { %v2379_v31 = vsel %vm1885_vm0, %v2378_v12, %v2377_v11  ;;  %v1582_v1 = vmul.f32 0.17677669, %v9713_v62  ;;  %v2352_v59 = vsel %vm1893_vm2, %v2351_v41, %v2350_v24  ;;  %v2355_v14 = vperm.slane %v1596_v51, %v8816_v3  ;;  %v13350_v12 = vld [vmem:[#allocation116_spill] sm:$0xff]  ;;  %v13351_v51 = vld [vmem:[#allocation130_spill] sm:$0xff]  ;;  %vm13355_vm0 = vmmov %vm13342_vm15 }
 0x305   :  { %v2382_v54 = vperm.slane %v1610_v47, %v8803_v6  ;;  %v1598_v25 = vmul.f32 0.17677669, %v13347_v39  ;;  %v2326_v8 = vperm.slane %v1581_v15, %v8821_v28  ;;  %v1583_v43 = vmul.f32 0.17677669, %v13348_v0  ;;  %v13354_v39 = vld [vmem:[#allocation139_spill] sm:$0xff] }
 0x306   :  { %v2354_v46 = vsel %vm1897_vm3, %v2353_v20, %v2352_v59  ;;  %v1612_v5 = vmul.f32 0.17677669, %v1346_v48  ;;  %v1571_v34 = vmul.f32 0.17677669, %v13349_v57  ;;  %v2325_v6 = vsel %vm1901_vm4, %v2324_v52, %v2323_v2 }
 0x307   :  { %v2381_v62 = vsel %vm1889_vm1, %v2380_v19, %v2379_v31  ;;  %v2384_v7 = vperm.slane %v1611_v16, %v8800_v4  ;;  %v2357_v11 = vperm.slane %v1597_v63, %v8821_v28  ;;  %v1599_v47 = vmul.f32 0.17677669, %v13350_v12  ;;  %v13352_v16 = vld [vmem:[#allocation134_spill] sm:$0xff]  ;;  %vm13358_vm1 = vmmov %vm13355_vm0 }
 0x308   :  { %v2383_v60 = vsel %vm1893_vm2, %v2382_v54, %v2381_v62  ;;  %v2328_v48 = vperm.slane %v1582_v1, %v8853_v17  ;;  %v1584_v21 = vmul.f32 0.17677669, %v13351_v51  ;;  %v2356_v15 = vsel %vm1901_vm4, %v2355_v14, %v2354_v46  ;;  %v13353_v54 = vld [vmem:[#allocation129_spill] sm:$0xff]  ;;  %vm13359_vm2 = vmmov %vm13343_vm8 }
 0x309   :  { %v1350_v56 = vpop.xlane.xlu1 %1349  ;;  %v1352_v53 = vpop.xlane.xlu2 %1351  ;;  %v2359_v24 = vperm.slane %v1598_v25, %v8853_v17  ;;  %v2327_v20 = vsel %vm1905_vm5, %v2326_v8, %v2325_v6  ;;  %v2330_v4 = vperm.slane %v1583_v43, %v8862_v27  ;;  %v2386_v49 = vperm.slane %v1612_v5, %v8816_v3  ;;  %v13356_v5 = vld [vmem:[#allocation135_spill] sm:$0xff]  ;;  %vm13368_vm15 = vmmov %vm13359_vm2 }
 0x30a   :  { %v1348_v9 = vpop.xlane.xlu0 %1347  ;;  %v1614_v52 = vmul.f32 0.17677669, %v1350_v56  ;;  %v2309_v19 = vperm.slane %v10053_v33, %v8911_v58  ;;  %v1600_v2 = vmul.f32 0.17677669, %v13352_v16  ;;  %v2385_v63 = vsel %vm1897_vm3, %v2384_v7, %v2383_v60  ;;  %vm13363_vm3 = vmmov %vm13359_vm2 }
 0x30b   :  { %v1613_v41 = vmul.f32 0.17677669, %v1348_v9  ;;  %v1585_v1 = vmul.f32 0.17677669, %v13353_v54  ;;  %v2358_v59 = vsel %vm1905_vm5, %v2357_v11, %v2356_v15  ;;  %v2361_v14 = vperm.slane %v1599_v47, %v8862_v27  ;;  %v13357_v11 = vld [vmem:[#allocation115_spill] sm:$0xff] }
 0x30c   :  { %v1601_v25 = vmul.f32 0.17677669, %v13354_v39  ;;  %v2329_v3 = vsel %vm1909_vm6, %v2328_v48, %v2327_v20  ;;  %v2332_v8 = vperm.slane %v1584_v21, %v8868_v38  ;;  %v2360_v0 = vsel %vm1909_vm6, %v2359_v24, %v2358_v59  ;;  %v13360_v21 = vld [vmem:[#allocation117_spill] sm:$0xff] }
 0x30d   :  { %v2388_v31 = vperm.slane %v1613_v41, %v8821_v28  ;;  %v1615_v43 = vmul.f32 0.17677669, %v1352_v53  ;;  %v2331_v46 = vsel %vm13355_vm0, %v2330_v4, %v2329_v3  ;;  %v1586_v56 = vmul.f32 0.17677669, %v13356_v5  ;;  %v13361_v4 = vld [vmem:[#allocation133_spill] sm:$0xff]  ;;  %v13365_v3 = vld [vmem:[#allocation152_spill] sm:$0xff] }
 0x30e   :  { %v2387_v28 = vsel %vm1901_vm4, %v2386_v49, %v2385_v63  ;;  %v2390_v57 = vperm.slane %v1614_v52, %v8853_v17  ;;  %v2307_v7 = vperm.slane %v1571_v34, %v8914_v37  ;;  %v2363_v9 = vperm.slane %v1600_v2, %v8868_v38  ;;  %v13362_v2 = vld [vmem:[#allocation128_spill] sm:$0xff] }
 0x30f   :  { %v1602_v12 = vmul.f32 0.17677669, %v13357_v11  ;;  %v2389_v47 = vsel %vm1905_vm5, %v2388_v31, %v2387_v28  ;;  %v2334_v53 = vperm.slane %v1585_v1, %v8888_v29  ;;  %v2362_v41 = vsel %vm13358_vm1, %v2361_v14, %v2360_v0  ;;  %vm13366_vm5 = vmmov %vm13355_vm0 }
 0x310   :  { %v2365_v48 = vperm.slane %v1601_v25, %v8888_v29  ;;  %v2333_v17 = vsel %vm13359_vm2, %v2332_v8, %v2331_v46  ;;  %v1587_v15 = vmul.f32 0.17677669, %v13360_v21  ;;  %v2392_v34 = vperm.slane %v1615_v43, %v8862_v27 }
 0x311   :  { %v1356_v6 = vpop.xlane.xlu1 %1355  ;;  %v1358_v62 = vpop.xlane.xlu2 %1357  ;;  %v2336_v20 = vperm.slane %v1586_v56, %v8885_v26  ;;  %v1603_v49 = vmul.f32 0.17677669, %v13361_v4  ;;  %v2391_v52 = vsel %vm1909_vm6, %v2390_v57, %v2389_v47  ;;  %v1588_v63 = vmul.f32 0.17677669, %v13362_v2  ;;  %vm13367_vm6 = vmmov %vm13344_vm7  ;;  %v13369_v56 = vld [vmem:[#allocation111_spill] sm:$0xff] }
 0x312   :  { %v1354_v60 = vpop.xlane.xlu0 %1353  ;;  %v1617_v24 = vmul.f32 0.17677669, %v1356_v6  ;;  %v2364_v31 = vsel %vm13363_vm3, %v2363_v9, %v2362_v41  ;;  %v2367_v54 = vperm.slane %v1602_v12, %v8885_v26  ;;  %v1604_v1 = vmul.f32 0.17677669, %v9953_v50  ;;  %vm13370_vm8 = vmmov %vm13367_vm6  ;;  %v13371_v9 = vld [vmem:[#allocation151_spill] sm:$0xff] }
 0x313   :  { %v1616_v51 = vmul.f32 0.17677669, %v1354_v60  ;;  %vm13364_vm4 = vcmask 851712   ;;  %v2335_v59 = vsel %vm1921_vm9, %v2334_v53, %v2333_v17  ;;  %v2366_v14 = vsel %vm1921_vm9, %v2365_v48, %v2364_v31 }
 0x314   :  { %v2308_v27 = vsel %vm13364_vm4, %v2307_v7, %v10041_v30  ;;  %v1618_v39 = vmul.f32 0.17677669, %v1358_v62  ;;  %v2338_v25 = vperm.slane %v1587_v15, %v8914_v37  ;;  %v2393_v8 = vsel %vm13366_vm5, %v2392_v34, %v2391_v52  ;;  %vm13372_vm7 = vmmov %vm13364_vm4 }
 0x315   :  { %v2394_v16 = vperm.slane %v1616_v51, %v8868_v38  ;;  %v1589_v38 = vmul.f32 0.17677669, %v13365_v3  ;;  %v2396_v0 = vperm.slane %v1617_v24, %v8888_v29  ;;  %v2337_v43 = vsel %vm13367_vm6, %v2336_v20, %v2335_v59  ;;  %vm13373_vm0 = vmmov %vm13364_vm4 }
 0x316   :  { %v2369_v50 = vperm.slane %v1603_v49, %v8914_v37  ;;  %v1605_v46 = vmul.f32 0.17677669, %v9945_v40  ;;  %v1574_v28 = vmul.f32 0.17677669, %v13369_v56  ;;  %v2340_v57 = vperm.slane %v1588_v63, %v8911_v58  ;;  %vm13375_vm1 = vmmov %vm13373_vm0 }
 0x317   :  { %v2395_v30 = vsel %vm13368_vm15, %v2394_v16, %v2393_v8  ;;  %v2368_v6 = vsel %vm13370_vm8, %v2367_v54, %v2366_v14  ;;  %v2371_v62 = vperm.slane %v1604_v1, %v8911_v58  ;;  %v1590_v29 = vmul.f32 0.17677669, %v13371_v9  ;;  %v13376_v16 = vld [vmem:[#allocation157_spill] sm:$0xff] }
 0x318   :  { %v2398_v11 = vperm.slane %v1618_v39, %v8885_v26  ;;  %v2339_v40 = vsel %vm13372_vm7, %v2338_v25, %v2337_v43  ;;  %v2342_v53 = vperm.slane %v1589_v38, %v8906_v45  ;;  %v1606_v41 = vmul.f32 0.17677669, %v9947_v32 }
 0x319   :  { %v1362_v5 = vpop.xlane.xlu1 %1361  ;;  %v1364_v60 = vpop.xlane.xlu2 %1363  ;;  %v2397_v48 = vsel %vm1921_vm9, %v2396_v0, %v2395_v30  ;;  %v2311_v51 = vperm.slane %v10047_v18, %v8906_v45  ;;  %v2370_v17 = vsel %vm13373_vm0, %v2369_v50, %v2368_v6  ;;  %v2373_v21 = vperm.slane %v1605_v46, %v8906_v45  ;;  %vm13374_vm9 = vmmov %vm13367_vm6 }
 0x31a   :  { %v1360_v7 = vpop.xlane.xlu0 %1359  ;;  %v1620_v47 = vmul.f32 0.17677669, %v1362_v5  ;;  %v2310_v15 = vsel %vm1933_vm12, %v2309_v19, %v2308_v27  ;;  %v2313_v34 = vperm.slane %v1574_v28, %v9042_v42  ;;  %v2372_v32 = vsel %vm1933_vm12, %v2371_v62, %v2370_v17 }
 0x31b   :  { %v1619_v12 = vmul.f32 0.17677669, %v1360_v7  ;;  %v1621_v24 = vmul.f32 0.17677669, %v1364_v60  ;;  %v2341_v20 = vsel %vm1933_vm12, %v2340_v57, %v2339_v40  ;;  %v2344_v18 = vperm.slane %v1590_v29, %v9042_v42 }
 0x31c   :  { %v2399_v4 = vsel %vm13374_vm9, %v2398_v11, %v2397_v48  ;;  %v2402_v49 = vperm.slane %v1620_v47, %v8911_v58  ;;  %v2343_v33 = vsel %vm1937_vm13, %v2342_v53, %v2341_v20  ;;  %v2375_v19 = vperm.slane %v1606_v41, %v9042_v42 }
 0x31d   :  { %v2400_v26 = vperm.slane %v1619_v12, %v8914_v37  ;;  %v2252_v37 = vsel %vm1941_vm14, %v2251_v22, %v10004_v44  ;;  %v13377_v2 = vperm.slane %v13376_v16, %v9042_v42  ;;  %v2283_v58 = vsel %vm1941_vm14, %v2282_v10, %v10033_v36 }
 0x31e   :  { %v2312_v13 = vsel %vm1937_vm13, %v2311_v51, %v2310_v15  ;;  %v2374_v22 = vsel %vm1937_vm13, %v2373_v21, %v2372_v32  ;;  %vm13378_vm2 = vcmask 1041409   ;;  %v2404_v1 = vperm.slane %v1621_v24, %v8906_v45 }
 0x31f   :  { %v2401_v52 = vsel %vm13375_vm1, %v2400_v26, %v2399_v4  ;;  %v2190_v63 = vsel %vm1941_vm14, %v13377_v2, %v9960_v61  ;;  %v2314_v54 = vsel %vm1941_vm14, %v2313_v34, %v2312_v13  ;;  %v13379_v61 = vld [vmem:[#allocation99_spill] sm:$0xff]  ;;  %vm13380_vm3 = vcmask 1042434  }
 0x320   :  { %v2422_v31 = vsel %vm13378_vm2, %v9975_v23, %v2190_v63  ;;  %v2345_v55 = vsel %vm1941_vm14, %v2344_v18, %v2343_v33  ;;  %v2403_v10 = vsel %vm1933_vm12, %v2402_v49, %v2401_v52  ;;  %v2376_v25 = vsel %vm1941_vm14, %v2375_v19, %v2374_v22 }
 0x321   :  { %v2434_v44 = vpop.xlane.xlu1 %2433  ;;  %v2423_v14 = vsel %vm13380_vm3, %v2252_v37, %v2422_v31  ;;  %vm13381_vm4 = vcmask 1043459   ;;  %v2405_v45 = vsel %vm1937_vm13, %v2404_v1, %v2403_v10  ;;  %vm13382_vm5 = vcmask 1046534  }
 0x322   :  { %v1366_v27 = vpop.xlane.xlu0 %1365  ;;  %v2437_v59 = vsub.f32 %v13379_v61, %v2434_v44  ;;  %v2424_v3 = vsel %vm13381_vm4, %v2283_v58, %v2423_v14  ;;  %vm13383_vm12 = vcmask 1047559   ;;  %vm13384_vm6 = vcmp.lt.s32.totalorder %v8749_v35, 8 }
 0x323   :  { %v1622_v36 = vmul.f32 0.17677669, %v1366_v27  ;;  %v2425_v38 = vsel %vm2414_vm11, %v2314_v54, %v2424_v3 }
 0x324   :  { %v2439_v39 = vmul.f32 1.442695, %v2437_v59  ;;  %v2426_v8 = vsel %vm2416_vm10, %v2345_v55, %v2425_v38 }
 0x325   :  { %v2406_v23 = vperm.slane %v1622_v36, %v9042_v42  ;;  %v2427_v43 = vsel %vm13382_vm5, %v2376_v25, %v2426_v8  ;;  %v13385_v42 = vlaneseq  ;;  %vm13576_vm5 = vmmov %vm13378_vm2 }
 0x326   :  { %7009 = vpow2.f32 %v2439_v39 }
 0x327   :  { %v2407_v0 = vsel %vm1941_vm14, %v2406_v23, %v2405_v45  ;;  %v10193_v5 = vshrl.u32 %v13385_v42, 7 }
 0x328   :  { %v2428_v50 = vsel %vm13383_vm12, %v2407_v0, %v2427_v43  ;;  %vm13578_vm12 = vmmov %vm13380_vm3 }
 0x329   :  { %v2432_v46 = vsel %vm13384_vm6, %v2428_v50, -1e+30  ;;  %6837 = vset.pattern.permute.xlu0 %v10193_v5  ;;  %6798 = vset.pattern.permute.xlu2 %v10193_v5  ;;  %v10198_v56 = vadd.s32 16, %v10193_v5  ;;  %v10219_v21 = vadd.s32 24, %v10193_v5  ;;  %v10225_v26 = vadd.s32 40, %v10193_v5  ;;  %vm13582_vm6 = vmmov %vm13381_vm4 }
 0x32a   :  { %2435 = vmax.xlane.f32.xlu2 %v2432_v46  ;;  %v10229_v15 = vadd.s32 32, %v10193_v5  ;;  %v10235_v34 = vadd.s32 56, %v10193_v5  ;;  %v10239_v32 = vadd.s32 48, %v10193_v5  ;;  %v10245_v24 = vadd.s32 80, %v10193_v5 }
 0x32b   :  { %6799 = vset.pattern.permute.xlu1 %v10198_v56  ;;  %13386 = vst [vmem:[#allocation155_spill] sm:$0xff] %v10219_v21  ;;  %v10249_v20 = vadd.s32 72, %v10193_v5  ;;  %v10255_v18 = vadd.s32 96, %v10193_v5  ;;  %v10259_v4 = vadd.s32 88, %v10193_v5  ;;  %v10265_v49 = vadd.s32 120, %v10193_v5 }
 0x32c   :  { %v7010_v30 = vpop.eup %7009  ;;  %v10269_v37 = vadd.s32 112, %v10193_v5  ;;  %v10275_v33 = vadd.s32 8, %v10193_v5  ;;  %v10308_v59 = vadd.s32 64, %v10193_v5  ;;  %v10312_v14 = vadd.s32 104, %v10193_v5 }
 0x32d   :  { %2443 = vadd.xlane.f32.xlu0 %v7010_v30 }
 0x39d   :  { %v2436_v28 = vpop.xlane.xlu2 %2435 }
 0x39e   :  { %v2438_v57 = vsub.f32 %v2432_v46, %v2436_v28 }
 0x3a0   :  { %v2441_v6 = vmul.f32 1.442695, %v2438_v57  ;;  %v2444_v35 = vpop.xlane.xlu0 %2443 }
 0x3a1   :  { %7011 = vrcp.f32 %v2444_v35  ;;  %v2458_v11 = vand.u32 2147483648, %v2444_v35  ;;  %v2456_v47 = vand.u32 2147483647, %v2444_v35  ;;  %vm2452_vm14 = vweird.f32 %v2444_v35 }
 0x3a2   :  { %7013 = vpow2.f32 %v2441_v6 }
 0x3a3   :  { %v2459_v40 = vor.u32 1.1754944e-38, %v2458_v11  ;;  %vm2457_vm8 = vcmp.eq.f32.partialorder %v2456_v47, 8.507059e+37 }
 0x3a7   :  { %v7012_v62 = vpop.eup %7011 }
 0x3a8   :  { %v10201_v7 = vpop.eup %7013  ;;  %v2448_v9 = vmul.f32 %v7012_v62, %v2444_v35  ;;  %vm2453_vm13 = vweird.f32 %v7012_v62 }
 0x3a9   :  { %2445 = vadd.xlane.f32.xlu1 %v10201_v7  ;;  %vm2454_vm15 = vmor %vm2452_vm14, %vm2453_vm13  ;;  %vm13616_vm13 = vcmask 1046534  }
 0x3aa   :  { %v2449_v29 = vsub.f32 1.0, %v2448_v9  ;;  %vm13617_vm14 = vmmov %vm13616_vm13 }
 0x3ac   :  { %v2450_v12 = vmul.f32 %v7012_v62, %v2449_v29 }
 0x3ae   :  { %v2451_v60 = vadd.f32 %v7012_v62, %v2450_v12 }
 0x3b0   :  { %v2455_v53 = vsel %vm2454_vm15, %v7012_v62, %v2451_v60  ;;  %vm13645_vm15 = vcmask 1047559  }
 0x3b1   :  { %v2460_v41 = vsel %vm2457_vm8, %v2459_v40, %v2455_v53  ;;  %vm13648_vm8 = vmmov %vm13645_vm15 }
 0x3b2   :  { %v10204_v48 = vmul.f32 %v7010_v30, %v2460_v41  ;;  %v13398_v41 = vld [vmem:[#allocation10_spill] sm:$0xff] }
 0x3b4   :  { %2477 = vst [vmem:[%s12313_s10] sm:$0xff] %v10204_v48  ;;  %v10211_v51 = vperm.slane %v10204_v48, 0  ;;  %v10214_v17 = vperm.slane %v10204_v48, 3  ;;  %v10280_v52 = vperm.slane %v10204_v48, 1  ;;  %v10321_v55 = vperm.slane %v10204_v48, 5 }
 0x3b5   :  { %v10339_v36 = vperm.slane %v10204_v48, 2  ;;  %v10342_v39 = vperm.slane %v10204_v48, 6  ;;  %v10378_v45 = vperm.slane %v10204_v48, 7 }
 0x3b6   :  { %2775 = vperm.xlu0 %6837, %v10214_v17   ;;  %2484 = vperm.xlu2 %6798, %v10211_v51  }
 0x3b7   :  { %13390 = vst [vmem:[#allocation161_spill] sm:$0xff] %v10378_v45 }
 0x3be   :  { %6800 = vset.pattern.permute.xlu2 %v10219_v21 }
 0x3c2   :  { %2496 = vperm.xlu1 %6799, %v10211_v51  }
 0x3c6   :  { %2502 = vperm.xlu2 %6800, %v10211_v51  }
 0x3ca   :  { %6802 = vset.pattern.permute.xlu1 %v10225_v26 }
 0x3ce   :  { %6801 = vset.pattern.permute.xlu2 %v10229_v15 }
 0x3d2   :  { %2514 = vperm.xlu1 %6802, %v10211_v51  }
 0x3d6   :  { %2508 = vperm.xlu2 %6801, %v10211_v51  }
 0x3da   :  { %6804 = vset.pattern.permute.xlu1 %v10235_v34 }
 0x3de   :  { %6803 = vset.pattern.permute.xlu2 %v10239_v32 }
 0x3e2   :  { %2526 = vperm.xlu1 %6804, %v10211_v51  }
 0x3e6   :  { %2520 = vperm.xlu2 %6803, %v10211_v51  }
 0x3ea   :  { %6806 = vset.pattern.permute.xlu1 %v10245_v24 }
 0x3ee   :  { %6805 = vset.pattern.permute.xlu2 %v10249_v20 }
 0x3f2   :  { %2544 = vperm.xlu1 %6806, %v10211_v51  }
 0x3f6   :  { %2538 = vperm.xlu2 %6805, %v10211_v51  }
 0x3fa   :  { %6808 = vset.pattern.permute.xlu1 %v10255_v18 }
 0x3fe   :  { %6807 = vset.pattern.permute.xlu2 %v10259_v4 }
 0x402   :  { %2556 = vperm.xlu1 %6808, %v10211_v51  }
 0x406   :  { %2550 = vperm.xlu2 %6807, %v10211_v51  }
 0x40a   :  { %6810 = vset.pattern.permute.xlu1 %v10265_v49 }
 0x40e   :  { %6809 = vset.pattern.permute.xlu2 %v10269_v37 }
 0x410   :  { %v10374_v38 = vpop.permute.xlu2 %2484 }
 0x412   :  { %2574 = vperm.xlu1 %6810, %v10211_v51  }
 0x416   :  { %2568 = vperm.xlu2 %6809, %v10211_v51  }
 0x41a   :  { %6812 = vset.pattern.permute.xlu1 %v10275_v33 }
 0x41c   :  { %v2446_v19 = vpop.xlane.xlu1 %2445 }
 0x41d   :  { %7015 = vrcp.f32 %v2446_v19  ;;  %v2473_v58 = vand.u32 2147483648, %v2446_v19  ;;  %v2471_v22 = vand.u32 2147483647, %v2446_v19  ;;  %vm2467_vm0 = vweird.f32 %v2446_v19 }
 0x41e   :  { %6811 = vset.pattern.permute.xlu2 %v10193_v5 }
 0x41f   :  { %v2474_v31 = vor.u32 1.1754944e-38, %v2473_v58  ;;  %vm2472_vm1 = vcmp.eq.f32.partialorder %v2471_v22, 8.507059e+37  ;;  %v13401_v58 = vld [vmem:[#allocation11_spill] sm:$0xff] }
 0x420   :  { %v10384_v0 = vpop.permute.xlu2 %2502 }
 0x422   :  { %2587 = vperm.xlu1 %6812, %v10280_v52  }
 0x423   :  { %v7016_v16 = vpop.eup %7015 }
 0x424   :  { %v2463_v2 = vmul.f32 %v7016_v16, %v2446_v19  ;;  %vm2468_vm7 = vweird.f32 %v7016_v16  ;;  %v13399_v19 = vunpack.c.h.bf16 %v13398_v41 }
 0x425   :  { %vm2469_vm9 = vmor %vm2467_vm0, %vm2468_vm7 }
 0x426   :  { %v2464_v63 = vsub.f32 1.0, %v2463_v2  ;;  %2581 = vperm.xlu2 %6811, %v10280_v52   ;;  %v13400_v2 = vunpack.c.l.bf16 %v13398_v41  ;;  %vm13703_vm7 = vmmov %vm13378_vm2 }
 0x427   :  { %vm13704_vm0 = vmmov %vm13378_vm2 }
 0x428   :  { %v2465_v13 = vmul.f32 %v7016_v16, %v2464_v63  ;;  %v10365_v3 = vpop.permute.xlu0 %2775 }
 0x429   :  { %13388 = vst [vmem:[#allocation121_spill] sm:$0xff] %v10365_v3 }
 0x42a   :  { %v2466_v44 = vadd.f32 %v7016_v16, %v2465_v13  ;;  %6814 = vset.pattern.permute.xlu1 %v10229_v15  ;;  %v13402_v13 = vunpack.c.l.bf16 %v13401_v58 }
 0x42c   :  { %v2470_v54 = vsel %vm2469_vm9, %v7016_v16, %v2466_v44  ;;  %vm13735_vm9 = vmmov %vm13380_vm3 }
 0x42d   :  { %v2475_v1 = vsel %vm2472_vm1, %v2474_v31, %v2470_v54  ;;  %vm13737_vm1 = vmmov %vm13380_vm3 }
 0x42e   :  { %v10286_v27 = vmul.f32 %v10201_v7, %v2475_v1  ;;  %6813 = vset.pattern.permute.xlu2 %v10219_v21 }
 0x430   :  { %2478 = vst [vmem:[%s12313_s10 + $0x8] sm:$0xff] %v10286_v27  ;;  %v10294_v61 = vperm.slane %v10286_v27, 0  ;;  %v10327_v10 = vperm.slane %v10286_v27, 2  ;;  %v10348_v25 = vperm.slane %v10286_v27, 3  ;;  %v10390_v50 = vperm.slane %v10286_v27, 4  ;;  %v10394_v46 = vpop.permute.xlu2 %2508 }
 0x432   :  { %2605 = vperm.xlu1 %6814, %v10280_v52   ;;  %3260 = vperm.xlu0 %6837, %v10294_v61   ;;  %13387 = vst [vmem:[#allocation162_spill] sm:$0xff] %v10327_v10 }
 0x433   :  { %13392 = vst [vmem:[#allocation137_spill] sm:$0xff] %v10390_v50 }
 0x434   :  { %v10386_v43 = vpop.permute.xlu1 %2496 }
 0x436   :  { %2599 = vperm.xlu2 %6813, %v10280_v52  }
 0x43a   :  { %6816 = vset.pattern.permute.xlu1 %v10239_v32  ;;  %6902 = vset.pattern.permute.xlu0 %v10265_v49 }
 0x43e   :  { %6815 = vset.pattern.permute.xlu2 %v10225_v26 }
 0x440   :  { %v10403_v28 = vpop.permute.xlu2 %2520 }
 0x442   :  { %2617 = vperm.xlu1 %6816, %v10280_v52   ;;  %2865 = vperm.xlu0 %6902, %v10214_v17  }
 0x444   :  { %v10396_v30 = vpop.permute.xlu1 %2514 }
 0x446   :  { %2611 = vperm.xlu2 %6815, %v10280_v52  }
 0x44a   :  { %6818 = vset.pattern.permute.xlu1 %v10249_v20  ;;  %3350 = vperm.xlu0 %6902, %v10294_v61  }
 0x44e   :  { %6817 = vset.pattern.permute.xlu2 %v10308_v59 }
 0x450   :  { %v10412_v35 = vpop.permute.xlu2 %2538 }
 0x452   :  { %2635 = vperm.xlu1 %6818, %v10280_v52   ;;  %6915 = vset.pattern.permute.xlu0 %v10312_v14 }
 0x454   :  { %v10405_v57 = vpop.permute.xlu1 %2526 }
 0x456   :  { %2629 = vperm.xlu2 %6817, %v10280_v52  }
 0x45a   :  { %6820 = vset.pattern.permute.xlu1 %v10259_v4  ;;  %2562 = vperm.xlu0 %6915, %v10211_v51  }
 0x45e   :  { %6819 = vset.pattern.permute.xlu2 %v10245_v24 }
 0x460   :  { %v10421_v9 = vpop.permute.xlu2 %2550 }
 0x462   :  { %2647 = vperm.xlu1 %6820, %v10280_v52   ;;  %3047 = vperm.xlu0 %6915, %v10321_v55  }
 0x464   :  { %v10414_v62 = vpop.permute.xlu1 %2544 }
 0x466   :  { %2641 = vperm.xlu2 %6819, %v10280_v52  }
 0x46a   :  { %6822 = vset.pattern.permute.xlu1 %v10269_v37  ;;  %3532 = vperm.xlu0 %6915, %v10327_v10  }
 0x46e   :  { %6821 = vset.pattern.permute.xlu2 %v10312_v14 }
 0x470   :  { %v10430_v12 = vpop.permute.xlu2 %2568 }
 0x471   :  { %13396 = vst [vmem:[#allocation144_spill] sm:$0xff] %v10430_v12 }
 0x472   :  { %2665 = vperm.xlu1 %6822, %v10280_v52   ;;  %6940 = vset.pattern.permute.xlu0 %v10198_v56 }
 0x474   :  { %v10423_v29 = vpop.permute.xlu1 %2556 }
 0x476   :  { %2659 = vperm.xlu2 %6821, %v10280_v52  }
 0x47a   :  { %6824 = vset.pattern.permute.xlu1 %v10193_v5  ;;  %2593 = vperm.xlu0 %6940, %v10280_v52  }
 0x47e   :  { %6823 = vset.pattern.permute.xlu2 %v10265_v49 }
 0x480   :  { %v2582_v40 = vpop.permute.xlu2 %2581 }
 0x481   :  { %v4047_v63 = vmul.f32 %v13400_v2, %v2582_v40 }
 0x482   :  { %2678 = vperm.xlu1 %6824, %v10339_v36   ;;  %3078 = vperm.xlu0 %6940, %v10342_v39  }
 0x484   :  { %v10432_v47 = vpop.permute.xlu1 %2574 }
 0x485   :  { %13397 = vst [vmem:[#allocation102_spill] sm:$0xff] %v10432_v47  ;;  %v10557_v47 = vperm.slane %v10286_v27, 7 }
 0x486   :  { %2671 = vperm.xlu2 %6823, %v10280_v52  }
 0x487   :  { %13433 = vst [vmem:[#allocation180_spill] sm:$0xff] %v10557_v47 }
 0x48a   :  { %6826 = vset.pattern.permute.xlu1 %v10219_v21  ;;  %3563 = vperm.xlu0 %6940, %v10348_v25  }
 0x48e   :  { %6825 = vset.pattern.permute.xlu2 %v10198_v56 }
 0x490   :  { %v2600_v54 = vpop.permute.xlu2 %2599 }
 0x492   :  { %2696 = vperm.xlu1 %6826, %v10339_v36   ;;  %6945 = vset.pattern.permute.xlu0 %v10235_v34 }
 0x494   :  { %v2588_v53 = vpop.permute.xlu1 %2587 }
 0x495   :  { %v4048_v16 = vmul.f32 %v13399_v19, %v2588_v53 }
 0x496   :  { %2690 = vperm.xlu2 %6825, %v10339_v36  }
 0x497   :  { %v4308_v31 = vadd.f32 %v4048_v16, %v4047_v63 }
 0x49a   :  { %6828 = vset.pattern.permute.xlu1 %v10225_v26  ;;  %2623 = vperm.xlu0 %6945, %v10280_v52  }
 0x49e   :  { %6827 = vset.pattern.permute.xlu2 %v10229_v15 }
 0x4a2   :  { %2708 = vperm.xlu1 %6828, %v10339_v36   ;;  %3108 = vperm.xlu0 %6945, %v10342_v39  }
 0x4a4   :  { %v10370_v23 = vpop.permute.xlu0 %3260  ;;  %v2606_v19 = vpop.permute.xlu1 %2605 }
 0x4a5   :  { %13389 = vst [vmem:[#allocation138_spill] sm:$0xff] %v10370_v23 }
 0x4a6   :  { %2702 = vperm.xlu2 %6827, %v10339_v36  }
 0x4aa   :  { %6830 = vset.pattern.permute.xlu1 %v10308_v59  ;;  %3593 = vperm.xlu0 %6945, %v10348_v25  }
 0x4ae   :  { %6829 = vset.pattern.permute.xlu2 %v10235_v34 }
 0x4b2   :  { %2726 = vperm.xlu1 %6830, %v10339_v36   ;;  %6950 = vset.pattern.permute.xlu0 %v10239_v32 }
 0x4b4   :  { %v10380_v8 = vpop.permute.xlu0 %2865 }
 0x4b5   :  { %13391 = vst [vmem:[#allocation120_spill] sm:$0xff] %v10380_v8 }
 0x4b6   :  { %2720 = vperm.xlu2 %6829, %v10339_v36  }
 0x4ba   :  { %6832 = vset.pattern.permute.xlu1 %v10245_v24  ;;  %2714 = vperm.xlu0 %6950, %v10339_v36  }
 0x4bc   :  { %v10398_v42 = vpop.permute.xlu0 %3350 }
 0x4bd   :  { %13393 = vst [vmem:[#allocation160_spill] sm:$0xff] %v10398_v42 }
 0x4be   :  { %6831 = vset.pattern.permute.xlu2 %v10249_v20 }
 0x4c2   :  { %2738 = vperm.xlu1 %6832, %v10339_v36   ;;  %3199 = vperm.xlu0 %6950, %v10378_v45  }
 0x4c6   :  { %2732 = vperm.xlu2 %6831, %v10339_v36  }
 0x4ca   :  { %6834 = vset.pattern.permute.xlu1 %v10312_v14  ;;  %3684 = vperm.xlu0 %6950, %v10390_v50  }
 0x4cc   :  { %v10407_v6 = vpop.permute.xlu0 %2562 }
 0x4ce   :  { %6833 = vset.pattern.permute.xlu2 %v10255_v18 }
 0x4d2   :  { %2756 = vperm.xlu1 %6834, %v10339_v36   ;;  %6963 = vset.pattern.permute.xlu0 %v10259_v4 }
 0x4d4   :  { %v10416_v7 = vpop.permute.xlu0 %3047 }
 0x4d5   :  { %13394 = vst [vmem:[#allocation166_spill] sm:$0xff] %v10416_v7 }
 0x4d6   :  { %2750 = vperm.xlu2 %6833, %v10339_v36  }
 0x4da   :  { %6836 = vset.pattern.permute.xlu1 %v10265_v49  ;;  %2744 = vperm.xlu0 %6963, %v10339_v36  }
 0x4dc   :  { %v10426_v11 = vpop.permute.xlu0 %3532 }
 0x4dd   :  { %13395 = vst [vmem:[#allocation119_spill] sm:$0xff] %v10426_v11  ;;  %v13404_v11 = vunpack.c.h.bf16 %v13401_v58  ;;  %v2618_v58 = vpop.permute.xlu1 %2617 }
 0x4de   :  { %6835 = vset.pattern.permute.xlu2 %v10269_v37 }
 0x4df   :  { %v4050_v53 = vmul.f32 %v13404_v11, %v2600_v54 }
 0x4e2   :  { %2768 = vperm.xlu1 %6836, %v10339_v36   ;;  %3229 = vperm.xlu0 %6963, %v10378_v45  }
 0x4e6   :  { %2762 = vperm.xlu2 %6835, %v10339_v36  }
 0x4ea   :  { %6839 = vset.pattern.permute.xlu1 %v10198_v56  ;;  %3714 = vperm.xlu0 %6963, %v10390_v50  }
 0x4ec   :  { %v2594_v60 = vpop.permute.xlu0 %2593 }
 0x4ed   :  { %v4049_v22 = vmul.f32 %v13402_v13, %v2594_v60  ;;  %v13405_v60 = vld [vmem:[#allocation12_spill] sm:$0xff]  ;;  %v2612_v13 = vpop.permute.xlu2 %2611 }
 0x4ee   :  { %6838 = vset.pattern.permute.xlu2 %v10275_v33  ;;  %v13406_v40 = vunpack.c.l.bf16 %v13405_v60  ;;  %v13408_v63 = vunpack.c.h.bf16 %v13405_v60  ;;  %v10473_v60 = vperm.slane %v10286_v27, 6 }
 0x4ef   :  { %v4309_v1 = vadd.f32 %v4308_v31, %v4049_v22  ;;  %v13409_v31 = vld [vmem:[#allocation13_spill] sm:$0xff] }
 0x4f0   :  { %v4051_v2 = vmul.f32 %v13406_v40, %v2606_v19  ;;  %v4052_v22 = vmul.f32 %v13408_v63, %v2612_v13  ;;  %13413 = vst [vmem:[#allocation126_spill] sm:$0xff] %v10473_v60  ;;  %v10494_v63 = vperm.slane %v10286_v27, 5 }
 0x4f1   :  { %v4310_v41 = vadd.f32 %v4309_v1, %v4050_v53  ;;  %v13411_v53 = vunpack.c.h.bf16 %v13409_v31 }
 0x4f2   :  { %2787 = vperm.xlu1 %6839, %v10214_v17   ;;  %6968 = vset.pattern.permute.xlu0 %v10275_v33  ;;  %13416 = vst [vmem:[#allocation171_spill] sm:$0xff] %v10494_v63 }
 0x4f3   :  { %v4311_v16 = vadd.f32 %v4310_v41, %v4051_v2 }
 0x4f4   :  { %v10444_v44 = vpop.permute.xlu0 %3078 }
 0x4f5   :  { %13403 = vst [vmem:[#allocation143_spill] sm:$0xff] %v10444_v44  ;;  %v4312_v11 = vadd.f32 %v4311_v16, %v4052_v22 }
 0x4f6   :  { %2781 = vperm.xlu2 %6838, %v10214_v17  }
 0x4fa   :  { %6841 = vset.pattern.permute.xlu1 %v10229_v15  ;;  %2490 = vperm.xlu0 %6968, %v10211_v51  }
 0x4fc   :  { %v10455_v42 = vpop.permute.xlu0 %3563 }
 0x4fd   :  { %13407 = vst [vmem:[#allocation165_spill] sm:$0xff] %v10455_v42 }
 0x4fe   :  { %6840 = vset.pattern.permute.xlu2 %v10219_v21 }
 0x502   :  { %2799 = vperm.xlu1 %6841, %v10214_v17   ;;  %2684 = vperm.xlu0 %6968, %v10339_v36   ;;  %v13410_v36 = vunpack.c.l.bf16 %v13409_v31  ;;  %v10509_v31 = vpop.permute.xlu2 %2629 }
 0x503   :  { %13419 = vst [vmem:[#allocation170_spill] sm:$0xff] %v10509_v31 }
 0x504   :  { %v4053_v54 = vmul.f32 %v13410_v36, %v2618_v58  ;;  %v10505_v58 = vperm.slane %v10204_v48, 4  ;;  %v10513_v36 = vpop.permute.xlu1 %2635 }
 0x505   :  { %13420 = vst [vmem:[#allocation147_spill] sm:$0xff] %v10513_v36 }
 0x506   :  { %2793 = vperm.xlu2 %6840, %v10214_v17   ;;  %v4313_v40 = vadd.f32 %v4312_v11, %v4053_v54  ;;  %v10517_v54 = vperm.slane %v10286_v27, 1  ;;  %v13438_v27 = vld [vmem:[#allocation21_spill] sm:$0xff] }
 0x50a   :  { %6843 = vset.pattern.permute.xlu1 %v10235_v34  ;;  %3169 = vperm.xlu0 %6968, %v10378_v45  }
 0x50c   :  { %v2624_v1 = vpop.permute.xlu0 %2623  ;;  %v10523_v48 = vpop.permute.xlu1 %2647 }
 0x50d   :  { %v4054_v19 = vmul.f32 %v13411_v53, %v2624_v1  ;;  %v10519_v53 = vpop.permute.xlu2 %2641  ;;  %13422 = vst [vmem:[#allocation169_spill] sm:$0xff] %v10523_v48  ;;  %v13431_v48 = vld [vmem:[#allocation19_spill] sm:$0xff] }
 0x50e   :  { %6842 = vset.pattern.permute.xlu2 %v10239_v32  ;;  %13421 = vst [vmem:[#allocation124_spill] sm:$0xff] %v10519_v53  ;;  %v13432_v53 = vunpack.c.l.bf16 %v13431_v48  ;;  %v13434_v31 = vunpack.c.h.bf16 %v13431_v48  ;;  %v13440_v48 = vunpack.c.h.bf16 %v13438_v27 }
 0x50f   :  { %v10467_v41 = vadd.f32 %v4313_v40, %v4054_v19 }
 0x511   :  { %13412 = vst [vmem:[#allocation103_spill] sm:$0xff] %v10467_v41 }
 0x512   :  { %2817 = vperm.xlu1 %6843, %v10214_v17   ;;  %3654 = vperm.xlu0 %6968, %v10390_v50  }
 0x514   :  { %v10478_v2 = vpop.permute.xlu0 %3108 }
 0x515   :  { %13414 = vst [vmem:[#allocation164_spill] sm:$0xff] %v10478_v2  ;;  %v10526_v19 = vpop.permute.xlu2 %2659 }
 0x516   :  { %2811 = vperm.xlu2 %6842, %v10214_v17   ;;  %13423 = vst [vmem:[#allocation175_spill] sm:$0xff] %v10526_v19 }
 0x51a   :  { %6845 = vset.pattern.permute.xlu1 %v10249_v20  ;;  %3848 = vperm.xlu0 %6968, %v10473_v60  }
 0x51c   :  { %v10485_v13 = vpop.permute.xlu0 %3593 }
 0x51d   :  { %13415 = vst [vmem:[#allocation142_spill] sm:$0xff] %v10485_v13  ;;  %v10535_v13 = vpop.permute.xlu2 %2671 }
 0x51e   :  { %6844 = vset.pattern.permute.xlu2 %v10308_v59  ;;  %13426 = vst [vmem:[#allocation174_spill] sm:$0xff] %v10535_v13 }
 0x522   :  { %2829 = vperm.xlu1 %6845, %v10214_v17   ;;  %6972 = vset.pattern.permute.xlu0 %v10219_v21 }
 0x525   :  { %v2691_v23 = vpop.permute.xlu2 %2690 }
 0x526   :  { %2823 = vperm.xlu2 %6844, %v10214_v17   ;;  %v4065_v36 = vmul.f32 %v13432_v53, %v2691_v23 }
 0x52a   :  { %6847 = vset.pattern.permute.xlu1 %v10255_v18  ;;  %2987 = vperm.xlu0 %6972, %v10321_v55  }
 0x52c   :  { %v10490_v16 = vpop.permute.xlu0 %2714 }
 0x52d   :  { %v2703_v2 = vpop.permute.xlu2 %2702 }
 0x52e   :  { %6846 = vset.pattern.permute.xlu2 %v10259_v4 }
 0x532   :  { %2847 = vperm.xlu1 %6847, %v10214_v17   ;;  %3472 = vperm.xlu0 %6972, %v10327_v10  }
 0x534   :  { %v10498_v22 = vpop.permute.xlu0 %3199 }
 0x535   :  { %13417 = vst [vmem:[#allocation148_spill] sm:$0xff] %v10498_v22 }
 0x536   :  { %2841 = vperm.xlu2 %6846, %v10214_v17  }
 0x53a   :  { %6849 = vset.pattern.permute.xlu1 %v10269_v37  ;;  %3763 = vperm.xlu0 %6972, %v10494_v63  }
 0x53c   :  { %v10507_v11 = vpop.permute.xlu0 %3684 }
 0x53d   :  { %13418 = vst [vmem:[#allocation125_spill] sm:$0xff] %v10507_v11  ;;  %v10532_v11 = vpop.permute.xlu1 %2665 }
 0x53e   :  { %6848 = vset.pattern.permute.xlu2 %v10312_v14  ;;  %13425 = vst [vmem:[#allocation153_spill] sm:$0xff] %v10532_v11 }
 0x542   :  { %2859 = vperm.xlu1 %6849, %v10214_v17   ;;  %6976 = vset.pattern.permute.xlu0 %v10229_v15 }
 0x545   :  { %v2679_v42 = vpop.permute.xlu1 %2678 }
 0x546   :  { %2853 = vperm.xlu2 %6848, %v10214_v17  }
 0x54a   :  { %6851 = vset.pattern.permute.xlu1 %v10275_v33  ;;  %2896 = vperm.xlu0 %6976, %v10505_v58  }
 0x54c   :  { %v2745_v1 = vpop.permute.xlu0 %2744 }
 0x54e   :  { %6850 = vset.pattern.permute.xlu2 %v10193_v5 }
 0x552   :  { %2878 = vperm.xlu1 %6851, %v10505_v58   ;;  %3381 = vperm.xlu0 %6976, %v10517_v54  }
 0x554   :  { %v10528_v40 = vpop.permute.xlu0 %3229 }
 0x555   :  { %13424 = vst [vmem:[#allocation146_spill] sm:$0xff] %v10528_v40  ;;  %v2697_v40 = vpop.permute.xlu1 %2696 }
 0x556   :  { %2872 = vperm.xlu2 %6850, %v10505_v58   ;;  %v4066_v12 = vmul.f32 %v13434_v31, %v2697_v40  ;;  %v13439_v31 = vunpack.c.l.bf16 %v13438_v27 }
 0x55a   :  { %6853 = vset.pattern.permute.xlu1 %v10219_v21  ;;  %3866 = vperm.xlu0 %6976, %v10473_v60   ;;  %v2721_v21 = vpop.permute.xlu2 %2720 }
 0x55c   :  { %v10539_v50 = vpop.permute.xlu0 %3714 }
 0x55d   :  { %13427 = vst [vmem:[#allocation173_spill] sm:$0xff] %v10539_v50  ;;  %v2709_v44 = vpop.permute.xlu1 %2708  ;;  %v13428_v50 = vld [vmem:[#allocation18_spill] sm:$0xff] }
 0x55e   :  { %6852 = vset.pattern.permute.xlu2 %v10198_v56  ;;  %v13429_v7 = vunpack.c.l.bf16 %v13428_v50  ;;  %v13430_v11 = vunpack.c.h.bf16 %v13428_v50  ;;  %v13435_v50 = vld [vmem:[#allocation20_spill] sm:$0xff] }
 0x55f   :  { %v13437_v23 = vunpack.c.h.bf16 %v13435_v50 }
 0x560   :  { %v4063_v13 = vmul.f32 %v13429_v7, %v2679_v42 }
 0x562   :  { %2890 = vperm.xlu1 %6853, %v10505_v58   ;;  %6980 = vset.pattern.permute.xlu0 %v10225_v26  ;;  %v2733_v3 = vpop.permute.xlu2 %2732 }
 0x566   :  { %2884 = vperm.xlu2 %6852, %v10505_v58  }
 0x56a   :  { %6855 = vset.pattern.permute.xlu1 %v10239_v32  ;;  %2805 = vperm.xlu0 %6980, %v10214_v17  }
 0x56c   :  { %v10544_v22 = vpop.permute.xlu0 %2490 }
 0x56e   :  { %6854 = vset.pattern.permute.xlu2 %v10225_v26 }
 0x572   :  { %2908 = vperm.xlu1 %6855, %v10505_v58   ;;  %3290 = vperm.xlu0 %6980, %v10294_v61  }
 0x574   :  { %v2685_v45 = vpop.permute.xlu0 %2684 }
 0x575   :  { %v4064_v19 = vmul.f32 %v13430_v11, %v2685_v45  ;;  %v13436_v45 = vunpack.c.l.bf16 %v13435_v50  ;;  %v2727_v11 = vpop.permute.xlu1 %2726 }
 0x576   :  { %2902 = vperm.xlu2 %6854, %v10505_v58  }
 0x577   :  { %v4329_v41 = vadd.f32 %v4064_v19, %v4063_v13  ;;  %v4067_v42 = vmul.f32 %v13436_v45, %v2703_v2  ;;  %v4068_v13 = vmul.f32 %v13437_v23, %v2709_v44  ;;  %v4070_v19 = vmul.f32 %v13440_v48, %v2721_v21 }
 0x579   :  { %v4330_v8 = vadd.f32 %v4329_v41, %v4065_v36  ;;  %v4069_v41 = vmul.f32 %v13439_v31, %v10490_v16  ;;  %v13444_v16 = vld [vmem:[#allocation23_spill] sm:$0xff] }
 0x57a   :  { %6857 = vset.pattern.permute.xlu1 %v10308_v59  ;;  %3969 = vperm.xlu0 %6980, %v10557_v47   ;;  %v13445_v23 = vunpack.c.l.bf16 %v13444_v16 }
 0x57b   :  { %v4331_v7 = vadd.f32 %v4330_v8, %v4066_v12  ;;  %v13441_v8 = vld [vmem:[#allocation22_spill] sm:$0xff] }
 0x57c   :  { %v13442_v12 = vunpack.c.l.bf16 %v13441_v8  ;;  %v13443_v45 = vunpack.c.h.bf16 %v13441_v8 }
 0x57d   :  { %v4332_v53 = vadd.f32 %v4331_v7, %v4067_v42  ;;  %v2739_v50 = vpop.permute.xlu1 %2738 }
 0x57e   :  { %6856 = vset.pattern.permute.xlu2 %v10235_v34  ;;  %v4071_v44 = vmul.f32 %v13442_v12, %v2727_v11  ;;  %v4072_v42 = vmul.f32 %v13443_v45, %v2733_v3  ;;  %v4073_v21 = vmul.f32 %v13445_v23, %v2739_v50 }
 0x57f   :  { %v4333_v36 = vadd.f32 %v4332_v53, %v4068_v13  ;;  %v13446_v53 = vunpack.c.h.bf16 %v13444_v16 }
 0x581   :  { %v4334_v40 = vadd.f32 %v4333_v36, %v4069_v41  ;;  %v4074_v27 = vmul.f32 %v13446_v53, %v2745_v1  ;;  %v10588_v41 = vpop.permute.xlu0 %3169 }
 0x582   :  { %2920 = vperm.xlu1 %6857, %v10505_v58   ;;  %6984 = vset.pattern.permute.xlu0 %v10308_v59  ;;  %13447 = vst [vmem:[#allocation179_spill] sm:$0xff] %v10588_v41 }
 0x583   :  { %v4335_v2 = vadd.f32 %v4334_v40, %v4070_v19  ;;  %v10623_v40 = vpop.permute.xlu2 %2750 }
 0x585   :  { %v4336_v7 = vadd.f32 %v4335_v2, %v4071_v44  ;;  %v10625_v8 = vpop.permute.xlu1 %2756 }
 0x586   :  { %2914 = vperm.xlu2 %6856, %v10505_v58  }
 0x587   :  { %v4337_v13 = vadd.f32 %v4336_v7, %v4072_v42 }
 0x589   :  { %v4338_v31 = vadd.f32 %v4337_v13, %v4073_v21  ;;  %v10593_v3 = vpop.permute.xlu0 %3654 }
 0x58a   :  { %6859 = vset.pattern.permute.xlu1 %v10259_v4  ;;  %2532 = vperm.xlu0 %6984, %v10211_v51   ;;  %13448 = vst [vmem:[#allocation178_spill] sm:$0xff] %v10593_v3 }
 0x58b   :  { %v10586_v11 = vadd.f32 %v4338_v31, %v4074_v27  ;;  %v10630_v12 = vpop.permute.xlu2 %2762 }
 0x58d   :  { %v10632_v44 = vpop.permute.xlu1 %2768 }
 0x58e   :  { %6858 = vset.pattern.permute.xlu2 %v10245_v24 }
 0x591   :  { %v10599_v51 = vpop.permute.xlu0 %3848 }
 0x592   :  { %2938 = vperm.xlu1 %6859, %v10505_v58   ;;  %3017 = vperm.xlu0 %6984, %v10321_v55   ;;  %13449 = vst [vmem:[#allocation184_spill] sm:$0xff] %v10599_v51  ;;  %v13457_v51 = vld [vmem:[#allocation3_spill] sm:$0xff] }
 0x593   :  { %v10639_v50 = vpop.permute.xlu2 %2781  ;;  %v13458_v3 = vunpack.c.l.bf16 %v13457_v51 }
 0x595   :  { %v10641_v45 = vpop.permute.xlu1 %2787 }
 0x596   :  { %2932 = vperm.xlu2 %6858, %v10505_v58  }
 0x59a   :  { %6861 = vset.pattern.permute.xlu1 %v10312_v14  ;;  %3502 = vperm.xlu0 %6984, %v10327_v10  }
 0x59b   :  { %v10648_v7 = vpop.permute.xlu2 %2793 }
 0x59c   :  { %v10604_v1 = vpop.permute.xlu0 %2987 }
 0x59d   :  { %v10650_v16 = vpop.permute.xlu1 %2799 }
 0x59e   :  { %6860 = vset.pattern.permute.xlu2 %v10255_v18 }
 0x5a2   :  { %2950 = vperm.xlu1 %6861, %v10505_v58   ;;  %3793 = vperm.xlu0 %6984, %v10494_v63  }
 0x5a4   :  { %v10609_v36 = vpop.permute.xlu0 %3472 }
 0x5a5   :  { %13450 = vst [vmem:[#allocation183_spill] sm:$0xff] %v10609_v36  ;;  %v4033_v36 = vmul.f32 %v13458_v3, %v10386_v43  ;;  %v13461_v43 = vld [vmem:[#allocation2_spill] sm:$0xff] }
 0x5a6   :  { %2944 = vperm.xlu2 %6860, %v10505_v58   ;;  %v13462_v3 = vunpack.c.l.bf16 %v13461_v43 }
 0x5aa   :  { %6863 = vset.pattern.permute.xlu1 %v10193_v5  ;;  %6987 = vset.pattern.permute.xlu0 %v10249_v20 }
 0x5ac   :  { %v10616_v48 = vpop.permute.xlu0 %3763 }
 0x5ad   :  { %13451 = vst [vmem:[#allocation202_spill] sm:$0xff] %v10616_v48  ;;  %v10665_v48 = vpop.permute.xlu1 %2817 }
 0x5ae   :  { %6862 = vset.pattern.permute.xlu2 %v10265_v49 }
 0x5b2   :  { %2969 = vperm.xlu1 %6863, %v10321_v55   ;;  %2926 = vperm.xlu0 %6987, %v10505_v58  }
 0x5b6   :  { %2962 = vperm.xlu2 %6862, %v10505_v58  }
 0x5ba   :  { %6865 = vset.pattern.permute.xlu1 %v10198_v56  ;;  %3411 = vperm.xlu0 %6987, %v10517_v54  }
 0x5bc   :  { %v10621_v19 = vpop.permute.xlu0 %2896 }
 0x5be   :  { %6864 = vset.pattern.permute.xlu2 %v10275_v33 }
 0x5c2   :  { %2981 = vperm.xlu1 %6865, %v10321_v55   ;;  %3896 = vperm.xlu0 %6987, %v10473_v60  }
 0x5c4   :  { %v10634_v2 = vpop.permute.xlu0 %3381 }
 0x5c5   :  { %13452 = vst [vmem:[#allocation201_spill] sm:$0xff] %v10634_v2 }
 0x5c6   :  { %2975 = vperm.xlu2 %6864, %v10321_v55  }
 0x5ca   :  { %6867 = vset.pattern.permute.xlu1 %v10225_v26  ;;  %6991 = vset.pattern.permute.xlu0 %v10245_v24 }
 0x5cc   :  { %v10644_v42 = vpop.permute.xlu0 %3866 }
 0x5cd   :  { %13453 = vst [vmem:[#allocation182_spill] sm:$0xff] %v10644_v42  ;;  %v10663_v42 = vpop.permute.xlu2 %2811 }
 0x5ce   :  { %6866 = vset.pattern.permute.xlu2 %v10229_v15 }
 0x5d2   :  { %2999 = vperm.xlu1 %6867, %v10321_v55   ;;  %2835 = vperm.xlu0 %6991, %v10214_v17   ;;  %v13454_v17 = vld [vmem:[#allocation4_spill] sm:$0xff] }
 0x5d3   :  { %v13455_v21 = vunpack.c.h.bf16 %v13454_v17  ;;  %v13456_v53 = vunpack.c.l.bf16 %v13454_v17 }
 0x5d5   :  { %v4032_v13 = vmul.f32 %v13455_v21, %v10544_v22  ;;  %v4031_v27 = vmul.f32 %v13456_v53, %v10374_v38  ;;  %v13460_v38 = vunpack.c.h.bf16 %v13457_v51  ;;  %v10678_v53 = vpop.permute.xlu2 %2823  ;;  %v13463_v51 = vunpack.c.h.bf16 %v13461_v43 }
 0x5d6   :  { %2993 = vperm.xlu2 %6866, %v10321_v55  }
 0x5d7   :  { %v4287_v31 = vadd.f32 %v4032_v13, %v4031_v27  ;;  %v4034_v17 = vmul.f32 %v13460_v38, %v10384_v0  ;;  %v10680_v27 = vpop.permute.xlu1 %2829  ;;  %v4036_v0 = vmul.f32 %v13463_v51, %v10396_v30 }
 0x5d9   :  { %v4288_v22 = vadd.f32 %v4287_v31, %v4033_v36  ;;  %v4035_v36 = vmul.f32 %v13462_v3, %v10394_v46  ;;  %v13465_v46 = vld [vmem:[#allocation6_spill] sm:$0xff] }
 0x5da   :  { %6869 = vset.pattern.permute.xlu1 %v10235_v34  ;;  %3320 = vperm.xlu0 %6991, %v10294_v61  }
 0x5db   :  { %v4289_v13 = vadd.f32 %v4288_v22, %v4034_v17 }
 0x5dc   :  { %v10653_v23 = vpop.permute.xlu0 %2805 }
 0x5dd   :  { %v4290_v31 = vadd.f32 %v4289_v13, %v4035_v36  ;;  %v10693_v17 = vpop.permute.xlu2 %2841  ;;  %v13466_v13 = vunpack.c.l.bf16 %v13465_v46 }
 0x5de   :  { %6868 = vset.pattern.permute.xlu2 %v10239_v32 }
 0x5df   :  { %v4291_v38 = vadd.f32 %v4290_v31, %v4036_v0  ;;  %v10695_v2 = vpop.permute.xlu1 %2847  ;;  %v4037_v3 = vmul.f32 %v13466_v13, %v10403_v28  ;;  %v13468_v31 = vld [vmem:[#allocation5_spill] sm:$0xff] }
 0x5e0   :  { %v13469_v51 = vunpack.c.l.bf16 %v13468_v31  ;;  %v13470_v28 = vunpack.c.h.bf16 %v13468_v31 }
 0x5e1   :  { %v4292_v36 = vadd.f32 %v4291_v38, %v4037_v3  ;;  %v13471_v3 = vld [vmem:[#allocation7_spill] sm:$0xff] }
 0x5e2   :  { %3011 = vperm.xlu1 %6869, %v10321_v55   ;;  %3999 = vperm.xlu0 %6991, %v10557_v47   ;;  %v4040_v38 = vmul.f32 %v13470_v28, %v10412_v35 }
 0x5e4   :  { %v10671_v21 = vpop.permute.xlu0 %3290 }
 0x5e5   :  { %13459 = vst [vmem:[#allocation189_spill] sm:$0xff] %v10671_v21  ;;  %v10708_v10 = vpop.permute.xlu2 %2853 }
 0x5e6   :  { %3005 = vperm.xlu2 %6868, %v10321_v55  }
 0x5e7   :  { %v10710_v21 = vpop.permute.xlu1 %2859 }
 0x5ea   :  { %6871 = vset.pattern.permute.xlu1 %v10245_v24  ;;  %6995 = vset.pattern.permute.xlu0 %v10255_v18 }
 0x5ec   :  { %v10691_v22 = vpop.permute.xlu0 %3969 }
 0x5ed   :  { %13464 = vst [vmem:[#allocation200_spill] sm:$0xff] %v10691_v22 }
 0x5ee   :  { %6870 = vset.pattern.permute.xlu2 %v10249_v20 }
 0x5f2   :  { %3029 = vperm.xlu1 %6871, %v10321_v55   ;;  %2653 = vperm.xlu0 %6995, %v10280_v52   ;;  %v13467_v52 = vunpack.c.h.bf16 %v13465_v46  ;;  %v13472_v46 = vunpack.c.l.bf16 %v13471_v3 }
 0x5f4   :  { %v4038_v30 = vmul.f32 %v13467_v52, %v10405_v57  ;;  %v4041_v57 = vmul.f32 %v13472_v46, %v10414_v62 }
 0x5f6   :  { %3023 = vperm.xlu2 %6870, %v10321_v55   ;;  %v4293_v22 = vadd.f32 %v4292_v36, %v4038_v30  ;;  %v13473_v36 = vunpack.c.h.bf16 %v13471_v3 }
 0x5f8   :  { %v4042_v30 = vmul.f32 %v13473_v36, %v10421_v9  ;;  %v13477_v9 = vld [vmem:[#allocation34_spill] sm:$0xff] }
 0x5f9   :  { %v13479_v3 = vunpack.c.l.bf16 %v13477_v9 }
 0x5fa   :  { %6873 = vset.pattern.permute.xlu1 %v10255_v18  ;;  %3138 = vperm.xlu0 %6995, %v10342_v39  }
 0x5fc   :  { %v2533_v43 = vpop.permute.xlu0 %2532 }
 0x5fd   :  { %v4039_v0 = vmul.f32 %v13469_v51, %v2533_v43  ;;  %v13474_v51 = vld [vmem:[#allocation9_spill] sm:$0xff] }
 0x5fe   :  { %6872 = vset.pattern.permute.xlu2 %v10259_v4  ;;  %v13475_v41 = vunpack.c.l.bf16 %v13474_v51  ;;  %v13476_v62 = vunpack.c.h.bf16 %v13474_v51 }
 0x5ff   :  { %v4294_v13 = vadd.f32 %v4293_v22, %v4039_v0  ;;  %v2873_v22 = vpop.permute.xlu2 %2872  ;;  %v2879_v0 = vpop.permute.xlu1 %2878 }
 0x600   :  { %v4043_v31 = vmul.f32 %v13475_v41, %v10423_v29  ;;  %v4044_v28 = vmul.f32 %v13476_v62, %v10407_v6  ;;  %v13478_v29 = vunpack.c.h.bf16 %v13477_v9  ;;  %v13483_v9 = vld [vmem:[#allocation36_spill] sm:$0xff] }
 0x601   :  { %v4295_v52 = vadd.f32 %v4294_v13, %v4040_v38 }
 0x602   :  { %3041 = vperm.xlu1 %6873, %v10321_v55   ;;  %3623 = vperm.xlu0 %6995, %v10348_v25   ;;  %v4096_v41 = vmul.f32 %v13478_v29, %v2879_v0  ;;  %v13484_v29 = vunpack.c.l.bf16 %v13483_v9 }
 0x603   :  { %v4296_v43 = vadd.f32 %v4295_v52, %v4041_v57  ;;  %v4095_v57 = vmul.f32 %v13479_v3, %v2873_v22 }
 0x604   :  { %v10731_v13 = vpop.permute.xlu0 %3017 }
 0x605   :  { %v4297_v35 = vadd.f32 %v4296_v43, %v4042_v30  ;;  %v4371_v6 = vadd.f32 %v4096_v41, %v4095_v57  ;;  %v13480_v30 = vld [vmem:[#allocation35_spill] sm:$0xff]  ;;  %v4099_v41 = vmul.f32 %v13484_v29, %v10621_v19  ;;  %v13485_v57 = vunpack.c.h.bf16 %v13483_v9 }
 0x606   :  { %3035 = vperm.xlu2 %6872, %v10321_v55   ;;  %v13481_v43 = vunpack.c.l.bf16 %v13480_v30 }
 0x607   :  { %v4298_v38 = vadd.f32 %v4297_v35, %v4043_v31  ;;  %v2885_v52 = vpop.permute.xlu2 %2884  ;;  %v2891_v36 = vpop.permute.xlu1 %2890  ;;  %v13482_v31 = vunpack.c.h.bf16 %v13480_v30 }
 0x608   :  { %v4097_v51 = vmul.f32 %v13481_v43, %v2885_v52 }
 0x609   :  { %v10733_v46 = vadd.f32 %v4298_v38, %v4044_v28  ;;  %v4098_v35 = vmul.f32 %v13482_v31, %v2891_v36  ;;  %v13486_v36 = vld [vmem:[#allocation37_spill] sm:$0xff] }
 0x60a   :  { %6875 = vset.pattern.permute.xlu1 %v10265_v49  ;;  %3914 = vperm.xlu0 %6995, %v10473_v60   ;;  %v4372_v0 = vadd.f32 %v4371_v6, %v4097_v51  ;;  %v13487_v30 = vunpack.c.l.bf16 %v13486_v36  ;;  %v13489_v19 = vunpack.c.h.bf16 %v13486_v36 }
 0x60c   :  { %v10746_v62 = vpop.permute.xlu0 %3502  ;;  %v4373_v28 = vadd.f32 %v4372_v0, %v4098_v35 }
 0x60e   :  { %6874 = vset.pattern.permute.xlu2 %v10269_v37  ;;  %v4374_v3 = vadd.f32 %v4373_v28, %v4099_v41  ;;  %v13490_v28 = vld [vmem:[#allocation38_spill] sm:$0xff] }
 0x60f   :  { %v2903_v22 = vpop.permute.xlu2 %2902  ;;  %v2909_v38 = vpop.permute.xlu1 %2908  ;;  %v13491_v29 = vunpack.c.l.bf16 %v13490_v28  ;;  %v13492_v41 = vunpack.c.h.bf16 %v13490_v28 }
 0x610   :  { %v4100_v52 = vmul.f32 %v13485_v57, %v2903_v22  ;;  %v4101_v6 = vmul.f32 %v13487_v30, %v2909_v38  ;;  %v13493_v57 = vld [vmem:[#allocation26_spill] sm:$0xff] }
 0x612   :  { %3059 = vperm.xlu1 %6875, %v10321_v55   ;;  %6999 = vset.pattern.permute.xlu0 %v10269_v37  ;;  %v4375_v51 = vadd.f32 %v4374_v3, %v4100_v52  ;;  %v13494_v52 = vunpack.c.h.bf16 %v13493_v57 }
 0x614   :  { %v10760_v43 = vpop.permute.xlu0 %3793  ;;  %v4376_v35 = vadd.f32 %v4375_v51, %v4101_v6  ;;  %v4080_v36 = vmul.f32 %v13494_v52, %v10639_v50 }
 0x615   :  { %13488 = vst [vmem:[#allocation207_spill] sm:$0xff] %v10760_v43 }
 0x616   :  { %3053 = vperm.xlu2 %6874, %v10321_v55  }
 0x617   :  { %v2915_v31 = vpop.permute.xlu2 %2914  ;;  %v2921_v55 = vpop.permute.xlu1 %2920 }
 0x618   :  { %v4102_v0 = vmul.f32 %v13489_v19, %v2915_v31  ;;  %v13495_v31 = vld [vmem:[#allocation121_spill] sm:$0xff]  ;;  %v13497_v19 = vld [vmem:[#allocation27_spill] sm:$0xff] }
 0x61a   :  { %6877 = vset.pattern.permute.xlu1 %v10275_v33  ;;  %2956 = vperm.xlu0 %6999, %v10505_v58   ;;  %v4103_v58 = vmul.f32 %v13491_v29, %v2921_v55  ;;  %v4377_v22 = vadd.f32 %v4376_v35, %v4102_v0  ;;  %v13496_v55 = vunpack.c.l.bf16 %v13493_v57  ;;  %v13498_v0 = vunpack.c.l.bf16 %v13497_v19 }
 0x61c   :  { %v4378_v9 = vadd.f32 %v4377_v22, %v4103_v58  ;;  %v4079_v35 = vmul.f32 %v13496_v55, %v13495_v31  ;;  %v4081_v28 = vmul.f32 %v13498_v0, %v10641_v45  ;;  %v13499_v58 = vld [vmem:[#allocation155_spill] sm:$0xff]  ;;  %v13500_v22 = vunpack.c.h.bf16 %v13497_v19 }
 0x61e   :  { %6876 = vset.pattern.permute.xlu2 %v10193_v5  ;;  %v4350_v29 = vadd.f32 %v4080_v36, %v4079_v35 }
 0x61f   :  { %v10777_v6 = vpop.permute.xlu2 %2932  ;;  %v10779_v51 = vpop.permute.xlu1 %2938 }
 0x620   :  { %v4351_v50 = vadd.f32 %v4350_v29, %v4081_v28 }
 0x622   :  { %3072 = vperm.xlu1 %6877, %v10342_v39   ;;  %3441 = vperm.xlu0 %6999, %v10517_v54  }
 0x624   :  { %v2927_v38 = vpop.permute.xlu0 %2926 }
 0x625   :  { %v4104_v3 = vmul.f32 %v13492_v41, %v2927_v38  ;;  %v4082_v38 = vmul.f32 %v13500_v22, %v10648_v7 }
 0x626   :  { %3066 = vperm.xlu2 %6876, %v10342_v39  }
 0x627   :  { %v10775_v30 = vadd.f32 %v4378_v9, %v4104_v3  ;;  %v13501_v9 = vld [vmem:[#allocation28_spill] sm:$0xff]  ;;  %v10796_v57 = vpop.permute.xlu2 %2944  ;;  %v10798_v52 = vpop.permute.xlu1 %2950  ;;  %v4352_v45 = vadd.f32 %v4351_v50, %v4082_v38 }
 0x628   :  { %v13502_v41 = vunpack.c.l.bf16 %v13501_v9  ;;  %v13503_v31 = vunpack.c.h.bf16 %v13501_v9 }
 0x62a   :  { %6879 = vset.pattern.permute.xlu1 %v10229_v15  ;;  %3829 = vperm.xlu0 %6999, %v10494_v63   ;;  %v4083_v3 = vmul.f32 %v13502_v41, %v10650_v16  ;;  %v4084_v36 = vmul.f32 %v13503_v31, %v10653_v23  ;;  %v13504_v16 = vld [vmem:[#allocation29_spill] sm:$0xff]  ;;  %v13508_v41 = vld [vmem:[#allocation30_spill] sm:$0xff] }
 0x62b   :  { %v13505_v19 = vunpack.c.l.bf16 %v13504_v16  ;;  %v13506_v23 = vunpack.c.h.bf16 %v13504_v16 }
 0x62c   :  { %v10803_v55 = vpop.permute.xlu0 %3411  ;;  %v4353_v7 = vadd.f32 %v4352_v45, %v4083_v3 }
 0x62d   :  { %v4085_v0 = vmul.f32 %v13505_v19, %v10663_v42  ;;  %v4086_v22 = vmul.f32 %v13506_v23, %v10665_v48  ;;  %v13509_v42 = vunpack.c.l.bf16 %v13508_v41  ;;  %v13512_v48 = vunpack.c.h.bf16 %v13508_v41  ;;  %v13514_v23 = vld [vmem:[#allocation46_spill] sm:$0xff] }
 0x62e   :  { %6878 = vset.pattern.permute.xlu2 %v13499_v58  ;;  %v4354_v35 = vadd.f32 %v4353_v7, %v4084_v36  ;;  %v13510_v36 = vld [vmem:[#allocation45_spill] sm:$0xff] }
 0x62f   :  { %v10811_v28 = vpop.permute.xlu2 %2962  ;;  %v2970_v29 = vpop.permute.xlu1 %2969  ;;  %v4087_v3 = vmul.f32 %v13509_v42, %v10678_v53  ;;  %v13511_v7 = vunpack.c.l.bf16 %v13510_v36  ;;  %v4088_v16 = vmul.f32 %v13512_v48, %v10680_v27  ;;  %v13516_v42 = vld [vmem:[#allocation31_spill] sm:$0xff] }
 0x630   :  { %v4355_v50 = vadd.f32 %v4354_v35, %v4085_v0  ;;  %v13513_v0 = vunpack.c.h.bf16 %v13510_v36 }
 0x631   :  { %v4111_v35 = vmul.f32 %v13511_v7, %v2970_v29  ;;  %v13518_v29 = vunpack.c.h.bf16 %v13516_v42 }
 0x632   :  { %3090 = vperm.xlu1 %6879, %v10342_v39   ;;  %4023 = vperm.xlu0 %6999, %v10557_v47   ;;  %v4356_v9 = vadd.f32 %v4355_v50, %v4086_v22  ;;  %v13515_v22 = vunpack.c.l.bf16 %v13514_v23  ;;  %v13517_v47 = vunpack.c.l.bf16 %v13516_v42 }
 0x634   :  { %v10818_v38 = vpop.permute.xlu0 %3896  ;;  %v4357_v19 = vadd.f32 %v4356_v9, %v4087_v3  ;;  %v4090_v9 = vmul.f32 %v13518_v29, %v10693_v17 }
 0x635   :  { %13507 = vst [vmem:[#allocation188_spill] sm:$0xff] %v10818_v38 }
 0x636   :  { %3084 = vperm.xlu2 %6878, %v10342_v39   ;;  %v4358_v63 = vadd.f32 %v4357_v19, %v4088_v16 }
 0x637   :  { %v2976_v45 = vpop.permute.xlu2 %2975  ;;  %v2982_v31 = vpop.permute.xlu1 %2981 }
 0x638   :  { %v4112_v50 = vmul.f32 %v13513_v0, %v2976_v45  ;;  %v4113_v38 = vmul.f32 %v13515_v22, %v2982_v31  ;;  %v13519_v45 = vunpack.c.h.bf16 %v13514_v23  ;;  %v13520_v31 = vld [vmem:[#allocation32_spill] sm:$0xff]  ;;  %v13525_v0 = vld [vmem:[#allocation47_spill] sm:$0xff] }
 0x639   :  { %v13521_v7 = vunpack.c.l.bf16 %v13520_v31 }
 0x63a   :  { %6881 = vset.pattern.permute.xlu1 %v10239_v32  ;;  %7008 = vset.pattern.permute.xlu0 %v10265_v49  ;;  %v4392_v53 = vadd.f32 %v4112_v50, %v4111_v35  ;;  %v4114_v36 = vmul.f32 %v13519_v45, %v10604_v1  ;;  %v13526_v1 = vunpack.c.l.bf16 %v13525_v0 }
 0x63b   :  { %v4091_v35 = vmul.f32 %v13521_v7, %v10695_v2  ;;  %v13527_v2 = vunpack.c.h.bf16 %v13525_v0 }
 0x63c   :  { %v4393_v41 = vadd.f32 %v4392_v53, %v4113_v38  ;;  %v13528_v53 = vld [vmem:[#allocation24_spill] sm:$0xff] }
 0x63d   :  { %v13529_v42 = vunpack.c.l.bf16 %v13528_v53  ;;  %v13532_v7 = vunpack.c.h.bf16 %v13528_v53 }
 0x63e   :  { %6880 = vset.pattern.permute.xlu2 %v10225_v26  ;;  %v4394_v17 = vadd.f32 %v4393_v41, %v4114_v36 }
 0x63f   :  { %v2994_v3 = vpop.permute.xlu2 %2993  ;;  %v4075_v29 = vmul.f32 %v13529_v42, %v10623_v40  ;;  %v13533_v40 = vld [vmem:[#allocation48_spill] sm:$0xff] }
 0x640   :  { %v4115_v50 = vmul.f32 %v13526_v1, %v2994_v3  ;;  %v13538_v0 = vunpack.c.h.bf16 %v13533_v40 }
 0x642   :  { %3102 = vperm.xlu1 %6881, %v10342_v39   ;;  %v4395_v45 = vadd.f32 %v4394_v17, %v4115_v50  ;;  %v13536_v17 = vld [vmem:[#allocation8_spill] sm:$0xff]  ;;  %v13539_v50 = vld [vmem:[#allocation25_spill] sm:$0xff] }
 0x644   :  { %v2836_v43 = vpop.permute.xlu0 %2835 }
 0x645   :  { %v4089_v60 = vmul.f32 %v13517_v47, %v2836_v43  ;;  %v3000_v47 = vpop.permute.xlu1 %2999  ;;  %v13522_v43 = vunpack.c.h.bf16 %v13520_v31 }
 0x646   :  { %3096 = vperm.xlu2 %6880, %v10342_v39   ;;  %v4116_v22 = vmul.f32 %v13527_v2, %v3000_v47  ;;  %v13534_v47 = vunpack.c.l.bf16 %v13533_v40  ;;  %v13541_v2 = vld [vmem:[#allocation170_spill] sm:$0xff]  ;;  %v13549_v40 = vunpack.c.h.bf16 %v13539_v50 }
 0x647   :  { %v4359_v27 = vadd.f32 %v4358_v63, %v4089_v60  ;;  %v4092_v19 = vmul.f32 %v13522_v43, %v10708_v10  ;;  %v13523_v60 = vld [vmem:[#allocation33_spill] sm:$0xff]  ;;  %v13530_v10 = vld [vmem:[#allocation120_spill] sm:$0xff]  ;;  %v3006_v36 = vpop.permute.xlu2 %3005 }
 0x648   :  { %v13524_v63 = vunpack.c.l.bf16 %v13523_v60  ;;  %v4396_v31 = vadd.f32 %v4395_v45, %v4116_v22  ;;  %v4117_v43 = vmul.f32 %v13534_v47, %v3006_v36  ;;  %v13542_v22 = vld [vmem:[#allocation14_spill] sm:$0xff]  ;;  %v13547_v36 = vunpack.c.h.bf16 %v13536_v17 }
 0x649   :  { %v4360_v48 = vadd.f32 %v4359_v27, %v4090_v9  ;;  %v13531_v9 = vunpack.c.h.bf16 %v13523_v60  ;;  %v13535_v60 = vld [vmem:[#allocation144_spill] sm:$0xff]  ;;  %v13543_v53 = vunpack.c.l.bf16 %v13542_v22  ;;  %v4078_v47 = vmul.f32 %v13549_v40, %v10632_v44 }
 0x64a   :  { %6883 = vset.pattern.permute.xlu1 %v10249_v20  ;;  %v4093_v16 = vmul.f32 %v13524_v63, %v10710_v21  ;;  %v4340_v21 = vadd.f32 %v10586_v11, %v4075_v29  ;;  %v13537_v63 = vunpack.c.l.bf16 %v13536_v17  ;;  %v13552_v17 = vld [vmem:[#allocation124_spill] sm:$0xff] }
 0x64b   :  { %v4361_v38 = vadd.f32 %v4360_v48, %v4091_v35  ;;  %v4094_v41 = vmul.f32 %v13531_v9, %v13530_v10  ;;  %v4076_v35 = vmul.f32 %v13532_v7, %v10625_v8  ;;  %v13540_v8 = vunpack.c.l.bf16 %v13539_v50  ;;  %v13544_v10 = vld [vmem:[#allocation49_spill] sm:$0xff]  ;;  %v13548_v7 = vld [vmem:[#allocation103_spill] sm:$0xff] }
 0x64c   :  { %v10868_v48 = vpop.permute.xlu0 %3320  ;;  %v4045_v11 = vmul.f32 %v13537_v63, %v13535_v60  ;;  %v4055_v42 = vmul.f32 %v13543_v53, %v13541_v2  ;;  %v13545_v9 = vunpack.c.l.bf16 %v13544_v10 }
 0x64d   :  { %v4362_v23 = vadd.f32 %v4361_v38, %v4092_v19  ;;  %v4341_v19 = vadd.f32 %v4340_v21, %v4076_v35  ;;  %v13546_v21 = vld [vmem:[#allocation102_spill] sm:$0xff] }
 0x64e   :  { %6882 = vset.pattern.permute.xlu2 %v10308_v59  ;;  %v4300_v29 = vadd.f32 %v10733_v46, %v4045_v11  ;;  %v13550_v46 = vld [vmem:[#allocation147_spill] sm:$0xff] }
 0x64f   :  { %v4363_v27 = vadd.f32 %v4362_v23, %v4093_v16  ;;  %v4397_v16 = vadd.f32 %v4396_v31, %v4117_v43  ;;  %v4077_v23 = vmul.f32 %v13540_v8, %v10630_v12  ;;  %v4046_v31 = vmul.f32 %v13547_v36, %v13546_v21  ;;  %v13553_v11 = vld [vmem:[#allocation15_spill] sm:$0xff] }
 0x650   :  { %v4315_v12 = vadd.f32 %v13548_v7, %v4055_v42  ;;  %v13551_v43 = vunpack.c.h.bf16 %v13542_v22  ;;  %v13556_v2 = vunpack.c.h.bf16 %v13553_v11  ;;  %v13559_v36 = vld [vmem:[#allocation175_spill] sm:$0xff] }
 0x651   :  { %v4364_v3 = vadd.f32 %v4363_v27, %v4094_v41  ;;  %v4119_v41 = vmul.f32 %v13545_v9, %v10731_v13  ;;  %v4342_v45 = vadd.f32 %v4341_v19, %v4077_v23  ;;  %v4301_v13 = vadd.f32 %v4300_v29, %v4046_v31  ;;  %v13555_v23 = vld [vmem:[#allocation169_spill] sm:$0xff] }
 0x652   :  { %3120 = vperm.xlu1 %6883, %v10342_v39   ;;  %v4058_v22 = vmul.f32 %v13556_v2, %v13555_v23  ;;  %v13566_v23 = vunpack.c.h.bf16 %v13544_v10 }
 0x653   :  { %v4343_v60 = vadd.f32 %v4342_v45, %v4078_v47  ;;  %v4365_v44 = vrot.slane %v4364_v3, 4  ;;  %v3024_v47 = vpop.permute.xlu2 %3023 }
 0x654   :  { %v3012_v38 = vpop.permute.xlu1 %3011  ;;  %v10900_v19 = vpop.permute.xlu0 %3999  ;;  %v4120_v2 = vmul.f32 %v13566_v23, %v3024_v47 }
 0x655   :  { %v4118_v1 = vmul.f32 %v13538_v0, %v3012_v38  ;;  %v4056_v38 = vmul.f32 %v13551_v43, %v13550_v46  ;;  %v4344_v50 = vrot.slane %v4343_v60, 4  ;;  %v4366_v9 = vadd.f32 %v4365_v44, %v4364_v3  ;;  %v13561_v43 = vld [vmem:[#allocation153_spill] sm:$0xff] }
 0x656   :  { %3114 = vperm.xlu2 %6882, %v10342_v39  }
 0x657   :  { %v4398_v27 = vadd.f32 %v4397_v16, %v4118_v1  ;;  %v4316_v63 = vadd.f32 %v4315_v12, %v4056_v38  ;;  %v13554_v16 = vunpack.c.l.bf16 %v13553_v11  ;;  %v4302_v1 = vrot.slane %v4301_v13, 4  ;;  %v13562_v38 = vld [vmem:[#allocation17_spill] sm:$0xff]  ;;  %v13564_v11 = vld [vmem:[#allocation174_spill] sm:$0xff] }
 0x658   :  { %v4345_v42 = vadd.f32 %v4344_v50, %v4343_v60 }
 0x659   :  { %v4399_v35 = vadd.f32 %v4398_v27, %v4119_v41  ;;  %v4057_v0 = vmul.f32 %v13554_v16, %v13552_v17  ;;  %v4303_v53 = vadd.f32 %v4302_v1, %v4301_v13  ;;  %v13557_v41 = vld [vmem:[#allocation16_spill] sm:$0xff]  ;;  %v13563_v13 = vunpack.c.l.bf16 %v13562_v38 }
 0x65a   :  { %6885 = vset.pattern.permute.xlu1 %v10259_v4  ;;  %v13558_v27 = vunpack.c.l.bf16 %v13557_v41  ;;  %v13560_v31 = vunpack.c.h.bf16 %v13557_v41  ;;  %v4346_v46 = vrot.slane %v4345_v42, 2  ;;  %v13565_v16 = vunpack.c.h.bf16 %v13562_v38 }
 0x65b   :  { %v4317_v8 = vadd.f32 %v4316_v63, %v4057_v0  ;;  %v4304_v12 = vrot.slane %v4303_v53, 2  ;;  %v4061_v60 = vmul.f32 %v13563_v13, %v13561_v43  ;;  %v4367_v63 = vrot.slane %v4366_v9, 2 }
 0x65c   :  { %v4060_v7 = vmul.f32 %v13560_v31, %v13559_v36  ;;  %v4062_v0 = vmul.f32 %v13565_v16, %v13564_v11  ;;  %v4347_v44 = vadd.f32 %v4346_v46, %v4345_v42  ;;  %v4400_v36 = vadd.f32 %v4399_v35, %v4120_v2  ;;  %v13570_v35 = vld [vmem:[#allocation53_spill] sm:$0xff]  ;;  %v13572_v11 = vld [vmem:[#allocation166_spill] sm:$0xff] }
 0x65d   :  { %v4318_v21 = vadd.f32 %v4317_v8, %v4058_v22  ;;  %v4305_v1 = vadd.f32 %v4304_v12, %v4303_v53  ;;  %v4368_v8 = vadd.f32 %v4367_v63, %v4366_v9  ;;  %v13573_v16 = vunpack.c.h.bf16 %v13570_v35 }
 0x65e   :  { %6884 = vset.pattern.permute.xlu2 %v10245_v24 }
 0x65f   :  { %v4369_v53 = vrot.slane %v4368_v8, 1 }
 0x660   :  { %v3036_v31 = vpop.permute.xlu2 %3035 }
 0x661   :  { %v4370_v13 = vadd.f32 %v4369_v53, %v4368_v8  ;;  %v13574_v53 = vld [vmem:[#allocation39_spill] sm:$0xff] }
 0x662   :  { %3132 = vperm.xlu1 %6885, %v10342_v39  }
 0x664   :  { %v2654_v29 = vpop.permute.xlu0 %2653  ;;  %v3030_v17 = vpop.permute.xlu1 %3029 }
 0x665   :  { %v4059_v45 = vmul.f32 %v13558_v27, %v2654_v29  ;;  %v13567_v29 = vld [vmem:[#allocation52_spill] sm:$0xff] }
 0x666   :  { %3126 = vperm.xlu2 %6884, %v10342_v39   ;;  %v13568_v41 = vunpack.c.l.bf16 %v13567_v29  ;;  %v13569_v9 = vunpack.c.h.bf16 %v13567_v29 }
 0x667   :  { %v4319_v40 = vadd.f32 %v4318_v21, %v4059_v45  ;;  %v4306_v45 = vrot.slane %v4305_v1, 1 }
 0x668   :  { %v4121_v27 = vmul.f32 %v13568_v41, %v3030_v17  ;;  %v4122_v47 = vmul.f32 %v13569_v9, %v3036_v31 }
 0x669   :  { %v4320_v3 = vadd.f32 %v4319_v40, %v4060_v7  ;;  %v4348_v40 = vrot.slane %v4347_v44, 1  ;;  %v4307_v10 = vadd.f32 %v4306_v45, %v4305_v1 }
 0x66a   :  { %6887 = vset.pattern.permute.xlu1 %v10269_v37  ;;  %v4401_v42 = vadd.f32 %v4400_v36, %v4121_v27 }
 0x66b   :  { %v4321_v50 = vadd.f32 %v4320_v3, %v4061_v60  ;;  %v4349_v38 = vadd.f32 %v4348_v40, %v4347_v44  ;;  %v13571_v3 = vunpack.c.l.bf16 %v13570_v35 }
 0x66c   :  { %v10928_v7 = vpop.permute.xlu0 %3138  ;;  %v4402_v63 = vadd.f32 %v4401_v42, %v4122_v47 }
 0x66d   :  { %v4322_v22 = vadd.f32 %v4321_v50, %v4062_v0  ;;  %v4124_v0 = vmul.f32 %v13573_v16, %v13572_v11  ;;  %v4624_v50 = vpack.c.bf16 %v4307_v10, %v4307_v10  ;;  %v4626_v2 = vpack.c.bf16 %v4349_v38, %v4349_v38 }
 0x66e   :  { %6886 = vset.pattern.permute.xlu2 %v10312_v14  ;;  %v13579_v16 = vunpack.c.h.bf16 %v13574_v53 }
 0x66f   :  { %v4323_v21 = vrot.slane %v4322_v22, 4  ;;  %v4720_v8 = vperm.slane %v4624_v50, 0  ;;  %v4722_v45 = vperm.slane %v4626_v2, 0  ;;  %v5616_v10 = vunpack.c.l.b16 %v4626_v2 }
 0x670   :  { %v3054_v38 = vpop.permute.xlu2 %3053 }
 0x671   :  { %v4324_v12 = vadd.f32 %v4323_v21, %v4322_v22  ;;  %v4627_v22 = vpack.c.bf16 %v4370_v13, %v4370_v13  ;;  %v5614_v21 = vunpack.c.l.b16 %v4624_v50  ;;  %v4736_v9 = vunpack.c.l.b16 %v4720_v8  ;;  %v13580_v50 = vld [vmem:[#allocation57_spill] sm:$0xff] }
 0x672   :  { %3150 = vperm.xlu1 %6887, %v10342_v39  }
 0x673   :  { %v4325_v46 = vrot.slane %v4324_v12, 2  ;;  %v4723_v36 = vperm.slane %v4627_v22, 0  ;;  %v5617_v47 = vunpack.c.l.b16 %v4627_v22 }
 0x674   :  { %v3042_v43 = vpop.permute.xlu1 %3041  ;;  %v10939_v44 = vpop.permute.xlu0 %3623 }
 0x675   :  { %v4326_v60 = vadd.f32 %v4325_v46, %v4324_v12  ;;  %v4123_v17 = vmul.f32 %v13571_v3, %v3042_v43  ;;  %v13575_v12 = vunpack.c.l.bf16 %v13574_v53  ;;  %v4739_v35 = vunpack.c.l.b16 %v4723_v36 }
 0x676   :  { %3144 = vperm.xlu2 %6886, %v10342_v39  }
 0x677   :  { %v4327_v1 = vrot.slane %v4326_v60, 1  ;;  %v4403_v23 = vadd.f32 %v4402_v63, %v4123_v17  ;;  %v4105_v42 = vmul.f32 %v13575_v12, %v10777_v6  ;;  %v13577_v6 = vld [vmem:[#allocation161_spill] sm:$0xff] }
 0x679   :  { %v4328_v29 = vadd.f32 %v4327_v1, %v4326_v60  ;;  %v4404_v41 = vadd.f32 %v4403_v23, %v4124_v0  ;;  %v4738_v60 = vunpack.c.l.b16 %v4722_v45  ;;  %v4380_v63 = vadd.f32 %v10775_v30, %v4105_v42 }
 0x67a   :  { %6889 = vset.pattern.permute.xlu1 %v10193_v5  ;;  %v4106_v0 = vmul.f32 %v13579_v16, %v10779_v51  ;;  %v13581_v1 = vunpack.c.l.bf16 %v13580_v50 }
 0x67b   :  { %v4625_v27 = vpack.c.bf16 %v4328_v29, %v4328_v29 }
 0x67c   :  { %v4125_v23 = vmul.f32 %v13581_v1, %v3054_v38  ;;  %v10959_v22 = vpop.permute.xlu0 %3914  ;;  %v4381_v29 = vadd.f32 %v4380_v63, %v4106_v0 }
 0x67d   :  { %v4721_v31 = vperm.slane %v4625_v27, 0  ;;  %v5615_v40 = vunpack.c.l.b16 %v4625_v27  ;;  %v13583_v27 = vunpack.c.h.bf16 %v13580_v50 }
 0x67e   :  { %6888 = vset.pattern.permute.xlu2 %v10265_v49  ;;  %v4405_v8 = vadd.f32 %v4404_v41, %v4125_v23 }
 0x67f   :  { %v4737_v46 = vunpack.c.l.b16 %v4721_v31  ;;  %v5630_v43 = vsel %vm13378_vm2, %v5615_v40, %v5614_v21  ;;  %v13584_v21 = vld [vmem:[#allocation41_spill] sm:$0xff]  ;;  %vm13766_vm2 = vmmov %vm13381_vm4 }
 0x680   :  { %v5631_v13 = vsel %vm13380_vm3, %v5616_v10, %v5630_v43  ;;  %v13585_v36 = vunpack.c.l.bf16 %v13584_v21  ;;  %v13586_v12 = vunpack.c.h.bf16 %v13584_v21  ;;  %vm13767_vm3 = vmmov %vm13766_vm2 }
 0x681   :  { %v5632_v3 = vsel %vm13381_vm4, %v5617_v47, %v5631_v13  ;;  %v4752_v17 = vsel %vm13576_vm5, %v4737_v46, %v4736_v9  ;;  %v13587_v47 = vld [vmem:[#allocation44_spill] sm:$0xff]  ;;  %vm13870_vm5 = vmmov %vm13648_vm8 }
 0x682   :  { %3163 = vperm.xlu1 %6889, %v13577_v6   ;;  %v4753_v11 = vsel %vm13578_vm12, %v4738_v60, %v4752_v17  ;;  %v4107_v31 = vmul.f32 %v13585_v36, %v10796_v57  ;;  %v4108_v42 = vmul.f32 %v13586_v12, %v10798_v52  ;;  %v13588_v46 = vunpack.c.l.bf16 %v13587_v47 }
 0x683   :  { %v4754_v2 = vsel %vm13582_vm6, %v4739_v35, %v4753_v11  ;;  %v13589_v57 = vunpack.c.h.bf16 %v13587_v47 }
 0x684   :  { %v3060_v30 = vpop.permute.xlu1 %3059  ;;  %v4382_v53 = vadd.f32 %v4381_v29, %v4107_v31 }
 0x685   :  { %v4126_v45 = vmul.f32 %v13583_v27, %v3060_v30  ;;  %v4110_v38 = vmul.f32 %v13589_v57, %v10811_v28  ;;  %v3067_v30 = vpop.permute.xlu2 %3066 }
 0x686   :  { %3156 = vperm.xlu2 %6888, %v10342_v39   ;;  %v4383_v39 = vadd.f32 %v4382_v53, %v4108_v42 }
 0x687   :  { %v4406_v51 = vadd.f32 %v4405_v8, %v4126_v45 }
 0x689   :  { %v4407_v40 = vrot.slane %v4406_v51, 4 }
 0x68a   :  { %6891 = vset.pattern.permute.xlu1 %v13499_v58 }
 0x68b   :  { %v4408_v10 = vadd.f32 %v4407_v40, %v4406_v51  ;;  %v13590_v51 = vld [vmem:[#allocation59_spill] sm:$0xff] }
 0x68c   :  { %v2957_v41 = vpop.permute.xlu0 %2956  ;;  %v13591_v40 = vunpack.c.h.bf16 %v13590_v51 }
 0x68d   :  { %v4409_v9 = vrot.slane %v4408_v10, 2  ;;  %v4109_v43 = vmul.f32 %v13588_v46, %v2957_v41 }
 0x68e   :  { %6890 = vset.pattern.permute.xlu2 %v10198_v56 }
 0x68f   :  { %v4384_v13 = vadd.f32 %v4383_v39, %v4109_v43  ;;  %v4410_v60 = vadd.f32 %v4409_v9, %v4408_v10  ;;  %v13592_v10 = vunpack.c.l.bf16 %v13590_v51  ;;  %v13594_v39 = vld [vmem:[#allocation60_spill] sm:$0xff] }
 0x690   :  { %v3085_v43 = vpop.permute.xlu2 %3084  ;;  %v13595_v57 = vunpack.c.l.bf16 %v13594_v39 }
 0x691   :  { %v4385_v63 = vadd.f32 %v4384_v13, %v4110_v38  ;;  %v4411_v52 = vrot.slane %v4410_v60, 1  ;;  %v4127_v41 = vmul.f32 %v13592_v10, %v3067_v30  ;;  %v13600_v30 = vld [vmem:[#allocation68_spill] sm:$0xff] }
 0x692   :  { %3181 = vperm.xlu1 %6891, %v13577_v6  }
 0x693   :  { %v4386_v35 = vrot.slane %v4385_v63, 4  ;;  %v4412_v16 = vadd.f32 %v4411_v52, %v4410_v60  ;;  %v13597_v52 = vld [vmem:[#allocation64_spill] sm:$0xff] }
 0x694   :  { %v3073_v8 = vpop.permute.xlu1 %3072 }
 0x695   :  { %v4387_v17 = vadd.f32 %v4386_v35, %v4385_v63  ;;  %v4629_v1 = vpack.c.bf16 %v4412_v16, %v4412_v16  ;;  %v4128_v53 = vmul.f32 %v13591_v40, %v3073_v8  ;;  %v13596_v63 = vunpack.c.h.bf16 %v13594_v39 }
 0x696   :  { %3175 = vperm.xlu2 %6890, %v13577_v6  }
 0x697   :  { %v4388_v11 = vrot.slane %v4387_v17, 2  ;;  %v4725_v29 = vperm.slane %v4629_v1, 0  ;;  %v5619_v21 = vunpack.c.l.b16 %v4629_v1  ;;  %v4413_v46 = vadd.f32 %v4128_v53, %v4127_v41  ;;  %v13604_v53 = vld [vmem:[#allocation69_spill] sm:$0xff] }
 0x698   :  { %v4130_v35 = vmul.f32 %v13596_v63, %v3085_v43  ;;  %v13606_v41 = vunpack.c.h.bf16 %v13604_v53 }
 0x699   :  { %v4389_v0 = vadd.f32 %v4388_v11, %v4387_v17  ;;  %v4741_v12 = vunpack.c.l.b16 %v4725_v29  ;;  %v13601_v29 = vunpack.c.l.bf16 %v13600_v30 }
 0x69a   :  { %6893 = vset.pattern.permute.xlu1 %v10225_v26 }
 0x69b   :  { %v4390_v50 = vrot.slane %v4389_v0, 1 }
 0x69d   :  { %v4391_v23 = vadd.f32 %v4390_v50, %v4389_v0  ;;  %v13599_v50 = vunpack.c.h.bf16 %v13597_v52 }
 0x69e   :  { %6892 = vset.pattern.permute.xlu2 %v10229_v15 }
 0x69f   :  { %v4628_v28 = vpack.c.bf16 %v4391_v23, %v4391_v23 }
 0x6a0   :  { %v3097_v16 = vpop.permute.xlu2 %3096 }
 0x6a1   :  { %v4724_v27 = vperm.slane %v4628_v28, 0  ;;  %v5618_v45 = vunpack.c.l.b16 %v4628_v28  ;;  %v4132_v1 = vmul.f32 %v13599_v50, %v3097_v16 }
 0x6a2   :  { %3193 = vperm.xlu1 %6893, %v13577_v6  }
 0x6a3   :  { %v4740_v36 = vunpack.c.l.b16 %v4724_v27  ;;  %v5633_v31 = vsel %vm2414_vm11, %v5618_v45, %v5632_v3  ;;  %v13593_v3 = vld [vmem:[#allocation143_spill] sm:$0xff]  ;;  %v13602_v27 = vld [vmem:[#allocation164_spill] sm:$0xff]  ;;  %v13603_v45 = vunpack.c.h.bf16 %v13600_v30 }
 0x6a4   :  { %v10986_v42 = vsel %vm2416_vm10, %v5619_v21, %v5633_v31  ;;  %v4129_v38 = vmul.f32 %v13595_v57, %v13593_v3  ;;  %v3091_v13 = vpop.permute.xlu1 %3090  ;;  %v13607_v57 = vld [vmem:[#allocation73_spill] sm:$0xff] }
 0x6a5   :  { %v4755_v9 = vsel %vm2414_vm11, %v4740_v36, %v4754_v2  ;;  %v13598_v2 = vunpack.c.l.bf16 %v13597_v52  ;;  %v4134_v21 = vmul.f32 %v13603_v45, %v13602_v27 }
 0x6a6   :  { %3187 = vperm.xlu2 %6892, %v13577_v6   ;;  %v10993_v47 = vsel %vm2416_vm10, %v4741_v12, %v4755_v9  ;;  %v4414_v60 = vadd.f32 %v4413_v46, %v4129_v38  ;;  %v13605_v12 = vunpack.c.l.bf16 %v13604_v53  ;;  %v13608_v38 = vunpack.c.l.bf16 %v13607_v57 }
 0x6a7   :  { %v4131_v17 = vmul.f32 %v13598_v2, %v3091_v13 }
 0x6a8   :  { %v4415_v11 = vadd.f32 %v4414_v60, %v4130_v35  ;;  %v13609_v60 = vunpack.c.h.bf16 %v13607_v57  ;;  %v13618_v57 = vld [vmem:[#allocation82_spill] sm:$0xff] }
 0x6aa   :  { %6895 = vset.pattern.permute.xlu1 %v10308_v59  ;;  %v4416_v0 = vadd.f32 %v4415_v11, %v4131_v17  ;;  %v13610_v17 = vld [vmem:[#allocation77_spill] sm:$0xff] }
 0x6ab   :  { %v13611_v11 = vunpack.c.l.bf16 %v13610_v17  ;;  %v13612_v50 = vunpack.c.h.bf16 %v13610_v17 }
 0x6ac   :  { %v4417_v28 = vadd.f32 %v4416_v0, %v4132_v1 }
 0x6ad   :  { %v4139_v16 = vmul.f32 %v13611_v11, %v10928_v7 }
 0x6ae   :  { %6894 = vset.pattern.permute.xlu2 %v10235_v34 }
 0x6b0   :  { %v3115_v51 = vpop.permute.xlu2 %3114 }
 0x6b1   :  { %v4135_v10 = vmul.f32 %v13605_v12, %v3115_v51 }
 0x6b2   :  { %3211 = vperm.xlu1 %6895, %v13577_v6  }
 0x6b4   :  { %v3103_v23 = vpop.permute.xlu1 %3102 }
 0x6b5   :  { %v4133_v8 = vmul.f32 %v13601_v29, %v3103_v23  ;;  %v13613_v29 = vld [vmem:[#allocation78_spill] sm:$0xff] }
 0x6b6   :  { %3205 = vperm.xlu2 %6894, %v13577_v6   ;;  %v13615_v45 = vunpack.c.h.bf16 %v13613_v29 }
 0x6b7   :  { %v4418_v36 = vadd.f32 %v4417_v28, %v4133_v8  ;;  %v13614_v8 = vunpack.c.l.bf16 %v13613_v29 }
 0x6b9   :  { %v4419_v31 = vadd.f32 %v4418_v36, %v4134_v21 }
 0x6ba   :  { %6897 = vset.pattern.permute.xlu1 %v10245_v24 }
 0x6bb   :  { %v4420_v43 = vadd.f32 %v4419_v31, %v4135_v10 }
 0x6be   :  { %6896 = vset.pattern.permute.xlu2 %v10249_v20 }
 0x6c0   :  { %v3127_v46 = vpop.permute.xlu2 %3126 }
 0x6c1   :  { %v4137_v13 = vmul.f32 %v13608_v38, %v3127_v46  ;;  %v13619_v38 = vunpack.c.l.bf16 %v13618_v57 }
 0x6c2   :  { %3223 = vperm.xlu1 %6897, %v13577_v6  }
 0x6c4   :  { %v3121_v40 = vpop.permute.xlu1 %3120 }
 0x6c5   :  { %v4136_v9 = vmul.f32 %v13606_v41, %v3121_v40 }
 0x6c6   :  { %3217 = vperm.xlu2 %6896, %v13577_v6  }
 0x6c7   :  { %v4421_v39 = vadd.f32 %v4420_v43, %v4136_v9 }
 0x6c9   :  { %v4422_v35 = vadd.f32 %v4421_v39, %v4137_v13 }
 0x6ca   :  { %6899 = vset.pattern.permute.xlu1 %v10312_v14 }
 0x6ce   :  { %6898 = vset.pattern.permute.xlu2 %v10255_v18 }
 0x6d0   :  { %v3145_v52 = vpop.permute.xlu2 %3144 }
 0x6d1   :  { %v4140_v1 = vmul.f32 %v13612_v50, %v3145_v52 }
 0x6d2   :  { %3241 = vperm.xlu1 %6899, %v13577_v6  }
 0x6d4   :  { %v3133_v3 = vpop.permute.xlu1 %3132 }
 0x6d5   :  { %v4138_v63 = vmul.f32 %v13609_v60, %v3133_v3 }
 0x6d6   :  { %3235 = vperm.xlu2 %6898, %v13577_v6  }
 0x6d7   :  { %v4423_v2 = vadd.f32 %v4422_v35, %v4138_v63  ;;  %v13620_v63 = vld [vmem:[#allocation179_spill] sm:$0xff]  ;;  %v13621_v35 = vunpack.c.h.bf16 %v13618_v57 }
 0x6d9   :  { %v4424_v0 = vadd.f32 %v4423_v2, %v4139_v16  ;;  %v13622_v2 = vld [vmem:[#allocation86_spill] sm:$0xff] }
 0x6da   :  { %6901 = vset.pattern.permute.xlu1 %v10265_v49  ;;  %v13623_v17 = vunpack.c.l.bf16 %v13622_v2  ;;  %v13624_v16 = vunpack.c.h.bf16 %v13622_v2 }
 0x6db   :  { %v4425_v30 = vadd.f32 %v4424_v0, %v4140_v1 }
 0x6de   :  { %6900 = vset.pattern.permute.xlu2 %v10269_v37 }
 0x6e0   :  { %v3157_v23 = vpop.permute.xlu2 %3156 }
 0x6e1   :  { %v4142_v21 = vmul.f32 %v13615_v45, %v3157_v23 }
 0x6e2   :  { %3253 = vperm.xlu1 %6901, %v13577_v6  }
 0x6e4   :  { %v3151_v28 = vpop.permute.xlu1 %3150 }
 0x6e5   :  { %v4141_v27 = vmul.f32 %v13614_v8, %v3151_v28  ;;  %v13625_v28 = vld [vmem:[#allocation87_spill] sm:$0xff] }
 0x6e6   :  { %3247 = vperm.xlu2 %6900, %v13577_v6   ;;  %v13627_v45 = vunpack.c.h.bf16 %v13625_v28 }
 0x6e7   :  { %v4426_v36 = vadd.f32 %v4425_v30, %v4141_v27  ;;  %v13626_v30 = vunpack.c.l.bf16 %v13625_v28  ;;  %v13639_v28 = vld [vmem:[#allocation100_spill] sm:$0xff] }
 0x6e9   :  { %v4427_v31 = vadd.f32 %v4426_v36, %v4142_v21  ;;  %v13628_v36 = vld [vmem:[#allocation148_spill] sm:$0xff] }
 0x6ea   :  { %6904 = vset.pattern.permute.xlu1 %v10198_v56 }
 0x6eb   :  { %v4428_v7 = vrot.slane %v4427_v31, 4 }
 0x6ed   :  { %v4429_v51 = vadd.f32 %v4428_v7, %v4427_v31  ;;  %v13629_v31 = vld [vmem:[#allocation91_spill] sm:$0xff] }
 0x6ee   :  { %6903 = vset.pattern.permute.xlu2 %v10275_v33  ;;  %v13630_v7 = vunpack.c.l.bf16 %v13629_v31 }
 0x6ef   :  { %v4430_v40 = vrot.slane %v4429_v51, 2 }
 0x6f0   :  { %v3176_v60 = vpop.permute.xlu2 %3175 }
 0x6f1   :  { %v4431_v53 = vadd.f32 %v4430_v40, %v4429_v51  ;;  %v4145_v11 = vmul.f32 %v13623_v17, %v3176_v60  ;;  %v4149_v51 = vmul.f32 %v13630_v7, %v13628_v36  ;;  %v13637_v17 = vld [vmem:[#allocation146_spill] sm:$0xff] }
 0x6f2   :  { %3272 = vperm.xlu1 %6904, %v10294_v61  }
 0x6f3   :  { %v4432_v12 = vrot.slane %v4431_v53, 1 }
 0x6f4   :  { %v3164_v39 = vpop.permute.xlu1 %3163 }
 0x6f5   :  { %v4433_v10 = vadd.f32 %v4432_v12, %v4431_v53  ;;  %v4143_v13 = vmul.f32 %v13619_v38, %v3164_v39 }
 0x6f6   :  { %3266 = vperm.xlu2 %6903, %v10294_v61  }
 0x6f7   :  { %v4630_v6 = vpack.c.bf16 %v4433_v10, %v4433_v10 }
 0x6f9   :  { %v4726_v41 = vperm.slane %v4630_v6, 0  ;;  %v5620_v9 = vunpack.c.l.b16 %v4630_v6  ;;  %v13631_v6 = vunpack.c.h.bf16 %v13629_v31  ;;  %v13642_v31 = vld [vmem:[#allocation104_spill] sm:$0xff] }
 0x6fa   :  { %6906 = vset.pattern.permute.xlu1 %v10229_v15  ;;  %v13643_v7 = vunpack.c.l.bf16 %v13642_v31 }
 0x6fb   :  { %v4742_v46 = vunpack.c.l.b16 %v4726_v41  ;;  %v11049_v43 = vsel %vm13616_vm13, %v5620_v9, %v10986_v42  ;;  %v4144_v42 = vmul.f32 %v13621_v35, %v13620_v63  ;;  %v13632_v9 = vld [vmem:[#allocation95_spill] sm:$0xff] }
 0x6fc   :  { %v13634_v60 = vunpack.c.h.bf16 %v13632_v9 }
 0x6fd   :  { %v11053_v3 = vsel %vm13617_vm14, %v4742_v46, %v10993_v47  ;;  %v4434_v47 = vadd.f32 %v4144_v42, %v4143_v13  ;;  %v13633_v46 = vunpack.c.l.bf16 %v13632_v9 }
 0x6fe   :  { %6905 = vset.pattern.permute.xlu2 %v13499_v58 }
 0x6ff   :  { %v4435_v50 = vadd.f32 %v4434_v47, %v4145_v11 }
 0x700   :  { %v3188_v1 = vpop.permute.xlu2 %3187 }
 0x701   :  { %v4147_v29 = vmul.f32 %v13626_v30, %v3188_v1  ;;  %v13640_v30 = vunpack.c.l.bf16 %v13639_v28 }
 0x702   :  { %3284 = vperm.xlu1 %6906, %v10294_v61  }
 0x704   :  { %v3182_v52 = vpop.permute.xlu1 %3181 }
 0x705   :  { %v4146_v0 = vmul.f32 %v13624_v16, %v3182_v52  ;;  %v13635_v52 = vld [vmem:[#allocation96_spill] sm:$0xff] }
 0x706   :  { %3278 = vperm.xlu2 %6905, %v10294_v61   ;;  %v13636_v47 = vunpack.c.l.bf16 %v13635_v52  ;;  %v13638_v11 = vunpack.c.h.bf16 %v13635_v52 }
 0x707   :  { %v4436_v23 = vadd.f32 %v4435_v50, %v4146_v0 }
 0x708   :  { %v4154_v16 = vmul.f32 %v13638_v11, %v13637_v17 }
 0x709   :  { %v4437_v27 = vadd.f32 %v4436_v23, %v4147_v29 }
 0x70a   :  { %6908 = vset.pattern.permute.xlu1 %v10235_v34 }
 0x70e   :  { %6907 = vset.pattern.permute.xlu2 %v10239_v32 }
 0x710   :  { %v3206_v12 = vpop.permute.xlu2 %3205 }
 0x711   :  { %v4150_v41 = vmul.f32 %v13631_v6, %v3206_v12 }
 0x712   :  { %3302 = vperm.xlu1 %6908, %v10294_v61  }
 0x714   :  { %v3194_v8 = vpop.permute.xlu1 %3193 }
 0x715   :  { %v4148_v21 = vmul.f32 %v13627_v45, %v3194_v8  ;;  %v13641_v8 = vunpack.c.h.bf16 %v13639_v28 }
 0x716   :  { %3296 = vperm.xlu2 %6907, %v10294_v61  }
 0x717   :  { %v4438_v40 = vadd.f32 %v4437_v27, %v4148_v21 }
 0x719   :  { %v4439_v53 = vadd.f32 %v4438_v40, %v4149_v51 }
 0x71a   :  { %6910 = vset.pattern.permute.xlu1 %v10249_v20 }
 0x71b   :  { %v4440_v57 = vadd.f32 %v4439_v53, %v4150_v41  ;;  %v13644_v53 = vunpack.c.h.bf16 %v13642_v31 }
 0x71e   :  { %6909 = vset.pattern.permute.xlu2 %v10308_v59 }
 0x720   :  { %v3218_v38 = vpop.permute.xlu2 %3217 }
 0x721   :  { %v4152_v63 = vmul.f32 %v13634_v60, %v3218_v38 }
 0x722   :  { %3314 = vperm.xlu1 %6910, %v10294_v61  }
 0x724   :  { %v3212_v10 = vpop.permute.xlu1 %3211 }
 0x725   :  { %v4151_v39 = vmul.f32 %v13633_v46, %v3212_v10 }
 0x726   :  { %3308 = vperm.xlu2 %6909, %v10294_v61  }
 0x727   :  { %v4441_v13 = vadd.f32 %v4440_v57, %v4151_v39 }
 0x729   :  { %v4442_v42 = vadd.f32 %v4441_v13, %v4152_v63 }
 0x72a   :  { %6912 = vset.pattern.permute.xlu1 %v10255_v18 }
 0x72e   :  { %6911 = vset.pattern.permute.xlu2 %v10259_v4 }
 0x730   :  { %v3236_v1 = vpop.permute.xlu2 %3235 }
 0x731   :  { %v4155_v29 = vmul.f32 %v13640_v30, %v3236_v1 }
 0x732   :  { %3332 = vperm.xlu1 %6912, %v10294_v61  }
 0x734   :  { %v3224_v35 = vpop.permute.xlu1 %3223 }
 0x735   :  { %v4153_v2 = vmul.f32 %v13636_v47, %v3224_v35 }
 0x736   :  { %3326 = vperm.xlu2 %6911, %v10294_v61  }
 0x737   :  { %v4443_v0 = vadd.f32 %v4442_v42, %v4153_v2  ;;  %v13646_v2 = vld [vmem:[#allocation105_spill] sm:$0xff] }
 0x738   :  { %v13647_v17 = vunpack.c.h.bf16 %v13646_v2 }
 0x739   :  { %v4444_v50 = vadd.f32 %v4443_v0, %v4154_v16  ;;  %v13649_v0 = vld [vmem:[#allocation138_spill] sm:$0xff] }
 0x73a   :  { %6914 = vset.pattern.permute.xlu1 %v10269_v37 }
 0x73b   :  { %v4445_v45 = vadd.f32 %v4444_v50, %v4155_v29  ;;  %v13650_v50 = vunpack.c.l.bf16 %v13646_v2 }
 0x73d   :  { %v4159_v1 = vmul.f32 %v13650_v50, %v13649_v0  ;;  %v13664_v0 = vld [vmem:[#allocation122_spill] sm:$0xff] }
 0x73e   :  { %6913 = vset.pattern.permute.xlu2 %v10312_v14  ;;  %v13665_v50 = vunpack.c.l.bf16 %v13664_v0 }
 0x740   :  { %v3248_v21 = vpop.permute.xlu2 %3247 }
 0x742   :  { %3344 = vperm.xlu1 %6914, %v10294_v61  }
 0x744   :  { %v3242_v23 = vpop.permute.xlu1 %3241 }
 0x745   :  { %v4156_v27 = vmul.f32 %v13641_v8, %v3242_v23 }
 0x746   :  { %3338 = vperm.xlu2 %6913, %v10294_v61   ;;  %v4157_v61 = vmul.f32 %v13643_v7, %v3248_v21 }
 0x747   :  { %v4446_v36 = vadd.f32 %v4445_v45, %v4156_v27 }
 0x749   :  { %v4447_v40 = vadd.f32 %v4446_v36, %v4157_v61  ;;  %v13654_v36 = vld [vmem:[#allocation113_spill] sm:$0xff] }
 0x74a   :  { %6917 = vset.pattern.permute.xlu1 %v10275_v33  ;;  %v13655_v31 = vunpack.c.l.bf16 %v13654_v36 }
 0x74e   :  { %6916 = vset.pattern.permute.xlu2 %v10193_v5 }
 0x750   :  { %v3267_v13 = vpop.permute.xlu2 %3266 }
 0x751   :  { %v4160_v11 = vmul.f32 %v13647_v17, %v3267_v13 }
 0x752   :  { %3363 = vperm.xlu1 %6917, %v10517_v54  }
 0x753   :  { %v4455_v29 = vadd.f32 %v4160_v11, %v4159_v1  ;;  %v4169_v1 = vmul.f32 %v13665_v50, %v10868_v48 }
 0x754   :  { %v3254_v51 = vpop.permute.xlu1 %3253 }
 0x755   :  { %v4158_v12 = vmul.f32 %v13644_v53, %v3254_v51  ;;  %v13656_v51 = vld [vmem:[#allocation189_spill] sm:$0xff] }
 0x756   :  { %3357 = vperm.xlu2 %6916, %v10517_v54  }
 0x757   :  { %v4448_v10 = vadd.f32 %v4447_v40, %v4158_v12  ;;  %v13657_v40 = vunpack.c.h.bf16 %v13654_v36 }
 0x759   :  { %v4449_v6 = vrot.slane %v4448_v10, 4  ;;  %v4164_v53 = vmul.f32 %v13657_v40, %v13656_v51  ;;  %v13671_v40 = vld [vmem:[#allocation127_spill] sm:$0xff] }
 0x75a   :  { %6919 = vset.pattern.permute.xlu1 %v13499_v58 }
 0x75b   :  { %v4450_v41 = vadd.f32 %v4449_v6, %v4448_v10  ;;  %v13658_v10 = vld [vmem:[#allocation114_spill] sm:$0xff] }
 0x75c   :  { %v13659_v6 = vunpack.c.l.bf16 %v13658_v10 }
 0x75d   :  { %v4451_v9 = vrot.slane %v4450_v41, 2 }
 0x75e   :  { %6918 = vset.pattern.permute.xlu2 %v10198_v56 }
 0x75f   :  { %v4452_v46 = vadd.f32 %v4451_v9, %v4450_v41 }
 0x760   :  { %v3279_v30 = vpop.permute.xlu2 %3278 }
 0x761   :  { %v4453_v39 = vrot.slane %v4452_v46, 1 }
 0x762   :  { %3375 = vperm.xlu1 %6919, %v10517_v54  }
 0x763   :  { %v4454_v57 = vadd.f32 %v4453_v39, %v4452_v46 }
 0x764   :  { %v3273_v47 = vpop.permute.xlu1 %3272 }
 0x765   :  { %v4631_v38 = vpack.c.bf16 %v4454_v57, %v4454_v57 }
 0x766   :  { %3369 = vperm.xlu2 %6918, %v10517_v54  }
 0x767   :  { %v4727_v60 = vperm.slane %v4631_v38, 0  ;;  %v5621_v63 = vunpack.c.l.b16 %v4631_v38  ;;  %v13660_v38 = vunpack.c.h.bf16 %v13658_v10  ;;  %v13673_v10 = vld [vmem:[#allocation160_spill] sm:$0xff] }
 0x769   :  { %v4743_v35 = vunpack.c.l.b16 %v4727_v60  ;;  %v5636_v42 = vsel %vm13645_vm15, %v5621_v63, %v11049_v43  ;;  %v13651_v43 = vld [vmem:[#allocation109_spill] sm:$0xff]  ;;  %v13661_v60 = vld [vmem:[#allocation118_spill] sm:$0xff] }
 0x76a   :  { %v5644_v52 = vpack.c.b16 %v5636_v42, %v5636_v42  ;;  %6921 = vset.pattern.permute.xlu1 %v10239_v32  ;;  %v13652_v23 = vunpack.c.l.bf16 %v13651_v43  ;;  %v13662_v63 = vunpack.c.l.bf16 %v13661_v60  ;;  %v13663_v2 = vunpack.c.h.bf16 %v13661_v60 }
 0x76b   :  { %v11124_v16 = vsel %vm13648_vm8, %v4743_v35, %v11053_v3  ;;  %v13653_v3 = vunpack.c.h.bf16 %v13651_v43 }
 0x76c   :  { %5648 = vst [vmem:[%s12314_s11 + $0x4] sm:$0xf] %v5644_v52  ;;  %v4161_v28 = vmul.f32 %v13652_v23, %v3273_v47  ;;  %v13666_v23 = vunpack.c.h.bf16 %v13664_v0 }
 0x76d   :  { %v4162_v27 = vmul.f32 %v13653_v3, %v3279_v30 }
 0x76e   :  { %6920 = vset.pattern.permute.xlu2 %v10225_v26  ;;  %v4456_v8 = vadd.f32 %v4455_v29, %v4161_v28 }
 0x770   :  { %v4457_v21 = vadd.f32 %v4456_v8, %v4162_v27  ;;  %v3297_v61 = vpop.permute.xlu2 %3296  ;;  %v13667_v27 = vld [vmem:[#allocation123_spill] sm:$0xff] }
 0x771   :  { %v4165_v41 = vmul.f32 %v13659_v6, %v3297_v61  ;;  %v13669_v48 = vunpack.c.h.bf16 %v13667_v27  ;;  %v13670_v61 = vld [vmem:[#allocation162_spill] sm:$0xff]  ;;  %v13674_v6 = vunpack.c.h.bf16 %v13671_v40 }
 0x772   :  { %3393 = vperm.xlu1 %6921, %v10517_v54  }
 0x774   :  { %v3285_v45 = vpop.permute.xlu1 %3284 }
 0x775   :  { %v4163_v7 = vmul.f32 %v13655_v31, %v3285_v45  ;;  %v13668_v45 = vunpack.c.l.bf16 %v13667_v27 }
 0x776   :  { %3387 = vperm.xlu2 %6920, %v10517_v54  }
 0x777   :  { %v4458_v12 = vadd.f32 %v4457_v21, %v4163_v7 }
 0x779   :  { %v4459_v9 = vadd.f32 %v4458_v12, %v4164_v53  ;;  %v13672_v53 = vunpack.c.l.bf16 %v13671_v40 }
 0x77a   :  { %6923 = vset.pattern.permute.xlu1 %v10308_v59 }
 0x77b   :  { %v4460_v46 = vadd.f32 %v4459_v9, %v4165_v41  ;;  %v4174_v41 = vmul.f32 %v13674_v6, %v13673_v10  ;;  %v13688_v6 = vld [vmem:[#allocation141_spill] sm:$0xff] }
 0x77e   :  { %6922 = vset.pattern.permute.xlu2 %v10235_v34 }
 0x780   :  { %v3309_v39 = vpop.permute.xlu2 %3308 }
 0x781   :  { %v4167_v35 = vmul.f32 %v13662_v63, %v3309_v39 }
 0x782   :  { %3405 = vperm.xlu1 %6923, %v10517_v54  }
 0x784   :  { %v3303_v57 = vpop.permute.xlu1 %3302 }
 0x785   :  { %v4166_v13 = vmul.f32 %v13660_v38, %v3303_v57 }
 0x786   :  { %3399 = vperm.xlu2 %6922, %v10517_v54  }
 0x787   :  { %v4461_v42 = vadd.f32 %v4460_v46, %v4166_v13  ;;  %v13675_v13 = vld [vmem:[#allocation131_spill] sm:$0xff] }
 0x788   :  { %v13676_v60 = vunpack.c.l.bf16 %v13675_v13 }
 0x789   :  { %v4462_v52 = vadd.f32 %v4461_v42, %v4167_v35  ;;  %v13678_v42 = vld [vmem:[#allocation132_spill] sm:$0xff] }
 0x78a   :  { %6925 = vset.pattern.permute.xlu1 %v10259_v4  ;;  %v13680_v0 = vunpack.c.h.bf16 %v13678_v42 }
 0x78e   :  { %6924 = vset.pattern.permute.xlu2 %v10245_v24 }
 0x790   :  { %v3327_v11 = vpop.permute.xlu2 %3326 }
 0x791   :  { %v4170_v28 = vmul.f32 %v13666_v23, %v3327_v11  ;;  %v13682_v23 = vld [vmem:[#allocation136_spill] sm:$0xff] }
 0x792   :  { %3423 = vperm.xlu1 %6925, %v10517_v54  }
 0x794   :  { %v3315_v47 = vpop.permute.xlu1 %3314 }
 0x795   :  { %v4168_v17 = vmul.f32 %v13663_v2, %v3315_v47 }
 0x796   :  { %3417 = vperm.xlu2 %6924, %v10517_v54  }
 0x797   :  { %v4463_v43 = vadd.f32 %v4462_v52, %v4168_v17  ;;  %v13679_v52 = vunpack.c.l.bf16 %v13678_v42 }
 0x799   :  { %v4464_v30 = vadd.f32 %v4463_v43, %v4169_v1  ;;  %v13681_v43 = vld [vmem:[#allocation201_spill] sm:$0xff] }
 0x79a   :  { %6927 = vset.pattern.permute.xlu1 %v10312_v14 }
 0x79b   :  { %v4465_v29 = vadd.f32 %v4464_v30, %v4170_v28  ;;  %v13683_v28 = vunpack.c.l.bf16 %v13682_v23 }
 0x79d   :  { %v4179_v30 = vmul.f32 %v13683_v28, %v13681_v43  ;;  %v3442_v28 = vpop.permute.xlu0 %3441 }
 0x79e   :  { %6926 = vset.pattern.permute.xlu2 %v10255_v18 }
 0x7a0   :  { %v3339_v8 = vpop.permute.xlu2 %3338 }
 0x7a1   :  { %v4172_v36 = vmul.f32 %v13669_v48, %v3339_v8  ;;  %v13684_v8 = vunpack.c.h.bf16 %v13682_v23 }
 0x7a2   :  { %3435 = vperm.xlu1 %6927, %v10517_v54  }
 0x7a4   :  { %v3333_v3 = vpop.permute.xlu1 %3332 }
 0x7a5   :  { %v4171_v21 = vmul.f32 %v13668_v45, %v3333_v3 }
 0x7a6   :  { %3429 = vperm.xlu2 %6926, %v10517_v54  }
 0x7a7   :  { %v4466_v31 = vadd.f32 %v4465_v29, %v4171_v21 }
 0x7a9   :  { %v4467_v7 = vadd.f32 %v4466_v31, %v4172_v36  ;;  %v13685_v36 = vld [vmem:[#allocation140_spill] sm:$0xff] }
 0x7aa   :  { %6929 = vset.pattern.permute.xlu1 %v10193_v5  ;;  %v13686_v31 = vunpack.c.l.bf16 %v13685_v36 }
 0x7ae   :  { %6928 = vset.pattern.permute.xlu2 %v10265_v49 }
 0x7b0   :  { %v3358_v39 = vpop.permute.xlu2 %3357 }
 0x7b1   :  { %v4175_v63 = vmul.f32 %v13676_v60, %v3358_v39  ;;  %v13691_v60 = vld [vmem:[#allocation145_spill] sm:$0xff] }
 0x7b2   :  { %3454 = vperm.xlu1 %6929, %v13670_v61  }
 0x7b4   :  { %v3345_v51 = vpop.permute.xlu1 %3344 }
 0x7b5   :  { %v4173_v12 = vmul.f32 %v13672_v53, %v3345_v51  ;;  %v13687_v51 = vunpack.c.h.bf16 %v13685_v36 }
 0x7b6   :  { %3447 = vperm.xlu2 %6928, %v10517_v54   ;;  %v13677_v54 = vunpack.c.h.bf16 %v13675_v13 }
 0x7b7   :  { %v4468_v9 = vadd.f32 %v4467_v7, %v4173_v12 }
 0x7b9   :  { %v4469_v46 = vadd.f32 %v4468_v9, %v4174_v41  ;;  %v13689_v41 = vunpack.c.l.bf16 %v13688_v6 }
 0x7ba   :  { %6931 = vset.pattern.permute.xlu1 %v10198_v56 }
 0x7bb   :  { %v4470_v43 = vrot.slane %v4469_v46, 4 }
 0x7bd   :  { %v4471_v23 = vadd.f32 %v4470_v43, %v4469_v46 }
 0x7be   :  { %6930 = vset.pattern.permute.xlu2 %v10275_v33 }
 0x7c0   :  { %v3370_v57 = vpop.permute.xlu2 %3369 }
 0x7c1   :  { %v4177_v47 = vmul.f32 %v13679_v52, %v3370_v57  ;;  %v13690_v57 = vunpack.c.h.bf16 %v13688_v6 }
 0x7c2   :  { %3466 = vperm.xlu1 %6931, %v13670_v61  }
 0x7c4   :  { %v3364_v38 = vpop.permute.xlu1 %3363 }
 0x7c5   :  { %v4176_v35 = vmul.f32 %v13677_v54, %v3364_v38  ;;  %v4184_v38 = vmul.f32 %v13690_v57, %v10803_v55  ;;  %v13694_v55 = vld [vmem:[#allocation149_spill] sm:$0xff] }
 0x7c6   :  { %3460 = vperm.xlu2 %6930, %v13670_v61  }
 0x7c7   :  { %v4476_v2 = vadd.f32 %v4176_v35, %v4175_v63  ;;  %v13692_v63 = vunpack.c.l.bf16 %v13691_v60 }
 0x7c9   :  { %v4477_v17 = vadd.f32 %v4476_v2, %v4177_v47  ;;  %v13693_v2 = vunpack.c.h.bf16 %v13691_v60 }
 0x7ca   :  { %6933 = vset.pattern.permute.xlu1 %v10225_v26 }
 0x7ce   :  { %6932 = vset.pattern.permute.xlu2 %v10229_v15 }
 0x7d0   :  { %v3388_v1 = vpop.permute.xlu2 %3387 }
 0x7d1   :  { %v4180_v3 = vmul.f32 %v13684_v8, %v3388_v1  ;;  %v13696_v8 = vunpack.c.h.bf16 %v13694_v55 }
 0x7d2   :  { %3484 = vperm.xlu1 %6933, %v13670_v61  }
 0x7d4   :  { %v3376_v11 = vpop.permute.xlu1 %3375 }
 0x7d5   :  { %v4178_v50 = vmul.f32 %v13680_v0, %v3376_v11  ;;  %v13695_v11 = vunpack.c.l.bf16 %v13694_v55 }
 0x7d6   :  { %3478 = vperm.xlu2 %6932, %v13670_v61  }
 0x7d7   :  { %v4478_v29 = vadd.f32 %v4477_v17, %v4178_v50 }
 0x7d9   :  { %v4479_v27 = vadd.f32 %v4478_v29, %v4179_v30  ;;  %v4472_v29 = vrot.slane %v4471_v23, 2 }
 0x7da   :  { %6935 = vset.pattern.permute.xlu1 %v10235_v34 }
 0x7db   :  { %v4480_v45 = vadd.f32 %v4479_v27, %v4180_v3 }
 0x7de   :  { %6934 = vset.pattern.permute.xlu2 %v10239_v32 }
 0x7e0   :  { %v3400_v21 = vpop.permute.xlu2 %3399 }
 0x7e1   :  { %v4182_v40 = vmul.f32 %v13687_v51, %v3400_v21 }
 0x7e2   :  { %3496 = vperm.xlu1 %6935, %v13670_v61  }
 0x7e4   :  { %v3394_v48 = vpop.permute.xlu1 %3393 }
 0x7e5   :  { %v4181_v7 = vmul.f32 %v13686_v31, %v3394_v48  ;;  %v4473_v31 = vadd.f32 %v4472_v29, %v4471_v23 }
 0x7e6   :  { %3490 = vperm.xlu2 %6934, %v13670_v61  }
 0x7e7   :  { %v4481_v53 = vadd.f32 %v4480_v45, %v4181_v7  ;;  %v13697_v45 = vld [vmem:[#allocation150_spill] sm:$0xff] }
 0x7e8   :  { %v13698_v21 = vunpack.c.l.bf16 %v13697_v45  ;;  %v13699_v7 = vunpack.c.h.bf16 %v13697_v45 }
 0x7e9   :  { %v4482_v12 = vadd.f32 %v4481_v53, %v4182_v40  ;;  %v4474_v53 = vrot.slane %v4473_v31, 1 }
 0x7ea   :  { %6937 = vset.pattern.permute.xlu1 %v10245_v24  ;;  %v4189_v48 = vmul.f32 %v13698_v21, %v3442_v28  ;;  %v13705_v28 = vld [vmem:[#allocation158_spill] sm:$0xff] }
 0x7eb   :  { %v4475_v6 = vadd.f32 %v4474_v53, %v4473_v31 }
 0x7ed   :  { %v4632_v57 = vpack.c.bf16 %v4475_v6, %v4475_v6 }
 0x7ee   :  { %6936 = vset.pattern.permute.xlu2 %v10249_v20 }
 0x7f0   :  { %v3418_v39 = vpop.permute.xlu2 %3417 }
 0x7f1   :  { %v4185_v54 = vmul.f32 %v13692_v63, %v3418_v39 }
 0x7f2   :  { %3514 = vperm.xlu1 %6937, %v13670_v61  }
 0x7f4   :  { %v3406_v10 = vpop.permute.xlu1 %3405 }
 0x7f5   :  { %v4183_v9 = vmul.f32 %v13689_v41, %v3406_v10 }
 0x7f6   :  { %3508 = vperm.xlu2 %6936, %v13670_v61  }
 0x7f7   :  { %v4483_v13 = vadd.f32 %v4482_v12, %v4183_v9 }
 0x7f9   :  { %v4484_v35 = vadd.f32 %v4483_v13, %v4184_v38  ;;  %v13700_v13 = vld [vmem:[#allocation154_spill] sm:$0xff] }
 0x7fa   :  { %6939 = vset.pattern.permute.xlu1 %v10255_v18  ;;  %v13701_v60 = vunpack.c.h.bf16 %v13700_v13 }
 0x7fb   :  { %v4485_v42 = vadd.f32 %v4484_v35, %v4185_v54  ;;  %v13702_v54 = vunpack.c.l.bf16 %v13700_v13 }
 0x7fe   :  { %6938 = vset.pattern.permute.xlu2 %v10259_v4 }
 0x800   :  { %v3430_v52 = vpop.permute.xlu2 %3429 }
 0x801   :  { %v4187_v0 = vmul.f32 %v13695_v11, %v3430_v52 }
 0x802   :  { %3526 = vperm.xlu1 %6939, %v13670_v61  }
 0x804   :  { %v3424_v47 = vpop.permute.xlu1 %3423 }
 0x805   :  { %v4186_v17 = vmul.f32 %v13693_v2, %v3424_v47  ;;  %v4728_v47 = vperm.slane %v4632_v57, 0 }
 0x806   :  { %3520 = vperm.xlu2 %6938, %v13670_v61  }
 0x807   :  { %v4486_v50 = vadd.f32 %v4485_v42, %v4186_v17  ;;  %v5622_v17 = vunpack.c.l.b16 %v4632_v57 }
 0x809   :  { %v4487_v1 = vadd.f32 %v4486_v50, %v4187_v0  ;;  %v4744_v0 = vunpack.c.l.b16 %v4728_v47 }
 0x80a   :  { %6942 = vset.pattern.permute.xlu1 %v10265_v49 }
 0x80e   :  { %6941 = vset.pattern.permute.xlu2 %v10269_v37 }
 0x810   :  { %v3448_v27 = vpop.permute.xlu2 %3447 }
 0x811   :  { %v4190_v51 = vmul.f32 %v13699_v7, %v3448_v27  ;;  %v13708_v27 = vunpack.c.h.bf16 %v13705_v28 }
 0x812   :  { %3544 = vperm.xlu1 %6942, %v13670_v61  }
 0x814   :  { %v3436_v30 = vpop.permute.xlu1 %3435 }
 0x815   :  { %v4188_v3 = vmul.f32 %v13696_v8, %v3436_v30  ;;  %v13706_v30 = vunpack.c.l.bf16 %v13705_v28 }
 0x816   :  { %3538 = vperm.xlu2 %6941, %v13670_v61  }
 0x817   :  { %v4488_v36 = vadd.f32 %v4487_v1, %v4188_v3  ;;  %v13707_v3 = vld [vmem:[#allocation183_spill] sm:$0xff] }
 0x818   :  { %v4194_v45 = vmul.f32 %v13708_v27, %v13707_v3 }
 0x819   :  { %v4489_v46 = vadd.f32 %v4488_v36, %v4189_v48  ;;  %v13709_v48 = vld [vmem:[#allocation159_spill] sm:$0xff] }
 0x81a   :  { %6944 = vset.pattern.permute.xlu1 %v10275_v33  ;;  %v13710_v36 = vunpack.c.l.bf16 %v13709_v48  ;;  %v13711_v53 = vunpack.c.h.bf16 %v13709_v48 }
 0x81b   :  { %v4490_v40 = vadd.f32 %v4489_v46, %v4190_v51 }
 0x81d   :  { %v4491_v12 = vrot.slane %v4490_v40, 4 }
 0x81e   :  { %6943 = vset.pattern.permute.xlu2 %v10193_v5 }
 0x81f   :  { %v4492_v10 = vadd.f32 %v4491_v12, %v4490_v40 }
 0x820   :  { %v3461_v61 = vpop.permute.xlu2 %3460 }
 0x821   :  { %v4493_v41 = vrot.slane %v4492_v10, 2  ;;  %v4192_v63 = vmul.f32 %v13701_v60, %v3461_v61  ;;  %v13715_v60 = vld [vmem:[#allocation167_spill] sm:$0xff] }
 0x822   :  { %3557 = vperm.xlu1 %6944, %v10348_v25  }
 0x823   :  { %v4494_v9 = vadd.f32 %v4493_v41, %v4492_v10  ;;  %v13712_v10 = vld [vmem:[#allocation163_spill] sm:$0xff] }
 0x824   :  { %v3455_v39 = vpop.permute.xlu1 %3454  ;;  %v13713_v6 = vunpack.c.l.bf16 %v13712_v10  ;;  %v13714_v57 = vunpack.c.h.bf16 %v13712_v10 }
 0x825   :  { %v4495_v38 = vrot.slane %v4494_v9, 1  ;;  %v4191_v35 = vmul.f32 %v13702_v54, %v3455_v39 }
 0x826   :  { %3551 = vperm.xlu2 %6943, %v10348_v25  }
 0x827   :  { %v4496_v42 = vadd.f32 %v4495_v38, %v4494_v9  ;;  %v4497_v52 = vadd.f32 %v4192_v63, %v4191_v35  ;;  %v13716_v63 = vunpack.c.l.bf16 %v13715_v60 }
 0x829   :  { %v4633_v2 = vpack.c.bf16 %v4496_v42, %v4496_v42  ;;  %v4199_v54 = vmul.f32 %v13716_v63, %v10746_v62  ;;  %v13717_v42 = vunpack.c.h.bf16 %v13715_v60 }
 0x82a   :  { %6947 = vset.pattern.permute.xlu1 %v10229_v15 }
 0x82b   :  { %v4729_v55 = vperm.slane %v4633_v2, 0  ;;  %v5623_v11 = vunpack.c.l.b16 %v4633_v2 }
 0x82d   :  { %v4745_v50 = vunpack.c.l.b16 %v4729_v55  ;;  %v11250_v1 = vsel %vm13703_vm7, %v5623_v11, %v5622_v17  ;;  %v13718_v11 = vld [vmem:[#allocation168_spill] sm:$0xff] }
 0x82e   :  { %6946 = vset.pattern.permute.xlu2 %v13499_v58  ;;  %v13720_v62 = vunpack.c.h.bf16 %v13718_v11 }
 0x82f   :  { %v11254_v43 = vsel %vm13704_vm0, %v4745_v50, %v4744_v0  ;;  %v13719_v0 = vunpack.c.l.bf16 %v13718_v11  ;;  %v13733_v11 = vld [vmem:[#allocation181_spill] sm:$0xff] }
 0x830   :  { %v3479_v8 = vpop.permute.xlu2 %3478 }
 0x831   :  { %v4195_v31 = vmul.f32 %v13710_v36, %v3479_v8  ;;  %v13721_v8 = vld [vmem:[#allocation172_spill] sm:$0xff] }
 0x832   :  { %3575 = vperm.xlu1 %6947, %v10348_v25   ;;  %v13722_v3 = vunpack.c.l.bf16 %v13721_v8  ;;  %v13724_v48 = vunpack.c.h.bf16 %v13721_v8  ;;  %v13736_v8 = vunpack.c.h.bf16 %v13733_v11 }
 0x834   :  { %v3467_v23 = vpop.permute.xlu1 %3466 }
 0x835   :  { %v4193_v29 = vmul.f32 %v13706_v30, %v3467_v23 }
 0x836   :  { %3569 = vperm.xlu2 %6946, %v10348_v25  }
 0x837   :  { %v4498_v21 = vadd.f32 %v4497_v52, %v4193_v29 }
 0x839   :  { %v4499_v7 = vadd.f32 %v4498_v21, %v4194_v45  ;;  %v13723_v21 = vld [vmem:[#allocation119_spill] sm:$0xff] }
 0x83a   :  { %6949 = vset.pattern.permute.xlu1 %v10239_v32  ;;  %v4204_v36 = vmul.f32 %v13724_v48, %v13723_v21 }
 0x83b   :  { %v4500_v51 = vadd.f32 %v4499_v7, %v4195_v31  ;;  %v13725_v7 = vld [vmem:[#allocation176_spill] sm:$0xff] }
 0x83e   :  { %6948 = vset.pattern.permute.xlu2 %v10225_v26 }
 0x840   :  { %v3491_v46 = vpop.permute.xlu2 %3490 }
 0x841   :  { %v4197_v41 = vmul.f32 %v13713_v6, %v3491_v46  ;;  %v13728_v6 = vunpack.c.h.bf16 %v13725_v7 }
 0x842   :  { %3587 = vperm.xlu1 %6949, %v10348_v25  }
 0x844   :  { %v3485_v40 = vpop.permute.xlu1 %3484 }
 0x845   :  { %v4196_v12 = vmul.f32 %v13711_v53, %v3485_v40 }
 0x846   :  { %3581 = vperm.xlu2 %6948, %v10348_v25  }
 0x847   :  { %v4501_v61 = vadd.f32 %v4500_v51, %v4196_v12  ;;  %v13726_v51 = vunpack.c.l.bf16 %v13725_v7  ;;  %v13727_v12 = vld [vmem:[#allocation137_spill] sm:$0xff] }
 0x849   :  { %v4502_v9 = vadd.f32 %v4501_v61, %v4197_v41 }
 0x84a   :  { %6952 = vset.pattern.permute.xlu1 %v10249_v20 }
 0x84e   :  { %6951 = vset.pattern.permute.xlu2 %v10308_v59 }
 0x850   :  { %v3509_v13 = vpop.permute.xlu2 %3508 }
 0x851   :  { %v4200_v52 = vmul.f32 %v13717_v42, %v3509_v13 }
 0x852   :  { %3605 = vperm.xlu1 %6952, %v10348_v25  }
 0x854   :  { %v3497_v39 = vpop.permute.xlu1 %3496 }
 0x855   :  { %v4198_v38 = vmul.f32 %v13714_v57, %v3497_v39 }
 0x856   :  { %3599 = vperm.xlu2 %6951, %v10348_v25  }
 0x857   :  { %v4503_v35 = vadd.f32 %v4502_v9, %v4198_v38 }
 0x859   :  { %v4504_v47 = vadd.f32 %v4503_v35, %v4199_v54  ;;  %v13729_v35 = vld [vmem:[#allocation177_spill] sm:$0xff] }
 0x85a   :  { %6954 = vset.pattern.permute.xlu1 %v10259_v4  ;;  %v13730_v42 = vunpack.c.l.bf16 %v13729_v35 }
 0x85b   :  { %v4505_v2 = vadd.f32 %v4504_v47, %v4200_v52 }
 0x85e   :  { %6953 = vset.pattern.permute.xlu2 %v10245_v24 }
 0x860   :  { %v3521_v17 = vpop.permute.xlu2 %3520 }
 0x861   :  { %v4202_v23 = vmul.f32 %v13720_v62, %v3521_v17 }
 0x862   :  { %3617 = vperm.xlu1 %6954, %v10348_v25  }
 0x864   :  { %v3515_v55 = vpop.permute.xlu1 %3514 }
 0x865   :  { %v4201_v50 = vmul.f32 %v13719_v0, %v3515_v55  ;;  %v13732_v55 = vld [vmem:[#allocation165_spill] sm:$0xff]  ;;  %v13734_v0 = vunpack.c.l.bf16 %v13733_v11 }
 0x866   :  { %3611 = vperm.xlu2 %6953, %v10348_v25  }
 0x867   :  { %v4506_v28 = vadd.f32 %v4505_v2, %v4201_v50  ;;  %v4209_v50 = vmul.f32 %v13734_v0, %v13732_v55 }
 0x869   :  { %v4507_v30 = vadd.f32 %v4506_v28, %v4202_v23 }
 0x86a   :  { %6956 = vset.pattern.permute.xlu1 %v10269_v37 }
 0x86e   :  { %6955 = vset.pattern.permute.xlu2 %v10312_v14 }
 0x870   :  { %v3539_v45 = vpop.permute.xlu2 %3538 }
 0x871   :  { %v4205_v46 = vmul.f32 %v13726_v51, %v3539_v45 }
 0x872   :  { %3635 = vperm.xlu1 %6956, %v10348_v25  }
 0x874   :  { %v3527_v29 = vpop.permute.xlu1 %3526 }
 0x875   :  { %v4203_v27 = vmul.f32 %v13722_v3, %v3527_v29 }
 0x876   :  { %3629 = vperm.xlu2 %6955, %v10348_v25  }
 0x877   :  { %v4508_v31 = vadd.f32 %v4507_v30, %v4203_v27 }
 0x879   :  { %v4509_v40 = vadd.f32 %v4508_v31, %v4204_v36  ;;  %v13738_v31 = vld [vmem:[#allocation185_spill] sm:$0xff] }
 0x87a   :  { %6958 = vset.pattern.permute.xlu1 %v10193_v5  ;;  %v13740_v51 = vunpack.c.h.bf16 %v13738_v31 }
 0x87b   :  { %v4510_v53 = vadd.f32 %v4509_v40, %v4205_v46 }
 0x87e   :  { %6957 = vset.pattern.permute.xlu2 %v10265_v49 }
 0x880   :  { %v3552_v38 = vpop.permute.xlu2 %3551 }
 0x881   :  { %v4207_v52 = vmul.f32 %v13730_v42, %v3552_v38 }
 0x882   :  { %3648 = vperm.xlu1 %6958, %v13727_v12  }
 0x884   :  { %v3545_v10 = vpop.permute.xlu1 %3544 }
 0x885   :  { %v4206_v41 = vmul.f32 %v13728_v6, %v3545_v10  ;;  %v13741_v10 = vld [vmem:[#allocation186_spill] sm:$0xff] }
 0x886   :  { %3641 = vperm.xlu2 %6957, %v10348_v25   ;;  %v13731_v25 = vunpack.c.h.bf16 %v13729_v35  ;;  %v13742_v6 = vunpack.c.l.bf16 %v13741_v10 }
 0x887   :  { %v4511_v61 = vadd.f32 %v4510_v53, %v4206_v41 }
 0x889   :  { %v4512_v9 = vrot.slane %v4511_v61, 4 }
 0x88a   :  { %6960 = vset.pattern.permute.xlu1 %v13499_v58 }
 0x88b   :  { %v4513_v39 = vadd.f32 %v4512_v9, %v4511_v61  ;;  %v13743_v9 = vld [vmem:[#allocation142_spill] sm:$0xff] }
 0x88d   :  { %v4514_v57 = vrot.slane %v4513_v39, 2 }
 0x88e   :  { %6959 = vset.pattern.permute.xlu2 %v10198_v56 }
 0x88f   :  { %v4515_v13 = vadd.f32 %v4514_v57, %v4513_v39  ;;  %v13744_v39 = vunpack.c.h.bf16 %v13741_v10 }
 0x890   :  { %v3570_v17 = vpop.permute.xlu2 %3569 }
 0x891   :  { %v4516_v60 = vrot.slane %v4515_v13, 1  ;;  %v4210_v3 = vmul.f32 %v13736_v8, %v3570_v17  ;;  %v4214_v57 = vmul.f32 %v13744_v39, %v13743_v9  ;;  %v13752_v8 = vld [vmem:[#allocation195_spill] sm:$0xff] }
 0x892   :  { %3666 = vperm.xlu1 %6960, %v13727_v12  }
 0x893   :  { %v4517_v63 = vadd.f32 %v4516_v60, %v4515_v13  ;;  %v13745_v13 = vld [vmem:[#allocation190_spill] sm:$0xff] }
 0x894   :  { %v3558_v54 = vpop.permute.xlu1 %3557  ;;  %v13746_v60 = vunpack.c.l.bf16 %v13745_v13 }
 0x895   :  { %v4634_v47 = vpack.c.bf16 %v4517_v63, %v4517_v63  ;;  %v4208_v2 = vmul.f32 %v13731_v25, %v3558_v54 }
 0x896   :  { %3660 = vperm.xlu2 %6959, %v13727_v12  }
 0x897   :  { %v4730_v62 = vperm.slane %v4634_v47, 0  ;;  %v5624_v23 = vunpack.c.l.b16 %v4634_v47  ;;  %v4518_v28 = vadd.f32 %v4208_v2, %v4207_v52  ;;  %v13747_v47 = vunpack.c.h.bf16 %v13745_v13  ;;  %v13748_v2 = vld [vmem:[#allocation194_spill] sm:$0xff] }
 0x898   :  { %v13749_v17 = vunpack.c.l.bf16 %v13748_v2 }
 0x899   :  { %v4746_v30 = vunpack.c.l.b16 %v4730_v62  ;;  %v11322_v29 = vsel %vm13735_vm9, %v5624_v23, %v11250_v1  ;;  %v4519_v27 = vadd.f32 %v4518_v28, %v4209_v50  ;;  %v13739_v1 = vunpack.c.l.bf16 %v13738_v31  ;;  %v13750_v50 = vld [vmem:[#allocation171_spill] sm:$0xff]  ;;  %v13755_v31 = vld [vmem:[#allocation126_spill] sm:$0xff] }
 0x89a   :  { %6962 = vset.pattern.permute.xlu1 %v10225_v26  ;;  %v13751_v23 = vunpack.c.h.bf16 %v13748_v2 }
 0x89b   :  { %v11329_v45 = vsel %vm13737_vm1, %v4746_v30, %v11254_v43  ;;  %v4520_v21 = vadd.f32 %v4519_v27, %v4210_v3  ;;  %v13753_v3 = vunpack.c.l.bf16 %v13752_v8 }
 0x89d   :  { %v4219_v27 = vmul.f32 %v13753_v3, %v10939_v44 }
 0x89e   :  { %6961 = vset.pattern.permute.xlu2 %v10229_v15 }
 0x8a0   :  { %v3582_v48 = vpop.permute.xlu2 %3581 }
 0x8a1   :  { %v4212_v46 = vmul.f32 %v13740_v51, %v3582_v48  ;;  %v13754_v48 = vunpack.c.h.bf16 %v13752_v8 }
 0x8a2   :  { %3678 = vperm.xlu1 %6962, %v13727_v12  }
 0x8a4   :  { %v3576_v36 = vpop.permute.xlu1 %3575 }
 0x8a5   :  { %v4211_v7 = vmul.f32 %v13739_v1, %v3576_v36 }
 0x8a6   :  { %3672 = vperm.xlu2 %6961, %v13727_v12  }
 0x8a7   :  { %v4521_v40 = vadd.f32 %v4520_v21, %v4211_v7  ;;  %v13756_v7 = vld [vmem:[#allocation180_spill] sm:$0xff] }
 0x8a9   :  { %v4522_v53 = vadd.f32 %v4521_v40, %v4212_v46  ;;  %v13757_v40 = vld [vmem:[#allocation199_spill] sm:$0xff] }
 0x8aa   :  { %6965 = vset.pattern.permute.xlu1 %v10308_v59  ;;  %v13759_v44 = vunpack.c.h.bf16 %v13757_v40 }
 0x8ae   :  { %6964 = vset.pattern.permute.xlu2 %v10235_v34 }
 0x8b0   :  { %v3600_v61 = vpop.permute.xlu2 %3599 }
 0x8b1   :  { %v4215_v63 = vmul.f32 %v13746_v60, %v3600_v61 }
 0x8b2   :  { %3696 = vperm.xlu1 %6965, %v13727_v12  }
 0x8b4   :  { %v3588_v43 = vpop.permute.xlu1 %3587 }
 0x8b5   :  { %v4213_v41 = vmul.f32 %v13742_v6, %v3588_v43 }
 0x8b6   :  { %3690 = vperm.xlu2 %6964, %v13727_v12  }
 0x8b7   :  { %v4523_v38 = vadd.f32 %v4522_v53, %v4213_v41  ;;  %v13758_v53 = vunpack.c.l.bf16 %v13757_v40 }
 0x8b9   :  { %v4524_v54 = vadd.f32 %v4523_v38, %v4214_v57 }
 0x8ba   :  { %6967 = vset.pattern.permute.xlu1 %v10245_v24 }
 0x8bb   :  { %v4525_v35 = vadd.f32 %v4524_v54, %v4215_v63  ;;  %v13760_v63 = vld [vmem:[#allocation178_spill] sm:$0xff]  ;;  %v13761_v54 = vld [vmem:[#allocation203_spill] sm:$0xff] }
 0x8be   :  { %6966 = vset.pattern.permute.xlu2 %v10249_v20 }
 0x8c0   :  { %v3612_v42 = vpop.permute.xlu2 %3611 }
 0x8c1   :  { %v4217_v55 = vmul.f32 %v13749_v17, %v3612_v42  ;;  %v13764_v17 = vld [vmem:[#allocation204_spill] sm:$0xff] }
 0x8c2   :  { %3708 = vperm.xlu1 %6967, %v13727_v12  }
 0x8c4   :  { %v3606_v52 = vpop.permute.xlu1 %3605 }
 0x8c5   :  { %v4216_v25 = vmul.f32 %v13747_v47, %v3606_v52  ;;  %v13763_v47 = vunpack.c.l.bf16 %v13761_v54 }
 0x8c6   :  { %3702 = vperm.xlu2 %6966, %v13727_v12  }
 0x8c7   :  { %v4526_v11 = vadd.f32 %v4525_v35, %v4216_v25  ;;  %v13762_v35 = vunpack.c.h.bf16 %v13761_v54 }
 0x8c9   :  { %v4527_v0 = vadd.f32 %v4526_v11, %v4217_v55  ;;  %v4224_v42 = vmul.f32 %v13762_v35, %v13760_v63  ;;  %v13765_v55 = vunpack.c.l.bf16 %v13764_v17 }
 0x8ca   :  { %6970 = vset.pattern.permute.xlu1 %v10193_v5 }
 0x8ce   :  { %6969 = vset.pattern.permute.xlu2 %v10255_v18 }
 0x8d0   :  { %v3630_v30 = vpop.permute.xlu2 %3629 }
 0x8d1   :  { %v4220_v36 = vmul.f32 %v13754_v48, %v3630_v30  ;;  %v13768_v48 = vunpack.c.h.bf16 %v13764_v17  ;;  %v13781_v17 = vld [vmem:[#allocation173_spill] sm:$0xff] }
 0x8d2   :  { %3745 = vperm.xlu1 %6970, %v13750_v50  }
 0x8d4   :  { %v3618_v62 = vpop.permute.xlu1 %3617 }
 0x8d5   :  { %v4218_v28 = vmul.f32 %v13751_v23, %v3618_v62 }
 0x8d6   :  { %3720 = vperm.xlu2 %6969, %v13727_v12  }
 0x8d7   :  { %v4528_v21 = vadd.f32 %v4527_v0, %v4218_v28 }
 0x8d9   :  { %v4529_v5 = vadd.f32 %v4528_v21, %v4219_v27 }
 0x8da   :  { %3842 = vperm.xlu1 %6970, %v13755_v31  }
 0x8db   :  { %v4530_v1 = vadd.f32 %v4529_v5, %v4220_v36 }
 0x8de   :  { %6971 = vset.pattern.permute.xlu2 %v10275_v33 }
 0x8e0   :  { %v3642_v51 = vpop.permute.xlu2 %3641 }
 0x8e1   :  { %v4222_v10 = vmul.f32 %v13759_v44, %v3642_v51 }
 0x8e2   :  { %3939 = vperm.xlu1 %6970, %v13756_v7  }
 0x8e4   :  { %v3636_v46 = vpop.permute.xlu1 %3635 }
 0x8e5   :  { %v4221_v43 = vmul.f32 %v13758_v53, %v3636_v46  ;;  %v13772_v53 = vld [vmem:[#allocation125_spill] sm:$0xff] }
 0x8e6   :  { %3751 = vperm.xlu2 %6971, %v13750_v50  }
 0x8e7   :  { %v4531_v6 = vadd.f32 %v4530_v1, %v4221_v43  ;;  %v13773_v43 = vld [vmem:[#allocation212_spill] sm:$0xff] }
 0x8e8   :  { %v13774_v44 = vunpack.c.l.bf16 %v13773_v43 }
 0x8e9   :  { %v4532_v41 = vadd.f32 %v4531_v6, %v4222_v10 }
 0x8ea   :  { %6975 = vset.pattern.permute.xlu1 %v10198_v56  ;;  %v4229_v10 = vmul.f32 %v13774_v44, %v13772_v53 }
 0x8eb   :  { %v4533_v61 = vrot.slane %v4532_v41, 4 }
 0x8ed   :  { %v4534_v9 = vadd.f32 %v4533_v61, %v4532_v41  ;;  %v13775_v41 = vunpack.c.h.bf16 %v13773_v43 }
 0x8ee   :  { %6973 = vset.pattern.permute.xlu2 %v10198_v56 }
 0x8ef   :  { %v4535_v39 = vrot.slane %v4534_v9, 2 }
 0x8f0   :  { %v3661_v13 = vpop.permute.xlu2 %3660 }
 0x8f1   :  { %v4536_v57 = vadd.f32 %v4535_v39, %v4534_v9  ;;  %v4225_v11 = vmul.f32 %v13765_v55, %v3661_v13 }
 0x8f2   :  { %3854 = vperm.xlu1 %6975, %v13755_v31  }
 0x8f3   :  { %v4537_v38 = vrot.slane %v4536_v57, 1 }
 0x8f4   :  { %v3649_v60 = vpop.permute.xlu1 %3648 }
 0x8f5   :  { %v4538_v52 = vadd.f32 %v4537_v38, %v4536_v57  ;;  %v4223_v25 = vmul.f32 %v13763_v47, %v3649_v60  ;;  %v13776_v38 = vld [vmem:[#allocation213_spill] sm:$0xff] }
 0x8f6   :  { %3757 = vperm.xlu2 %6973, %v13750_v50   ;;  %v13777_v13 = vunpack.c.l.bf16 %v13776_v38  ;;  %v13778_v63 = vunpack.c.h.bf16 %v13776_v38 }
 0x8f7   :  { %v4635_v2 = vpack.c.bf16 %v4538_v52, %v4538_v52  ;;  %v4539_v0 = vadd.f32 %v4224_v42, %v4223_v25  ;;  %v13779_v52 = vld [vmem:[#allocation217_spill] sm:$0xff] }
 0x8f8   :  { %v13780_v47 = vunpack.c.l.bf16 %v13779_v52  ;;  %v13782_v55 = vunpack.c.h.bf16 %v13779_v52  ;;  %v13799_v52 = vld [vmem:[#allocation58_spill] sm:$0xff] }
 0x8f9   :  { %v4731_v62 = vperm.slane %v4635_v2, 0  ;;  %v5625_v23 = vunpack.c.l.b16 %v4635_v2  ;;  %v4540_v28 = vadd.f32 %v4539_v0, %v4225_v11 }
 0x8fa   :  { %6978 = vset.pattern.permute.xlu1 %v13499_v58  ;;  %v13769_v58 = vld [vmem:[#allocation208_spill] sm:$0xff]  ;;  %v4234_v11 = vmul.f32 %v13782_v55, %v13781_v17  ;;  %v13801_v17 = vld [vmem:[#allocation55_spill] sm:$0xff] }
 0x8fb   :  { %v4747_v30 = vunpack.c.l.b16 %v4731_v62  ;;  %v11390_v8 = vsel %vm13766_vm2, %v5625_v23, %v11322_v29  ;;  %v13770_v5 = vunpack.c.l.bf16 %v13769_v58  ;;  %v13783_v62 = vld [vmem:[#allocation221_spill] sm:$0xff]  ;;  %v13802_v55 = vunpack.c.l.bf16 %v13801_v17 }
 0x8fc   :  { %v13784_v23 = vunpack.c.l.bf16 %v13783_v62 }
 0x8fd   :  { %v11394_v3 = vsel %vm13767_vm3, %v4747_v30, %v11329_v45  ;;  %v13771_v45 = vunpack.c.h.bf16 %v13769_v58 }
 0x8fe   :  { %6974 = vset.pattern.permute.xlu2 %v10275_v33 }
 0x900   :  { %v3673_v27 = vpop.permute.xlu2 %3672 }
 0x901   :  { %v4227_v1 = vmul.f32 %v13770_v5, %v3673_v27 }
 0x902   :  { %3860 = vperm.xlu1 %6978, %v13755_v31  }
 0x904   :  { %v3667_v21 = vpop.permute.xlu1 %3666 }
 0x905   :  { %v4226_v36 = vmul.f32 %v13768_v48, %v3667_v21  ;;  %v13785_v48 = vld [vmem:[#allocation226_spill] sm:$0xff] }
 0x906   :  { %3945 = vperm.xlu2 %6974, %v13756_v7   ;;  %v13787_v5 = vunpack.c.l.bf16 %v13785_v48 }
 0x907   :  { %v4541_v29 = vadd.f32 %v4540_v28, %v4226_v36  ;;  %v13786_v36 = vunpack.c.h.bf16 %v13785_v48 }
 0x909   :  { %v4542_v51 = vadd.f32 %v4541_v29, %v4227_v1 }
 0x90a   :  { %3957 = vperm.xlu1 %6978, %v13756_v7  }
 0x90e   :  { %6977 = vset.pattern.permute.xlu2 %v10198_v56 }
 0x910   :  { %v3691_v40 = vpop.permute.xlu2 %3690 }
 0x911   :  { %v4230_v61 = vmul.f32 %v13775_v41, %v3691_v40 }
 0x912   :  { %6982 = vset.pattern.permute.xlu1 %v10229_v15 }
 0x914   :  { %v3679_v33 = vpop.permute.xlu1 %3678 }
 0x915   :  { %v4228_v46 = vmul.f32 %v13771_v45, %v3679_v33  ;;  %v13788_v33 = vld [vmem:[#allocation184_spill] sm:$0xff]  ;;  %v13789_v45 = vld [vmem:[#allocation247_spill] sm:$0xff] }
 0x916   :  { %3951 = vperm.xlu2 %6977, %v13756_v7   ;;  %v13791_v53 = vunpack.c.l.bf16 %v13789_v45 }
 0x917   :  { %v4543_v6 = vadd.f32 %v4542_v51, %v4228_v46  ;;  %v13790_v46 = vunpack.c.h.bf16 %v13789_v45  ;;  %v13808_v45 = vld [vmem:[#allocation231_spill] sm:$0xff] }
 0x919   :  { %v4544_v9 = vadd.f32 %v4543_v6, %v4229_v10  ;;  %v4256_v40 = vmul.f32 %v13790_v46, %v13788_v33  ;;  %v13792_v6 = vld [vmem:[#allocation230_spill] sm:$0xff]  ;;  %v13809_v46 = vunpack.c.l.bf16 %v13808_v45 }
 0x91a   :  { %3963 = vperm.xlu1 %6982, %v13756_v7   ;;  %v13793_v41 = vunpack.c.l.bf16 %v13792_v6 }
 0x91b   :  { %v4545_v56 = vadd.f32 %v4544_v9, %v4230_v61 }
 0x91e   :  { %6979 = vset.pattern.permute.xlu2 %v10229_v15 }
 0x920   :  { %v3703_v39 = vpop.permute.xlu2 %3702 }
 0x921   :  { %v4232_v54 = vmul.f32 %v13778_v63, %v3703_v39 }
 0x922   :  { %6983 = vset.pattern.permute.xlu1 %v10239_v32 }
 0x924   :  { %v3697_v57 = vpop.permute.xlu1 %3696 }
 0x925   :  { %v4231_v60 = vmul.f32 %v13777_v13, %v3697_v57  ;;  %v13796_v13 = vld [vmem:[#allocation90_spill] sm:$0xff] }
 0x926   :  { %3769 = vperm.xlu2 %6979, %v13750_v50  }
 0x927   :  { %v4546_v35 = vadd.f32 %v4545_v56, %v4231_v60  ;;  %v13797_v60 = vunpack.c.l.bf16 %v13796_v13 }
 0x929   :  { %v4547_v42 = vadd.f32 %v4546_v35, %v4232_v54  ;;  %v13798_v54 = vunpack.c.h.bf16 %v13796_v13 }
 0x92a   :  { %3781 = vperm.xlu1 %6983, %v13750_v50  }
 0x92e   :  { %6981 = vset.pattern.permute.xlu2 %v10225_v26 }
 0x930   :  { %v3721_v2 = vpop.permute.xlu2 %3720 }
 0x931   :  { %v4235_v28 = vmul.f32 %v13784_v23, %v3721_v2 }
 0x932   :  { %6986 = vset.pattern.permute.xlu1 %v10235_v34 }
 0x934   :  { %v3709_v15 = vpop.permute.xlu1 %3708 }
 0x935   :  { %v4233_v25 = vmul.f32 %v13780_v47, %v3709_v15  ;;  %v13800_v47 = vunpack.c.l.bf16 %v13799_v52 }
 0x936   :  { %3775 = vperm.xlu2 %6981, %v13750_v50  }
 0x937   :  { %v4548_v0 = vadd.f32 %v4547_v42, %v4233_v25 }
 0x939   :  { %v4549_v30 = vadd.f32 %v4548_v0, %v4234_v11 }
 0x93a   :  { %3787 = vperm.xlu1 %6986, %v13750_v50  }
 0x93b   :  { %v11434_v26 = vadd.f32 %v4549_v30, %v4235_v28  ;;  %v13803_v28 = vunpack.c.h.bf16 %v13799_v52 }
 0x93e   :  { %3872 = vperm.xlu2 %6981, %v13755_v31  }
 0x940   :  { %v3752_v27 = vpop.permute.xlu2 %3751 }
 0x941   :  { %v4240_v58 = vmul.f32 %v13786_v36, %v3752_v27  ;;  %v13804_v27 = vld [vmem:[#allocation182_spill] sm:$0xff] }
 0x942   :  { %3884 = vperm.xlu1 %6986, %v13755_v31  }
 0x944   :  { %v3746_v21 = vpop.permute.xlu1 %3745 }
 0x945   :  { %v4239_v1 = vmul.f32 %v13787_v5, %v3746_v21  ;;  %v13805_v21 = vld [vmem:[#allocation40_spill] sm:$0xff] }
 0x946   :  { %6985 = vset.pattern.permute.xlu2 %v10239_v32  ;;  %v13794_v32 = vld [vmem:[#allocation202_spill] sm:$0xff]  ;;  %v13806_v48 = vunpack.c.l.bf16 %v13805_v21  ;;  %v13815_v13 = vunpack.c.h.bf16 %v13805_v21  ;;  %v13824_v21 = vld [vmem:[#allocation101_spill] sm:$0xff] }
 0x947   :  { %v4560_v29 = vadd.f32 %v4240_v58, %v4239_v1  ;;  %v13807_v1 = vunpack.c.h.bf16 %v13801_v17 }
 0x948   :  { %v4259_v36 = vmul.f32 %v13806_v48, %v13804_v27  ;;  %v13825_v48 = vunpack.c.l.bf16 %v13824_v21 }
 0x94a   :  { %6989 = vset.pattern.permute.xlu1 %v10308_v59  ;;  %v13795_v59 = vunpack.c.h.bf16 %v13792_v6 }
 0x94c   :  { %v3843_v51 = vpop.permute.xlu1 %3842  ;;  %v4242_v9 = vmul.f32 %v13795_v59, %v13794_v32 }
 0x94d   :  { %v4255_v43 = vmul.f32 %v13791_v53, %v3843_v51 }
 0x94e   :  { %3878 = vperm.xlu2 %6985, %v13755_v31  }
 0x94f   :  { %v4581_v44 = vadd.f32 %v4256_v40, %v4255_v43 }
 0x950   :  { %v3758_v10 = vpop.permute.xlu2 %3757 }
 0x951   :  { %v4241_v61 = vmul.f32 %v13793_v41, %v3758_v10  ;;  %v13812_v41 = vld [vmem:[#allocation200_spill] sm:$0xff] }
 0x952   :  { %3890 = vperm.xlu1 %6989, %v13755_v31  }
 0x953   :  { %v4561_v56 = vadd.f32 %v4560_v29, %v4241_v61 }
 0x954   :  { %v3940_v57 = vpop.permute.xlu1 %3939 }
 0x955   :  { %v4562_v39 = vadd.f32 %v4561_v56, %v4242_v9  ;;  %v4271_v63 = vmul.f32 %v13797_v60, %v3940_v57  ;;  %v13814_v9 = vunpack.c.h.bf16 %v13808_v45  ;;  %v13827_v45 = vunpack.c.h.bf16 %v13824_v21 }
 0x956   :  { %3975 = vperm.xlu2 %6985, %v13756_v7  }
 0x95a   :  { %3987 = vperm.xlu1 %6989, %v13756_v7  }
 0x95e   :  { %6988 = vset.pattern.permute.xlu2 %v10235_v34 }
 0x960   :  { %v3946_v38 = vpop.permute.xlu2 %3945 }
 0x961   :  { %v4272_v35 = vmul.f32 %v13798_v54, %v3946_v38 }
 0x962   :  { %6993 = vset.pattern.permute.xlu1 %v10249_v20 }
 0x963   :  { %v4602_v42 = vadd.f32 %v4272_v35, %v4271_v63  ;;  %v13816_v35 = vld [vmem:[#allocation235_spill] sm:$0xff] }
 0x964   :  { %v3855_v15 = vpop.permute.xlu1 %3854 }
 0x965   :  { %v4257_v25 = vmul.f32 %v13800_v47, %v3855_v15 }
 0x966   :  { %3981 = vperm.xlu2 %6988, %v13756_v7  }
 0x967   :  { %v4582_v2 = vadd.f32 %v4581_v44, %v4257_v25  ;;  %v13810_v44 = vld [vmem:[#allocation76_spill] sm:$0xff] }
 0x968   :  { %v13811_v10 = vunpack.c.l.bf16 %v13810_v44 }
 0x96a   :  { %3993 = vperm.xlu1 %6993, %v13756_v7  }
 0x96e   :  { %6990 = vset.pattern.permute.xlu2 %v10249_v20 }
 0x970   :  { %v3952_v34 = vpop.permute.xlu2 %3951 }
 0x971   :  { %v4273_v11 = vmul.f32 %v13802_v55, %v3952_v34  ;;  %v13820_v55 = vunpack.c.h.bf16 %v13816_v35 }
 0x972   :  { %6994 = vset.pattern.permute.xlu1 %v10259_v4 }
 0x973   :  { %v4603_v0 = vadd.f32 %v4602_v42, %v4273_v11  ;;  %v13817_v42 = vunpack.c.l.bf16 %v13816_v35 }
 0x974   :  { %v3861_v23 = vpop.permute.xlu1 %3860 }
 0x975   :  { %v4258_v30 = vmul.f32 %v13803_v28, %v3861_v23  ;;  %v13822_v23 = vld [vmem:[#allocation238_spill] sm:$0xff] }
 0x976   :  { %3799 = vperm.xlu2 %6990, %v13750_v50   ;;  %v13823_v28 = vunpack.c.l.bf16 %v13822_v23 }
 0x977   :  { %v4583_v58 = vadd.f32 %v4582_v2, %v4258_v30 }
 0x979   :  { %v4584_v5 = vadd.f32 %v4583_v58, %v4259_v36 }
 0x97a   :  { %3811 = vperm.xlu1 %6994, %v13750_v50  }
 0x97c   :  { %v3958_v20 = vpop.permute.xlu1 %3957 }
 0x97d   :  { %v4274_v29 = vmul.f32 %v13807_v1, %v3958_v20 }
 0x97e   :  { %6992 = vset.pattern.permute.xlu2 %v10245_v24  ;;  %v13813_v24 = vunpack.c.h.bf16 %v13810_v44 }
 0x97f   :  { %v4604_v51 = vadd.f32 %v4603_v0, %v4274_v29  ;;  %v13821_v0 = vld [vmem:[#allocation207_spill] sm:$0xff] }
 0x980   :  { %v3770_v33 = vpop.permute.xlu2 %3769  ;;  %v4276_v61 = vmul.f32 %v13813_v24, %v13812_v41  ;;  %v4247_v30 = vmul.f32 %v13823_v28, %v13821_v0  ;;  %v6123_v0 = vld [vmem:[%s12315_s5 + $0xe4] sm:$0xf] }
 0x981   :  { %v4243_v40 = vmul.f32 %v13809_v46, %v3770_v33 }
 0x982   :  { %6997 = vset.pattern.permute.xlu1 %v10255_v18 }
 0x983   :  { %v4563_v53 = vadd.f32 %v4562_v39, %v4243_v40 }
 0x986   :  { %3805 = vperm.xlu2 %6992, %v13750_v50  }
 0x98a   :  { %3817 = vperm.xlu1 %6997, %v13750_v50  }
 0x98c   :  { %v3964_v43 = vpop.permute.xlu1 %3963 }
 0x98d   :  { %v4275_v6 = vmul.f32 %v13811_v10, %v3964_v43  ;;  %v13828_v43 = vld [vmem:[#allocation61_spill] sm:$0xff] }
 0x98e   :  { %3902 = vperm.xlu2 %6992, %v13755_v31   ;;  %v13829_v44 = vunpack.c.l.bf16 %v13828_v43  ;;  %v13831_v41 = vunpack.c.h.bf16 %v13828_v43  ;;  %v6120_v43 = vld [vmem:[%s12315_s5 + $0xcc] sm:$0xf] }
 0x98f   :  { %v4605_v32 = vadd.f32 %v4604_v51, %v4275_v6  ;;  %v13830_v6 = vld [vmem:[#allocation188_spill] sm:$0xff] }
 0x990   :  { %v3776_v59 = vpop.permute.xlu2 %3775  ;;  %v4264_v24 = vmul.f32 %v13831_v41, %v13830_v6  ;;  %v5750_v6 = vld [vmem:[%s12315_s5 + $0xa0] sm:$0xf]  ;;  %v6117_v41 = vld [vmem:[%s12315_s5 + $0xac] sm:$0xf0] }
 0x991   :  { %v4244_v56 = vmul.f32 %v13814_v9, %v3776_v59  ;;  %v4606_v39 = vadd.f32 %v4605_v32, %v4276_v61  ;;  %v13832_v9 = vld [vmem:[#allocation108_spill] sm:$0xff] }
 0x992   :  { %6998 = vset.pattern.permute.xlu1 %v10312_v14 }
 0x993   :  { %v4564_v57 = vadd.f32 %v4563_v53, %v4244_v56  ;;  %v13833_v56 = vunpack.c.l.bf16 %v13832_v9 }
 0x996   :  { %6996 = vset.pattern.permute.xlu2 %v10259_v4  ;;  %v13818_v4 = vld [vmem:[#allocation51_spill] sm:$0xff] }
 0x997   :  { %v13819_v25 = vunpack.c.l.bf16 %v13818_v4  ;;  %v13826_v1 = vunpack.c.h.bf16 %v13818_v4 }
 0x998   :  { %v3873_v38 = vpop.permute.xlu2 %3872 }
 0x999   :  { %v4260_v60 = vmul.f32 %v13815_v13, %v3873_v38  ;;  %v13834_v13 = vunpack.c.h.bf16 %v13832_v9  ;;  %v5751_v9 = vor.u32 %v6117_v41, %v5750_v6  ;;  %v5712_v6 = vld [vmem:[%s12315_s5 + $0x58] sm:$0xf0] }
 0x99a   :  { %3726 = vperm.xlu1 %6998, %v13727_v12  }
 0x99b   :  { %v4585_v63 = vadd.f32 %v4584_v5, %v4260_v60 }
 0x99c   :  { %v3782_v54 = vpop.permute.xlu1 %3781 }
 0x99d   :  { %v4245_v15 = vmul.f32 %v13817_v42, %v3782_v54 }
 0x99e   :  { %3908 = vperm.xlu2 %6996, %v13755_v31  }
 0x99f   :  { %v4565_v52 = vadd.f32 %v4564_v57, %v4245_v15  ;;  %v13837_v15 = vld [vmem:[#allocation80_spill] sm:$0xff] }
 0x9a2   :  { %7001 = vset.pattern.permute.xlu1 %v10255_v18 }
 0x9a6   :  { %4005 = vperm.xlu2 %6996, %v13756_v7  }
 0x9a8   :  { %v3879_v47 = vpop.permute.xlu2 %3878 }
 0x9a9   :  { %v4261_v2 = vmul.f32 %v13819_v25, %v3879_v47  ;;  %v13839_v25 = vunpack.c.h.bf16 %v13837_v15 }
 0x9aa   :  { %4011 = vperm.xlu1 %7001, %v13756_v7  }
 0x9ab   :  { %v4586_v34 = vadd.f32 %v4585_v63, %v4261_v2  ;;  %v13840_v2 = vld [vmem:[#allocation85_spill] sm:$0xff] }
 0x9ac   :  { %v3788_v17 = vpop.permute.xlu1 %3787 }
 0x9ad   :  { %v4246_v11 = vmul.f32 %v13820_v55, %v3788_v17 }
 0x9ae   :  { %7000 = vset.pattern.permute.xlu2 %v10312_v14 }
 0x9af   :  { %v4566_v18 = vadd.f32 %v4565_v52, %v4246_v11  ;;  %v13838_v52 = vunpack.c.l.bf16 %v13837_v15 }
 0x9b0   :  { %v3976_v27 = vpop.permute.xlu2 %3975 }
 0x9b1   :  { %v4277_v36 = vmul.f32 %v13825_v48, %v3976_v27  ;;  %v11516_v58 = vadd.f32 %v4566_v18, %v4247_v30  ;;  %v5790_v30 = vld [vmem:[%s12315_s5 + $0xe8] sm:$0xf]  ;;  %v6126_v18 = vld [vmem:[%s12315_s5 + $0xf4] sm:$0xf0] }
 0x9b2   :  { %7003 = vset.pattern.permute.xlu1 %v10312_v14  ;;  %v5791_v48 = vor.u32 %v6126_v18, %v5790_v30  ;;  %v6110_v30 = vld [vmem:[%s12315_s5 + $0x74] sm:$0xf0] }
 0x9b3   :  { %v4607_v5 = vadd.f32 %v4606_v39, %v4277_v36  ;;  %v6124_v36 = vld [vmem:[%s12315_s5 + $0xec] sm:$0xf] }
 0x9b4   :  { %v3885_v20 = vpop.permute.xlu1 %3884  ;;  %4956 = vmatpush.bf16.msra.mxu2 %v5791_v48 }
 0x9b5   :  { %v4262_v29 = vmul.f32 %v13826_v1, %v3885_v20  ;;  %v5766_v20 = vld [vmem:[%s12315_s5 + $0xc0] sm:$0xf] }
 0x9b6   :  { %3823 = vperm.xlu2 %7000, %v13750_v50  }
 0x9b7   :  { %v4587_v51 = vadd.f32 %v4586_v34, %v4262_v29  ;;  %v13841_v34 = vunpack.c.l.bf16 %v13840_v2  ;;  %v6121_v29 = vld [vmem:[%s12315_s5 + $0xcc] sm:$0xf0] }
 0x9b9   :  { %v4267_v17 = vmul.f32 %v13841_v34, %v10959_v22  ;;  %v5784_v22 = vld [vmem:[%s12315_s5 + $0xf0] sm:$0xf0]  ;;  %v5744_v34 = vld [vmem:[%s12315_s5 + $0x98] sm:$0xf0] }
 0x9ba   :  { %3920 = vperm.xlu1 %7003, %v13755_v31   ;;  %v5787_v21 = vor.u32 %v6123_v0, %v5784_v22  ;;  %v5726_v22 = vld [vmem:[%s12315_s5 + $0x68] sm:$0xf] }
 0x9bb   :  { %v5727_v48 = vor.u32 %v6110_v30, %v5726_v22  ;;  %v6091_v22 = vld [vmem:[%s12316_s4 + $0xe4] sm:$0xf]  ;;  %v5916_v30 = vld [vmem:[%s12316_s4 + $0xf0] sm:$0xf0] }
 0x9bc   :  { %4942 = vmatpush.bf16.msra.mxu1 %v5787_v21 }
 0x9be   :  { %7002 = vset.pattern.permute.xlu2 %v10269_v37 }
 0x9c0   :  { %v3982_v33 = vpop.permute.xlu2 %3981 }
 0x9c1   :  { %v4278_v46 = vmul.f32 %v13827_v45, %v3982_v33  ;;  %v5768_v33 = vld [vmem:[%s12315_s5 + $0xd0] sm:$0xf0]  ;;  %v5767_v45 = vor.u32 %v6121_v29, %v5766_v20  ;;  %v5702_v29 = vld [vmem:[%s12315_s5 + $0x40] sm:$0xf] }
 0x9c2   :  { %7005 = vset.pattern.permute.xlu1 %v10265_v49 }
 0x9c3   :  { %v4608_v40 = vadd.f32 %v4607_v5, %v4278_v46  ;;  %v5792_v5 = vld [vmem:[%s12315_s5 + $0xf8] sm:$0xf0] }
 0x9c4   :  { %v3891_v53 = vpop.permute.xlu1 %3890  ;;  %v5795_v1 = vor.u32 %v6124_v36, %v5792_v5  ;;  %v6108_v36 = vld [vmem:[%s12315_s5 + $0x6c] sm:$0xf]  ;;  %v5728_v5 = vld [vmem:[%s12315_s5 + $0x78] sm:$0xf0] }
 0x9c5   :  { %v4263_v10 = vmul.f32 %v13829_v44, %v3891_v53  ;;  %v6122_v53 = vld [vmem:[%s12315_s5 + $0xd4] sm:$0xf0]  ;;  %v5731_v20 = vor.u32 %v6108_v36, %v5728_v5  ;;  %v5922_v36 = vld [vmem:[%s12316_s4 + $0xe8] sm:$0xf] }
 0x9c6   :  { %3732 = vperm.xlu2 %7002, %v13727_v12   ;;  %4970 = vmatpush.bf16.msra.mxu3 %v5795_v1  ;;  %v6094_v5 = vld [vmem:[%s12316_s4 + $0xf4] sm:$0xf0] }
 0x9c7   :  { %v4588_v61 = vadd.f32 %v4587_v51, %v4263_v10  ;;  %v6119_v51 = vld [vmem:[%s12315_s5 + $0xc4] sm:$0xf]  ;;  %v5776_v10 = vld [vmem:[%s12315_s5 + $0xd8] sm:$0xf0] }
 0x9c8   :  { %v5771_v46 = vor.u32 %v6119_v51, %v5768_v33  ;;  %v6105_v51 = vld [vmem:[%s12315_s5 + $0x4c] sm:$0xf0]  ;;  %v6103_v33 = vld [vmem:[%s12315_s5 + $0x44] sm:$0xf] }
 0x9c9   :  { %v4589_v32 = vadd.f32 %v4588_v61, %v4264_v24  ;;  %v5779_v24 = vor.u32 %v6120_v43, %v5776_v10  ;;  %v6115_v61 = vld [vmem:[%s12315_s5 + $0xa4] sm:$0xf]  ;;  %v6104_v10 = vld [vmem:[%s12315_s5 + $0x4c] sm:$0xf] }
 0x9ca   :  { %3738 = vperm.xlu1 %7005, %v13727_v12   ;;  %4943 = vmatpush.bf16.msra.mxu1 %v5771_v46  ;;  %v5704_v46 = vld [vmem:[%s12315_s5 + $0x50] sm:$0xf0]  ;;  %v5715_v41 = vor.u32 %v6104_v10, %v5712_v6  ;;  %v6087_v10 = vld [vmem:[%s12316_s4 + $0xc4] sm:$0xf] }
 0x9cb   :  { %4971 = vmatpush.bf16.msra.mxu3 %v5779_v24  ;;  %v5707_v43 = vor.u32 %v6103_v33, %v5704_v46  ;;  %v5686_v24 = vld [vmem:[%s12315_s5 + $0x20] sm:$0xf]  ;;  %v13842_v46 = vunpack.c.h.bf16 %v13822_v23  ;;  %v5900_v6 = vld [vmem:[%s12316_s4 + $0xd0] sm:$0xf0] }
 0x9cc   :  { %v3988_v59 = vpop.permute.xlu1 %3987  ;;  %v5898_v33 = vld [vmem:[%s12316_s4 + $0xc0] sm:$0xf]  ;;  %v5903_v23 = vor.u32 %v6087_v10, %v5900_v6  ;;  %v6080_v6 = vld [vmem:[%s12316_s4 + $0x8c] sm:$0xf] }
 0x9cd   :  { %v4279_v39 = vmul.f32 %v13833_v56, %v3988_v59  ;;  %v5758_v59 = vld [vmem:[%s12315_s5 + $0xa8] sm:$0xf]  ;;  %v6118_v56 = vld [vmem:[%s12315_s5 + $0xb4] sm:$0xf0] }
 0x9ce   :  { %7004 = vset.pattern.permute.xlu2 %v10312_v14  ;;  %v13835_v14 = vld [vmem:[#allocation92_spill] sm:$0xff] }
 0x9cf   :  { %v4609_v38 = vadd.f32 %v4608_v40, %v4279_v39  ;;  %v13836_v12 = vunpack.c.l.bf16 %v13835_v14  ;;  %v5774_v40 = vld [vmem:[%s12315_s5 + $0xc8] sm:$0xf]  ;;  %v6116_v39 = vld [vmem:[%s12315_s5 + $0xac] sm:$0xf] }
 0x9d0   :  { %v11542_v63 = vpop.permute.xlu2 %3799  ;;  %v5775_v44 = vor.u32 %v6122_v53, %v5774_v40  ;;  %v5710_v40 = vld [vmem:[%s12315_s5 + $0x48] sm:$0xf]  ;;  %v6106_v53 = vld [vmem:[%s12315_s5 + $0x54] sm:$0xf0] }
 0x9d2   :  { %3835 = vperm.xlu1 %7005, %v13750_v50   ;;  %v4281_v50 = vmul.f32 %v13836_v12, %v10900_v19  ;;  %4957 = vmatpush.bf16.msra.mxu2 %v5775_v44  ;;  %v5711_v44 = vor.u32 %v6106_v53, %v5710_v40  ;;  %v4248_v40 = vmul.f32 %v13842_v46, %v11542_v63  ;;  %v6090_v63 = vld [vmem:[%s12316_s4 + $0xd4] sm:$0xf0]  ;;  %v3830_v46 = vpop.permute.xlu0 %3829 }
 0x9d6   :  { %4017 = vperm.xlu2 %7004, %v13756_v7  }
 0x9da   :  { %4029 = vperm.xlu1 %7005, %v13756_v7  }
 0x9dc   :  { %v3994_v57 = vpop.permute.xlu1 %3993 }
 0x9dd   :  { %v4280_v60 = vmul.f32 %v13834_v13, %v3994_v57  ;;  %v5760_v57 = vld [vmem:[%s12315_s5 + $0xb8] sm:$0xf0]  ;;  %v5759_v13 = vor.u32 %v6118_v56, %v5758_v59  ;;  %v5694_v56 = vld [vmem:[%s12315_s5 + $0x28] sm:$0xf] }
 0x9de   :  { %7006 = vset.pattern.permute.xlu2 %v10269_v37 }
 0x9df   :  { %v4610_v54 = vadd.f32 %v4609_v38, %v4280_v60  ;;  %v5763_v60 = vor.u32 %v6116_v39, %v5760_v57  ;;  %4958 = vmatpush.bf16.msra.mxu2 %v5759_v13  ;;  %v6102_v39 = vld [vmem:[%s12315_s5 + $0x34] sm:$0xf0] }
 0x9e0   :  { %v11550_v42 = vpop.permute.xlu2 %3805  ;;  %v5695_v13 = vor.u32 %v6102_v39, %v5694_v56 }
 0x9e1   :  { %v11548_v35 = vadd.f32 %v4610_v54, %v4281_v50  ;;  %v5734_v50 = vld [vmem:[%s12315_s5 + $0x80] sm:$0xf]  ;;  %v6113_v54 = vld [vmem:[%s12315_s5 + $0x8c] sm:$0xf0]  ;;  %4972 = vmatpush.bf16.msra.mxu3 %v5763_v60  ;;  %v6100_v60 = vld [vmem:[%s12315_s5 + $0x2c] sm:$0xf] }
 0x9e2   :  { %v5735_v15 = vor.u32 %v6113_v54, %v5734_v50  ;;  %v5696_v50 = vld [vmem:[%s12315_s5 + $0x38] sm:$0xf0] }
 0x9e3   :  { %v5699_v54 = vor.u32 %v6100_v60, %v5696_v50  ;;  %v5882_v50 = vld [vmem:[%s12316_s4 + $0xa0] sm:$0xf] }
 0x9e6   :  { %3926 = vperm.xlu2 %7006, %v13755_v31  }
 0x9e8   :  { %v3903_v7 = vpop.permute.xlu2 %3902 }
 0x9e9   :  { %v4265_v47 = vmul.f32 %v13838_v52, %v3903_v7  ;;  %v6111_v7 = vld [vmem:[%s12315_s5 + $0x84] sm:$0xf]  ;;  %v5736_v52 = vld [vmem:[%s12315_s5 + $0x90] sm:$0xf0] }
 0x9eb   :  { %v4590_v4 = vadd.f32 %v4589_v32, %v4265_v47  ;;  %v5752_v32 = vld [vmem:[%s12315_s5 + $0xb0] sm:$0xf0]  ;;  %v5742_v47 = vld [vmem:[%s12315_s5 + $0x88] sm:$0xf] }
 0x9ec   :  { %v11582_v27 = vpop.permute.xlu1 %3811  ;;  %v5755_v38 = vor.u32 %v6115_v61, %v5752_v32  ;;  %v6101_v61 = vld [vmem:[%s12315_s5 + $0x2c] sm:$0xf0]  ;;  %v6099_v32 = vld [vmem:[%s12315_s5 + $0x24] sm:$0xf] }
 0x9ed   :  { %v5687_v59 = vor.u32 %v6101_v61, %v5686_v24  ;;  %v6088_v24 = vld [vmem:[%s12316_s4 + $0xcc] sm:$0xf]  ;;  %v5908_v61 = vld [vmem:[%s12316_s4 + $0xd8] sm:$0xf0] }
 0x9ee   :  { %7007 = vset.pattern.permute.xlu2 %v10265_v49  ;;  %v5782_v49 = vld [vmem:[%s12315_s5 + $0xe0] sm:$0xf]  ;;  %4944 = vmatpush.bf16.msra.mxu1 %v5755_v38 }
 0x9f6   :  { %3932 = vperm.xlu2 %7007, %v13755_v31   ;;  %v6125_v31 = vld [vmem:[%s12315_s5 + $0xec] sm:$0xf0] }
 0x9f7   :  { %v5783_v28 = vor.u32 %v6125_v31, %v5782_v49  ;;  %v6109_v49 = vld [vmem:[%s12315_s5 + $0x6c] sm:$0xf0]  ;;  %v6107_v31 = vld [vmem:[%s12315_s5 + $0x64] sm:$0xf] }
 0x9f8   :  { %v3909_v37 = vpop.permute.xlu2 %3908 }
 0x9f9   :  { %v4266_v19 = vmul.f32 %v13839_v25, %v3909_v37  ;;  %4928 = vmatpush.bf16.msra.mxu0 %v5783_v28  ;;  %v6114_v37 = vld [vmem:[%s12315_s5 + $0x94] sm:$0xf0]  ;;  %v5720_v28 = vld [vmem:[%s12315_s5 + $0x70] sm:$0xf0] }
 0x9fa   :  { %v5743_v25 = vor.u32 %v6114_v37, %v5742_v47  ;;  %v5723_v21 = vor.u32 %v6107_v31, %v5720_v28  ;;  %v6095_v47 = vld [vmem:[%s12315_s5 + $0x4] sm:$0xf]  ;;  %v5914_v31 = vld [vmem:[%s12316_s4 + $0xe0] sm:$0xf]  ;;  %v6093_v28 = vld [vmem:[%s12316_s4 + $0xec] sm:$0xf0] }
 0x9fb   :  { %v4591_v55 = vadd.f32 %v4590_v4, %v4266_v19  ;;  %v5739_v4 = vor.u32 %v6111_v7, %v5736_v52  ;;  %v6112_v19 = vld [vmem:[%s12315_s5 + $0x8c] sm:$0xf]  ;;  %v6097_v52 = vld [vmem:[%s12315_s5 + $0xc] sm:$0xf0] }
 0x9fc   :  { %v11638_v12 = vpop.permute.xlu1 %3817  ;;  %4959 = vmatpush.bf16.msra.mxu2 %v5743_v25  ;;  %v5678_v25 = vld [vmem:[%s12315_s5 + $0x8] sm:$0xf] }
 0x9fd   :  { %v11562_v11 = vadd.f32 %v4591_v55, %v4267_v17  ;;  %4929 = vmatpush.bf16.msra.mxu0 %v5767_v45  ;;  %v5747_v17 = vor.u32 %v6112_v19, %v5744_v34  ;;  %4945 = vmatpush.bf16.msra.mxu1 %v5739_v4  ;;  %v5718_v55 = vld [vmem:[%s12315_s5 + $0x60] sm:$0xf]  ;;  %v5703_v45 = vor.u32 %v6105_v51, %v5702_v29  ;;  %v5672_v4 = vld [vmem:[%s12315_s5 + $0x10] sm:$0xf0]  ;;  %v6098_v19 = vld [vmem:[%s12315_s5 + $0x14] sm:$0xf0] }
 0x9fe   :  { %v5719_v0 = vor.u32 %v6109_v49, %v5718_v55  ;;  %v5675_v34 = vor.u32 %v6095_v47, %v5672_v4  ;;  %v6096_v55 = vld [vmem:[%s12315_s5 + $0xc] sm:$0xf]  ;;  %v5680_v49 = vld [vmem:[%s12315_s5 + $0x18] sm:$0xf0]  ;;  %v5923_v29 = vor.u32 %v6094_v5, %v5922_v36  ;;  %v6086_v4 = vld [vmem:[%s12316_s4 + $0xb4] sm:$0xf0] }
 0x9ff   :  { %4973 = vmatpush.bf16.msra.mxu3 %v5747_v17  ;;  %v5679_v17 = vor.u32 %v6098_v19, %v5678_v25  ;;  %v5924_v51 = vld [vmem:[%s12316_s4 + $0xf8] sm:$0xf0]  ;;  %v6079_v36 = vld [vmem:[%s12316_s4 + $0x84] sm:$0xf] }
 0xa00   :  { %v11690_v1 = vpop.permute.xlu2 %4005  ;;  %4960 = vmatpush.bf16.msra.mxu2 %v5727_v48  ;;  %v5919_v48 = vor.u32 %v6091_v22, %v5916_v30 }
 0xa01   :  { %4930 = vmatpush.bf16.msra.mxu0 %v5751_v9  ;;  %4946 = vmatpush.bf16.msra.mxu1 %v5723_v21  ;;  %v5688_v9 = vld [vmem:[%s12315_s5 + $0x30] sm:$0xf0]  ;;  %v5915_v21 = vor.u32 %v6093_v28, %v5914_v31  ;;  %v13849_v31 = vld [vmem:[#allocation243_spill] sm:$0xff] }
 0xa02   :  { %v5691_v38 = vor.u32 %v6099_v32, %v5688_v9  ;;  %v13843_v32 = vld [vmem:[#allocation239_spill] sm:$0xff] }
 0xa03   :  { %4974 = vmatpush.bf16.msra.mxu3 %v5731_v20  ;;  %v6092_v20 = vld [vmem:[%s12316_s4 + $0xec] sm:$0xf] }
 0xa04   :  { %4961 = vmatpush.bf16.msra.mxu2 %v5711_v44 }
 0xa05   :  { %4931 = vmatpush.bf16.msra.mxu0 %v5735_v15  ;;  %4947 = vmatpush.bf16.msra.mxu1 %v5707_v43  ;;  %v5670_v15 = vld [vmem:[%s12315_s5] sm:$0xf]  ;;  %v5927_v43 = vor.u32 %v6092_v20, %v5924_v51  ;;  %v5868_v51 = vld [vmem:[%s12316_s4 + $0x90] sm:$0xf0] }
 0xa06   :  { %v5671_v37 = vor.u32 %v6097_v52, %v5670_v15  ;;  %v4568_v15 = vadd.f32 %v11516_v58, %v4248_v40  ;;  %v13846_v52 = vunpack.c.h.bf16 %v13843_v32  ;;  %v13847_v58 = vld [vmem:[#allocation222_spill] sm:$0xff] }
 0xa07   :  { %4975 = vmatpush.bf16.msra.mxu3 %v5715_v41  ;;  %v5906_v41 = vld [vmem:[%s12316_s4 + $0xc8] sm:$0xf]  ;;  %v13848_v25 = vunpack.c.l.bf16 %v13847_v58 }
 0xa08   :  { %4962 = vmatpush.bf16.msra.mxu2 %v5695_v13  ;;  %v5907_v39 = vor.u32 %v6090_v63, %v5906_v41  ;;  %v13845_v13 = vunpack.c.h.bf16 %v13783_v62  ;;  %v4250_v47 = vmul.f32 %v13846_v52, %v11582_v27  ;;  %v5876_v41 = vld [vmem:[%s12316_s4 + $0x98] sm:$0xf0] }
 0xa09   :  { %4932 = vmatpush.bf16.msra.mxu0 %v5719_v0  ;;  %4948 = vmatpush.bf16.msra.mxu1 %v5691_v38  ;;  %v5683_v0 = vor.u32 %v6096_v55, %v5680_v49  ;;  %v5911_v38 = vor.u32 %v6088_v24, %v5908_v61  ;;  %v5892_v55 = vld [vmem:[%s12316_s4 + $0xb8] sm:$0xf0]  ;;  %v5879_v63 = vor.u32 %v6080_v6, %v5876_v41  ;;  %v13853_v24 = vunpack.c.h.bf16 %v13835_v14  ;;  %v5852_v14 = vld [vmem:[%s12316_s4 + $0x70] sm:$0xf0] }
 0xa0a   :  { %v5860_v52 = vld [vmem:[%s12316_s4 + $0x78] sm:$0xf0]  ;;  %v5820_v41 = vld [vmem:[%s12316_s4 + $0x30] sm:$0xf0] }
 0xa0b   :  { %4976 = vmatpush.bf16.msra.mxu3 %v5699_v54  ;;  %v6085_v54 = vld [vmem:[%s12316_s4 + $0xac] sm:$0xf0]  ;;  %v4282_v61 = vmul.f32 %v13853_v24, %v11690_v1  ;;  %v5858_v1 = vld [vmem:[%s12316_s4 + $0x68] sm:$0xf] }
 0xa0c   :  { %v11682_v18 = vpop.permute.xlu1 %3726  ;;  %4963 = vmatpush.bf16.msra.mxu2 %v5679_v17  ;;  %v5883_v62 = vor.u32 %v6085_v54, %v5882_v50  ;;  %v6084_v17 = vld [vmem:[%s12316_s4 + $0xac] sm:$0xf] }
 0xa0d   :  { %4933 = vmatpush.bf16.msra.mxu0 %v5703_v45  ;;  %4949 = vmatpush.bf16.msra.mxu1 %v5675_v34  ;;  %v6089_v45 = vld [vmem:[%s12316_s4 + $0xcc] sm:$0xf0]  ;;  %v4236_v60 = vmul.f32 %v13845_v13, %v11682_v18  ;;  %v5884_v18 = vld [vmem:[%s12316_s4 + $0xb0] sm:$0xf0]  ;;  %v5895_v22 = vor.u32 %v6084_v17, %v5892_v55  ;;  %v6071_v55 = vld [vmem:[%s12316_s4 + $0x44] sm:$0xf] }
 0xa0e   :  { %v5899_v44 = vor.u32 %v6089_v45, %v5898_v33  ;;  %v5874_v33 = vld [vmem:[%s12316_s4 + $0x88] sm:$0xf]  ;;  %v6082_v45 = vld [vmem:[%s12316_s4 + $0x94] sm:$0xf0]  ;;  %v6073_v17 = vld [vmem:[%s12316_s4 + $0x4c] sm:$0xf0] }
 0xa0f   :  { %4977 = vmatpush.bf16.msra.mxu3 %v5683_v0  ;;  %v13850_v0 = vunpack.c.l.bf16 %v13849_v31  ;;  %v4551_v30 = vadd.f32 %v11434_v26, %v4236_v60  ;;  %v5875_v10 = vor.u32 %v6082_v45, %v5874_v33  ;;  %v6078_v60 = vld [vmem:[%s12316_s4 + $0x74] sm:$0xf0]  ;;  %v4024_v33 = vpop.permute.xlu0 %4023 }
 0xa10   :  { %v11742_v7 = vpop.permute.xlu2 %3823  ;;  %5178 = vmatpush.bf16.msrb.mxu2 %v5923_v29 }
 0xa11   :  { %4934 = vmatpush.bf16.msra.mxu0 %v5687_v59  ;;  %5164 = vmatpush.bf16.msrb.mxu1 %v5919_v48  ;;  %v13844_v59 = vunpack.c.l.bf16 %v13843_v32  ;;  %v4251_v28 = vmul.f32 %v13850_v0, %v11638_v12  ;;  %v6081_v48 = vld [vmem:[%s12316_s4 + $0x8c] sm:$0xf0]  ;;  %v13851_v12 = vunpack.c.h.bf16 %v13849_v31 }
 0xa13   :  { %v4249_v9 = vmul.f32 %v13844_v59, %v11550_v42  ;;  %5192 = vmatpush.bf16.msrb.mxu3 %v5927_v43  ;;  %v6083_v42 = vld [vmem:[%s12316_s4 + $0xa4] sm:$0xf]  ;;  %v4252_v20 = vmul.f32 %v13851_v12, %v11742_v7  ;;  %v13852_v7 = vunpack.c.h.bf16 %v13847_v58  ;;  %v5850_v59 = vld [vmem:[%s12316_s4 + $0x60] sm:$0xf] }
 0xa14   :  { %5179 = vmatpush.bf16.msrb.mxu2 %v5907_v39  ;;  %v5887_v27 = vor.u32 %v6083_v42, %v5884_v18  ;;  %v5859_v42 = vor.u32 %v6078_v60, %v5858_v1 }
 0xa15   :  { %4935 = vmatpush.bf16.msra.mxu0 %v5671_v37  ;;  %5165 = vmatpush.bf16.msrb.mxu1 %v5903_v23  ;;  %v5890_v37 = vld [vmem:[%s12316_s4 + $0xa8] sm:$0xf]  ;;  %v4569_v49 = vadd.f32 %v4568_v15, %v4249_v9  ;;  %v6077_v9 = vld [vmem:[%s12316_s4 + $0x6c] sm:$0xf0]  ;;  %v6076_v15 = vld [vmem:[%s12316_s4 + $0x6c] sm:$0xf] }
 0xa16   :  { %v5891_v34 = vor.u32 %v6086_v4, %v5890_v37  ;;  %v5851_v13 = vor.u32 %v6077_v9, %v5850_v59  ;;  %v13856_v37 = vld [vmem:[#allocation97_spill] sm:$0xff]  ;;  %v6068_v9 = vld [vmem:[%s12316_s4 + $0x2c] sm:$0xf] }
 0xa17   :  { %5193 = vmatpush.bf16.msrb.mxu3 %v5911_v38  ;;  %v4570_v5 = vadd.f32 %v4569_v49, %v4250_v47  ;;  %v13854_v47 = vld [vmem:[#allocation246_spill] sm:$0xff]  ;;  %v13857_v4 = vunpack.c.l.bf16 %v13856_v37  ;;  %v13858_v49 = vunpack.c.h.bf16 %v13856_v37  ;;  %v5804_v37 = vld [vmem:[%s12316_s4 + $0x10] sm:$0xf0] }
 0xa18   :  { %5180 = vmatpush.bf16.msrb.mxu2 %v5891_v34  ;;  %v5834_v34 = vld [vmem:[%s12316_s4 + $0x40] sm:$0xf] }
 0xa19   :  { %5150 = vmatpush.bf16.msrb.mxu0 %v5915_v21  ;;  %v5866_v21 = vld [vmem:[%s12316_s4 + $0x80] sm:$0xf]  ;;  %5166 = vmatpush.bf16.msrb.mxu1 %v5887_v27  ;;  %v4571_v23 = vadd.f32 %v4570_v5, %v4251_v28  ;;  %v5836_v28 = vld [vmem:[%s12316_s4 + $0x50] sm:$0xf0] }
 0xa1a   :  { %v5867_v26 = vor.u32 %v6081_v48, %v5866_v21  ;;  %v13859_v48 = vunpack.c.h.bf16 %v13854_v47  ;;  %v5839_v5 = vor.u32 %v6071_v55, %v5836_v28  ;;  %v13864_v55 = vld [vmem:[#allocation72_spill] sm:$0xff] }
 0xa1b   :  { %5194 = vmatpush.bf16.msrb.mxu3 %v5895_v22  ;;  %v4572_v39 = vadd.f32 %v4571_v23, %v4252_v20  ;;  %v5842_v22 = vld [vmem:[%s12316_s4 + $0x48] sm:$0xf]  ;;  %v6072_v20 = vld [vmem:[%s12316_s4 + $0x4c] sm:$0xf] }
 0xa1c   :  { %v11734_v57 = vpop.permute.xlu1 %4011  ;;  %5181 = vmatpush.bf16.msrb.mxu2 %v5875_v10  ;;  %v5826_v23 = vld [vmem:[%s12316_s4 + $0x28] sm:$0xf] }
 0xa1d   :  { %5151 = vmatpush.bf16.msrb.mxu0 %v5899_v44  ;;  %v5871_v44 = vor.u32 %v6079_v36, %v5868_v51  ;;  %v4283_v58 = vmul.f32 %v13857_v4, %v11734_v57  ;;  %v5810_v4 = vld [vmem:[%s12316_s4 + $0x8] sm:$0xf] }
 0xa1f   :  { %5167 = vmatpush.bf16.msrb.mxu1 %v5871_v44  ;;  %5195 = vmatpush.bf16.msrb.mxu3 %v5879_v63  ;;  %v6070_v63 = vld [vmem:[%s12316_s4 + $0x34] sm:$0xf0] }
 0xa20   :  { %v3733_v56 = vpop.permute.xlu2 %3732  ;;  %5182 = vmatpush.bf16.msrb.mxu2 %v5859_v42  ;;  %v5827_v59 = vor.u32 %v6070_v63, %v5826_v23  ;;  %v6063_v42 = vld [vmem:[%s12316_s4 + $0x4] sm:$0xf] }
 0xa21   :  { %v4237_v19 = vmul.f32 %v13848_v25, %v3733_v56  ;;  %5152 = vmatpush.bf16.msrb.mxu0 %v5883_v62  ;;  %v6075_v56 = vld [vmem:[%s12316_s4 + $0x64] sm:$0xf]  ;;  %v13855_v62 = vunpack.c.l.bf16 %v13854_v47  ;;  %v5863_v25 = vor.u32 %v6076_v15, %v5860_v52  ;;  %v13862_v15 = vunpack.c.h.bf16 %v13840_v2 }
 0xa22   :  { %v5855_v54 = vor.u32 %v6075_v56, %v5852_v14  ;;  %v5828_v56 = vld [vmem:[%s12316_s4 + $0x38] sm:$0xf0] }
 0xa23   :  { %v4552_v40 = vadd.f32 %v4551_v30, %v4237_v19  ;;  %v4253_v18 = vmul.f32 %v13855_v62, %v3830_v46  ;;  %v4612_v19 = vadd.f32 %v11548_v35, %v4282_v61  ;;  %v5835_v35 = vor.u32 %v6073_v17, %v5834_v34  ;;  %v6074_v30 = vld [vmem:[%s12316_s4 + $0x54] sm:$0xf0]  ;;  %5196 = vmatpush.bf16.msrb.mxu3 %v5863_v25  ;;  %v6064_v34 = vld [vmem:[%s12316_s4 + $0xc] sm:$0xf]  ;;  %v5812_v17 = vld [vmem:[%s12316_s4 + $0x18] sm:$0xf0] }
 0xa24   :  { %5168 = vmatpush.bf16.msrb.mxu1 %v5855_v54  ;;  %v5843_v12 = vor.u32 %v6074_v30, %v5842_v22  ;;  %v5831_v14 = vor.u32 %v6068_v9, %v5828_v56  ;;  %v6065_v54 = vld [vmem:[%s12316_s4 + $0xc] sm:$0xf0] }
 0xa25   :  { %5153 = vmatpush.bf16.msrb.mxu0 %v5867_v26  ;;  %v4573_v31 = vadd.f32 %v4572_v39, %v4253_v18  ;;  %v4613_v26 = vadd.f32 %v4612_v19, %v4283_v58  ;;  %v13860_v39 = vld [vmem:[#allocation98_spill] sm:$0xff]  ;;  %v6066_v58 = vld [vmem:[%s12316_s4 + $0x14] sm:$0xf0] }
 0xa26   :  { %5183 = vmatpush.bf16.msrb.mxu2 %v5843_v12 }
 0xa28   :  { %5169 = vmatpush.bf16.msrb.mxu1 %v5839_v5 }
 0xa29   :  { %5154 = vmatpush.bf16.msrb.mxu0 %v5851_v13 }
 0xa2a   :  { %5184 = vmatpush.bf16.msrb.mxu2 %v5827_v59  ;;  %v34_v59 = vld [vmem:[%s12317_s0 + $0x4] sm:$0xf] }
 0xa2b   :  { %5651 = vst [vmem:[%s12314_s11 + $0x14] sm:$0xf] %v34_v59  ;;  %v6062_v59 = vld [vmem:[%s12317_s0] sm:$0xff] }
 0xa2c   :  { %v11801_v53 = vpop.permute.xlu1 %3920 }
 0xa2d   :  { %5155 = vmatpush.bf16.msrb.mxu0 %v5835_v35  ;;  %v4268_v52 = vmul.f32 %v13862_v15, %v11801_v53  ;;  %v13863_v53 = vunpack.c.h.bf16 %v13860_v39  ;;  %v6042_v15 = vld [vmem:[%s12318_s6 + $0xe0] sm:$0xf] }
 0xa30   :  { %v4018_v38 = vpop.permute.xlu2 %4017 }
 0xa31   :  { %v4284_v57 = vmul.f32 %v13858_v49, %v4018_v38  ;;  %v13861_v38 = vunpack.c.l.bf16 %v13860_v39  ;;  %v13865_v49 = vunpack.c.l.bf16 %v13864_v55 }
 0xa33   :  { %v4614_v44 = vadd.f32 %v4613_v26, %v4284_v57  ;;  %v4285_v13 = vmul.f32 %v13861_v38, %v4024_v33  ;;  %v13866_v26 = vunpack.c.h.bf16 %v13864_v55 }
 0xa35   :  { %v4615_v47 = vadd.f32 %v4614_v44, %v4285_v13 }
 0xa3c   :  { %v3739_v29 = vpop.permute.xlu1 %3738 }
 0xa3d   :  { %v4238_v43 = vmul.f32 %v13852_v7, %v3739_v29  ;;  %v5844_v29 = vld [vmem:[%s12316_s4 + $0x58] sm:$0xf0]  ;;  %v6069_v7 = vld [vmem:[%s12316_s4 + $0x2c] sm:$0xf0] }
 0xa3e   :  { %v5847_v51 = vor.u32 %v6072_v20, %v5844_v29 }
 0xa3f   :  { %v4553_v32 = vadd.f32 %v4552_v40, %v4238_v43  ;;  %v5818_v40 = vld [vmem:[%s12316_s4 + $0x20] sm:$0xf]  ;;  %v6067_v43 = vld [vmem:[%s12316_s4 + $0x24] sm:$0xf] }
 0xa40   :  { %v3927_v10 = vpop.permute.xlu2 %3926  ;;  %v5819_v6 = vor.u32 %v6069_v7, %v5818_v40  ;;  %5197 = vmatpush.bf16.msrb.mxu3 %v5847_v51 }
 0xa41   :  { %v4554_v50 = vrot.slane %v4553_v32, 4  ;;  %v4269_v57 = vmul.f32 %v13865_v49, %v3927_v10  ;;  %v6026_v49 = vld [vmem:[%s12318_s6 + $0xc0] sm:$0xf] }
 0xa42   :  { %5156 = vmatpush.bf16.msrb.mxu0 %v5819_v6 }
 0xa43   :  { %v4555_v27 = vadd.f32 %v4554_v50, %v4553_v32  ;;  %v5823_v32 = vor.u32 %v6067_v43, %v5820_v41  ;;  %v5802_v50 = vld [vmem:[%s12316_s4] sm:$0xf] }
 0xa44   :  { %v3836_v0 = vpop.permute.xlu1 %3835  ;;  %v5803_v18 = vor.u32 %v6065_v54, %v5802_v50  ;;  %5198 = vmatpush.bf16.msrb.mxu3 %v5831_v14 }
 0xa45   :  { %v4556_v21 = vrot.slane %v4555_v27, 2  ;;  %v4254_v36 = vmul.f32 %v13859_v48, %v3836_v0  ;;  %5170 = vmatpush.bf16.msrb.mxu1 %v5823_v32  ;;  %v5815_v0 = vor.u32 %v6064_v34, %v5812_v17 }
 0xa46   :  { %5157 = vmatpush.bf16.msrb.mxu0 %v5803_v18  ;;  %v6155_v18 = vld [vmem:[%s12318_s6 + $0xe4] sm:$0xf] }
 0xa47   :  { %v4557_v45 = vadd.f32 %v4556_v21, %v4555_v27  ;;  %v4574_v46 = vadd.f32 %v4573_v31, %v4254_v36  ;;  %v5807_v27 = vor.u32 %v6063_v42, %v5804_v37  ;;  %v5811_v31 = vor.u32 %v6066_v58, %v5810_v4  ;;  %v6044_v37 = vld [vmem:[%s12318_s6 + $0xf0] sm:$0xf0]  ;;  %v6050_v4 = vld [vmem:[%s12318_s6 + $0xe8] sm:$0xf] }
 0xa48   :  { %v4593_v21 = vadd.f32 %v11562_v11, %v4268_v52  ;;  %5199 = vmatpush.bf16.msrb.mxu3 %v5815_v0  ;;  %v6157_v52 = vld [vmem:[%s12318_s6 + $0xec] sm:$0xf0]  ;;  %v6047_v55 = vor.u32 %v6155_v18, %v6044_v37  ;;  %v6135_v37 = vld [vmem:[%s12318_s6 + $0x44] sm:$0xf] }
 0xa49   :  { %v4558_v24 = vrot.slane %v4557_v45, 1  ;;  %v4575_v61 = vrot.slane %v4574_v46, 4  ;;  %5171 = vmatpush.bf16.msrb.mxu1 %v5807_v27  ;;  %5185 = vmatpush.bf16.msrb.mxu2 %v5811_v31  ;;  %v6043_v17 = vor.u32 %v6157_v52, %v6042_v15  ;;  %v5962_v52 = vld [vmem:[%s12318_s6 + $0x40] sm:$0xf] }
 0xa4a   :  { %v4594_v29 = vadd.f32 %v4593_v21, %v4269_v57  ;;  %v6153_v57 = vld [vmem:[%s12318_s6 + $0xcc] sm:$0xf0]  ;;  %v6036_v21 = vld [vmem:[%s12318_s6 + $0xd8] sm:$0xf0] }
 0xa4b   :  { %v4559_v1 = vadd.f32 %v4558_v24, %v4557_v45  ;;  %v4576_v60 = vadd.f32 %v4575_v61, %v4574_v46 }
 0xa4c   :  { %v4030_v62 = vpop.permute.xlu1 %4029 }
 0xa4d   :  { %v4636_v25 = vpack.c.bf16 %v4559_v1, %v4559_v1  ;;  %v4577_v2 = vrot.slane %v4576_v60, 2  ;;  %v4286_v19 = vmul.f32 %v13863_v53, %v4030_v62  ;;  %v6156_v53 = vld [vmem:[%s12318_s6 + $0xec] sm:$0xf] }
 0xa4f   :  { %v4732_v35 = vperm.slane %v4636_v25, 0  ;;  %v5626_v28 = vunpack.c.l.b16 %v4636_v25  ;;  %v4578_v22 = vadd.f32 %v4577_v2, %v4576_v60  ;;  %v4616_v30 = vadd.f32 %v4615_v47, %v4286_v19  ;;  %v6158_v2 = vld [vmem:[%s12318_s6 + $0xf4] sm:$0xf0]  ;;  %v6052_v19 = vld [vmem:[%s12318_s6 + $0xf8] sm:$0xf0] }
 0xa50   :  { %v3933_v48 = vpop.permute.xlu2 %3932  ;;  %v6051_v31 = vor.u32 %v6158_v2, %v6050_v4  ;;  %v6055_v0 = vor.u32 %v6156_v53, %v6052_v19  ;;  %v5964_v4 = vld [vmem:[%s12318_s6 + $0x50] sm:$0xf0]  ;;  %v6136_v2 = vld [vmem:[%s12318_s6 + $0x4c] sm:$0xf]  ;;  %v5972_v53 = vld [vmem:[%s12318_s6 + $0x58] sm:$0xf0] }
 0xa51   :  { %v4748_v36 = vunpack.c.l.b16 %v4732_v35  ;;  %v5640_v5 = vsel %vm2414_vm11, %v5626_v28, %v11390_v8  ;;  %v4579_v12 = vrot.slane %v4578_v22, 1  ;;  %v4617_v20 = vrot.slane %v4616_v30, 4  ;;  %v6151_v35 = vld [vmem:[%s12318_s6 + $0xc4] sm:$0xf]  ;;  %v6034_v28 = vld [vmem:[%s12318_s6 + $0xc8] sm:$0xf] }
 0xa52   :  { %v4270_v51 = vmul.f32 %v13866_v26, %v3933_v48  ;;  %v6027_v48 = vor.u32 %v6153_v57, %v6026_v49  ;;  %v6147_v26 = vld [vmem:[%s12318_s6 + $0xa4] sm:$0xf]  ;;  %v5975_v49 = vor.u32 %v6136_v2, %v5972_v53 }
 0xa53   :  { %v4580_v33 = vadd.f32 %v4579_v12, %v4578_v22  ;;  %v4618_v45 = vadd.f32 %v4617_v20, %v4616_v30  ;;  %v4762_v11 = vsel %vm2414_vm11, %v4748_v36, %v11394_v3  ;;  %v33_v3 = vld [vmem:[%s12317_s0] sm:$0xf]  ;;  %vm13868_vm11 = vmmov %vm13648_vm8  ;;  %v6154_v22 = vld [vmem:[%s12318_s6 + $0xd4] sm:$0xf0] }
 0xa54   :  { %v4595_v46 = vadd.f32 %v4594_v29, %v4270_v51  ;;  %5650 = vst [vmem:[%s12314_s11 + $0x8] sm:$0xf] %v33_v3  ;;  %v6152_v30 = vld [vmem:[%s12318_s6 + $0xcc] sm:$0xf]  ;;  %v6149_v12 = vld [vmem:[%s12318_s6 + $0xac] sm:$0xf0]  ;;  %v6035_v20 = vor.u32 %v6154_v22, %v6034_v28 }
 0xa55   :  { %v4637_v40 = vpack.c.bf16 %v4580_v33, %v4580_v33  ;;  %v4619_v7 = vrot.slane %v4618_v45, 2  ;;  %v6039_v29 = vor.u32 %v6152_v30, %v6036_v21  ;;  %v6012_v51 = vld [vmem:[%s12318_s6 + $0xb0] sm:$0xf0]  ;;  %v6018_v33 = vld [vmem:[%s12318_s6 + $0xa8] sm:$0xf] }
 0xa56   :  { %v4596_v43 = vrot.slane %v4595_v46, 4  ;;  %v6131_v57 = vld [vmem:[%s12318_s6 + $0x24] sm:$0xf]  ;;  %v5956_v28 = vld [vmem:[%s12318_s6 + $0x38] sm:$0xf0] }
 0xa57   :  { %v4733_v44 = vperm.slane %v4637_v40, 0  ;;  %v5627_v10 = vunpack.c.l.b16 %v4637_v40  ;;  %v4620_v8 = vadd.f32 %v4619_v7, %v4618_v45  ;;  %v6150_v45 = vld [vmem:[%s12318_s6 + $0xb4] sm:$0xf0]  ;;  %v6015_v7 = vor.u32 %v6147_v26, %v6012_v51  ;;  %v5930_v21 = vld [vmem:[%s12318_s6] sm:$0xf] }
 0xa58   :  { %v4597_v6 = vadd.f32 %v4596_v43, %v4595_v46  ;;  %v6020_v46 = vld [vmem:[%s12318_s6 + $0xb8] sm:$0xf0]  ;;  %v5994_v43 = vld [vmem:[%s12318_s6 + $0x80] sm:$0xf]  ;;  %v6130_v26 = vld [vmem:[%s12318_s6 + $0x14] sm:$0xf0] }
 0xa59   :  { %v4749_v41 = vunpack.c.l.b16 %v4733_v44  ;;  %v5641_v23 = vsel %vm2416_vm10, %v5627_v10, %v5640_v5  ;;  %v4621_v63 = vrot.slane %v4620_v8, 1  ;;  %v6010_v5 = vld [vmem:[%s12318_s6 + $0xa0] sm:$0xf]  ;;  %v6145_v44 = vld [vmem:[%s12318_s6 + $0x8c] sm:$0xf0]  ;;  %v6019_v10 = vor.u32 %v6150_v45, %v6018_v33 }
 0xa5a   :  { %v4598_v24 = vrot.slane %v4597_v6, 2  ;;  %v6011_v40 = vor.u32 %v6149_v12, %v6010_v5  ;;  %v6127_v12 = vld [vmem:[%s12318_s6 + $0x4] sm:$0xf]  ;;  %v6128_v51 = vld [vmem:[%s12318_s6 + $0xc] sm:$0xf] }
 0xa5b   :  { %v4622_v61 = vadd.f32 %v4621_v63, %v4620_v8  ;;  %v4763_v32 = vsel %vm2416_vm10, %v4749_v41, %v4762_v11  ;;  %vm13867_vm10 = vmmov %vm13616_vm13  ;;  %v6148_v11 = vld [vmem:[%s12318_s6 + $0xac] sm:$0xf]  ;;  %v5996_v41 = vld [vmem:[%s12318_s6 + $0x90] sm:$0xf0] }
 0xa5c   :  { %v4599_v9 = vadd.f32 %v4598_v24, %v4597_v6  ;;  %vm13869_vm4 = vmmov %vm13867_vm10  ;;  %v6023_v8 = vor.u32 %v6148_v11, %v6020_v46  ;;  %v6143_v6 = vld [vmem:[%s12318_s6 + $0x84] sm:$0xf]  ;;  %v6146_v63 = vld [vmem:[%s12318_s6 + $0x94] sm:$0xf0] }
 0xa5d   :  { %v4639_v39 = vpack.c.bf16 %v4622_v61, %v4622_v61  ;;  %v6144_v24 = vld [vmem:[%s12318_s6 + $0x8c] sm:$0xf]  ;;  %v6004_v61 = vld [vmem:[%s12318_s6 + $0x98] sm:$0xf0]  ;;  %v5999_v3 = vor.u32 %v6143_v6, %v5996_v41 }
 0xa5e   :  { %v4600_v56 = vrot.slane %v4599_v9, 1  ;;  %v5940_v33 = vld [vmem:[%s12318_s6 + $0x18] sm:$0xf0] }
 0xa5f   :  { %v4735_v14 = vperm.slane %v4639_v39, 0  ;;  %v5629_v50 = vunpack.c.l.b16 %v4639_v39 }
 0xa60   :  { %v4601_v38 = vadd.f32 %v4600_v56, %v4599_v9  ;;  %v5978_v9 = vld [vmem:[%s12318_s6 + $0x60] sm:$0xf]  ;;  %v6141_v56 = vld [vmem:[%s12318_s6 + $0x6c] sm:$0xf0] }
 0xa61   :  { %v4751_v47 = vunpack.c.l.b16 %v4735_v14  ;;  %v5980_v14 = vld [vmem:[%s12318_s6 + $0x70] sm:$0xf0] }
 0xa62   :  { %v4638_v13 = vpack.c.bf16 %v4601_v38, %v4601_v38  ;;  %v6007_v38 = vor.u32 %v6144_v24, %v6004_v61 }
 0xa64   :  { %v4734_v1 = vperm.slane %v4638_v13, 0  ;;  %v5628_v60 = vunpack.c.l.b16 %v4638_v13  ;;  %v6139_v13 = vld [vmem:[%s12318_s6 + $0x64] sm:$0xf] }
 0xa65   :  { %v5983_v15 = vor.u32 %v6139_v13, %v5980_v14 }
 0xa66   :  { %v4750_v54 = vunpack.c.l.b16 %v4734_v1  ;;  %v5642_v42 = vsel %vm13867_vm10, %v5628_v60, %v5641_v23  ;;  %v6002_v23 = vld [vmem:[%s12318_s6 + $0x88] sm:$0xf]  ;;  %v6142_v60 = vld [vmem:[%s12318_s6 + $0x74] sm:$0xf0] }
 0xa67   :  { %v5643_v62 = vsel %vm13868_vm11, %v5629_v50, %v5642_v42  ;;  %v6003_v39 = vor.u32 %v6146_v63, %v6002_v23  ;;  %v5986_v1 = vld [vmem:[%s12318_s6 + $0x68] sm:$0xf]  ;;  %v6140_v50 = vld [vmem:[%s12318_s6 + $0x6c] sm:$0xf]  ;;  %v5979_v42 = vor.u32 %v6141_v56, %v5978_v9 }
 0xa68   :  { %v5645_v58 = vpack.c.b16 %v5643_v62, %v5643_v62  ;;  %v4764_v25 = vsel %vm13869_vm4, %v4750_v54, %v4763_v32  ;;  %v5995_v32 = vor.u32 %v6145_v44, %v5994_v43  ;;  %v5988_v54 = vld [vmem:[%s12318_s6 + $0x78] sm:$0xf0]  ;;  %v5987_v62 = vor.u32 %v6142_v60, %v5986_v1  ;;  %v7051_v43 = vld [vmem:[%s12311_s1 + $0x8] sm:$0xff] }
 0xa69   :  { %v4765_v27 = vsel %vm13870_vm5, %v4751_v47, %v4764_v25  ;;  %v6137_v47 = vld [vmem:[%s12318_s6 + $0x4c] sm:$0xf0]  ;;  %v5991_v18 = vor.u32 %v6140_v50, %v5988_v54  ;;  %v6138_v25 = vld [vmem:[%s12318_s6 + $0x54] sm:$0xf0] }
 0xa6a   :  { %5649 = vst [vmem:[%s12314_s11 + $0x10] sm:$0xf] %v5645_v58  ;;  %v4766_v34 = vpack.c.b16 %v4765_v27, %v11124_v16  ;;  %v6028_v16 = vld [vmem:[%s12318_s6 + $0xd0] sm:$0xf0]  ;;  %v5970_v58 = vld [vmem:[%s12318_s6 + $0x48] sm:$0xf]  ;;  %v5963_v19 = vor.u32 %v6137_v47, %v5962_v52  ;;  %v5967_v27 = vor.u32 %v6135_v37, %v5964_v4 }
 0xa6b   :  { %v6031_v36 = vor.u32 %v6151_v35, %v6028_v16  ;;  %v6134_v35 = vld [vmem:[%s12318_s6 + $0x34] sm:$0xf0]  ;;  %v6132_v16 = vld [vmem:[%s12318_s6 + $0x2c] sm:$0xf] }
 0xa6c   :  { %4936 = vmatmul.bf16.vlgmr.msra.gmra.mxu0 %v4766_v34  ;;  %4950 = vmatmul.bf16.vlgmr.msra.gmra.mxu1 %v4766_v34  ;;  %v5959_v5 = vor.u32 %v6132_v16, %v5956_v28 }
 0xa6d   :  { %4964 = vmatmul.bf16.vlgmr.msra.gmra.mxu2 %v4766_v34  ;;  %4978 = vmatmul.bf16.vlgmr.msra.gmra.mxu3 %v4766_v34  ;;  %v5946_v34 = vld [vmem:[%s12318_s6 + $0x20] sm:$0xf] }
 0xa6e   :  { %5398 = vmatpush.bf16.msra.mxu0 %v6043_v17  ;;  %5412 = vmatpush.bf16.msra.mxu1 %v6047_v55  ;;  %v6133_v17 = vld [vmem:[%s12318_s6 + $0x2c] sm:$0xf0]  ;;  %v5971_v55 = vor.u32 %v6138_v25, %v5970_v58 }
 0xa6f   :  { %5426 = vmatpush.bf16.msra.mxu2 %v6051_v31  ;;  %5440 = vmatpush.bf16.msra.mxu3 %v6055_v0  ;;  %v5948_v31 = vld [vmem:[%s12318_s6 + $0x30] sm:$0xf0]  ;;  %v5954_v0 = vld [vmem:[%s12318_s6 + $0x28] sm:$0xf]  ;;  %v5947_v22 = vor.u32 %v6133_v17, %v5946_v34 }
 0xa70   :  { %v5951_v30 = vor.u32 %v6131_v57, %v5948_v31 }
 0xa72   :  { %5399 = vmatpush.bf16.msra.mxu0 %v6027_v48  ;;  %5413 = vmatpush.bf16.msra.mxu1 %v6031_v36  ;;  %v6129_v48 = vld [vmem:[%s12318_s6 + $0xc] sm:$0xf0]  ;;  %v5955_v36 = vor.u32 %v6134_v35, %v5954_v0 }
 0xa73   :  { %5427 = vmatpush.bf16.msra.mxu2 %v6035_v20  ;;  %5441 = vmatpush.bf16.msra.mxu3 %v6039_v29  ;;  %v5932_v20 = vld [vmem:[%s12318_s6 + $0x10] sm:$0xf0]  ;;  %v5938_v29 = vld [vmem:[%s12318_s6 + $0x8] sm:$0xf]  ;;  %v5931_v45 = vor.u32 %v6129_v48, %v5930_v21 }
 0xa74   :  { %v5935_v11 = vor.u32 %v6127_v12, %v5932_v20  ;;  %v5939_v46 = vor.u32 %v6130_v26, %v5938_v29 }
 0xa76   :  { %5400 = vmatpush.bf16.msra.mxu0 %v6011_v40  ;;  %5414 = vmatpush.bf16.msra.mxu1 %v6015_v7  ;;  %v5943_v40 = vor.u32 %v6128_v51, %v5940_v33  ;;  %v7050_v7 = vld [vmem:[%s12311_s1] sm:$0xff] }
 0xa77   :  { %5428 = vmatpush.bf16.msra.mxu2 %v6019_v10  ;;  %5442 = vmatpush.bf16.msra.mxu3 %v6023_v8  ;;  %v4623_v44 = vpack.c.bf16 %v7051_v43, %v7050_v7 }
 0xa7a   :  { %5401 = vmatpush.bf16.msra.mxu0 %v5995_v32  ;;  %5415 = vmatpush.bf16.msra.mxu1 %v5999_v3 }
 0xa7b   :  { %5429 = vmatpush.bf16.msra.mxu2 %v6003_v39  ;;  %5443 = vmatpush.bf16.msra.mxu3 %v6007_v38  ;;  %v12243_v38 = vld [vmem:[%s12319_s7] sm:$0xf] }
 0xa7c   :  { %5158 = vmatmul.bf16.vlgmr.msrb.gmra.mxu0 %v6062_v59  ;;  %5172 = vmatmul.bf16.vlgmr.msrb.gmra.mxu1 %v6062_v59  ;;  %v5464_v60 = vperm.slane %v12243_v38, 0  ;;  %v5465_v50 = vperm.slane %v12243_v38, 1  ;;  %v5467_v25 = vperm.slane %v12243_v38, 3  ;;  %v5466_v20 = vperm.slane %v12243_v38, 2 }
 0xa7d   :  { %5186 = vmatmul.bf16.vlgmr.msrb.gmra.mxu2 %v6062_v59  ;;  %5200 = vmatmul.bf16.vlgmr.msrb.gmra.mxu3 %v6062_v59 }
 0xa7e   :  { %5402 = vmatpush.bf16.msra.mxu0 %v5979_v42  ;;  %5416 = vmatpush.bf16.msra.mxu1 %v5983_v15 }
 0xa7f   :  { %5430 = vmatpush.bf16.msra.mxu2 %v5987_v62  ;;  %5444 = vmatpush.bf16.msra.mxu3 %v5991_v18 }
 0xa82   :  { %5403 = vmatpush.bf16.msra.mxu0 %v5963_v19  ;;  %5417 = vmatpush.bf16.msra.mxu1 %v5967_v27 }
 0xa83   :  { %5431 = vmatpush.bf16.msra.mxu2 %v5971_v55  ;;  %5445 = vmatpush.bf16.msra.mxu3 %v5975_v49 }
 0xa86   :  { %5404 = vmatpush.bf16.msra.mxu0 %v5947_v22  ;;  %5418 = vmatpush.bf16.msra.mxu1 %v5951_v30 }
 0xa87   :  { %5432 = vmatpush.bf16.msra.mxu2 %v5955_v36  ;;  %5446 = vmatpush.bf16.msra.mxu3 %v5959_v5 }
 0xa8a   :  { %5405 = vmatpush.bf16.msra.mxu0 %v5931_v45  ;;  %5419 = vmatpush.bf16.msra.mxu1 %v5935_v11 }
 0xa8b   :  { %5433 = vmatpush.bf16.msra.mxu2 %v5939_v46  ;;  %5447 = vmatpush.bf16.msra.mxu3 %v5943_v40 }
 0xa8d   :  { %5406 = vmatmul.bf16.vlgmr.msra.gmra.mxu0 %v4623_v44  ;;  %5420 = vmatmul.bf16.vlgmr.msra.gmra.mxu1 %v4623_v44 }
 0xa8e   :  { %5434 = vmatmul.bf16.vlgmr.msra.gmra.mxu2 %v4623_v44  ;;  %5448 = vmatmul.bf16.vlgmr.msra.gmra.mxu3 %v4623_v44 }
 0xae9   :  { %v4937_v10 = vpop.f32.mrf.mxu0  ;;  %v4951_v8 = vpop.f32.mrf.mxu1 }
 0xaf0   :  { %v4965_v6 = vpop.f32.mrf.mxu2  ;;  %v4979_v41 = vpop.f32.mrf.mxu3 }
 0xaf1   :  { %v4939_v23 = vpop.f32.mrf.mxu0  ;;  %v4953_v63 = vpop.f32.mrf.mxu1 }
 0xaf8   :  { %v12238_v24 = vpop.f32.mrf.mxu2  ;;  %v4981_v61 = vpop.f32.mrf.mxu3 }
 0xaf9   :  { %v5159_v32 = vpop.f32.mrf.mxu0  ;;  %v5173_v3 = vpop.f32.mrf.mxu1 }
 0xafa   :  { %v5160_v14 = vadd.f32 %v5159_v32, %v4937_v10  ;;  %v5174_v1 = vadd.f32 %v5173_v3, %v4951_v8 }
 0xb00   :  { %v5187_v59 = vpop.f32.mrf.mxu2  ;;  %v5201_v9 = vpop.f32.mrf.mxu3 }
 0xb01   :  { %v5161_v56 = vpop.f32.mrf.mxu0  ;;  %v5175_v39 = vpop.f32.mrf.mxu1  ;;  %v5202_v58 = vadd.f32 %v5201_v9, %v4979_v41  ;;  %v5188_v21 = vadd.f32 %v5187_v59, %v4965_v6 }
 0xb02   :  { %v5162_v2 = vadd.f32 %v5161_v56, %v4939_v23  ;;  %v5176_v53 = vadd.f32 %v5175_v39, %v4953_v63 }
 0xb08   :  { %v5203_v13 = vpop.f32.mrf.mxu3  ;;  %v5189_v15 = vpop.f32.mrf.mxu2 }
 0xb09   :  { %v5204_v26 = vadd.f32 %v5203_v13, %v4981_v61  ;;  %v5190_v43 = vadd.f32 %v5189_v15, %v12238_v24 }
 0xb0a   :  { %v5407_v54 = vpop.f32.mrf.mxu0  ;;  %v5421_v42 = vpop.f32.mrf.mxu1 }
 0xb0b   :  { %v5454_v52 = vadd.f32 %v5407_v54, %v5160_v14  ;;  %v5455_v47 = vadd.f32 %v5421_v42, %v5174_v1 }
 0xb0d   :  { %v5472_v62 = vadd.f32 %v5464_v60, %v5454_v52  ;;  %v5473_v18 = vadd.f32 %v5465_v50, %v5455_v47 }
 0xb0f   :  { %v6056_v37 = vmul.f32 -1.442695, %v5472_v62  ;;  %v6058_v4 = vmul.f32 -1.442695, %v5473_v18  ;;  %v37_v62 = vld [vmem:[%s12320_s2] sm:$0xff] }
 0xb11   :  { %7017 = vpow2.f32 %v6056_v37  ;;  %v5449_v19 = vpop.f32.mrf.mxu3  ;;  %v5435_v31 = vpop.f32.mrf.mxu2 }
 0xb12   :  { %7019 = vpow2.f32 %v6058_v4  ;;  %v5457_v27 = vadd.f32 %v5449_v19, %v5202_v58  ;;  %v5409_v34 = vpop.f32.mrf.mxu0  ;;  %v5423_v17 = vpop.f32.mrf.mxu1  ;;  %v5456_v12 = vadd.f32 %v5435_v31, %v5188_v21 }
 0xb13   :  { %v5458_v55 = vadd.f32 %v5409_v34, %v5162_v2  ;;  %v5459_v49 = vadd.f32 %v5423_v17, %v5176_v53 }
 0xb14   :  { %v5475_v57 = vadd.f32 %v5467_v25, %v5457_v27  ;;  %v5474_v33 = vadd.f32 %v5466_v20, %v5456_v12 }
 0xb15   :  { %v5476_v0 = vadd.f32 %v5464_v60, %v5458_v55  ;;  %v5477_v35 = vadd.f32 %v5465_v50, %v5459_v49 }
 0xb16   :  { %v6060_v16 = vmul.f32 -1.442695, %v5475_v57 }
 0xb17   :  { %v7018_v28 = vpop.eup %7017  ;;  %v6057_v22 = vmul.f32 -1.442695, %v5476_v0  ;;  %v6059_v36 = vmul.f32 -1.442695, %v5477_v35 }
 0xb18   :  { %v7020_v30 = vpop.eup %7019  ;;  %v5486_v48 = vadd.f32 1.0, %v7018_v28  ;;  %7021 = vpow2.f32 %v6060_v16 }
 0xb19   :  { %v5524_v5 = vadd.f32 1.0, %v7020_v30  ;;  %7023 = vpow2.f32 %v6057_v22  ;;  %v5451_v29 = vpop.f32.mrf.mxu3  ;;  %v5437_v46 = vpop.f32.mrf.mxu2 }
 0xb1a   :  { %7025 = vrcp.f32 %v5486_v48  ;;  %v5461_v40 = vadd.f32 %v5451_v29, %v5204_v26  ;;  %v5460_v23 = vadd.f32 %v5437_v46, %v5190_v43  ;;  %v5497_v9 = vand.u32 2147483647, %v5486_v48 }
 0xb1b   :  { %7027 = vrcp.f32 %v5524_v5  ;;  %v5537_v59 = vand.u32 2147483648, %v5524_v5  ;;  %v5499_v24 = vand.u32 2147483648, %v5486_v48  ;;  %v5535_v39 = vand.u32 2147483647, %v5524_v5 }
 0xb1c   :  { %7029 = vpow2.f32 %v6059_v36  ;;  %v5479_v32 = vadd.f32 %v5467_v25, %v5461_v40  ;;  %vm5493_vm13 = vweird.f32 %v5486_v48  ;;  %vm5531_vm14 = vweird.f32 %v5524_v5 }
 0xb1d   :  { %v5478_v1 = vadd.f32 %v5466_v20, %v5460_v23  ;;  %vm5498_vm8 = vcmp.eq.f32.partialorder %v5497_v9, 8.507059e+37  ;;  %v5500_v54 = vor.u32 1.1754944e-38, %v5499_v24  ;;  %v5538_v47 = vor.u32 1.1754944e-38, %v5537_v59 }
 0xb1e   :  { %v7022_v51 = vpop.eup %7021  ;;  %v6061_v60 = vmul.f32 -1.442695, %v5479_v32  ;;  %vm5536_vm0 = vcmp.eq.f32.partialorder %v5535_v39, 8.507059e+37 }
 0xb1f   :  { %v7024_v45 = vpop.eup %7023  ;;  %v12249_v11 = vadd.f32 1.0, %v7022_v51 }
 0xb20   :  { %v7026_v7 = vpop.eup %7025  ;;  %v12252_v44 = vadd.f32 1.0, %v7024_v45 }
 0xb21   :  { %v7028_v10 = vpop.eup %7027  ;;  %v5489_v8 = vmul.f32 %v7026_v7, %v5486_v48  ;;  %7031 = vrcp.f32 %v12249_v11  ;;  %vm5494_vm12 = vweird.f32 %v7026_v7  ;;  %v5577_v49 = vand.u32 2147483648, %v12249_v11 }
 0xb22   :  { %v7030_v6 = vpop.eup %7029  ;;  %v5527_v41 = vmul.f32 %v7028_v10, %v5524_v5  ;;  %7033 = vtanh.f32 %v5474_v33  ;;  %vm5532_vm6 = vweird.f32 %v7028_v10  ;;  %vm5495_vm15 = vmor %vm5493_vm13, %vm5494_vm12  ;;  %vm5508_vm9 = vweird.f32 %v12252_v44 }
 0xb23   :  { %v5490_v63 = vsub.f32 1.0, %v5489_v8  ;;  %7035 = vrcp.f32 %v12252_v44  ;;  %v12256_v61 = vadd.f32 1.0, %v7030_v6  ;;  %vm5533_vm7 = vmor %vm5531_vm14, %vm5532_vm6  ;;  %v5512_v57 = vand.u32 2147483647, %v12252_v44 }
 0xb24   :  { %v5528_v3 = vsub.f32 1.0, %v5527_v41  ;;  %v5514_v31 = vand.u32 2147483648, %v12252_v44  ;;  %vm5571_vm10 = vweird.f32 %v12249_v11  ;;  %v5575_v12 = vand.u32 2147483647, %v12249_v11 }
 0xb25   :  { %v5491_v56 = vmul.f32 %v7026_v7, %v5490_v63  ;;  %7037 = vrcp.f32 %v12256_v61  ;;  %v5552_v30 = vand.u32 2147483648, %v12256_v61  ;;  %v5550_v21 = vand.u32 2147483647, %v12256_v61 }
 0xb26   :  { %v5529_v38 = vmul.f32 %v7028_v10, %v5528_v3  ;;  %7039 = vpow2.f32 %v6061_v60  ;;  %v5515_v20 = vor.u32 1.1754944e-38, %v5514_v31  ;;  %vm5546_vm5 = vweird.f32 %v12256_v61 }
 0xb27   :  { %v12259_v13 = vpop.eup %7031  ;;  %v5492_v14 = vadd.f32 %v7026_v7, %v5491_v56  ;;  %7041 = vtanh.f32 %v5478_v1  ;;  %vm5513_vm12 = vcmp.eq.f32.partialorder %v5512_v57, 8.507059e+37  ;;  %vm5551_vm13 = vcmp.eq.f32.partialorder %v5550_v21, 8.507059e+37 }
 0xb28   :  { %v7034_v50 = vpop.eup %7033  ;;  %v5530_v42 = vadd.f32 %v7028_v10, %v5529_v38  ;;  %v5567_v15 = vmul.f32 %v12259_v13, %v12249_v11  ;;  %vm5572_vm2 = vweird.f32 %v12259_v13  ;;  %v5553_v11 = vor.u32 1.1754944e-38, %v5552_v30 }
 0xb29   :  { %v7036_v52 = vpop.eup %7035  ;;  %v5496_v18 = vsel %vm5495_vm15, %v7026_v7, %v5492_v14  ;;  %vm12285_vm4 = vmor %vm5571_vm10, %vm5572_vm2  ;;  %v5578_v7 = vor.u32 1.1754944e-38, %v5577_v49  ;;  %vm5576_vm14 = vcmp.eq.f32.partialorder %v5575_v12, 8.507059e+37 }
 0xb2a   :  { %v5501_v37 = vsel %vm5498_vm8, %v5500_v54, %v5496_v18  ;;  %v5534_v4 = vsel %vm5533_vm7, %v7028_v10, %v5530_v42  ;;  %v5568_v58 = vsub.f32 1.0, %v5567_v15  ;;  %v5504_v25 = vmul.f32 %v7036_v52, %v12252_v44 }
 0xb2b   :  { %v7038_v2 = vpop.eup %7037  ;;  %v5539_v53 = vsel %vm5536_vm0, %v5538_v47, %v5534_v4  ;;  %v5598_v19 = vmul.f32 %v7034_v50, %v5501_v37  ;;  %vm5509_vm1 = vweird.f32 %v7036_v52 }
 0xb2c   :  { %v5596_v27 = vmul.f32 %v5539_v53, %v37_v62  ;;  %v5569_v34 = vmul.f32 %v12259_v13, %v5568_v58  ;;  %v5505_v17 = vsub.f32 1.0, %v5504_v25  ;;  %v5542_v55 = vmul.f32 %v7038_v2, %v12256_v61  ;;  %v7040_v28 = vpop.eup %7039  ;;  %vm5510_vm11 = vmor %vm5508_vm9, %vm5509_vm1 }
 0xb2d   :  { %vm5547_vm3 = vweird.f32 %v7038_v2  ;;  %v7042_v5 = vpop.eup %7041  ;;  %v5565_v29 = vadd.f32 1.0, %v7040_v28 }
 0xb2e   :  { %v5600_v0 = vadd.f32 %v5598_v19, %v5596_v27  ;;  %v5543_v35 = vsub.f32 1.0, %v5542_v55  ;;  %v5506_v16 = vmul.f32 %v7036_v52, %v5505_v17  ;;  %v5570_v22 = vadd.f32 %v12259_v13, %v5569_v34  ;;  %vm5548_vm6 = vmor %vm5546_vm5, %vm5547_vm3 }
 0xb2f   :  { %v5592_v9 = vand.u32 2147483648, %v5565_v29  ;;  %v5590_v56 = vand.u32 2147483647, %v5565_v29  ;;  %vm5586_vm8 = vweird.f32 %v5565_v29 }
 0xb30   :  { %7043 = vtanh.f32 %v5600_v0  ;;  %5608 = vst [vmem:[%s12321_s9] sm:$0xff] %v5600_v0  ;;  %v5544_v48 = vmul.f32 %v7038_v2, %v5543_v35  ;;  %v5507_v36 = vadd.f32 %v7036_v52, %v5506_v16  ;;  %v5574_v45 = vsel %vm12285_vm4, %v12259_v13, %v5570_v22 }
 0xb31   :  { %7045 = vrcp.f32 %v5565_v29  ;;  %v5579_v6 = vsel %vm5576_vm14, %v5578_v7, %v5574_v45  ;;  %v5593_v13 = vor.u32 1.1754944e-38, %v5592_v9  ;;  %vm5591_vm0 = vcmp.eq.f32.partialorder %v5590_v56, 8.507059e+37 }
 0xb32   :  { %v5511_v51 = vsel %vm5510_vm11, %v7036_v52, %v5507_v36  ;;  %v5545_v33 = vadd.f32 %v7038_v2, %v5544_v48 }
 0xb33   :  { %v5516_v40 = vsel %vm5513_vm12, %v5515_v20, %v5511_v51 }
 0xb34   :  { %v5549_v43 = vsel %vm5548_vm6, %v7038_v2, %v5545_v33  ;;  %v5599_v44 = vmul.f32 %v7042_v5, %v5516_v40 }
 0xb35   :  { %v5554_v10 = vsel %vm5551_vm13, %v5553_v11, %v5549_v43 }
 0xb36   :  { %v7044_v8 = vpop.eup %7043 }
 0xb37   :  { %v38_v46 = vld [vmem:[%s12320_s2 + $0x8] sm:$0xff]  ;;  %v5604_v23 = vmul.f32 %v7044_v8, %v5579_v6  ;;  %v7046_v61 = vpop.eup %7045 }
 0xb38   :  { %v5597_v41 = vmul.f32 %v5554_v10, %v38_v46  ;;  %v5582_v3 = vmul.f32 %v7046_v61, %v5565_v29  ;;  %vm5587_vm15 = vweird.f32 %v7046_v61 }
 0xb39   :  { %5606 = vst [vmem:[%s12322_s8] sm:$0xff] %v5604_v23  ;;  %v5610_v32 = vpack.c.bf16 %v5604_v23, %v5604_v23  ;;  %vm5588_vm7 = vmor %vm5586_vm8, %vm5587_vm15 }
 0xb3a   :  { %v5601_v63 = vadd.f32 %v5599_v44, %v5597_v41  ;;  %v5583_v59 = vsub.f32 1.0, %v5582_v3 }
 0xb3b   :  { %5612 = vst [vmem:[%s12314_s11] sm:$0xf] %v5610_v32 }
 0xb3c   :  { %5609 = vst [vmem:[%s12321_s9 + $0x8] sm:$0xff] %v5601_v63  ;;  %7047 = vtanh.f32 %v5601_v63  ;;  %v5584_v24 = vmul.f32 %v7046_v61, %v5583_v59 }
 0xb3e   :  { %v5585_v39 = vadd.f32 %v7046_v61, %v5584_v24 }
 0xb40   :  { %v5589_v14 = vsel %vm5588_vm7, %v7046_v61, %v5585_v39 }
 0xb41   :  { %v5594_v1 = vsel %vm5591_vm0, %v5593_v13, %v5589_v14 }
 0xb42   :  { %v7048_v38 = vpop.eup %7047 }
 0xb43   :  { %v5605_v60 = vmul.f32 %v7048_v38, %v5594_v1 }
 0xb45   :  { %5607 = vst [vmem:[%s12322_s8 + $0x8] sm:$0xff] %v5605_v60  ;;  %v5611_v50 = vpack.c.bf16 %v5605_v60, %v5605_v60 }
 0xb47   :  { %5613 = vst [vmem:[%s12314_s11 + $0xc] sm:$0xf] %v5611_v50 }

</bundles_post_ra>
